<compile_context>
chip_gen: v7x
topology: tpu7x:2x2x1
jax: 0.10.0
libtpu: 0.0.40
codegen_flags: <defaults>
</compile_context>

<pallas_src>
import functools

import jax
import jax.numpy as jnp
from jax.experimental import pallas as pl
from jax.experimental.pallas import tpu as pltpu  # noqa: F401  (TPU backend)

_SELU_ALPHA = 1.6732632423543772
_SELU_SCALE = 1.0507009873554805


def _apply_act(y, act):
    if act == "none":
        return y
    if act == "relu":
        return jnp.maximum(y, 0.0)
    if act == "selu":
        return _SELU_SCALE * jnp.where(y > 0, y, _SELU_ALPHA * (jnp.exp(y) - 1.0))
    if act == "sigmoid":
        return pl.reciprocal(1.0 + jnp.exp(-y), approx=True)
    raise ValueError(act)


# ---------------------------------------------------------------------------
# Pallas kernels (whole-array single block; everything fits VMEM at these
# sizes, Mosaic pads to (8,128) vregs in-register -> no HBM zero-padding).
# ---------------------------------------------------------------------------

def _fused_matmul_kernel(*refs, act, pre_act, has_pre, has_res):
    idx = 0
    a_ref = refs[idx]; idx += 1
    if has_pre:
        ps_ref, pt_ref = refs[idx], refs[idx + 1]; idx += 2
    w_ref, s_ref, t_ref = refs[idx], refs[idx + 1], refs[idx + 2]; idx += 3
    if has_res:
        r_ref = refs[idx]; idx += 1
    o_ref = refs[idx]

    a = a_ref[...]
    if has_pre:                                   # e.g. BN+ReLU before 1x1 conv
        a = _apply_act(a * ps_ref[...] + pt_ref[...], pre_act)
    y = jnp.dot(a, w_ref[...], preferred_element_type=jnp.float32)
    y = _apply_act(y * s_ref[...] + t_ref[...], act)   # bias / post-BN / act
    if has_res:
        y = y + r_ref[...]                        # fused residual add
    o_ref[...] = y


def fused_matmul(a, w, *, scale=None, shift=None, act="none",
                 pre_scale=None, pre_shift=None, pre_act="relu",
                 residual=None):
    """o = act(pre(a) @ w * scale + shift) [+ residual]; pre = per-col affine+act."""
    M, K = a.shape
    K2, N = w.shape
    assert K == K2
    has_pre = pre_scale is not None
    has_res = residual is not None
    if scale is None:
        scale = jnp.ones((N,), jnp.float32)
    if shift is None:
        shift = jnp.zeros((N,), jnp.float32)
    args = [a.astype(jnp.float32)]
    if has_pre:
        args += [pre_scale.reshape(1, K).astype(jnp.float32),
                 pre_shift.reshape(1, K).astype(jnp.float32)]
    args += [w.astype(jnp.float32),
             scale.reshape(1, N).astype(jnp.float32),
             shift.reshape(1, N).astype(jnp.float32)]
    if has_res:
        args.append(residual.astype(jnp.float32))
    kernel = functools.partial(_fused_matmul_kernel, act=act, pre_act=pre_act,
                               has_pre=has_pre, has_res=has_res)
    return pl.pallas_call(
        kernel, out_shape=jax.ShapeDtypeStruct((M, N), jnp.float32))(*args)


def _affine_act_kernel(x_ref, s_ref, t_ref, o_ref, *, act):
    o_ref[...] = _apply_act(x_ref[...] * s_ref[...] + t_ref[...], act)


def affine_act(x2d, scale, shift, act="none"):
    """y = act(x * scale + shift), per-channel scale/shift (standalone BN+ReLU)."""
    M, C = x2d.shape
    return pl.pallas_call(
        functools.partial(_affine_act_kernel, act=act),
        out_shape=jax.ShapeDtypeStruct((M, C), jnp.float32),
    )(x2d.astype(jnp.float32),
      scale.reshape(1, C).astype(jnp.float32),
      shift.reshape(1, C).astype(jnp.float32))


def _hg_gate_kernel(x_ref, xs_ref, wa_ref, wb_ref, b_ref, o_ref):
    """SELU((x * sigmoid(xs)) @ Wa + xs @ Wb + b)  ==
       HGlayer gate + channel-concat + 1x1 conv + SELU in one kernel."""
    xs = xs_ref[...]
    gate = pl.reciprocal(1.0 + jnp.exp(-xs), approx=True)   # sigmoid on the EUP
    g = x_ref[...] * gate
    y = jnp.dot(g, wa_ref[...], preferred_element_type=jnp.float32)
    y = y + jnp.dot(xs, wb_ref[...], preferred_element_type=jnp.float32)
    o_ref[...] = _apply_act(y + b_ref[...], "selu")


def hg_gate_matmul(x2d, xs2d, wa, wb, b):
    M, _ = x2d.shape
    N = wa.shape[1]
    return pl.pallas_call(
        _hg_gate_kernel,
        out_shape=jax.ShapeDtypeStruct((M, N), jnp.float32),
    )(x2d.astype(jnp.float32), xs2d.astype(jnp.float32),
      wa.astype(jnp.float32), wb.astype(jnp.float32),
      b.reshape(1, N).astype(jnp.float32))


# ---------------------------------------------------------------------------
# JAX glue helpers (fused by XLA under the single jit)
# ---------------------------------------------------------------------------

def bn_scale_shift(bn, eps=1e-5):
    scale = bn["gamma"] * jax.lax.rsqrt(bn["var"] + eps)
    shift = bn["beta"] - bn["mean"] * scale
    return scale, shift


def _w1x1(w):   # (Cout, Cin, 1, 1) -> (Cin, Cout)
    return jnp.transpose(w[:, :, 0, 0])


def _wconv(w):  # (Cout, Cin, kh, kw) -> (kh*kw*Cin, Cout), matches im2col order
    cout, cin, kh, kw = w.shape
    return jnp.transpose(w, (2, 3, 1, 0)).reshape(kh * kw * cin, cout)


def _im2col(x, kh, kw, dil_h, dil_w, pad_h, pad_w):
    B, H, W, C = x.shape
    xp = jnp.pad(x, ((0, 0), (pad_h, pad_h), (pad_w, pad_w), (0, 0)))
    Hout = H + 2 * pad_h - dil_h * (kh - 1)
    Wout = W + 2 * pad_w - dil_w * (kw - 1)
    patches = [xp[:, i * dil_h:i * dil_h + Hout, j * dil_w:j * dil_w + Wout, :]
               for i in range(kh) for j in range(kw)]
    a = jnp.concatenate(patches, axis=-1)
    return a.reshape(-1, kh * kw * C), Hout, Wout


def conv_transpose_h(x, w, b, rate):
    """ConvTranspose2d kernel (rate,1), stride (rate,1). w: (Cin, Cout, rate, 1).
    Single matmul over all taps (N = rate*Cout), then row interleave."""
    B, H, Wd, C = x.shape
    cin, cout = w.shape[0], w.shape[1]
    wm = jnp.transpose(w[:, :, :, 0], (0, 2, 1)).reshape(cin, rate * cout)
    bias = jnp.tile(b, rate)        # column order is (r, cout) -> b[cout] repeats
    y = fused_matmul(x.reshape(-1, C), wm, shift=bias)
    y = y.reshape(B, H, Wd, rate, cout).transpose(0, 1, 3, 2, 4)
    return y.reshape(B, H * rate, Wd, cout)


def maxpool_h2(x):  # MaxPool2d kernel (2,1), stride (2,1) on NHWC
    return jnp.maximum(x[:, 0::2], x[:, 1::2])


# ---------------------------------------------------------------------------
# Module forward passes (mirror the PyTorch graph)
# ---------------------------------------------------------------------------

def acblock_fwd(p, x, dilation, out_scale=None, out_shift=None, out_act="none"):
    """ACBlock: (BN+ReLU -> 5x1 dilated conv) + (BN+ReLU -> 1x3 dilated conv).
    Both pre-BN+ReLU run as ONE affine kernel (channel-duplicated input); both
    convs run as ONE matmul (im2col concatenated along K).  An optional
    post-BN (+activation) is folded into the matmul epilogue (exact)."""
    r = 2 ** dilation
    B, H, Wd, C = x.shape
    Cout = p["conv2"]["w"].shape[0]
    s2, t2 = bn_scale_shift(p["bn2"])
    s3, t3 = bn_scale_shift(p["bn3"])
    xf = x.reshape(-1, C)
    hh = affine_act(jnp.concatenate([xf, xf], axis=-1),
                    jnp.concatenate([s2, s3]), jnp.concatenate([t2, t3]), "relu")
    h2 = hh[:, :C].reshape(B, H, Wd, C)
    h3 = hh[:, C:].reshape(B, H, Wd, C)
    # zero-padding is applied AFTER BN+ReLU (matches the PyTorch graph)
    a2, Ho, Wo = _im2col(h2, 5, 1, r, 1, 2 * r, 0)
    a3, _, _ = _im2col(h3, 1, 3, 1, r, 0, r)
    a = jnp.concatenate([a2, a3], axis=-1)                       # (M, 8*C)
    wm = jnp.concatenate([_wconv(p["conv2"]["w"]),
                          _wconv(p["conv3"]["w"])], axis=0)      # (8*C, Cout)
    bias = p["conv2"]["b"] + p["conv3"]["b"]
    if out_scale is None:
        scale, shift = None, bias
    else:   # fold following BN exactly: BN(y+b) = y*sc + (b*sc + shift)
        scale, shift = out_scale, bias * out_scale + out_shift
    y = fused_matmul(a, wm, scale=scale, shift=shift, act=out_act)
    return y.reshape(B, Ho, Wo, Cout)


def dense_layer_fwd(p, x, dilation):
    B, H, Wd, Cin = x.shape
    growth = p["skip_conv"]["w"].shape[0]
    # skip path: conv1x1 -> BN, BN folded into the matmul epilogue (exact).
    ssc, ssh = bn_scale_shift(p["skip_bn"])
    residual = fused_matmul(x.reshape(-1, Cin), _w1x1(p["skip_conv"]["w"]),
                            scale=ssc, shift=p["skip_conv"]["b"] * ssc + ssh)
    h = acblock_fwd(p["ac1"], x, dilation)
    # bn_last + ReLU folded into the second AC block's matmul epilogue.
    ls, lt = bn_scale_shift(p["bn_last"])
    h = acblock_fwd(p["ac2"], h, dilation + 1,
                    out_scale=ls, out_shift=lt, out_act="relu")
    r = 2 ** (dilation + 1)
    a, Ho, Wo = _im2col(h, 3, 3, r, r, r, r)
    # conv_last (bias=False) with the residual add fused into the epilogue.
    out = fused_matmul(a, _wconv(p["conv_last"]["w"]), residual=residual)
    # TODO(synk): _DenseLayer._pad replicate-padding branch not implemented; with
    # these kernel/dilation/padding choices spatial dims always match (no-op).
    # F.dropout: identity in inference mode.
    return out.reshape(B, Ho, Wo, growth)


def dense_block_fwd(p, x):
    B, H, Wd, Cin = x.shape
    growth = p["skip_conv"]["w"].shape[0]
    ssc, ssh = bn_scale_shift(p["skip_bn"])
    residual = fused_matmul(x.reshape(-1, Cin), _w1x1(p["skip_conv"]["w"]),
                            scale=ssc, shift=p["skip_conv"]["b"] * ssc + ssh)
    feats = [x]
    cur = x
    for i, lp in enumerate(p["layers"]):
        cur = dense_layer_fwd(lp, cur, dilation=i)
        feats.append(cur)
    cat = jnp.concatenate(feats, axis=-1)
    Ctot = cat.shape[-1]
    os_, ot = bn_scale_shift(p["bn_out"])
    # BN+ReLU prologue + 1x1 conv + bias + residual add, all in one kernel.
    out = fused_matmul(cat.reshape(-1, Ctot), _w1x1(p["conv_out"]["w"]),
                       shift=p["conv_out"]["b"],
                       pre_scale=os_, pre_shift=ot, pre_act="relu",
                       residual=residual)
    return out.reshape(B, H, Wd, growth)


def hglayer_fwd(p, x, x_sup, rate=2):
    B, H, Wd, C = x_sup.shape
    cd1_out = p["cd1"]["w"].shape[0]
    h = fused_matmul(x_sup.reshape(-1, C), _w1x1(p["cd1"]["w"]),
                     shift=p["cd1"]["b"], act="selu").reshape(B, H, Wd, cd1_out)
    xs = conv_transpose_h(h, p["up"]["w"], p["up"]["b"], rate)   # x_superior
    assert xs.shape == x.shape
    Bx, Hx, Wx, Cx = x.shape
    wcd = _w1x1(p["cd"]["w"])                                    # (2*Cx, Cout)
    out = hg_gate_matmul(x.reshape(-1, Cx), xs.reshape(-1, Cx),
                         wcd[:Cx], wcd[Cx:], p["cd"]["b"])
    return out.reshape(Bx, Hx, Wx, -1)


def pool_fwd(p, x):
    B, H, Wd, C = x.shape
    cout = p["w"].shape[0]
    y = fused_matmul(x.reshape(-1, C), _w1x1(p["w"]), shift=p["b"])
    return maxpool_h2(y.reshape(B, H, Wd, cout))


def multiscale_forward(p, x_nhwc):
    x0 = x_nhwc
    x1 = dense_block_fwd(p["En1"], x0)
    x_1 = pool_fwd(p["pool1"], x1)
    x2 = dense_block_fwd(p["En2"], x_1)
    x_2 = pool_fwd(p["pool2"], x2)
    x3 = dense_block_fwd(p["En3"], x_2)
    x_3 = pool_fwd(p["pool3"], x3)
    xy_ = dense_block_fwd(p["Enter"], x_3)
    hg1 = hglayer_fwd(p["hg1"], x_2, xy_)
    hg2 = hglayer_fwd(p["hg2"], x_1, hg1)
    y3 = conv_transpose_h(xy_, p["up3"]["w"], p["up3"]["b"], 2)
    y_3 = dense_block_fwd(p["De3"], y3) + hg1
    y2 = conv_transpose_h(y_3, p["up2"]["w"], p["up2"]["b"], 2)
    y_2 = dense_block_fwd(p["De2"], y2) + hg2
    y1 = conv_transpose_h(y_2, p["up1"]["w"], p["up1"]["b"], 2)
    y_1 = dense_block_fwd(p["De1"], y1)
    return y_1


# ---------------------------------------------------------------------------
# Deterministic parameter construction
# ---------------------------------------------------------------------------

class KeyGen:
    def __init__(self, seed=0):
        self._key = jax.random.PRNGKey(seed)

    def __call__(self):
        self._key, sub = jax.random.split(self._key)
        return sub


def init_conv(kg, cout, cin, kh, kw, bias=True):
    p = {"w": 0.1 * jax.random.normal(kg(), (cout, cin, kh, kw), jnp.float32)}
    p["b"] = (0.1 * jax.random.normal(kg(), (cout,), jnp.float32)) if bias else None
    return p


def init_bn(kg, c):
    return {
        "gamma": 1.0 + 0.1 * jax.random.normal(kg(), (c,), jnp.float32),
        "beta": 0.1 * jax.random.normal(kg(), (c,), jnp.float32),
        "mean": 0.1 * jax.random.normal(kg(), (c,), jnp.float32),
        "var": 1.0 + 0.1 * jax.random.uniform(kg(), (c,), jnp.float32),
    }


def init_convT(kg, cin, cout, kh, kw):
    return {"w": 0.1 * jax.random.normal(kg(), (cin, cout, kh, kw), jnp.float32),
            "b": 0.1 * jax.random.normal(kg(), (cout,), jnp.float32)}


def init_acblock(kg, cin, cout):
    return {"bn2": init_bn(kg, cin), "conv2": init_conv(kg, cout, cin, 5, 1),
            "bn3": init_bn(kg, cin), "conv3": init_conv(kg, cout, cin, 1, 3)}


def init_dense_layer(kg, cin, growth):
    return {
        "ac1": init_acblock(kg, cin, growth),
        "ac2": init_acblock(kg, growth, growth),
        "bn_last": init_bn(kg, growth),
        "conv_last": init_conv(kg, growth, growth, 3, 3, bias=False),
        "skip_conv": init_conv(kg, growth, cin, 1, 1),
        "skip_bn": init_bn(kg, growth),
    }


def init_dense_block(kg, num_layers, cin, growth):
    layers, c = [], cin
    for _ in range(num_layers):
        layers.append(init_dense_layer(kg, c, growth))
        c = growth
    out_channel = cin + num_layers * growth
    return {
        "layers": layers,
        "bn_out": init_bn(kg, out_channel),
        "conv_out": init_conv(kg, growth, out_channel, 1, 1),
        "skip_conv": init_conv(kg, growth, cin, 1, 1),
        "skip_bn": init_bn(kg, growth),
    }


def init_hglayer(kg, cin, cout, rate):
    return {"cd1": init_conv(kg, cout, cin, 1, 1),
            "up": init_convT(kg, 16, 16, rate, 1),          # hardcoded 16 ch in ref
            "cd": init_conv(kg, cout, cout * 2, 1, 1)}


def init_multiscale(kg, first_channel=32, kl=((16, 2),) * 7):
    p = {}
    p["En1"] = init_dense_block(kg, kl[0][1], first_channel, kl[0][0])
    p["pool1"] = init_conv(kg, kl[0][0], kl[0][0], 1, 1)
    p["En2"] = init_dense_block(kg, kl[1][1], kl[0][0], kl[1][0])
    p["pool2"] = init_conv(kg, kl[1][0], kl[1][0], 1, 1)
    p["En3"] = init_dense_block(kg, kl[2][1], kl[1][0], kl[2][0])
    p["pool3"] = init_conv(kg, kl[2][0], kl[2][0], 1, 1)
    p["Enter"] = init_dense_block(kg, kl[3][1], kl[2][0], kl[3][0])
    p["up3"] = init_convT(kg, kl[3][0], kl[3][0], 2, 1)
    p["De3"] = init_dense_block(kg, kl[-3][1], kl[3][0], kl[-3][0])
    p["up2"] = init_convT(kg, kl[-3][0], kl[-3][0], 2, 1)
    p["De2"] = init_dense_block(kg, kl[-2][1], kl[-3][0], kl[-2][0])
    p["up1"] = init_convT(kg, kl[-2][0], kl[-2][0], 2, 1)
    p["De1"] = init_dense_block(kg, kl[-1][1], kl[-2][0], kl[-1][0])
    p["hg1"] = init_hglayer(kg, kl[3][0], kl[4][0], 2)
    p["hg2"] = init_hglayer(kg, kl[4][0], kl[5][0], 2)
    return p


if __name__ == "__main__":
    # NOTE: the PyTorch defaults kl=[(14,4),(16,4),...] make HGlayer_F #2
    # channel-incompatible (14-ch feature * 16-ch sigmoid gate); we instantiate
    # with a self-consistent kl=[(16,2)]*7 so the reference forward is valid.
    kg = KeyGen(0)
    params = init_multiscale(kg)

    key = jax.random.PRNGKey(0)
    x_nchw = jax.random.normal(key, (1, 32, 16, 8), jnp.float32)   # (B, C=32, H, W)
    x_nhwc = jnp.transpose(x_nchw, (0, 2, 3, 1))

    forward = jax.jit(multiscale_forward)   # single jit over the whole network
    y_nhwc = forward(params, x_nhwc)
    y_nchw = jnp.transpose(y_nhwc, (0, 3, 1, 2))
    jax.block_until_ready(y_nchw)
    assert y_nchw.shape == (1, 16, 16, 8), y_nchw.shape
    print("KERNEL_OK")
</pallas_src>

<mosaic_0001>
module attributes {stable_mosaic.version = 11 : i64} {
  func.func @_affine_act_kernel(%arg0: memref<128x64xf32, #tpu.memory_space<vmem>>, %arg1: memref<1x64xf32, #tpu.memory_space<vmem>>, %arg2: memref<1x64xf32, #tpu.memory_space<vmem>>, %arg3: memref<128x64xf32, #tpu.memory_space<vmem>>) attributes {dimension_semantics = [], scalar_prefetch = 0 : i64, scratch_operands = 0 : i64, tpu.core_type = #tpu.core_type<tc>} {
    %c0 = arith.constant 0 : index
    %c0_0 = arith.constant 0 : index
    %0 = vector.load %arg0[%c0, %c0_0] : memref<128x64xf32, #tpu.memory_space<vmem>>, vector<128x64xf32>
    %c0_1 = arith.constant 0 : index
    %c0_2 = arith.constant 0 : index
    %1 = vector.load %arg1[%c0_1, %c0_2] : memref<1x64xf32, #tpu.memory_space<vmem>>, vector<1x64xf32>
    %2 = vector.broadcast %1 : vector<1x64xf32> to vector<128x64xf32>
    %3 = arith.mulf %0, %2 : vector<128x64xf32>
    %c0_3 = arith.constant 0 : index
    %c0_4 = arith.constant 0 : index
    %4 = vector.load %arg2[%c0_3, %c0_4] : memref<1x64xf32, #tpu.memory_space<vmem>>, vector<1x64xf32>
    %5 = vector.broadcast %4 : vector<1x64xf32> to vector<128x64xf32>
    %6 = arith.addf %3, %5 : vector<128x64xf32>
    %cst = arith.constant 0.000000e+00 : f32
    %7 = vector.broadcast %cst : f32 to vector<128x64xf32>
    %8 = arith.maximumf %6, %7 : vector<128x64xf32>
    %c0_5 = arith.constant 0 : index
    %c0_6 = arith.constant 0 : index
    %9 = vector.load %arg3[%c0_5, %c0_6] : memref<128x64xf32, #tpu.memory_space<vmem>>, vector<128x64xf32>
    tpu.vector_store %arg3[%c0_5, %c0_6], %8 {strides = array<i32>} : memref<128x64xf32, #tpu.memory_space<vmem>>, vector<128x64xf32>,
    return
  }
}

module attributes {stable_mosaic.version = 11 : i64} {
  func.func @_fused_matmul_kernel(%arg0: memref<128x256xf32, #tpu.memory_space<vmem>>, %arg1: memref<256x16xf32, #tpu.memory_space<vmem>>, %arg2: memref<1x16xf32, #tpu.memory_space<vmem>>, %arg3: memref<1x16xf32, #tpu.memory_space<vmem>>, %arg4: memref<128x16xf32, #tpu.memory_space<vmem>>) attributes {dimension_semantics = [], scalar_prefetch = 0 : i64, scratch_operands = 0 : i64, tpu.core_type = #tpu.core_type<tc>} {
    %c0 = arith.constant 0 : index
    %c0_0 = arith.constant 0 : index
    %0 = vector.load %arg0[%c0, %c0_0] : memref<128x256xf32, #tpu.memory_space<vmem>>, vector<128x256xf32>
    %c0_1 = arith.constant 0 : index
    %c0_2 = arith.constant 0 : index
    %1 = vector.load %arg1[%c0_1, %c0_2] : memref<256x16xf32, #tpu.memory_space<vmem>>, vector<256x16xf32>
    %cst = arith.constant dense<0.000000e+00> : vector<128x16xf32>
    %2 = tpu.matmul %0, %1, %cst {dimension_numbers = #tpu.dot_dimension_numbers<[1], [0], [0], [1], [0, 0, 1, 1], [], []>} : vector<128x256xf32>, vector<256x16xf32>, vector<128x16xf32> -> vector<128x16xf32>
    %c0_3 = arith.constant 0 : index
    %c0_4 = arith.constant 0 : index
    %3 = vector.load %arg2[%c0_3, %c0_4] : memref<1x16xf32, #tpu.memory_space<vmem>>, vector<1x16xf32>
    %4 = vector.broadcast %3 : vector<1x16xf32> to vector<128x16xf32>
    %5 = arith.mulf %2, %4 : vector<128x16xf32>
    %c0_5 = arith.constant 0 : index
    %c0_6 = arith.constant 0 : index
    %6 = vector.load %arg3[%c0_5, %c0_6] : memref<1x16xf32, #tpu.memory_space<vmem>>, vector<1x16xf32>
    %7 = vector.broadcast %6 : vector<1x16xf32> to vector<128x16xf32>
    %8 = arith.addf %5, %7 : vector<128x16xf32>
    %c0_7 = arith.constant 0 : index
    %c0_8 = arith.constant 0 : index
    %9 = vector.load %arg4[%c0_7, %c0_8] : memref<128x16xf32, #tpu.memory_space<vmem>>, vector<128x16xf32>
    tpu.vector_store %arg4[%c0_7, %c0_8], %8 {strides = array<i32>} : memref<128x16xf32, #tpu.memory_space<vmem>>, vector<128x16xf32>,
    return
  }
}

module attributes {stable_mosaic.version = 11 : i64} {
  func.func @_affine_act_kernel(%arg0: memref<128x32xf32, #tpu.memory_space<vmem>>, %arg1: memref<1x32xf32, #tpu.memory_space<vmem>>, %arg2: memref<1x32xf32, #tpu.memory_space<vmem>>, %arg3: memref<128x32xf32, #tpu.memory_space<vmem>>) attributes {dimension_semantics = [], scalar_prefetch = 0 : i64, scratch_operands = 0 : i64, tpu.core_type = #tpu.core_type<tc>} {
    %c0 = arith.constant 0 : index
    %c0_0 = arith.constant 0 : index
    %0 = vector.load %arg0[%c0, %c0_0] : memref<128x32xf32, #tpu.memory_space<vmem>>, vector<128x32xf32>
    %c0_1 = arith.constant 0 : index
    %c0_2 = arith.constant 0 : index
    %1 = vector.load %arg1[%c0_1, %c0_2] : memref<1x32xf32, #tpu.memory_space<vmem>>, vector<1x32xf32>
    %2 = vector.broadcast %1 : vector<1x32xf32> to vector<128x32xf32>
    %3 = arith.mulf %0, %2 : vector<128x32xf32>
    %c0_3 = arith.constant 0 : index
    %c0_4 = arith.constant 0 : index
    %4 = vector.load %arg2[%c0_3, %c0_4] : memref<1x32xf32, #tpu.memory_space<vmem>>, vector<1x32xf32>
    %5 = vector.broadcast %4 : vector<1x32xf32> to vector<128x32xf32>
    %6 = arith.addf %3, %5 : vector<128x32xf32>
    %cst = arith.constant 0.000000e+00 : f32
    %7 = vector.broadcast %cst : f32 to vector<128x32xf32>
    %8 = arith.maximumf %6, %7 : vector<128x32xf32>
    %c0_5 = arith.constant 0 : index
    %c0_6 = arith.constant 0 : index
    %9 = vector.load %arg3[%c0_5, %c0_6] : memref<128x32xf32, #tpu.memory_space<vmem>>, vector<128x32xf32>
    tpu.vector_store %arg3[%c0_5, %c0_6], %8 {strides = array<i32>} : memref<128x32xf32, #tpu.memory_space<vmem>>, vector<128x32xf32>,
    return
  }
}

module attributes {stable_mosaic.version = 11 : i64} {
  func.func @_fused_matmul_kernel(%arg0: memref<128x128xf32, #tpu.memory_space<vmem>>, %arg1: memref<128x16xf32, #tpu.memory_space<vmem>>, %arg2: memref<1x16xf32, #tpu.memory_space<vmem>>, %arg3: memref<1x16xf32, #tpu.memory_space<vmem>>, %arg4: memref<128x16xf32, #tpu.memory_space<vmem>>) attributes {dimension_semantics = [], scalar_prefetch = 0 : i64, scratch_operands = 0 : i64, tpu.core_type = #tpu.core_type<tc>} {
    %c0 = arith.constant 0 : index
    %c0_0 = arith.constant 0 : index
    %0 = vector.load %arg0[%c0, %c0_0] : memref<128x128xf32, #tpu.memory_space<vmem>>, vector<128x128xf32>
    %c0_1 = arith.constant 0 : index
    %c0_2 = arith.constant 0 : index
    %1 = vector.load %arg1[%c0_1, %c0_2] : memref<128x16xf32, #tpu.memory_space<vmem>>, vector<128x16xf32>
    %cst = arith.constant dense<0.000000e+00> : vector<128x16xf32>
    %2 = tpu.matmul %0, %1, %cst {dimension_numbers = #tpu.dot_dimension_numbers<[1], [0], [0], [1], [0, 0, 1, 1], [], []>} : vector<128x128xf32>, vector<128x16xf32>, vector<128x16xf32> -> vector<128x16xf32>
    %c0_3 = arith.constant 0 : index
    %c0_4 = arith.constant 0 : index
    %3 = vector.load %arg2[%c0_3, %c0_4] : memref<1x16xf32, #tpu.memory_space<vmem>>, vector<1x16xf32>
    %4 = vector.broadcast %3 : vector<1x16xf32> to vector<128x16xf32>
    %5 = arith.mulf %2, %4 : vector<128x16xf32>
    %c0_5 = arith.constant 0 : index
    %c0_6 = arith.constant 0 : index
    %6 = vector.load %arg3[%c0_5, %c0_6] : memref<1x16xf32, #tpu.memory_space<vmem>>, vector<1x16xf32>
    %7 = vector.broadcast %6 : vector<1x16xf32> to vector<128x16xf32>
    %8 = arith.addf %5, %7 : vector<128x16xf32>
    %cst_7 = arith.constant 0.000000e+00 : f32
    %9 = vector.broadcast %cst_7 : f32 to vector<128x16xf32>
    %10 = arith.maximumf %8, %9 : vector<128x16xf32>
    %c0_8 = arith.constant 0 : index
    %c0_9 = arith.constant 0 : index
    %11 = vector.load %arg4[%c0_8, %c0_9] : memref<128x16xf32, #tpu.memory_space<vmem>>, vector<128x16xf32>
    tpu.vector_store %arg4[%c0_8, %c0_9], %10 {strides = array<i32>} : memref<128x16xf32, #tpu.memory_space<vmem>>, vector<128x16xf32>,
    return
  }
}

module attributes {stable_mosaic.version = 11 : i64} {
  func.func @_fused_matmul_kernel(%arg0: memref<128x32xf32, #tpu.memory_space<vmem>>, %arg1: memref<32x16xf32, #tpu.memory_space<vmem>>, %arg2: memref<1x16xf32, #tpu.memory_space<vmem>>, %arg3: memref<1x16xf32, #tpu.memory_space<vmem>>, %arg4: memref<128x16xf32, #tpu.memory_space<vmem>>) attributes {dimension_semantics = [], scalar_prefetch = 0 : i64, scratch_operands = 0 : i64, tpu.core_type = #tpu.core_type<tc>} {
    %c0 = arith.constant 0 : index
    %c0_0 = arith.constant 0 : index
    %0 = vector.load %arg0[%c0, %c0_0] : memref<128x32xf32, #tpu.memory_space<vmem>>, vector<128x32xf32>
    %c0_1 = arith.constant 0 : index
    %c0_2 = arith.constant 0 : index
    %1 = vector.load %arg1[%c0_1, %c0_2] : memref<32x16xf32, #tpu.memory_space<vmem>>, vector<32x16xf32>
    %cst = arith.constant dense<0.000000e+00> : vector<128x16xf32>
    %2 = tpu.matmul %0, %1, %cst {dimension_numbers = #tpu.dot_dimension_numbers<[1], [0], [0], [1], [0, 0, 1, 1], [], []>} : vector<128x32xf32>, vector<32x16xf32>, vector<128x16xf32> -> vector<128x16xf32>
    %c0_3 = arith.constant 0 : index
    %c0_4 = arith.constant 0 : index
    %3 = vector.load %arg2[%c0_3, %c0_4] : memref<1x16xf32, #tpu.memory_space<vmem>>, vector<1x16xf32>
    %4 = vector.broadcast %3 : vector<1x16xf32> to vector<128x16xf32>
    %5 = arith.mulf %2, %4 : vector<128x16xf32>
    %c0_5 = arith.constant 0 : index
    %c0_6 = arith.constant 0 : index
    %6 = vector.load %arg3[%c0_5, %c0_6] : memref<1x16xf32, #tpu.memory_space<vmem>>, vector<1x16xf32>
    %7 = vector.broadcast %6 : vector<1x16xf32> to vector<128x16xf32>
    %8 = arith.addf %5, %7 : vector<128x16xf32>
    %c0_7 = arith.constant 0 : index
    %c0_8 = arith.constant 0 : index
    %9 = vector.load %arg4[%c0_7, %c0_8] : memref<128x16xf32, #tpu.memory_space<vmem>>, vector<128x16xf32>
    tpu.vector_store %arg4[%c0_7, %c0_8], %8 {strides = array<i32>} : memref<128x16xf32, #tpu.memory_space<vmem>>, vector<128x16xf32>,
    return
  }
}

module attributes {stable_mosaic.version = 11 : i64} {
  func.func @_fused_matmul_kernel(%arg0: memref<128x144xf32, #tpu.memory_space<vmem>>, %arg1: memref<144x16xf32, #tpu.memory_space<vmem>>, %arg2: memref<1x16xf32, #tpu.memory_space<vmem>>, %arg3: memref<1x16xf32, #tpu.memory_space<vmem>>, %arg4: memref<128x16xf32, #tpu.memory_space<vmem>>, %arg5: memref<128x16xf32, #tpu.memory_space<vmem>>) attributes {dimension_semantics = [], scalar_prefetch = 0 : i64, scratch_operands = 0 : i64, tpu.core_type = #tpu.core_type<tc>} {
    %c0 = arith.constant 0 : index
    %c0_0 = arith.constant 0 : index
    %0 = vector.load %arg0[%c0, %c0_0] : memref<128x144xf32, #tpu.memory_space<vmem>>, vector<128x144xf32>
    %c0_1 = arith.constant 0 : index
    %c0_2 = arith.constant 0 : index
    %1 = vector.load %arg1[%c0_1, %c0_2] : memref<144x16xf32, #tpu.memory_space<vmem>>, vector<144x16xf32>
    %cst = arith.constant dense<0.000000e+00> : vector<128x16xf32>
    %2 = tpu.matmul %0, %1, %cst {dimension_numbers = #tpu.dot_dimension_numbers<[1], [0], [0], [1], [0, 0, 1, 1], [], []>} : vector<128x144xf32>, vector<144x16xf32>, vector<128x16xf32> -> vector<128x16xf32>
    %c0_3 = arith.constant 0 : index
    %c0_4 = arith.constant 0 : index
    %3 = vector.load %arg2[%c0_3, %c0_4] : memref<1x16xf32, #tpu.memory_space<vmem>>, vector<1x16xf32>
    %4 = vector.broadcast %3 : vector<1x16xf32> to vector<128x16xf32>
    %5 = arith.mulf %2, %4 : vector<128x16xf32>
    %c0_5 = arith.constant 0 : index
    %c0_6 = arith.constant 0 : index
    %6 = vector.load %arg3[%c0_5, %c0_6] : memref<1x16xf32, #tpu.memory_space<vmem>>, vector<1x16xf32>
    %7 = vector.broadcast %6 : vector<1x16xf32> to vector<128x16xf32>
    %8 = arith.addf %5, %7 : vector<128x16xf32>
    %c0_7 = arith.constant 0 : index
    %c0_8 = arith.constant 0 : index
    %9 = vector.load %arg4[%c0_7, %c0_8] : memref<128x16xf32, #tpu.memory_space<vmem>>, vector<128x16xf32>
    %10 = arith.addf %8, %9 : vector<128x16xf32>
    %c0_9 = arith.constant 0 : index
    %c0_10 = arith.constant 0 : index
    %11 = vector.load %arg5[%c0_9, %c0_10] : memref<128x16xf32, #tpu.memory_space<vmem>>, vector<128x16xf32>
    tpu.vector_store %arg5[%c0_9, %c0_10], %10 {strides = array<i32>} : memref<128x16xf32, #tpu.memory_space<vmem>>, vector<128x16xf32>,
    return
  }
}

module attributes {stable_mosaic.version = 11 : i64} {
  func.func @_fused_matmul_kernel(%arg0: memref<128x128xf32, #tpu.memory_space<vmem>>, %arg1: memref<128x16xf32, #tpu.memory_space<vmem>>, %arg2: memref<1x16xf32, #tpu.memory_space<vmem>>, %arg3: memref<1x16xf32, #tpu.memory_space<vmem>>, %arg4: memref<128x16xf32, #tpu.memory_space<vmem>>) attributes {dimension_semantics = [], scalar_prefetch = 0 : i64, scratch_operands = 0 : i64, tpu.core_type = #tpu.core_type<tc>} {
    %c0 = arith.constant 0 : index
    %c0_0 = arith.constant 0 : index
    %0 = vector.load %arg0[%c0, %c0_0] : memref<128x128xf32, #tpu.memory_space<vmem>>, vector<128x128xf32>
    %c0_1 = arith.constant 0 : index
    %c0_2 = arith.constant 0 : index
    %1 = vector.load %arg1[%c0_1, %c0_2] : memref<128x16xf32, #tpu.memory_space<vmem>>, vector<128x16xf32>
    %cst = arith.constant dense<0.000000e+00> : vector<128x16xf32>
    %2 = tpu.matmul %0, %1, %cst {dimension_numbers = #tpu.dot_dimension_numbers<[1], [0], [0], [1], [0, 0, 1, 1], [], []>} : vector<128x128xf32>, vector<128x16xf32>, vector<128x16xf32> -> vector<128x16xf32>
    %c0_3 = arith.constant 0 : index
    %c0_4 = arith.constant 0 : index
    %3 = vector.load %arg2[%c0_3, %c0_4] : memref<1x16xf32, #tpu.memory_space<vmem>>, vector<1x16xf32>
    %4 = vector.broadcast %3 : vector<1x16xf32> to vector<128x16xf32>
    %5 = arith.mulf %2, %4 : vector<128x16xf32>
    %c0_5 = arith.constant 0 : index
    %c0_6 = arith.constant 0 : index
    %6 = vector.load %arg3[%c0_5, %c0_6] : memref<1x16xf32, #tpu.memory_space<vmem>>, vector<1x16xf32>
    %7 = vector.broadcast %6 : vector<1x16xf32> to vector<128x16xf32>
    %8 = arith.addf %5, %7 : vector<128x16xf32>
    %c0_7 = arith.constant 0 : index
    %c0_8 = arith.constant 0 : index
    %9 = vector.load %arg4[%c0_7, %c0_8] : memref<128x16xf32, #tpu.memory_space<vmem>>, vector<128x16xf32>
    tpu.vector_store %arg4[%c0_7, %c0_8], %8 {strides = array<i32>} : memref<128x16xf32, #tpu.memory_space<vmem>>, vector<128x16xf32>,
    return
  }
}

module attributes {stable_mosaic.version = 11 : i64} {
  func.func @_fused_matmul_kernel(%arg0: memref<128x16xf32, #tpu.memory_space<vmem>>, %arg1: memref<16x16xf32, #tpu.memory_space<vmem>>, %arg2: memref<1x16xf32, #tpu.memory_space<vmem>>, %arg3: memref<1x16xf32, #tpu.memory_space<vmem>>, %arg4: memref<128x16xf32, #tpu.memory_space<vmem>>) attributes {dimension_semantics = [], scalar_prefetch = 0 : i64, scratch_operands = 0 : i64, tpu.core_type = #tpu.core_type<tc>} {
    %c0 = arith.constant 0 : index
    %c0_0 = arith.constant 0 : index
    %0 = vector.load %arg0[%c0, %c0_0] : memref<128x16xf32, #tpu.memory_space<vmem>>, vector<128x16xf32>
    %c0_1 = arith.constant 0 : index
    %c0_2 = arith.constant 0 : index
    %1 = vector.load %arg1[%c0_1, %c0_2] : memref<16x16xf32, #tpu.memory_space<vmem>>, vector<16x16xf32>
    %cst = arith.constant dense<0.000000e+00> : vector<128x16xf32>
    %2 = tpu.matmul %0, %1, %cst {dimension_numbers = #tpu.dot_dimension_numbers<[1], [0], [0], [1], [0, 0, 1, 1], [], []>} : vector<128x16xf32>, vector<16x16xf32>, vector<128x16xf32> -> vector<128x16xf32>
    %c0_3 = arith.constant 0 : index
    %c0_4 = arith.constant 0 : index
    %3 = vector.load %arg2[%c0_3, %c0_4] : memref<1x16xf32, #tpu.memory_space<vmem>>, vector<1x16xf32>
    %4 = vector.broadcast %3 : vector<1x16xf32> to vector<128x16xf32>
    %5 = arith.mulf %2, %4 : vector<128x16xf32>
    %c0_5 = arith.constant 0 : index
    %c0_6 = arith.constant 0 : index
    %6 = vector.load %arg3[%c0_5, %c0_6] : memref<1x16xf32, #tpu.memory_space<vmem>>, vector<1x16xf32>
    %7 = vector.broadcast %6 : vector<1x16xf32> to vector<128x16xf32>
    %8 = arith.addf %5, %7 : vector<128x16xf32>
    %c0_7 = arith.constant 0 : index
    %c0_8 = arith.constant 0 : index
    %9 = vector.load %arg4[%c0_7, %c0_8] : memref<128x16xf32, #tpu.memory_space<vmem>>, vector<128x16xf32>
    tpu.vector_store %arg4[%c0_7, %c0_8], %8 {strides = array<i32>} : memref<128x16xf32, #tpu.memory_space<vmem>>, vector<128x16xf32>,
    return
  }
}

module attributes {stable_mosaic.version = 11 : i64} {
  func.func @_fused_matmul_kernel(%arg0: memref<128x64xf32, #tpu.memory_space<vmem>>, %arg1: memref<1x64xf32, #tpu.memory_space<vmem>>, %arg2: memref<1x64xf32, #tpu.memory_space<vmem>>, %arg3: memref<64x16xf32, #tpu.memory_space<vmem>>, %arg4: memref<1x16xf32, #tpu.memory_space<vmem>>, %arg5: memref<1x16xf32, #tpu.memory_space<vmem>>, %arg6: memref<128x16xf32, #tpu.memory_space<vmem>>, %arg7: memref<128x16xf32, #tpu.memory_space<vmem>>) attributes {dimension_semantics = [], scalar_prefetch = 0 : i64, scratch_operands = 0 : i64, tpu.core_type = #tpu.core_type<tc>} {
    %c0 = arith.constant 0 : index
    %c0_0 = arith.constant 0 : index
    %0 = vector.load %arg0[%c0, %c0_0] : memref<128x64xf32, #tpu.memory_space<vmem>>, vector<128x64xf32>
    %c0_1 = arith.constant 0 : index
    %c0_2 = arith.constant 0 : index
    %1 = vector.load %arg1[%c0_1, %c0_2] : memref<1x64xf32, #tpu.memory_space<vmem>>, vector<1x64xf32>
    %2 = vector.broadcast %1 : vector<1x64xf32> to vector<128x64xf32>
    %3 = arith.mulf %0, %2 : vector<128x64xf32>
    %c0_3 = arith.constant 0 : index
    %c0_4 = arith.constant 0 : index
    %4 = vector.load %arg2[%c0_3, %c0_4] : memref<1x64xf32, #tpu.memory_space<vmem>>, vector<1x64xf32>
    %5 = vector.broadcast %4 : vector<1x64xf32> to vector<128x64xf32>
    %6 = arith.addf %3, %5 : vector<128x64xf32>
    %cst = arith.constant 0.000000e+00 : f32
    %7 = vector.broadcast %cst : f32 to vector<128x64xf32>
    %8 = arith.maximumf %6, %7 : vector<128x64xf32>
    %c0_5 = arith.constant 0 : index
    %c0_6 = arith.constant 0 : index
    %9 = vector.load %arg3[%c0_5, %c0_6] : memref<64x16xf32, #tpu.memory_space<vmem>>, vector<64x16xf32>
    %cst_7 = arith.constant dense<0.000000e+00> : vector<128x16xf32>
    %10 = tpu.matmul %8, %9, %cst_7 {dimension_numbers = #tpu.dot_dimension_numbers<[1], [0], [0], [1], [0, 0, 1, 1], [], []>} : vector<128x64xf32>, vector<64x16xf32>, vector<128x16xf32> -> vector<128x16xf32>
    %c0_8 = arith.constant 0 : index
    %c0_9 = arith.constant 0 : index
    %11 = vector.load %arg4[%c0_8, %c0_9] : memref<1x16xf32, #tpu.memory_space<vmem>>, vector<1x16xf32>
    %12 = vector.broadcast %11 : vector<1x16xf32> to vector<128x16xf32>
    %13 = arith.mulf %10, %12 : vector<128x16xf32>
    %c0_10 = arith.constant 0 : index
    %c0_11 = arith.constant 0 : index
    %14 = vector.load %arg5[%c0_10, %c0_11] : memref<1x16xf32, #tpu.memory_space<vmem>>, vector<1x16xf32>
    %15 = vector.broadcast %14 : vector<1x16xf32> to vector<128x16xf32>
    %16 = arith.addf %13, %15 : vector<128x16xf32>
    %c0_12 = arith.constant 0 : index
    %c0_13 = arith.constant 0 : index
    %17 = vector.load %arg6[%c0_12, %c0_13] : memref<128x16xf32, #tpu.memory_space<vmem>>, vector<128x16xf32>
    %18 = arith.addf %16, %17 : vector<128x16xf32>
    %c0_14 = arith.constant 0 : index
    %c0_15 = arith.constant 0 : index
    %19 = vector.load %arg7[%c0_14, %c0_15] : memref<128x16xf32, #tpu.memory_space<vmem>>, vector<128x16xf32>
    tpu.vector_store %arg7[%c0_14, %c0_15], %18 {strides = array<i32>} : memref<128x16xf32, #tpu.memory_space<vmem>>, vector<128x16xf32>,
    return
  }
}

module attributes {stable_mosaic.version = 11 : i64} {
  func.func @_affine_act_kernel(%arg0: memref<64x32xf32, #tpu.memory_space<vmem>>, %arg1: memref<1x32xf32, #tpu.memory_space<vmem>>, %arg2: memref<1x32xf32, #tpu.memory_space<vmem>>, %arg3: memref<64x32xf32, #tpu.memory_space<vmem>>) attributes {dimension_semantics = [], scalar_prefetch = 0 : i64, scratch_operands = 0 : i64, tpu.core_type = #tpu.core_type<tc>} {
    %c0 = arith.constant 0 : index
    %c0_0 = arith.constant 0 : index
    %0 = vector.load %arg0[%c0, %c0_0] : memref<64x32xf32, #tpu.memory_space<vmem>>, vector<64x32xf32>
    %c0_1 = arith.constant 0 : index
    %c0_2 = arith.constant 0 : index
    %1 = vector.load %arg1[%c0_1, %c0_2] : memref<1x32xf32, #tpu.memory_space<vmem>>, vector<1x32xf32>
    %2 = vector.broadcast %1 : vector<1x32xf32> to vector<64x32xf32>
    %3 = arith.mulf %0, %2 : vector<64x32xf32>
    %c0_3 = arith.constant 0 : index
    %c0_4 = arith.constant 0 : index
    %4 = vector.load %arg2[%c0_3, %c0_4] : memref<1x32xf32, #tpu.memory_space<vmem>>, vector<1x32xf32>
    %5 = vector.broadcast %4 : vector<1x32xf32> to vector<64x32xf32>
    %6 = arith.addf %3, %5 : vector<64x32xf32>
    %cst = arith.constant 0.000000e+00 : f32
    %7 = vector.broadcast %cst : f32 to vector<64x32xf32>
    %8 = arith.maximumf %6, %7 : vector<64x32xf32>
    %c0_5 = arith.constant 0 : index
    %c0_6 = arith.constant 0 : index
    %9 = vector.load %arg3[%c0_5, %c0_6] : memref<64x32xf32, #tpu.memory_space<vmem>>, vector<64x32xf32>
    tpu.vector_store %arg3[%c0_5, %c0_6], %8 {strides = array<i32>} : memref<64x32xf32, #tpu.memory_space<vmem>>, vector<64x32xf32>,
    return
  }
}

module attributes {stable_mosaic.version = 11 : i64} {
  func.func @_fused_matmul_kernel(%arg0: memref<64x128xf32, #tpu.memory_space<vmem>>, %arg1: memref<128x16xf32, #tpu.memory_space<vmem>>, %arg2: memref<1x16xf32, #tpu.memory_space<vmem>>, %arg3: memref<1x16xf32, #tpu.memory_space<vmem>>, %arg4: memref<64x16xf32, #tpu.memory_space<vmem>>) attributes {dimension_semantics = [], scalar_prefetch = 0 : i64, scratch_operands = 0 : i64, tpu.core_type = #tpu.core_type<tc>} {
    %c0 = arith.constant 0 : index
    %c0_0 = arith.constant 0 : index
    %0 = vector.load %arg0[%c0, %c0_0] : memref<64x128xf32, #tpu.memory_space<vmem>>, vector<64x128xf32>
    %c0_1 = arith.constant 0 : index
    %c0_2 = arith.constant 0 : index
    %1 = vector.load %arg1[%c0_1, %c0_2] : memref<128x16xf32, #tpu.memory_space<vmem>>, vector<128x16xf32>
    %cst = arith.constant dense<0.000000e+00> : vector<64x16xf32>
    %2 = tpu.matmul %0, %1, %cst {dimension_numbers = #tpu.dot_dimension_numbers<[1], [0], [0], [1], [0, 0, 1, 1], [], []>} : vector<64x128xf32>, vector<128x16xf32>, vector<64x16xf32> -> vector<64x16xf32>
    %c0_3 = arith.constant 0 : index
    %c0_4 = arith.constant 0 : index
    %3 = vector.load %arg2[%c0_3, %c0_4] : memref<1x16xf32, #tpu.memory_space<vmem>>, vector<1x16xf32>
    %4 = vector.broadcast %3 : vector<1x16xf32> to vector<64x16xf32>
    %5 = arith.mulf %2, %4 : vector<64x16xf32>
    %c0_5 = arith.constant 0 : index
    %c0_6 = arith.constant 0 : index
    %6 = vector.load %arg3[%c0_5, %c0_6] : memref<1x16xf32, #tpu.memory_space<vmem>>, vector<1x16xf32>
    %7 = vector.broadcast %6 : vector<1x16xf32> to vector<64x16xf32>
    %8 = arith.addf %5, %7 : vector<64x16xf32>
    %c0_7 = arith.constant 0 : index
    %c0_8 = arith.constant 0 : index
    %9 = vector.load %arg4[%c0_7, %c0_8] : memref<64x16xf32, #tpu.memory_space<vmem>>, vector<64x16xf32>
    tpu.vector_store %arg4[%c0_7, %c0_8], %8 {strides = array<i32>} : memref<64x16xf32, #tpu.memory_space<vmem>>, vector<64x16xf32>,
    return
  }
}

module attributes {stable_mosaic.version = 11 : i64} {
  func.func @_fused_matmul_kernel(%arg0: memref<64x128xf32, #tpu.memory_space<vmem>>, %arg1: memref<128x16xf32, #tpu.memory_space<vmem>>, %arg2: memref<1x16xf32, #tpu.memory_space<vmem>>, %arg3: memref<1x16xf32, #tpu.memory_space<vmem>>, %arg4: memref<64x16xf32, #tpu.memory_space<vmem>>) attributes {dimension_semantics = [], scalar_prefetch = 0 : i64, scratch_operands = 0 : i64, tpu.core_type = #tpu.core_type<tc>} {
    %c0 = arith.constant 0 : index
    %c0_0 = arith.constant 0 : index
    %0 = vector.load %arg0[%c0, %c0_0] : memref<64x128xf32, #tpu.memory_space<vmem>>, vector<64x128xf32>
    %c0_1 = arith.constant 0 : index
    %c0_2 = arith.constant 0 : index
    %1 = vector.load %arg1[%c0_1, %c0_2] : memref<128x16xf32, #tpu.memory_space<vmem>>, vector<128x16xf32>
    %cst = arith.constant dense<0.000000e+00> : vector<64x16xf32>
    %2 = tpu.matmul %0, %1, %cst {dimension_numbers = #tpu.dot_dimension_numbers<[1], [0], [0], [1], [0, 0, 1, 1], [], []>} : vector<64x128xf32>, vector<128x16xf32>, vector<64x16xf32> -> vector<64x16xf32>
    %c0_3 = arith.constant 0 : index
    %c0_4 = arith.constant 0 : index
    %3 = vector.load %arg2[%c0_3, %c0_4] : memref<1x16xf32, #tpu.memory_space<vmem>>, vector<1x16xf32>
    %4 = vector.broadcast %3 : vector<1x16xf32> to vector<64x16xf32>
    %5 = arith.mulf %2, %4 : vector<64x16xf32>
    %c0_5 = arith.constant 0 : index
    %c0_6 = arith.constant 0 : index
    %6 = vector.load %arg3[%c0_5, %c0_6] : memref<1x16xf32, #tpu.memory_space<vmem>>, vector<1x16xf32>
    %7 = vector.broadcast %6 : vector<1x16xf32> to vector<64x16xf32>
    %8 = arith.addf %5, %7 : vector<64x16xf32>
    %cst_7 = arith.constant 0.000000e+00 : f32
    %9 = vector.broadcast %cst_7 : f32 to vector<64x16xf32>
    %10 = arith.maximumf %8, %9 : vector<64x16xf32>
    %c0_8 = arith.constant 0 : index
    %c0_9 = arith.constant 0 : index
    %11 = vector.load %arg4[%c0_8, %c0_9] : memref<64x16xf32, #tpu.memory_space<vmem>>, vector<64x16xf32>
    tpu.vector_store %arg4[%c0_8, %c0_9], %10 {strides = array<i32>} : memref<64x16xf32, #tpu.memory_space<vmem>>, vector<64x16xf32>,
    return
  }
}

module attributes {stable_mosaic.version = 11 : i64} {
  func.func @_fused_matmul_kernel(%arg0: memref<64x16xf32, #tpu.memory_space<vmem>>, %arg1: memref<16x16xf32, #tpu.memory_space<vmem>>, %arg2: memref<1x16xf32, #tpu.memory_space<vmem>>, %arg3: memref<1x16xf32, #tpu.memory_space<vmem>>, %arg4: memref<64x16xf32, #tpu.memory_space<vmem>>) attributes {dimension_semantics = [], scalar_prefetch = 0 : i64, scratch_operands = 0 : i64, tpu.core_type = #tpu.core_type<tc>} {
    %c0 = arith.constant 0 : index
    %c0_0 = arith.constant 0 : index
    %0 = vector.load %arg0[%c0, %c0_0] : memref<64x16xf32, #tpu.memory_space<vmem>>, vector<64x16xf32>
    %c0_1 = arith.constant 0 : index
    %c0_2 = arith.constant 0 : index
    %1 = vector.load %arg1[%c0_1, %c0_2] : memref<16x16xf32, #tpu.memory_space<vmem>>, vector<16x16xf32>
    %cst = arith.constant dense<0.000000e+00> : vector<64x16xf32>
    %2 = tpu.matmul %0, %1, %cst {dimension_numbers = #tpu.dot_dimension_numbers<[1], [0], [0], [1], [0, 0, 1, 1], [], []>} : vector<64x16xf32>, vector<16x16xf32>, vector<64x16xf32> -> vector<64x16xf32>
    %c0_3 = arith.constant 0 : index
    %c0_4 = arith.constant 0 : index
    %3 = vector.load %arg2[%c0_3, %c0_4] : memref<1x16xf32, #tpu.memory_space<vmem>>, vector<1x16xf32>
    %4 = vector.broadcast %3 : vector<1x16xf32> to vector<64x16xf32>
    %5 = arith.mulf %2, %4 : vector<64x16xf32>
    %c0_5 = arith.constant 0 : index
    %c0_6 = arith.constant 0 : index
    %6 = vector.load %arg3[%c0_5, %c0_6] : memref<1x16xf32, #tpu.memory_space<vmem>>, vector<1x16xf32>
    %7 = vector.broadcast %6 : vector<1x16xf32> to vector<64x16xf32>
    %8 = arith.addf %5, %7 : vector<64x16xf32>
    %c0_7 = arith.constant 0 : index
    %c0_8 = arith.constant 0 : index
    %9 = vector.load %arg4[%c0_7, %c0_8] : memref<64x16xf32, #tpu.memory_space<vmem>>, vector<64x16xf32>
    tpu.vector_store %arg4[%c0_7, %c0_8], %8 {strides = array<i32>} : memref<64x16xf32, #tpu.memory_space<vmem>>, vector<64x16xf32>,
    return
  }
}

module attributes {stable_mosaic.version = 11 : i64} {
  func.func @_fused_matmul_kernel(%arg0: memref<64x144xf32, #tpu.memory_space<vmem>>, %arg1: memref<144x16xf32, #tpu.memory_space<vmem>>, %arg2: memref<1x16xf32, #tpu.memory_space<vmem>>, %arg3: memref<1x16xf32, #tpu.memory_space<vmem>>, %arg4: memref<64x16xf32, #tpu.memory_space<vmem>>, %arg5: memref<64x16xf32, #tpu.memory_space<vmem>>) attributes {dimension_semantics = [], scalar_prefetch = 0 : i64, scratch_operands = 0 : i64, tpu.core_type = #tpu.core_type<tc>} {
    %c0 = arith.constant 0 : index
    %c0_0 = arith.constant 0 : index
    %0 = vector.load %arg0[%c0, %c0_0] : memref<64x144xf32, #tpu.memory_space<vmem>>, vector<64x144xf32>
    %c0_1 = arith.constant 0 : index
    %c0_2 = arith.constant 0 : index
    %1 = vector.load %arg1[%c0_1, %c0_2] : memref<144x16xf32, #tpu.memory_space<vmem>>, vector<144x16xf32>
    %cst = arith.constant dense<0.000000e+00> : vector<64x16xf32>
    %2 = tpu.matmul %0, %1, %cst {dimension_numbers = #tpu.dot_dimension_numbers<[1], [0], [0], [1], [0, 0, 1, 1], [], []>} : vector<64x144xf32>, vector<144x16xf32>, vector<64x16xf32> -> vector<64x16xf32>
    %c0_3 = arith.constant 0 : index
    %c0_4 = arith.constant 0 : index
    %3 = vector.load %arg2[%c0_3, %c0_4] : memref<1x16xf32, #tpu.memory_space<vmem>>, vector<1x16xf32>
    %4 = vector.broadcast %3 : vector<1x16xf32> to vector<64x16xf32>
    %5 = arith.mulf %2, %4 : vector<64x16xf32>
    %c0_5 = arith.constant 0 : index
    %c0_6 = arith.constant 0 : index
    %6 = vector.load %arg3[%c0_5, %c0_6] : memref<1x16xf32, #tpu.memory_space<vmem>>, vector<1x16xf32>
    %7 = vector.broadcast %6 : vector<1x16xf32> to vector<64x16xf32>
    %8 = arith.addf %5, %7 : vector<64x16xf32>
    %c0_7 = arith.constant 0 : index
    %c0_8 = arith.constant 0 : index
    %9 = vector.load %arg4[%c0_7, %c0_8] : memref<64x16xf32, #tpu.memory_space<vmem>>, vector<64x16xf32>
    %10 = arith.addf %8, %9 : vector<64x16xf32>
    %c0_9 = arith.constant 0 : index
    %c0_10 = arith.constant 0 : index
    %11 = vector.load %arg5[%c0_9, %c0_10] : memref<64x16xf32, #tpu.memory_space<vmem>>, vector<64x16xf32>
    tpu.vector_store %arg5[%c0_9, %c0_10], %10 {strides = array<i32>} : memref<64x16xf32, #tpu.memory_space<vmem>>, vector<64x16xf32>,
    return
  }
}

module attributes {stable_mosaic.version = 11 : i64} {
  func.func @_affine_act_kernel(%arg0: memref<32x32xf32, #tpu.memory_space<vmem>>, %arg1: memref<1x32xf32, #tpu.memory_space<vmem>>, %arg2: memref<1x32xf32, #tpu.memory_space<vmem>>, %arg3: memref<32x32xf32, #tpu.memory_space<vmem>>) attributes {dimension_semantics = [], scalar_prefetch = 0 : i64, scratch_operands = 0 : i64, tpu.core_type = #tpu.core_type<tc>} {
    %c0 = arith.constant 0 : index
    %c0_0 = arith.constant 0 : index
    %0 = vector.load %arg0[%c0, %c0_0] : memref<32x32xf32, #tpu.memory_space<vmem>>, vector<32x32xf32>
    %c0_1 = arith.constant 0 : index
    %c0_2 = arith.constant 0 : index
    %1 = vector.load %arg1[%c0_1, %c0_2] : memref<1x32xf32, #tpu.memory_space<vmem>>, vector<1x32xf32>
    %2 = vector.broadcast %1 : vector<1x32xf32> to vector<32x32xf32>
    %3 = arith.mulf %0, %2 : vector<32x32xf32>
    %c0_3 = arith.constant 0 : index
    %c0_4 = arith.constant 0 : index
    %4 = vector.load %arg2[%c0_3, %c0_4] : memref<1x32xf32, #tpu.memory_space<vmem>>, vector<1x32xf32>
    %5 = vector.broadcast %4 : vector<1x32xf32> to vector<32x32xf32>
    %6 = arith.addf %3, %5 : vector<32x32xf32>
    %cst = arith.constant 0.000000e+00 : f32
    %7 = vector.broadcast %cst : f32 to vector<32x32xf32>
    %8 = arith.maximumf %6, %7 : vector<32x32xf32>
    %c0_5 = arith.constant 0 : index
    %c0_6 = arith.constant 0 : index
    %9 = vector.load %arg3[%c0_5, %c0_6] : memref<32x32xf32, #tpu.memory_space<vmem>>, vector<32x32xf32>
    tpu.vector_store %arg3[%c0_5, %c0_6], %8 {strides = array<i32>} : memref<32x32xf32, #tpu.memory_space<vmem>>, vector<32x32xf32>,
    return
  }
}

module attributes {stable_mosaic.version = 11 : i64} {
  func.func @_fused_matmul_kernel(%arg0: memref<64x48xf32, #tpu.memory_space<vmem>>, %arg1: memref<1x48xf32, #tpu.memory_space<vmem>>, %arg2: memref<1x48xf32, #tpu.memory_space<vmem>>, %arg3: memref<48x16xf32, #tpu.memory_space<vmem>>, %arg4: memref<1x16xf32, #tpu.memory_space<vmem>>, %arg5: memref<1x16xf32, #tpu.memory_space<vmem>>, %arg6: memref<64x16xf32, #tpu.memory_space<vmem>>, %arg7: memref<64x16xf32, #tpu.memory_space<vmem>>) attributes {dimension_semantics = [], scalar_prefetch = 0 : i64, scratch_operands = 0 : i64, tpu.core_type = #tpu.core_type<tc>} {
    %c0 = arith.constant 0 : index
    %c0_0 = arith.constant 0 : index
    %0 = vector.load %arg0[%c0, %c0_0] : memref<64x48xf32, #tpu.memory_space<vmem>>, vector<64x48xf32>
    %c0_1 = arith.constant 0 : index
    %c0_2 = arith.constant 0 : index
    %1 = vector.load %arg1[%c0_1, %c0_2] : memref<1x48xf32, #tpu.memory_space<vmem>>, vector<1x48xf32>
    %2 = vector.broadcast %1 : vector<1x48xf32> to vector<64x48xf32>
    %3 = arith.mulf %0, %2 : vector<64x48xf32>
    %c0_3 = arith.constant 0 : index
    %c0_4 = arith.constant 0 : index
    %4 = vector.load %arg2[%c0_3, %c0_4] : memref<1x48xf32, #tpu.memory_space<vmem>>, vector<1x48xf32>
    %5 = vector.broadcast %4 : vector<1x48xf32> to vector<64x48xf32>
    %6 = arith.addf %3, %5 : vector<64x48xf32>
    %cst = arith.constant 0.000000e+00 : f32
    %7 = vector.broadcast %cst : f32 to vector<64x48xf32>
    %8 = arith.maximumf %6, %7 : vector<64x48xf32>
    %c0_5 = arith.constant 0 : index
    %c0_6 = arith.constant 0 : index
    %9 = vector.load %arg3[%c0_5, %c0_6] : memref<48x16xf32, #tpu.memory_space<vmem>>, vector<48x16xf32>
    %cst_7 = arith.constant dense<0.000000e+00> : vector<64x16xf32>
    %10 = tpu.matmul %8, %9, %cst_7 {dimension_numbers = #tpu.dot_dimension_numbers<[1], [0], [0], [1], [0, 0, 1, 1], [], []>} : vector<64x48xf32>, vector<48x16xf32>, vector<64x16xf32> -> vector<64x16xf32>
    %c0_8 = arith.constant 0 : index
    %c0_9 = arith.constant 0 : index
    %11 = vector.load %arg4[%c0_8, %c0_9] : memref<1x16xf32, #tpu.memory_space<vmem>>, vector<1x16xf32>
    %12 = vector.broadcast %11 : vector<1x16xf32> to vector<64x16xf32>
    %13 = arith.mulf %10, %12 : vector<64x16xf32>
    %c0_10 = arith.constant 0 : index
    %c0_11 = arith.constant 0 : index
    %14 = vector.load %arg5[%c0_10, %c0_11] : memref<1x16xf32, #tpu.memory_space<vmem>>, vector<1x16xf32>
    %15 = vector.broadcast %14 : vector<1x16xf32> to vector<64x16xf32>
    %16 = arith.addf %13, %15 : vector<64x16xf32>
    %c0_12 = arith.constant 0 : index
    %c0_13 = arith.constant 0 : index
    %17 = vector.load %arg6[%c0_12, %c0_13] : memref<64x16xf32, #tpu.memory_space<vmem>>, vector<64x16xf32>
    %18 = arith.addf %16, %17 : vector<64x16xf32>
    %c0_14 = arith.constant 0 : index
    %c0_15 = arith.constant 0 : index
    %19 = vector.load %arg7[%c0_14, %c0_15] : memref<64x16xf32, #tpu.memory_space<vmem>>, vector<64x16xf32>
    tpu.vector_store %arg7[%c0_14, %c0_15], %18 {strides = array<i32>} : memref<64x16xf32, #tpu.memory_space<vmem>>, vector<64x16xf32>,
    return
  }
}

module attributes {stable_mosaic.version = 11 : i64} {
  func.func @_fused_matmul_kernel(%arg0: memref<32x128xf32, #tpu.memory_space<vmem>>, %arg1: memref<128x16xf32, #tpu.memory_space<vmem>>, %arg2: memref<1x16xf32, #tpu.memory_space<vmem>>, %arg3: memref<1x16xf32, #tpu.memory_space<vmem>>, %arg4: memref<32x16xf32, #tpu.memory_space<vmem>>) attributes {dimension_semantics = [], scalar_prefetch = 0 : i64, scratch_operands = 0 : i64, tpu.core_type = #tpu.core_type<tc>} {
    %c0 = arith.constant 0 : index
    %c0_0 = arith.constant 0 : index
    %0 = vector.load %arg0[%c0, %c0_0] : memref<32x128xf32, #tpu.memory_space<vmem>>, vector<32x128xf32>
    %c0_1 = arith.constant 0 : index
    %c0_2 = arith.constant 0 : index
    %1 = vector.load %arg1[%c0_1, %c0_2] : memref<128x16xf32, #tpu.memory_space<vmem>>, vector<128x16xf32>
    %cst = arith.constant dense<0.000000e+00> : vector<32x16xf32>
    %2 = tpu.matmul %0, %1, %cst {dimension_numbers = #tpu.dot_dimension_numbers<[1], [0], [0], [1], [0, 0, 1, 1], [], []>} : vector<32x128xf32>, vector<128x16xf32>, vector<32x16xf32> -> vector<32x16xf32>
    %c0_3 = arith.constant 0 : index
    %c0_4 = arith.constant 0 : index
    %3 = vector.load %arg2[%c0_3, %c0_4] : memref<1x16xf32, #tpu.memory_space<vmem>>, vector<1x16xf32>
    %4 = vector.broadcast %3 : vector<1x16xf32> to vector<32x16xf32>
    %5 = arith.mulf %2, %4 : vector<32x16xf32>
    %c0_5 = arith.constant 0 : index
    %c0_6 = arith.constant 0 : index
    %6 = vector.load %arg3[%c0_5, %c0_6] : memref<1x16xf32, #tpu.memory_space<vmem>>, vector<1x16xf32>
    %7 = vector.broadcast %6 : vector<1x16xf32> to vector<32x16xf32>
    %8 = arith.addf %5, %7 : vector<32x16xf32>
    %c0_7 = arith.constant 0 : index
    %c0_8 = arith.constant 0 : index
    %9 = vector.load %arg4[%c0_7, %c0_8] : memref<32x16xf32, #tpu.memory_space<vmem>>, vector<32x16xf32>
    tpu.vector_store %arg4[%c0_7, %c0_8], %8 {strides = array<i32>} : memref<32x16xf32, #tpu.memory_space<vmem>>, vector<32x16xf32>,
    return
  }
}

module attributes {stable_mosaic.version = 11 : i64} {
  func.func @_fused_matmul_kernel(%arg0: memref<32x128xf32, #tpu.memory_space<vmem>>, %arg1: memref<128x16xf32, #tpu.memory_space<vmem>>, %arg2: memref<1x16xf32, #tpu.memory_space<vmem>>, %arg3: memref<1x16xf32, #tpu.memory_space<vmem>>, %arg4: memref<32x16xf32, #tpu.memory_space<vmem>>) attributes {dimension_semantics = [], scalar_prefetch = 0 : i64, scratch_operands = 0 : i64, tpu.core_type = #tpu.core_type<tc>} {
    %c0 = arith.constant 0 : index
    %c0_0 = arith.constant 0 : index
    %0 = vector.load %arg0[%c0, %c0_0] : memref<32x128xf32, #tpu.memory_space<vmem>>, vector<32x128xf32>
    %c0_1 = arith.constant 0 : index
    %c0_2 = arith.constant 0 : index
    %1 = vector.load %arg1[%c0_1, %c0_2] : memref<128x16xf32, #tpu.memory_space<vmem>>, vector<128x16xf32>
    %cst = arith.constant dense<0.000000e+00> : vector<32x16xf32>
    %2 = tpu.matmul %0, %1, %cst {dimension_numbers = #tpu.dot_dimension_numbers<[1], [0], [0], [1], [0, 0, 1, 1], [], []>} : vector<32x128xf32>, vector<128x16xf32>, vector<32x16xf32> -> vector<32x16xf32>
    %c0_3 = arith.constant 0 : index
    %c0_4 = arith.constant 0 : index
    %3 = vector.load %arg2[%c0_3, %c0_4] : memref<1x16xf32, #tpu.memory_space<vmem>>, vector<1x16xf32>
    %4 = vector.broadcast %3 : vector<1x16xf32> to vector<32x16xf32>
    %5 = arith.mulf %2, %4 : vector<32x16xf32>
    %c0_5 = arith.constant 0 : index
    %c0_6 = arith.constant 0 : index
    %6 = vector.load %arg3[%c0_5, %c0_6] : memref<1x16xf32, #tpu.memory_space<vmem>>, vector<1x16xf32>
    %7 = vector.broadcast %6 : vector<1x16xf32> to vector<32x16xf32>
    %8 = arith.addf %5, %7 : vector<32x16xf32>
    %cst_7 = arith.constant 0.000000e+00 : f32
    %9 = vector.broadcast %cst_7 : f32 to vector<32x16xf32>
    %10 = arith.maximumf %8, %9 : vector<32x16xf32>
    %c0_8 = arith.constant 0 : index
    %c0_9 = arith.constant 0 : index
    %11 = vector.load %arg4[%c0_8, %c0_9] : memref<32x16xf32, #tpu.memory_space<vmem>>, vector<32x16xf32>
    tpu.vector_store %arg4[%c0_8, %c0_9], %10 {strides = array<i32>} : memref<32x16xf32, #tpu.memory_space<vmem>>, vector<32x16xf32>,
    return
  }
}

module attributes {stable_mosaic.version = 11 : i64} {
  func.func @_fused_matmul_kernel(%arg0: memref<32x16xf32, #tpu.memory_space<vmem>>, %arg1: memref<16x16xf32, #tpu.memory_space<vmem>>, %arg2: memref<1x16xf32, #tpu.memory_space<vmem>>, %arg3: memref<1x16xf32, #tpu.memory_space<vmem>>, %arg4: memref<32x16xf32, #tpu.memory_space<vmem>>) attributes {dimension_semantics = [], scalar_prefetch = 0 : i64, scratch_operands = 0 : i64, tpu.core_type = #tpu.core_type<tc>} {
    %c0 = arith.constant 0 : index
    %c0_0 = arith.constant 0 : index
    %0 = vector.load %arg0[%c0, %c0_0] : memref<32x16xf32, #tpu.memory_space<vmem>>, vector<32x16xf32>
    %c0_1 = arith.constant 0 : index
    %c0_2 = arith.constant 0 : index
    %1 = vector.load %arg1[%c0_1, %c0_2] : memref<16x16xf32, #tpu.memory_space<vmem>>, vector<16x16xf32>
    %cst = arith.constant dense<0.000000e+00> : vector<32x16xf32>
    %2 = tpu.matmul %0, %1, %cst {dimension_numbers = #tpu.dot_dimension_numbers<[1], [0], [0], [1], [0, 0, 1, 1], [], []>} : vector<32x16xf32>, vector<16x16xf32>, vector<32x16xf32> -> vector<32x16xf32>
    %c0_3 = arith.constant 0 : index
    %c0_4 = arith.constant 0 : index
    %3 = vector.load %arg2[%c0_3, %c0_4] : memref<1x16xf32, #tpu.memory_space<vmem>>, vector<1x16xf32>
    %4 = vector.broadcast %3 : vector<1x16xf32> to vector<32x16xf32>
    %5 = arith.mulf %2, %4 : vector<32x16xf32>
    %c0_5 = arith.constant 0 : index
    %c0_6 = arith.constant 0 : index
    %6 = vector.load %arg3[%c0_5, %c0_6] : memref<1x16xf32, #tpu.memory_space<vmem>>, vector<1x16xf32>
    %7 = vector.broadcast %6 : vector<1x16xf32> to vector<32x16xf32>
    %8 = arith.addf %5, %7 : vector<32x16xf32>
    %c0_7 = arith.constant 0 : index
    %c0_8 = arith.constant 0 : index
    %9 = vector.load %arg4[%c0_7, %c0_8] : memref<32x16xf32, #tpu.memory_space<vmem>>, vector<32x16xf32>
    tpu.vector_store %arg4[%c0_7, %c0_8], %8 {strides = array<i32>} : memref<32x16xf32, #tpu.memory_space<vmem>>, vector<32x16xf32>,
    return
  }
}

module attributes {stable_mosaic.version = 11 : i64} {
  func.func @_fused_matmul_kernel(%arg0: memref<32x144xf32, #tpu.memory_space<vmem>>, %arg1: memref<144x16xf32, #tpu.memory_space<vmem>>, %arg2: memref<1x16xf32, #tpu.memory_space<vmem>>, %arg3: memref<1x16xf32, #tpu.memory_space<vmem>>, %arg4: memref<32x16xf32, #tpu.memory_space<vmem>>, %arg5: memref<32x16xf32, #tpu.memory_space<vmem>>) attributes {dimension_semantics = [], scalar_prefetch = 0 : i64, scratch_operands = 0 : i64, tpu.core_type = #tpu.core_type<tc>} {
    %c0 = arith.constant 0 : index
    %c0_0 = arith.constant 0 : index
    %0 = vector.load %arg0[%c0, %c0_0] : memref<32x144xf32, #tpu.memory_space<vmem>>, vector<32x144xf32>
    %c0_1 = arith.constant 0 : index
    %c0_2 = arith.constant 0 : index
    %1 = vector.load %arg1[%c0_1, %c0_2] : memref<144x16xf32, #tpu.memory_space<vmem>>, vector<144x16xf32>
    %cst = arith.constant dense<0.000000e+00> : vector<32x16xf32>
    %2 = tpu.matmul %0, %1, %cst {dimension_numbers = #tpu.dot_dimension_numbers<[1], [0], [0], [1], [0, 0, 1, 1], [], []>} : vector<32x144xf32>, vector<144x16xf32>, vector<32x16xf32> -> vector<32x16xf32>
    %c0_3 = arith.constant 0 : index
    %c0_4 = arith.constant 0 : index
    %3 = vector.load %arg2[%c0_3, %c0_4] : memref<1x16xf32, #tpu.memory_space<vmem>>, vector<1x16xf32>
    %4 = vector.broadcast %3 : vector<1x16xf32> to vector<32x16xf32>
    %5 = arith.mulf %2, %4 : vector<32x16xf32>
    %c0_5 = arith.constant 0 : index
    %c0_6 = arith.constant 0 : index
    %6 = vector.load %arg3[%c0_5, %c0_6] : memref<1x16xf32, #tpu.memory_space<vmem>>, vector<1x16xf32>
    %7 = vector.broadcast %6 : vector<1x16xf32> to vector<32x16xf32>
    %8 = arith.addf %5, %7 : vector<32x16xf32>
    %c0_7 = arith.constant 0 : index
    %c0_8 = arith.constant 0 : index
    %9 = vector.load %arg4[%c0_7, %c0_8] : memref<32x16xf32, #tpu.memory_space<vmem>>, vector<32x16xf32>
    %10 = arith.addf %8, %9 : vector<32x16xf32>
    %c0_9 = arith.constant 0 : index
    %c0_10 = arith.constant 0 : index
    %11 = vector.load %arg5[%c0_9, %c0_10] : memref<32x16xf32, #tpu.memory_space<vmem>>, vector<32x16xf32>
    tpu.vector_store %arg5[%c0_9, %c0_10], %10 {strides = array<i32>} : memref<32x16xf32, #tpu.memory_space<vmem>>, vector<32x16xf32>,
    return
  }
}

module attributes {stable_mosaic.version = 11 : i64} {
  func.func @_fused_matmul_kernel(%arg0: memref<32x48xf32, #tpu.memory_space<vmem>>, %arg1: memref<1x48xf32, #tpu.memory_space<vmem>>, %arg2: memref<1x48xf32, #tpu.memory_space<vmem>>, %arg3: memref<48x16xf32, #tpu.memory_space<vmem>>, %arg4: memref<1x16xf32, #tpu.memory_space<vmem>>, %arg5: memref<1x16xf32, #tpu.memory_space<vmem>>, %arg6: memref<32x16xf32, #tpu.memory_space<vmem>>, %arg7: memref<32x16xf32, #tpu.memory_space<vmem>>) attributes {dimension_semantics = [], scalar_prefetch = 0 : i64, scratch_operands = 0 : i64, tpu.core_type = #tpu.core_type<tc>} {
    %c0 = arith.constant 0 : index
    %c0_0 = arith.constant 0 : index
    %0 = vector.load %arg0[%c0, %c0_0] : memref<32x48xf32, #tpu.memory_space<vmem>>, vector<32x48xf32>
    %c0_1 = arith.constant 0 : index
    %c0_2 = arith.constant 0 : index
    %1 = vector.load %arg1[%c0_1, %c0_2] : memref<1x48xf32, #tpu.memory_space<vmem>>, vector<1x48xf32>
    %2 = vector.broadcast %1 : vector<1x48xf32> to vector<32x48xf32>
    %3 = arith.mulf %0, %2 : vector<32x48xf32>
    %c0_3 = arith.constant 0 : index
    %c0_4 = arith.constant 0 : index
    %4 = vector.load %arg2[%c0_3, %c0_4] : memref<1x48xf32, #tpu.memory_space<vmem>>, vector<1x48xf32>
    %5 = vector.broadcast %4 : vector<1x48xf32> to vector<32x48xf32>
    %6 = arith.addf %3, %5 : vector<32x48xf32>
    %cst = arith.constant 0.000000e+00 : f32
    %7 = vector.broadcast %cst : f32 to vector<32x48xf32>
    %8 = arith.maximumf %6, %7 : vector<32x48xf32>
    %c0_5 = arith.constant 0 : index
    %c0_6 = arith.constant 0 : index
    %9 = vector.load %arg3[%c0_5, %c0_6] : memref<48x16xf32, #tpu.memory_space<vmem>>, vector<48x16xf32>
    %cst_7 = arith.constant dense<0.000000e+00> : vector<32x16xf32>
    %10 = tpu.matmul %8, %9, %cst_7 {dimension_numbers = #tpu.dot_dimension_numbers<[1], [0], [0], [1], [0, 0, 1, 1], [], []>} : vector<32x48xf32>, vector<48x16xf32>, vector<32x16xf32> -> vector<32x16xf32>
    %c0_8 = arith.constant 0 : index
    %c0_9 = arith.constant 0 : index
    %11 = vector.load %arg4[%c0_8, %c0_9] : memref<1x16xf32, #tpu.memory_space<vmem>>, vector<1x16xf32>
    %12 = vector.broadcast %11 : vector<1x16xf32> to vector<32x16xf32>
    %13 = arith.mulf %10, %12 : vector<32x16xf32>
    %c0_10 = arith.constant 0 : index
    %c0_11 = arith.constant 0 : index
    %14 = vector.load %arg5[%c0_10, %c0_11] : memref<1x16xf32, #tpu.memory_space<vmem>>, vector<1x16xf32>
    %15 = vector.broadcast %14 : vector<1x16xf32> to vector<32x16xf32>
    %16 = arith.addf %13, %15 : vector<32x16xf32>
    %c0_12 = arith.constant 0 : index
    %c0_13 = arith.constant 0 : index
    %17 = vector.load %arg6[%c0_12, %c0_13] : memref<32x16xf32, #tpu.memory_space<vmem>>, vector<32x16xf32>
    %18 = arith.addf %16, %17 : vector<32x16xf32>
    %c0_14 = arith.constant 0 : index
    %c0_15 = arith.constant 0 : index
    %19 = vector.load %arg7[%c0_14, %c0_15] : memref<32x16xf32, #tpu.memory_space<vmem>>, vector<32x16xf32>
    tpu.vector_store %arg7[%c0_14, %c0_15], %18 {strides = array<i32>} : memref<32x16xf32, #tpu.memory_space<vmem>>, vector<32x16xf32>,
    return
  }
}

module attributes {stable_mosaic.version = 11 : i64} {
  func.func @_affine_act_kernel(%arg0: memref<16x32xf32, #tpu.memory_space<vmem>>, %arg1: memref<1x32xf32, #tpu.memory_space<vmem>>, %arg2: memref<1x32xf32, #tpu.memory_space<vmem>>, %arg3: memref<16x32xf32, #tpu.memory_space<vmem>>) attributes {dimension_semantics = [], scalar_prefetch = 0 : i64, scratch_operands = 0 : i64, tpu.core_type = #tpu.core_type<tc>} {
    %c0 = arith.constant 0 : index
    %c0_0 = arith.constant 0 : index
    %0 = vector.load %arg0[%c0, %c0_0] : memref<16x32xf32, #tpu.memory_space<vmem>>, vector<16x32xf32>
    %c0_1 = arith.constant 0 : index
    %c0_2 = arith.constant 0 : index
    %1 = vector.load %arg1[%c0_1, %c0_2] : memref<1x32xf32, #tpu.memory_space<vmem>>, vector<1x32xf32>
    %2 = vector.broadcast %1 : vector<1x32xf32> to vector<16x32xf32>
    %3 = arith.mulf %0, %2 : vector<16x32xf32>
    %c0_3 = arith.constant 0 : index
    %c0_4 = arith.constant 0 : index
    %4 = vector.load %arg2[%c0_3, %c0_4] : memref<1x32xf32, #tpu.memory_space<vmem>>, vector<1x32xf32>
    %5 = vector.broadcast %4 : vector<1x32xf32> to vector<16x32xf32>
    %6 = arith.addf %3, %5 : vector<16x32xf32>
    %cst = arith.constant 0.000000e+00 : f32
    %7 = vector.broadcast %cst : f32 to vector<16x32xf32>
    %8 = arith.maximumf %6, %7 : vector<16x32xf32>
    %c0_5 = arith.constant 0 : index
    %c0_6 = arith.constant 0 : index
    %9 = vector.load %arg3[%c0_5, %c0_6] : memref<16x32xf32, #tpu.memory_space<vmem>>, vector<16x32xf32>
    tpu.vector_store %arg3[%c0_5, %c0_6], %8 {strides = array<i32>} : memref<16x32xf32, #tpu.memory_space<vmem>>, vector<16x32xf32>,
    return
  }
}

module attributes {stable_mosaic.version = 11 : i64} {
  func.func @_fused_matmul_kernel(%arg0: memref<16x128xf32, #tpu.memory_space<vmem>>, %arg1: memref<128x16xf32, #tpu.memory_space<vmem>>, %arg2: memref<1x16xf32, #tpu.memory_space<vmem>>, %arg3: memref<1x16xf32, #tpu.memory_space<vmem>>, %arg4: memref<16x16xf32, #tpu.memory_space<vmem>>) attributes {dimension_semantics = [], scalar_prefetch = 0 : i64, scratch_operands = 0 : i64, tpu.core_type = #tpu.core_type<tc>} {
    %c0 = arith.constant 0 : index
    %c0_0 = arith.constant 0 : index
    %0 = vector.load %arg0[%c0, %c0_0] : memref<16x128xf32, #tpu.memory_space<vmem>>, vector<16x128xf32>
    %c0_1 = arith.constant 0 : index
    %c0_2 = arith.constant 0 : index
    %1 = vector.load %arg1[%c0_1, %c0_2] : memref<128x16xf32, #tpu.memory_space<vmem>>, vector<128x16xf32>
    %cst = arith.constant dense<0.000000e+00> : vector<16x16xf32>
    %2 = tpu.matmul %0, %1, %cst {dimension_numbers = #tpu.dot_dimension_numbers<[1], [0], [0], [1], [0, 0, 1, 1], [], []>} : vector<16x128xf32>, vector<128x16xf32>, vector<16x16xf32> -> vector<16x16xf32>
    %c0_3 = arith.constant 0 : index
    %c0_4 = arith.constant 0 : index
    %3 = vector.load %arg2[%c0_3, %c0_4] : memref<1x16xf32, #tpu.memory_space<vmem>>, vector<1x16xf32>
    %4 = vector.broadcast %3 : vector<1x16xf32> to vector<16x16xf32>
    %5 = arith.mulf %2, %4 : vector<16x16xf32>
    %c0_5 = arith.constant 0 : index
    %c0_6 = arith.constant 0 : index
    %6 = vector.load %arg3[%c0_5, %c0_6] : memref<1x16xf32, #tpu.memory_space<vmem>>, vector<1x16xf32>
    %7 = vector.broadcast %6 : vector<1x16xf32> to vector<16x16xf32>
    %8 = arith.addf %5, %7 : vector<16x16xf32>
    %c0_7 = arith.constant 0 : index
    %c0_8 = arith.constant 0 : index
    %9 = vector.load %arg4[%c0_7, %c0_8] : memref<16x16xf32, #tpu.memory_space<vmem>>, vector<16x16xf32>
    tpu.vector_store %arg4[%c0_7, %c0_8], %8 {strides = array<i32>} : memref<16x16xf32, #tpu.memory_space<vmem>>, vector<16x16xf32>,
    return
  }
}

module attributes {stable_mosaic.version = 11 : i64} {
  func.func @_fused_matmul_kernel(%arg0: memref<16x128xf32, #tpu.memory_space<vmem>>, %arg1: memref<128x16xf32, #tpu.memory_space<vmem>>, %arg2: memref<1x16xf32, #tpu.memory_space<vmem>>, %arg3: memref<1x16xf32, #tpu.memory_space<vmem>>, %arg4: memref<16x16xf32, #tpu.memory_space<vmem>>) attributes {dimension_semantics = [], scalar_prefetch = 0 : i64, scratch_operands = 0 : i64, tpu.core_type = #tpu.core_type<tc>} {
    %c0 = arith.constant 0 : index
    %c0_0 = arith.constant 0 : index
    %0 = vector.load %arg0[%c0, %c0_0] : memref<16x128xf32, #tpu.memory_space<vmem>>, vector<16x128xf32>
    %c0_1 = arith.constant 0 : index
    %c0_2 = arith.constant 0 : index
    %1 = vector.load %arg1[%c0_1, %c0_2] : memref<128x16xf32, #tpu.memory_space<vmem>>, vector<128x16xf32>
    %cst = arith.constant dense<0.000000e+00> : vector<16x16xf32>
    %2 = tpu.matmul %0, %1, %cst {dimension_numbers = #tpu.dot_dimension_numbers<[1], [0], [0], [1], [0, 0, 1, 1], [], []>} : vector<16x128xf32>, vector<128x16xf32>, vector<16x16xf32> -> vector<16x16xf32>
    %c0_3 = arith.constant 0 : index
    %c0_4 = arith.constant 0 : index
    %3 = vector.load %arg2[%c0_3, %c0_4] : memref<1x16xf32, #tpu.memory_space<vmem>>, vector<1x16xf32>
    %4 = vector.broadcast %3 : vector<1x16xf32> to vector<16x16xf32>
    %5 = arith.mulf %2, %4 : vector<16x16xf32>
    %c0_5 = arith.constant 0 : index
    %c0_6 = arith.constant 0 : index
    %6 = vector.load %arg3[%c0_5, %c0_6] : memref<1x16xf32, #tpu.memory_space<vmem>>, vector<1x16xf32>
    %7 = vector.broadcast %6 : vector<1x16xf32> to vector<16x16xf32>
    %8 = arith.addf %5, %7 : vector<16x16xf32>
    %cst_7 = arith.constant 0.000000e+00 : f32
    %9 = vector.broadcast %cst_7 : f32 to vector<16x16xf32>
    %10 = arith.maximumf %8, %9 : vector<16x16xf32>
    %c0_8 = arith.constant 0 : index
    %c0_9 = arith.constant 0 : index
    %11 = vector.load %arg4[%c0_8, %c0_9] : memref<16x16xf32, #tpu.memory_space<vmem>>, vector<16x16xf32>
    tpu.vector_store %arg4[%c0_8, %c0_9], %10 {strides = array<i32>} : memref<16x16xf32, #tpu.memory_space<vmem>>, vector<16x16xf32>,
    return
  }
}

module attributes {stable_mosaic.version = 11 : i64} {
  func.func @_fused_matmul_kernel(%arg0: memref<16x16xf32, #tpu.memory_space<vmem>>, %arg1: memref<16x16xf32, #tpu.memory_space<vmem>>, %arg2: memref<1x16xf32, #tpu.memory_space<vmem>>, %arg3: memref<1x16xf32, #tpu.memory_space<vmem>>, %arg4: memref<16x16xf32, #tpu.memory_space<vmem>>) attributes {dimension_semantics = [], scalar_prefetch = 0 : i64, scratch_operands = 0 : i64, tpu.core_type = #tpu.core_type<tc>} {
    %c0 = arith.constant 0 : index
    %c0_0 = arith.constant 0 : index
    %0 = vector.load %arg0[%c0, %c0_0] : memref<16x16xf32, #tpu.memory_space<vmem>>, vector<16x16xf32>
    %c0_1 = arith.constant 0 : index
    %c0_2 = arith.constant 0 : index
    %1 = vector.load %arg1[%c0_1, %c0_2] : memref<16x16xf32, #tpu.memory_space<vmem>>, vector<16x16xf32>
    %cst = arith.constant dense<0.000000e+00> : vector<16x16xf32>
    %2 = tpu.matmul %0, %1, %cst {dimension_numbers = #tpu.dot_dimension_numbers<[1], [0], [0], [1], [0, 0, 1, 1], [], []>} : vector<16x16xf32>, vector<16x16xf32>, vector<16x16xf32> -> vector<16x16xf32>
    %c0_3 = arith.constant 0 : index
    %c0_4 = arith.constant 0 : index
    %3 = vector.load %arg2[%c0_3, %c0_4] : memref<1x16xf32, #tpu.memory_space<vmem>>, vector<1x16xf32>
    %4 = vector.broadcast %3 : vector<1x16xf32> to vector<16x16xf32>
    %5 = arith.mulf %2, %4 : vector<16x16xf32>
    %c0_5 = arith.constant 0 : index
    %c0_6 = arith.constant 0 : index
    %6 = vector.load %arg3[%c0_5, %c0_6] : memref<1x16xf32, #tpu.memory_space<vmem>>, vector<1x16xf32>
    %7 = vector.broadcast %6 : vector<1x16xf32> to vector<16x16xf32>
    %8 = arith.addf %5, %7 : vector<16x16xf32>
    %c0_7 = arith.constant 0 : index
    %c0_8 = arith.constant 0 : index
    %9 = vector.load %arg4[%c0_7, %c0_8] : memref<16x16xf32, #tpu.memory_space<vmem>>, vector<16x16xf32>
    tpu.vector_store %arg4[%c0_7, %c0_8], %8 {strides = array<i32>} : memref<16x16xf32, #tpu.memory_space<vmem>>, vector<16x16xf32>,
    return
  }
}

module attributes {stable_mosaic.version = 11 : i64} {
  func.func @_fused_matmul_kernel(%arg0: memref<16x144xf32, #tpu.memory_space<vmem>>, %arg1: memref<144x16xf32, #tpu.memory_space<vmem>>, %arg2: memref<1x16xf32, #tpu.memory_space<vmem>>, %arg3: memref<1x16xf32, #tpu.memory_space<vmem>>, %arg4: memref<16x16xf32, #tpu.memory_space<vmem>>, %arg5: memref<16x16xf32, #tpu.memory_space<vmem>>) attributes {dimension_semantics = [], scalar_prefetch = 0 : i64, scratch_operands = 0 : i64, tpu.core_type = #tpu.core_type<tc>} {
    %c0 = arith.constant 0 : index
    %c0_0 = arith.constant 0 : index
    %0 = vector.load %arg0[%c0, %c0_0] : memref<16x144xf32, #tpu.memory_space<vmem>>, vector<16x144xf32>
    %c0_1 = arith.constant 0 : index
    %c0_2 = arith.constant 0 : index
    %1 = vector.load %arg1[%c0_1, %c0_2] : memref<144x16xf32, #tpu.memory_space<vmem>>, vector<144x16xf32>
    %cst = arith.constant dense<0.000000e+00> : vector<16x16xf32>
    %2 = tpu.matmul %0, %1, %cst {dimension_numbers = #tpu.dot_dimension_numbers<[1], [0], [0], [1], [0, 0, 1, 1], [], []>} : vector<16x144xf32>, vector<144x16xf32>, vector<16x16xf32> -> vector<16x16xf32>
    %c0_3 = arith.constant 0 : index
    %c0_4 = arith.constant 0 : index
    %3 = vector.load %arg2[%c0_3, %c0_4] : memref<1x16xf32, #tpu.memory_space<vmem>>, vector<1x16xf32>
    %4 = vector.broadcast %3 : vector<1x16xf32> to vector<16x16xf32>
    %5 = arith.mulf %2, %4 : vector<16x16xf32>
    %c0_5 = arith.constant 0 : index
    %c0_6 = arith.constant 0 : index
    %6 = vector.load %arg3[%c0_5, %c0_6] : memref<1x16xf32, #tpu.memory_space<vmem>>, vector<1x16xf32>
    %7 = vector.broadcast %6 : vector<1x16xf32> to vector<16x16xf32>
    %8 = arith.addf %5, %7 : vector<16x16xf32>
    %c0_7 = arith.constant 0 : index
    %c0_8 = arith.constant 0 : index
    %9 = vector.load %arg4[%c0_7, %c0_8] : memref<16x16xf32, #tpu.memory_space<vmem>>, vector<16x16xf32>
    %10 = arith.addf %8, %9 : vector<16x16xf32>
    %c0_9 = arith.constant 0 : index
    %c0_10 = arith.constant 0 : index
    %11 = vector.load %arg5[%c0_9, %c0_10] : memref<16x16xf32, #tpu.memory_space<vmem>>, vector<16x16xf32>
    tpu.vector_store %arg5[%c0_9, %c0_10], %10 {strides = array<i32>} : memref<16x16xf32, #tpu.memory_space<vmem>>, vector<16x16xf32>,
    return
  }
}

module attributes {stable_mosaic.version = 11 : i64} {
  func.func @_fused_matmul_kernel(%arg0: memref<16x48xf32, #tpu.memory_space<vmem>>, %arg1: memref<1x48xf32, #tpu.memory_space<vmem>>, %arg2: memref<1x48xf32, #tpu.memory_space<vmem>>, %arg3: memref<48x16xf32, #tpu.memory_space<vmem>>, %arg4: memref<1x16xf32, #tpu.memory_space<vmem>>, %arg5: memref<1x16xf32, #tpu.memory_space<vmem>>, %arg6: memref<16x16xf32, #tpu.memory_space<vmem>>, %arg7: memref<16x16xf32, #tpu.memory_space<vmem>>) attributes {dimension_semantics = [], scalar_prefetch = 0 : i64, scratch_operands = 0 : i64, tpu.core_type = #tpu.core_type<tc>} {
    %c0 = arith.constant 0 : index
    %c0_0 = arith.constant 0 : index
    %0 = vector.load %arg0[%c0, %c0_0] : memref<16x48xf32, #tpu.memory_space<vmem>>, vector<16x48xf32>
    %c0_1 = arith.constant 0 : index
    %c0_2 = arith.constant 0 : index
    %1 = vector.load %arg1[%c0_1, %c0_2] : memref<1x48xf32, #tpu.memory_space<vmem>>, vector<1x48xf32>
    %2 = vector.broadcast %1 : vector<1x48xf32> to vector<16x48xf32>
    %3 = arith.mulf %0, %2 : vector<16x48xf32>
    %c0_3 = arith.constant 0 : index
    %c0_4 = arith.constant 0 : index
    %4 = vector.load %arg2[%c0_3, %c0_4] : memref<1x48xf32, #tpu.memory_space<vmem>>, vector<1x48xf32>
    %5 = vector.broadcast %4 : vector<1x48xf32> to vector<16x48xf32>
    %6 = arith.addf %3, %5 : vector<16x48xf32>
    %cst = arith.constant 0.000000e+00 : f32
    %7 = vector.broadcast %cst : f32 to vector<16x48xf32>
    %8 = arith.maximumf %6, %7 : vector<16x48xf32>
    %c0_5 = arith.constant 0 : index
    %c0_6 = arith.constant 0 : index
    %9 = vector.load %arg3[%c0_5, %c0_6] : memref<48x16xf32, #tpu.memory_space<vmem>>, vector<48x16xf32>
    %cst_7 = arith.constant dense<0.000000e+00> : vector<16x16xf32>
    %10 = tpu.matmul %8, %9, %cst_7 {dimension_numbers = #tpu.dot_dimension_numbers<[1], [0], [0], [1], [0, 0, 1, 1], [], []>} : vector<16x48xf32>, vector<48x16xf32>, vector<16x16xf32> -> vector<16x16xf32>
    %c0_8 = arith.constant 0 : index
    %c0_9 = arith.constant 0 : index
    %11 = vector.load %arg4[%c0_8, %c0_9] : memref<1x16xf32, #tpu.memory_space<vmem>>, vector<1x16xf32>
    %12 = vector.broadcast %11 : vector<1x16xf32> to vector<16x16xf32>
    %13 = arith.mulf %10, %12 : vector<16x16xf32>
    %c0_10 = arith.constant 0 : index
    %c0_11 = arith.constant 0 : index
    %14 = vector.load %arg5[%c0_10, %c0_11] : memref<1x16xf32, #tpu.memory_space<vmem>>, vector<1x16xf32>
    %15 = vector.broadcast %14 : vector<1x16xf32> to vector<16x16xf32>
    %16 = arith.addf %13, %15 : vector<16x16xf32>
    %c0_12 = arith.constant 0 : index
    %c0_13 = arith.constant 0 : index
    %17 = vector.load %arg6[%c0_12, %c0_13] : memref<16x16xf32, #tpu.memory_space<vmem>>, vector<16x16xf32>
    %18 = arith.addf %16, %17 : vector<16x16xf32>
    %c0_14 = arith.constant 0 : index
    %c0_15 = arith.constant 0 : index
    %19 = vector.load %arg7[%c0_14, %c0_15] : memref<16x16xf32, #tpu.memory_space<vmem>>, vector<16x16xf32>
    tpu.vector_store %arg7[%c0_14, %c0_15], %18 {strides = array<i32>} : memref<16x16xf32, #tpu.memory_space<vmem>>, vector<16x16xf32>,
    return
  }
}

module attributes {stable_mosaic.version = 11 : i64} {
  func.func @_fused_matmul_kernel(%arg0: memref<16x16xf32, #tpu.memory_space<vmem>>, %arg1: memref<16x16xf32, #tpu.memory_space<vmem>>, %arg2: memref<1x16xf32, #tpu.memory_space<vmem>>, %arg3: memref<1x16xf32, #tpu.memory_space<vmem>>, %arg4: memref<16x16xf32, #tpu.memory_space<vmem>>) attributes {dimension_semantics = [], scalar_prefetch = 0 : i64, scratch_operands = 0 : i64, tpu.core_type = #tpu.core_type<tc>} {
    %c0 = arith.constant 0 : index
    %c0_0 = arith.constant 0 : index
    %0 = vector.load %arg0[%c0, %c0_0] : memref<16x16xf32, #tpu.memory_space<vmem>>, vector<16x16xf32>
    %c0_1 = arith.constant 0 : index
    %c0_2 = arith.constant 0 : index
    %1 = vector.load %arg1[%c0_1, %c0_2] : memref<16x16xf32, #tpu.memory_space<vmem>>, vector<16x16xf32>
    %cst = arith.constant dense<0.000000e+00> : vector<16x16xf32>
    %2 = tpu.matmul %0, %1, %cst {dimension_numbers = #tpu.dot_dimension_numbers<[1], [0], [0], [1], [0, 0, 1, 1], [], []>} : vector<16x16xf32>, vector<16x16xf32>, vector<16x16xf32> -> vector<16x16xf32>
    %c0_3 = arith.constant 0 : index
    %c0_4 = arith.constant 0 : index
    %3 = vector.load %arg2[%c0_3, %c0_4] : memref<1x16xf32, #tpu.memory_space<vmem>>, vector<1x16xf32>
    %4 = vector.broadcast %3 : vector<1x16xf32> to vector<16x16xf32>
    %5 = arith.mulf %2, %4 : vector<16x16xf32>
    %c0_5 = arith.constant 0 : index
    %c0_6 = arith.constant 0 : index
    %6 = vector.load %arg3[%c0_5, %c0_6] : memref<1x16xf32, #tpu.memory_space<vmem>>, vector<1x16xf32>
    %7 = vector.broadcast %6 : vector<1x16xf32> to vector<16x16xf32>
    %8 = arith.addf %5, %7 : vector<16x16xf32>
    %cst_7 = arith.constant 0.000000e+00 : f32
    %9 = vector.broadcast %cst_7 : f32 to vector<16x16xf32>
    %10 = arith.cmpf ogt, %8, %9 : vector<16x16xf32>
    %11 = math.exp %8 : vector<16x16xf32>
    %cst_8 = arith.constant 1.000000e+00 : f32
    %12 = vector.broadcast %cst_8 : f32 to vector<16x16xf32>
    %13 = arith.subf %11, %12 : vector<16x16xf32>
    %cst_9 = arith.constant 1.67326319 : f32
    %14 = vector.broadcast %cst_9 : f32 to vector<16x16xf32>
    %15 = arith.mulf %14, %13 : vector<16x16xf32>
    %16 = arith.select %10, %8, %15 : vector<16x16xi1>, vector<16x16xf32>
    %cst_10 = arith.constant 1.05070102 : f32
    %17 = vector.broadcast %cst_10 : f32 to vector<16x16xf32>
    %18 = arith.mulf %17, %16 : vector<16x16xf32>
    %c0_11 = arith.constant 0 : index
    %c0_12 = arith.constant 0 : index
    %19 = vector.load %arg4[%c0_11, %c0_12] : memref<16x16xf32, #tpu.memory_space<vmem>>, vector<16x16xf32>
    tpu.vector_store %arg4[%c0_11, %c0_12], %18 {strides = array<i32>} : memref<16x16xf32, #tpu.memory_space<vmem>>, vector<16x16xf32>,
    return
  }
}

module attributes {stable_mosaic.version = 11 : i64} {
  func.func @_fused_matmul_kernel(%arg0: memref<16x16xf32, #tpu.memory_space<vmem>>, %arg1: memref<16x32xf32, #tpu.memory_space<vmem>>, %arg2: memref<1x32xf32, #tpu.memory_space<vmem>>, %arg3: memref<1x32xf32, #tpu.memory_space<vmem>>, %arg4: memref<16x32xf32, #tpu.memory_space<vmem>>) attributes {dimension_semantics = [], scalar_prefetch = 0 : i64, scratch_operands = 0 : i64, tpu.core_type = #tpu.core_type<tc>} {
    %c0 = arith.constant 0 : index
    %c0_0 = arith.constant 0 : index
    %0 = vector.load %arg0[%c0, %c0_0] : memref<16x16xf32, #tpu.memory_space<vmem>>, vector<16x16xf32>
    %c0_1 = arith.constant 0 : index
    %c0_2 = arith.constant 0 : index
    %1 = vector.load %arg1[%c0_1, %c0_2] : memref<16x32xf32, #tpu.memory_space<vmem>>, vector<16x32xf32>
    %cst = arith.constant dense<0.000000e+00> : vector<16x32xf32>
    %2 = tpu.matmul %0, %1, %cst {dimension_numbers = #tpu.dot_dimension_numbers<[1], [0], [0], [1], [0, 0, 1, 1], [], []>} : vector<16x16xf32>, vector<16x32xf32>, vector<16x32xf32> -> vector<16x32xf32>
    %c0_3 = arith.constant 0 : index
    %c0_4 = arith.constant 0 : index
    %3 = vector.load %arg2[%c0_3, %c0_4] : memref<1x32xf32, #tpu.memory_space<vmem>>, vector<1x32xf32>
    %4 = vector.broadcast %3 : vector<1x32xf32> to vector<16x32xf32>
    %5 = arith.mulf %2, %4 : vector<16x32xf32>
    %c0_5 = arith.constant 0 : index
    %c0_6 = arith.constant 0 : index
    %6 = vector.load %arg3[%c0_5, %c0_6] : memref<1x32xf32, #tpu.memory_space<vmem>>, vector<1x32xf32>
    %7 = vector.broadcast %6 : vector<1x32xf32> to vector<16x32xf32>
    %8 = arith.addf %5, %7 : vector<16x32xf32>
    %c0_7 = arith.constant 0 : index
    %c0_8 = arith.constant 0 : index
    %9 = vector.load %arg4[%c0_7, %c0_8] : memref<16x32xf32, #tpu.memory_space<vmem>>, vector<16x32xf32>
    tpu.vector_store %arg4[%c0_7, %c0_8], %8 {strides = array<i32>} : memref<16x32xf32, #tpu.memory_space<vmem>>, vector<16x32xf32>,
    return
  }
}

module attributes {stable_mosaic.version = 11 : i64} {
  func.func @_hg_gate_kernel(%arg0: memref<32x16xf32, #tpu.memory_space<vmem>>, %arg1: memref<32x16xf32, #tpu.memory_space<vmem>>, %arg2: memref<16x16xf32, #tpu.memory_space<vmem>>, %arg3: memref<16x16xf32, #tpu.memory_space<vmem>>, %arg4: memref<1x16xf32, #tpu.memory_space<vmem>>, %arg5: memref<32x16xf32, #tpu.memory_space<vmem>>) attributes {dimension_semantics = [], scalar_prefetch = 0 : i64, scratch_operands = 0 : i64, tpu.core_type = #tpu.core_type<tc>} {
    %c0 = arith.constant 0 : index
    %c0_0 = arith.constant 0 : index
    %0 = vector.load %arg1[%c0, %c0_0] : memref<32x16xf32, #tpu.memory_space<vmem>>, vector<32x16xf32>
    %cst = arith.constant 0.000000e+00 : f32
    %1 = vector.broadcast %cst : f32 to vector<32x16xf32>
    %2 = arith.subf %1, %0 : vector<32x16xf32>
    %3 = math.exp %2 : vector<32x16xf32>
    %cst_1 = arith.constant 1.000000e+00 : f32
    %4 = vector.broadcast %cst_1 : f32 to vector<32x16xf32>
    %5 = arith.addf %4, %3 : vector<32x16xf32>
    %6 = tpu.reciprocal %5 {approx = true} : vector<32x16xf32> -> vector<32x16xf32>
    %c0_2 = arith.constant 0 : index
    %c0_3 = arith.constant 0 : index
    %7 = vector.load %arg0[%c0_2, %c0_3] : memref<32x16xf32, #tpu.memory_space<vmem>>, vector<32x16xf32>
    %8 = arith.mulf %7, %6 : vector<32x16xf32>
    %c0_4 = arith.constant 0 : index
    %c0_5 = arith.constant 0 : index
    %9 = vector.load %arg2[%c0_4, %c0_5] : memref<16x16xf32, #tpu.memory_space<vmem>>, vector<16x16xf32>
    %cst_6 = arith.constant dense<0.000000e+00> : vector<32x16xf32>
    %10 = tpu.matmul %8, %9, %cst_6 {dimension_numbers = #tpu.dot_dimension_numbers<[1], [0], [0], [1], [0, 0, 1, 1], [], []>} : vector<32x16xf32>, vector<16x16xf32>, vector<32x16xf32> -> vector<32x16xf32>
    %c0_7 = arith.constant 0 : index
    %c0_8 = arith.constant 0 : index
    %11 = vector.load %arg3[%c0_7, %c0_8] : memref<16x16xf32, #tpu.memory_space<vmem>>, vector<16x16xf32>
    %cst_9 = arith.constant dense<0.000000e+00> : vector<32x16xf32>
    %12 = tpu.matmul %0, %11, %cst_9 {dimension_numbers = #tpu.dot_dimension_numbers<[1], [0], [0], [1], [0, 0, 1, 1], [], []>} : vector<32x16xf32>, vector<16x16xf32>, vector<32x16xf32> -> vector<32x16xf32>
    %13 = arith.addf %10, %12 : vector<32x16xf32>
    %c0_10 = arith.constant 0 : index
    %c0_11 = arith.constant 0 : index
    %14 = vector.load %arg4[%c0_10, %c0_11] : memref<1x16xf32, #tpu.memory_space<vmem>>, vector<1x16xf32>
    %15 = vector.broadcast %14 : vector<1x16xf32> to vector<32x16xf32>
    %16 = arith.addf %13, %15 : vector<32x16xf32>
    %cst_12 = arith.constant 0.000000e+00 : f32
    %17 = vector.broadcast %cst_12 : f32 to vector<32x16xf32>
    %18 = arith.cmpf ogt, %16, %17 : vector<32x16xf32>
    %19 = math.exp %16 : vector<32x16xf32>
    %cst_13 = arith.constant 1.000000e+00 : f32
    %20 = vector.broadcast %cst_13 : f32 to vector<32x16xf32>
    %21 = arith.subf %19, %20 : vector<32x16xf32>
    %cst_14 = arith.constant 1.67326319 : f32
    %22 = vector.broadcast %cst_14 : f32 to vector<32x16xf32>
    %23 = arith.mulf %22, %21 : vector<32x16xf32>
    %24 = arith.select %18, %16, %23 : vector<32x16xi1>, vector<32x16xf32>
    %cst_15 = arith.constant 1.05070102 : f32
    %25 = vector.broadcast %cst_15 : f32 to vector<32x16xf32>
    %26 = arith.mulf %25, %24 : vector<32x16xf32>
    %c0_16 = arith.constant 0 : index
    %c0_17 = arith.constant 0 : index
    %27 = vector.load %arg5[%c0_16, %c0_17] : memref<32x16xf32, #tpu.memory_space<vmem>>, vector<32x16xf32>
    tpu.vector_store %arg5[%c0_16, %c0_17], %26 {strides = array<i32>} : memref<32x16xf32, #tpu.memory_space<vmem>>, vector<32x16xf32>,
    return
  }
}

module attributes {stable_mosaic.version = 11 : i64} {
  func.func @_fused_matmul_kernel(%arg0: memref<32x16xf32, #tpu.memory_space<vmem>>, %arg1: memref<16x32xf32, #tpu.memory_space<vmem>>, %arg2: memref<1x32xf32, #tpu.memory_space<vmem>>, %arg3: memref<1x32xf32, #tpu.memory_space<vmem>>, %arg4: memref<32x32xf32, #tpu.memory_space<vmem>>) attributes {dimension_semantics = [], scalar_prefetch = 0 : i64, scratch_operands = 0 : i64, tpu.core_type = #tpu.core_type<tc>} {
    %c0 = arith.constant 0 : index
    %c0_0 = arith.constant 0 : index
    %0 = vector.load %arg0[%c0, %c0_0] : memref<32x16xf32, #tpu.memory_space<vmem>>, vector<32x16xf32>
    %c0_1 = arith.constant 0 : index
    %c0_2 = arith.constant 0 : index
    %1 = vector.load %arg1[%c0_1, %c0_2] : memref<16x32xf32, #tpu.memory_space<vmem>>, vector<16x32xf32>
    %cst = arith.constant dense<0.000000e+00> : vector<32x32xf32>
    %2 = tpu.matmul %0, %1, %cst {dimension_numbers = #tpu.dot_dimension_numbers<[1], [0], [0], [1], [0, 0, 1, 1], [], []>} : vector<32x16xf32>, vector<16x32xf32>, vector<32x32xf32> -> vector<32x32xf32>
    %c0_3 = arith.constant 0 : index
    %c0_4 = arith.constant 0 : index
    %3 = vector.load %arg2[%c0_3, %c0_4] : memref<1x32xf32, #tpu.memory_space<vmem>>, vector<1x32xf32>
    %4 = vector.broadcast %3 : vector<1x32xf32> to vector<32x32xf32>
    %5 = arith.mulf %2, %4 : vector<32x32xf32>
    %c0_5 = arith.constant 0 : index
    %c0_6 = arith.constant 0 : index
    %6 = vector.load %arg3[%c0_5, %c0_6] : memref<1x32xf32, #tpu.memory_space<vmem>>, vector<1x32xf32>
    %7 = vector.broadcast %6 : vector<1x32xf32> to vector<32x32xf32>
    %8 = arith.addf %5, %7 : vector<32x32xf32>
    %c0_7 = arith.constant 0 : index
    %c0_8 = arith.constant 0 : index
    %9 = vector.load %arg4[%c0_7, %c0_8] : memref<32x32xf32, #tpu.memory_space<vmem>>, vector<32x32xf32>
    tpu.vector_store %arg4[%c0_7, %c0_8], %8 {strides = array<i32>} : memref<32x32xf32, #tpu.memory_space<vmem>>, vector<32x32xf32>,
    return
  }
}

module attributes {stable_mosaic.version = 11 : i64} {
  func.func @_fused_matmul_kernel(%arg0: memref<32x16xf32, #tpu.memory_space<vmem>>, %arg1: memref<16x16xf32, #tpu.memory_space<vmem>>, %arg2: memref<1x16xf32, #tpu.memory_space<vmem>>, %arg3: memref<1x16xf32, #tpu.memory_space<vmem>>, %arg4: memref<32x16xf32, #tpu.memory_space<vmem>>) attributes {dimension_semantics = [], scalar_prefetch = 0 : i64, scratch_operands = 0 : i64, tpu.core_type = #tpu.core_type<tc>} {
    %c0 = arith.constant 0 : index
    %c0_0 = arith.constant 0 : index
    %0 = vector.load %arg0[%c0, %c0_0] : memref<32x16xf32, #tpu.memory_space<vmem>>, vector<32x16xf32>
    %c0_1 = arith.constant 0 : index
    %c0_2 = arith.constant 0 : index
    %1 = vector.load %arg1[%c0_1, %c0_2] : memref<16x16xf32, #tpu.memory_space<vmem>>, vector<16x16xf32>
    %cst = arith.constant dense<0.000000e+00> : vector<32x16xf32>
    %2 = tpu.matmul %0, %1, %cst {dimension_numbers = #tpu.dot_dimension_numbers<[1], [0], [0], [1], [0, 0, 1, 1], [], []>} : vector<32x16xf32>, vector<16x16xf32>, vector<32x16xf32> -> vector<32x16xf32>
    %c0_3 = arith.constant 0 : index
    %c0_4 = arith.constant 0 : index
    %3 = vector.load %arg2[%c0_3, %c0_4] : memref<1x16xf32, #tpu.memory_space<vmem>>, vector<1x16xf32>
    %4 = vector.broadcast %3 : vector<1x16xf32> to vector<32x16xf32>
    %5 = arith.mulf %2, %4 : vector<32x16xf32>
    %c0_5 = arith.constant 0 : index
    %c0_6 = arith.constant 0 : index
    %6 = vector.load %arg3[%c0_5, %c0_6] : memref<1x16xf32, #tpu.memory_space<vmem>>, vector<1x16xf32>
    %7 = vector.broadcast %6 : vector<1x16xf32> to vector<32x16xf32>
    %8 = arith.addf %5, %7 : vector<32x16xf32>
    %cst_7 = arith.constant 0.000000e+00 : f32
    %9 = vector.broadcast %cst_7 : f32 to vector<32x16xf32>
    %10 = arith.cmpf ogt, %8, %9 : vector<32x16xf32>
    %11 = math.exp %8 : vector<32x16xf32>
    %cst_8 = arith.constant 1.000000e+00 : f32
    %12 = vector.broadcast %cst_8 : f32 to vector<32x16xf32>
    %13 = arith.subf %11, %12 : vector<32x16xf32>
    %cst_9 = arith.constant 1.67326319 : f32
    %14 = vector.broadcast %cst_9 : f32 to vector<32x16xf32>
    %15 = arith.mulf %14, %13 : vector<32x16xf32>
    %16 = arith.select %10, %8, %15 : vector<32x16xi1>, vector<32x16xf32>
    %cst_10 = arith.constant 1.05070102 : f32
    %17 = vector.broadcast %cst_10 : f32 to vector<32x16xf32>
    %18 = arith.mulf %17, %16 : vector<32x16xf32>
    %c0_11 = arith.constant 0 : index
    %c0_12 = arith.constant 0 : index
    %19 = vector.load %arg4[%c0_11, %c0_12] : memref<32x16xf32, #tpu.memory_space<vmem>>, vector<32x16xf32>
    tpu.vector_store %arg4[%c0_11, %c0_12], %18 {strides = array<i32>} : memref<32x16xf32, #tpu.memory_space<vmem>>, vector<32x16xf32>,
    return
  }
}

module attributes {stable_mosaic.version = 11 : i64} {
  func.func @_hg_gate_kernel(%arg0: memref<64x16xf32, #tpu.memory_space<vmem>>, %arg1: memref<64x16xf32, #tpu.memory_space<vmem>>, %arg2: memref<16x16xf32, #tpu.memory_space<vmem>>, %arg3: memref<16x16xf32, #tpu.memory_space<vmem>>, %arg4: memref<1x16xf32, #tpu.memory_space<vmem>>, %arg5: memref<64x16xf32, #tpu.memory_space<vmem>>) attributes {dimension_semantics = [], scalar_prefetch = 0 : i64, scratch_operands = 0 : i64, tpu.core_type = #tpu.core_type<tc>} {
    %c0 = arith.constant 0 : index
    %c0_0 = arith.constant 0 : index
    %0 = vector.load %arg1[%c0, %c0_0] : memref<64x16xf32, #tpu.memory_space<vmem>>, vector<64x16xf32>
    %cst = arith.constant 0.000000e+00 : f32
    %1 = vector.broadcast %cst : f32 to vector<64x16xf32>
    %2 = arith.subf %1, %0 : vector<64x16xf32>
    %3 = math.exp %2 : vector<64x16xf32>
    %cst_1 = arith.constant 1.000000e+00 : f32
    %4 = vector.broadcast %cst_1 : f32 to vector<64x16xf32>
    %5 = arith.addf %4, %3 : vector<64x16xf32>
    %6 = tpu.reciprocal %5 {approx = true} : vector<64x16xf32> -> vector<64x16xf32>
    %c0_2 = arith.constant 0 : index
    %c0_3 = arith.constant 0 : index
    %7 = vector.load %arg0[%c0_2, %c0_3] : memref<64x16xf32, #tpu.memory_space<vmem>>, vector<64x16xf32>
    %8 = arith.mulf %7, %6 : vector<64x16xf32>
    %c0_4 = arith.constant 0 : index
    %c0_5 = arith.constant 0 : index
    %9 = vector.load %arg2[%c0_4, %c0_5] : memref<16x16xf32, #tpu.memory_space<vmem>>, vector<16x16xf32>
    %cst_6 = arith.constant dense<0.000000e+00> : vector<64x16xf32>
    %10 = tpu.matmul %8, %9, %cst_6 {dimension_numbers = #tpu.dot_dimension_numbers<[1], [0], [0], [1], [0, 0, 1, 1], [], []>} : vector<64x16xf32>, vector<16x16xf32>, vector<64x16xf32> -> vector<64x16xf32>
    %c0_7 = arith.constant 0 : index
    %c0_8 = arith.constant 0 : index
    %11 = vector.load %arg3[%c0_7, %c0_8] : memref<16x16xf32, #tpu.memory_space<vmem>>, vector<16x16xf32>
    %cst_9 = arith.constant dense<0.000000e+00> : vector<64x16xf32>
    %12 = tpu.matmul %0, %11, %cst_9 {dimension_numbers = #tpu.dot_dimension_numbers<[1], [0], [0], [1], [0, 0, 1, 1], [], []>} : vector<64x16xf32>, vector<16x16xf32>, vector<64x16xf32> -> vector<64x16xf32>
    %13 = arith.addf %10, %12 : vector<64x16xf32>
    %c0_10 = arith.constant 0 : index
    %c0_11 = arith.constant 0 : index
    %14 = vector.load %arg4[%c0_10, %c0_11] : memref<1x16xf32, #tpu.memory_space<vmem>>, vector<1x16xf32>
    %15 = vector.broadcast %14 : vector<1x16xf32> to vector<64x16xf32>
    %16 = arith.addf %13, %15 : vector<64x16xf32>
    %cst_12 = arith.constant 0.000000e+00 : f32
    %17 = vector.broadcast %cst_12 : f32 to vector<64x16xf32>
    %18 = arith.cmpf ogt, %16, %17 : vector<64x16xf32>
    %19 = math.exp %16 : vector<64x16xf32>
    %cst_13 = arith.constant 1.000000e+00 : f32
    %20 = vector.broadcast %cst_13 : f32 to vector<64x16xf32>
    %21 = arith.subf %19, %20 : vector<64x16xf32>
    %cst_14 = arith.constant 1.67326319 : f32
    %22 = vector.broadcast %cst_14 : f32 to vector<64x16xf32>
    %23 = arith.mulf %22, %21 : vector<64x16xf32>
    %24 = arith.select %18, %16, %23 : vector<64x16xi1>, vector<64x16xf32>
    %cst_15 = arith.constant 1.05070102 : f32
    %25 = vector.broadcast %cst_15 : f32 to vector<64x16xf32>
    %26 = arith.mulf %25, %24 : vector<64x16xf32>
    %c0_16 = arith.constant 0 : index
    %c0_17 = arith.constant 0 : index
    %27 = vector.load %arg5[%c0_16, %c0_17] : memref<64x16xf32, #tpu.memory_space<vmem>>, vector<64x16xf32>
    tpu.vector_store %arg5[%c0_16, %c0_17], %26 {strides = array<i32>} : memref<64x16xf32, #tpu.memory_space<vmem>>, vector<64x16xf32>,
    return
  }
}

module attributes {stable_mosaic.version = 11 : i64} {
  func.func @_fused_matmul_kernel(%arg0: memref<64x16xf32, #tpu.memory_space<vmem>>, %arg1: memref<16x32xf32, #tpu.memory_space<vmem>>, %arg2: memref<1x32xf32, #tpu.memory_space<vmem>>, %arg3: memref<1x32xf32, #tpu.memory_space<vmem>>, %arg4: memref<64x32xf32, #tpu.memory_space<vmem>>) attributes {dimension_semantics = [], scalar_prefetch = 0 : i64, scratch_operands = 0 : i64, tpu.core_type = #tpu.core_type<tc>} {
    %c0 = arith.constant 0 : index
    %c0_0 = arith.constant 0 : index
    %0 = vector.load %arg0[%c0, %c0_0] : memref<64x16xf32, #tpu.memory_space<vmem>>, vector<64x16xf32>
    %c0_1 = arith.constant 0 : index
    %c0_2 = arith.constant 0 : index
    %1 = vector.load %arg1[%c0_1, %c0_2] : memref<16x32xf32, #tpu.memory_space<vmem>>, vector<16x32xf32>
    %cst = arith.constant dense<0.000000e+00> : vector<64x32xf32>
    %2 = tpu.matmul %0, %1, %cst {dimension_numbers = #tpu.dot_dimension_numbers<[1], [0], [0], [1], [0, 0, 1, 1], [], []>} : vector<64x16xf32>, vector<16x32xf32>, vector<64x32xf32> -> vector<64x32xf32>
    %c0_3 = arith.constant 0 : index
    %c0_4 = arith.constant 0 : index
    %3 = vector.load %arg2[%c0_3, %c0_4] : memref<1x32xf32, #tpu.memory_space<vmem>>, vector<1x32xf32>
    %4 = vector.broadcast %3 : vector<1x32xf32> to vector<64x32xf32>
    %5 = arith.mulf %2, %4 : vector<64x32xf32>
    %c0_5 = arith.constant 0 : index
    %c0_6 = arith.constant 0 : index
    %6 = vector.load %arg3[%c0_5, %c0_6] : memref<1x32xf32, #tpu.memory_space<vmem>>, vector<1x32xf32>
    %7 = vector.broadcast %6 : vector<1x32xf32> to vector<64x32xf32>
    %8 = arith.addf %5, %7 : vector<64x32xf32>
    %c0_7 = arith.constant 0 : index
    %c0_8 = arith.constant 0 : index
    %9 = vector.load %arg4[%c0_7, %c0_8] : memref<64x32xf32, #tpu.memory_space<vmem>>, vector<64x32xf32>
    tpu.vector_store %arg4[%c0_7, %c0_8], %8 {strides = array<i32>} : memref<64x32xf32, #tpu.memory_space<vmem>>, vector<64x32xf32>,
    return
  }
}

module attributes {stable_mosaic.version = 11 : i64} {
  func.func @_fused_matmul_kernel(%arg0: memref<128x48xf32, #tpu.memory_space<vmem>>, %arg1: memref<1x48xf32, #tpu.memory_space<vmem>>, %arg2: memref<1x48xf32, #tpu.memory_space<vmem>>, %arg3: memref<48x16xf32, #tpu.memory_space<vmem>>, %arg4: memref<1x16xf32, #tpu.memory_space<vmem>>, %arg5: memref<1x16xf32, #tpu.memory_space<vmem>>, %arg6: memref<128x16xf32, #tpu.memory_space<vmem>>, %arg7: memref<128x16xf32, #tpu.memory_space<vmem>>) attributes {dimension_semantics = [], scalar_prefetch = 0 : i64, scratch_operands = 0 : i64, tpu.core_type = #tpu.core_type<tc>} {
    %c0 = arith.constant 0 : index
    %c0_0 = arith.constant 0 : index
    %0 = vector.load %arg0[%c0, %c0_0] : memref<128x48xf32, #tpu.memory_space<vmem>>, vector<128x48xf32>
    %c0_1 = arith.constant 0 : index
    %c0_2 = arith.constant 0 : index
    %1 = vector.load %arg1[%c0_1, %c0_2] : memref<1x48xf32, #tpu.memory_space<vmem>>, vector<1x48xf32>
    %2 = vector.broadcast %1 : vector<1x48xf32> to vector<128x48xf32>
    %3 = arith.mulf %0, %2 : vector<128x48xf32>
    %c0_3 = arith.constant 0 : index
    %c0_4 = arith.constant 0 : index
    %4 = vector.load %arg2[%c0_3, %c0_4] : memref<1x48xf32, #tpu.memory_space<vmem>>, vector<1x48xf32>
    %5 = vector.broadcast %4 : vector<1x48xf32> to vector<128x48xf32>
    %6 = arith.addf %3, %5 : vector<128x48xf32>
    %cst = arith.constant 0.000000e+00 : f32
    %7 = vector.broadcast %cst : f32 to vector<128x48xf32>
    %8 = arith.maximumf %6, %7 : vector<128x48xf32>
    %c0_5 = arith.constant 0 : index
    %c0_6 = arith.constant 0 : index
    %9 = vector.load %arg3[%c0_5, %c0_6] : memref<48x16xf32, #tpu.memory_space<vmem>>, vector<48x16xf32>
    %cst_7 = arith.constant dense<0.000000e+00> : vector<128x16xf32>
    %10 = tpu.matmul %8, %9, %cst_7 {dimension_numbers = #tpu.dot_dimension_numbers<[1], [0], [0], [1], [0, 0, 1, 1], [], []>} : vector<128x48xf32>, vector<48x16xf32>, vector<128x16xf32> -> vector<128x16xf32>
    %c0_8 = arith.constant 0 : index
    %c0_9 = arith.constant 0 : index
    %11 = vector.load %arg4[%c0_8, %c0_9] : memref<1x16xf32, #tpu.memory_space<vmem>>, vector<1x16xf32>
    %12 = vector.broadcast %11 : vector<1x16xf32> to vector<128x16xf32>
    %13 = arith.mulf %10, %12 : vector<128x16xf32>
    %c0_10 = arith.constant 0 : index
    %c0_11 = arith.constant 0 : index
    %14 = vector.load %arg5[%c0_10, %c0_11] : memref<1x16xf32, #tpu.memory_space<vmem>>, vector<1x16xf32>
    %15 = vector.broadcast %14 : vector<1x16xf32> to vector<128x16xf32>
    %16 = arith.addf %13, %15 : vector<128x16xf32>
    %c0_12 = arith.constant 0 : index
    %c0_13 = arith.constant 0 : index
    %17 = vector.load %arg6[%c0_12, %c0_13] : memref<128x16xf32, #tpu.memory_space<vmem>>, vector<128x16xf32>
    %18 = arith.addf %16, %17 : vector<128x16xf32>
    %c0_14 = arith.constant 0 : index
    %c0_15 = arith.constant 0 : index
    %19 = vector.load %arg7[%c0_14, %c0_15] : memref<128x16xf32, #tpu.memory_space<vmem>>, vector<128x16xf32>
    tpu.vector_store %arg7[%c0_14, %c0_15], %18 {strides = array<i32>} : memref<128x16xf32, #tpu.memory_space<vmem>>, vector<128x16xf32>,
    return
  }
}

</mosaic_0001>

<bundles_post_ra>
// kernel: multiscale_forward.112
= control target key start
LH: loop header
LB: loop body
LE: loop exit
PB: predicated region body
PF: predicated region fallthrough
CT: control target
= control target key end

     0   :  { %vm92_vm0 = vcmask 523264   ;;  %s271_s0 = inlined_call_operand.vmem [shape: f32[128,64], index: 0, kind: input, shape index: {}]   ;;  %s272_s1 = inlined_call_operand.vmem [shape: f32[1,64], index: 1, kind: input, shape index: {}]   ;;  %s273_s2 = inlined_call_operand.vmem [shape: f32[1,64], index: 2, kind: input, shape index: {}]   ;;  %s274_s3 = inlined_call_operand.vmem [shape: f32[128,64], index: 3, kind: output, shape index: {}]  }
   0x1   :  { %v14_v0 = vld [vmem:[%s271_s0] sm:$0xff]  ;;  %v15_v4 = vld [vmem:[%s271_s0 + $0x8] sm:$0xff]  ;;  %v16_v5 = vld [vmem:[%s271_s0 + $0x10] sm:$0xff] }
   0x2   :  { %v113_v1 = vld [vmem:[%s272_s1] ss:$0 sm:$0xff]  ;;  %v17_v6 = vld [vmem:[%s271_s0 + $0x18] sm:$0xff]  ;;  %v19_v11 = vld [vmem:[%s271_s0 + $0x28] sm:$0xff] }
   0x3   :  { %v144_v2 = vld [vmem:[%s273_s2] ss:$0 sm:$0xff]  ;;  %v37_v3 = vmul.f32 %v113_v1, %v14_v0  ;;  %v38_v7 = vmul.f32 %v113_v1, %v15_v4  ;;  %v39_v8 = vmul.f32 %v113_v1, %v16_v5  ;;  %v40_v9 = vmul.f32 %v113_v1, %v17_v6  ;;  %v20_v12 = vld [vmem:[%s271_s0 + $0x30] sm:$0xff]  ;;  %v21_v17 = vld [vmem:[%s271_s0 + $0x38] sm:$0xff] }
   0x4   :  { %v18_v10 = vld [vmem:[%s271_s0 + $0x20] sm:$0xff]  ;;  %v42_v15 = vmul.f32 %v113_v1, %v19_v11  ;;  %v43_v16 = vmul.f32 %v113_v1, %v20_v12  ;;  %v44_v21 = vmul.f32 %v113_v1, %v21_v17  ;;  %v23_v27 = vld [vmem:[%s271_s0 + $0x48] sm:$0xff]  ;;  %v24_v28 = vld [vmem:[%s271_s0 + $0x50] sm:$0xff] }
   0x5   :  { %v60_v13 = vadd.f32 %v144_v2, %v37_v3  ;;  %v41_v14 = vmul.f32 %v113_v1, %v18_v10  ;;  %v61_v18 = vadd.f32 %v144_v2, %v38_v7  ;;  %v62_v19 = vadd.f32 %v144_v2, %v39_v8  ;;  %v22_v22 = vld [vmem:[%s271_s0 + $0x40] sm:$0xff]  ;;  %v25_v29 = vld [vmem:[%s271_s0 + $0x58] sm:$0xff]  ;;  %v27_v35 = vld [vmem:[%s271_s0 + $0x68] sm:$0xff] }
   0x6   :  { %v63_v20 = vadd.f32 %v144_v2, %v40_v9  ;;  %v65_v25 = vadd.f32 %v144_v2, %v42_v15  ;;  %v66_v26 = vadd.f32 %v144_v2, %v43_v16  ;;  %v67_v33 = vadd.f32 %v144_v2, %v44_v21  ;;  %v26_v34 = vld [vmem:[%s271_s0 + $0x60] sm:$0xff]  ;;  %v28_v36 = vld [vmem:[%s271_s0 + $0x70] sm:$0xff]  ;;  %v29_v41 = vld [vmem:[%s271_s0 + $0x78] sm:$0xff] }
   0x7   :  { %v76_v23 = vmax.f32 %v60_v13, 0.0  ;;  %v64_v24 = vadd.f32 %v144_v2, %v41_v14  ;;  %v77_v30 = vmax.f32 %v61_v18, 0.0  ;;  %v78_v31 = vmax.f32 %v62_v19, 0.0 }
   0x8   :  { %v79_v32 = vmax.f32 %v63_v20, 0.0  ;;  %v81_v38 = vmax.f32 %v65_v25, 0.0  ;;  %v82_v39 = vmax.f32 %v66_v26, 0.0  ;;  %v45_v40 = vmul.f32 %v113_v1, %v22_v22 }
   0x9   :  { %93 = vst.msk [vmem:[%s274_s3] sm:$0xff] %vm92_vm0, %v76_v23  ;;  %v80_v37 = vmax.f32 %v64_v24, 0.0  ;;  %94 = vst.msk [vmem:[%s274_s3 + $0x8] sm:$0xff] %vm92_vm0, %v77_v30  ;;  %v83_v42 = vmax.f32 %v67_v33, 0.0  ;;  %v46_v43 = vmul.f32 %v113_v1, %v23_v27  ;;  %v47_v44 = vmul.f32 %v113_v1, %v24_v28 }
   0xa   :  { %95 = vst.msk [vmem:[%s274_s3 + $0x10] sm:$0xff] %vm92_vm0, %v78_v31  ;;  %96 = vst.msk [vmem:[%s274_s3 + $0x18] sm:$0xff] %vm92_vm0, %v79_v32  ;;  %v48_v45 = vmul.f32 %v113_v1, %v25_v29  ;;  %v68_v46 = vadd.f32 %v144_v2, %v45_v40  ;;  %v49_v47 = vmul.f32 %v113_v1, %v26_v34 }
   0xb   :  { %97 = vst.msk [vmem:[%s274_s3 + $0x20] sm:$0xff] %vm92_vm0, %v80_v37  ;;  %98 = vst.msk [vmem:[%s274_s3 + $0x28] sm:$0xff] %vm92_vm0, %v81_v38  ;;  %v50_v48 = vmul.f32 %v113_v1, %v27_v35  ;;  %v51_v49 = vmul.f32 %v113_v1, %v28_v36  ;;  %v69_v50 = vadd.f32 %v144_v2, %v46_v43 }
   0xc   :  { %99 = vst.msk [vmem:[%s274_s3 + $0x30] sm:$0xff] %vm92_vm0, %v82_v39  ;;  %100 = vst.msk [vmem:[%s274_s3 + $0x38] sm:$0xff] %vm92_vm0, %v83_v42  ;;  %v70_v51 = vadd.f32 %v144_v2, %v47_v44  ;;  %v71_v52 = vadd.f32 %v144_v2, %v48_v45  ;;  %v52_v53 = vmul.f32 %v113_v1, %v29_v41  ;;  %v84_v54 = vmax.f32 %v68_v46, 0.0 }
   0xd   :  { %v72_v55 = vadd.f32 %v144_v2, %v49_v47  ;;  %v73_v56 = vadd.f32 %v144_v2, %v50_v48  ;;  %v74_v57 = vadd.f32 %v144_v2, %v51_v49  ;;  %v85_v58 = vmax.f32 %v69_v50, 0.0 }
   0xe   :  { %v86_v59 = vmax.f32 %v70_v51, 0.0  ;;  %v87_v60 = vmax.f32 %v71_v52, 0.0  ;;  %v75_v61 = vadd.f32 %v144_v2, %v52_v53  ;;  %101 = vst.msk [vmem:[%s274_s3 + $0x40] sm:$0xff] %vm92_vm0, %v84_v54 }
   0xf   :  { %v88_v62 = vmax.f32 %v72_v55, 0.0  ;;  %v89_v63 = vmax.f32 %v73_v56, 0.0  ;;  %v90_v0 = vmax.f32 %v74_v57, 0.0  ;;  %102 = vst.msk [vmem:[%s274_s3 + $0x48] sm:$0xff] %vm92_vm0, %v85_v58 }
  0x10   :  { %103 = vst.msk [vmem:[%s274_s3 + $0x50] sm:$0xff] %vm92_vm0, %v86_v59  ;;  %104 = vst.msk [vmem:[%s274_s3 + $0x58] sm:$0xff] %vm92_vm0, %v87_v60  ;;  %v91_v1 = vmax.f32 %v75_v61, 0.0 }
  0x11   :  { %105 = vst.msk [vmem:[%s274_s3 + $0x60] sm:$0xff] %vm92_vm0, %v88_v62  ;;  %106 = vst.msk [vmem:[%s274_s3 + $0x68] sm:$0xff] %vm92_vm0, %v89_v63 }
  0x12   :  { %107 = vst.msk [vmem:[%s274_s3 + $0x70] sm:$0xff] %vm92_vm0, %v90_v0  ;;  %108 = vst.msk [vmem:[%s274_s3 + $0x78] sm:$0xff] %vm92_vm0, %v91_v1 }

// kernel: multiscale_forward.113
= control target key start
LH: loop header
LB: loop body
LE: loop exit
PB: predicated region body
PF: predicated region fallthrough
CT: control target
= control target key end

     0   :  { %vm272_vm0 = vcmask 130048   ;;  %s746_s1 = inlined_call_operand.vmem [shape: f32[256,16], index: 1, kind: input, shape index: {}]   ;;  %s747_s0 = inlined_call_operand.vmem [shape: f32[128,256], index: 0, kind: input, shape index: {}]   ;;  %s748_s2 = inlined_call_operand.vmem [shape: f32[1,16], index: 2, kind: input, shape index: {}]   ;;  %s749_s3 = inlined_call_operand.vmem [shape: f32[1,16], index: 3, kind: input, shape index: {}]   ;;  %s750_s4 = inlined_call_operand.vmem [shape: f32[128,16], index: 4, kind: output, shape index: {}]  }
   0x1   :  { %v65_v0 = vld [vmem:[%s746_s1 + $0x80] sm:$0xff]  ;;  %v66_v1 = vld [vmem:[%s746_s1 + $0x88] sm:$0xff]  ;;  %v67_v5 = vld [vmem:[%s746_s1 + $0x90] sm:$0xff] }
   0x2   :  { %v49_v2 = vld [vmem:[%s746_s1] sm:$0xff]  ;;  %v375_v3 = vpack.c.bf16 %v66_v1, %v65_v0  ;;  %v50_v4 = vld [vmem:[%s746_s1 + $0x8] sm:$0xff]  ;;  %v68_v6 = vld [vmem:[%s746_s1 + $0x98] sm:$0xff] }
   0x3   :  { %v377_v7 = vpack.c.bf16 %v50_v4, %v49_v2  ;;  %v379_v8 = vpack.c.bf16 %v68_v6, %v67_v5  ;;  %v51_v9 = vld [vmem:[%s746_s1 + $0x10] sm:$0xff]  ;;  %v52_v10 = vld [vmem:[%s746_s1 + $0x18] sm:$0xff]  ;;  %v69_v11 = vld [vmem:[%s746_s1 + $0xa0] sm:$0xff] }
   0x4   :  { %376 = vmatprep.subr.bf16.mxu0 %v375_v3  ;;  %407 = vmatprep.subr.bf16.mxu1 %v375_v3  ;;  %v70_v12 = vld [vmem:[%s746_s1 + $0xa8] sm:$0xff]  ;;  %v381_v13 = vpack.c.bf16 %v52_v10, %v51_v9  ;;  %v53_v15 = vld [vmem:[%s746_s1 + $0x20] sm:$0xff]  ;;  %v71_v17 = vld [vmem:[%s746_s1 + $0xb0] sm:$0xff] }
   0x5   :  { %378 = vmatpush3.bf16.msra.mxu0 %v377_v7  ;;  %415 = vmatpush3.bf16.msra.mxu1 %v377_v7  ;;  %v383_v14 = vpack.c.bf16 %v70_v12, %v69_v11  ;;  %v54_v16 = vld [vmem:[%s746_s1 + $0x28] sm:$0xff]  ;;  %v72_v18 = vld [vmem:[%s746_s1 + $0xb8] sm:$0xff]  ;;  %v55_v21 = vld [vmem:[%s746_s1 + $0x30] sm:$0xff] }
   0x6   :  { %380 = vmatprep.subr.bf16.mxu0 %v379_v8  ;;  %408 = vmatprep.subr.bf16.mxu1 %v379_v8  ;;  %v385_v19 = vpack.c.bf16 %v54_v16, %v53_v15  ;;  %v387_v20 = vpack.c.bf16 %v72_v18, %v71_v17  ;;  %v56_v22 = vld [vmem:[%s746_s1 + $0x38] sm:$0xff]  ;;  %v73_v23 = vld [vmem:[%s746_s1 + $0xc0] sm:$0xff]  ;;  %v74_v24 = vld [vmem:[%s746_s1 + $0xc8] sm:$0xff] }
   0x7   :  { %v18_v25 = vld [vmem:[%s747_s0 + $0x8] sm:$0xff]  ;;  %v389_v27 = vpack.c.bf16 %v56_v22, %v55_v21  ;;  %v391_v28 = vpack.c.bf16 %v74_v24, %v73_v23  ;;  %v57_v29 = vld [vmem:[%s746_s1 + $0x40] sm:$0xff]  ;;  %v75_v31 = vld [vmem:[%s746_s1 + $0xd0] sm:$0xff] }
   0x8   :  { %145 = vmatprep.mubr.f32.mxu0 %v18_v25  ;;  %v34_v26 = vld [vmem:[%s747_s0 + $0x88] sm:$0xff]  ;;  %v76_v32 = vld [vmem:[%s746_s1 + $0xd8] sm:$0xff]  ;;  %v59_v35 = vld [vmem:[%s746_s1 + $0x50] sm:$0xff] }
   0x9   :  { %382 = vmatpush3.bf16.msra.mxu0 %v381_v13  ;;  %416 = vmatpush3.bf16.msra.mxu1 %v381_v13  ;;  %v58_v30 = vld [vmem:[%s746_s1 + $0x48] sm:$0xff]  ;;  %v395_v34 = vpack.c.bf16 %v76_v32, %v75_v31  ;;  %v60_v36 = vld [vmem:[%s746_s1 + $0x58] sm:$0xff]  ;;  %v77_v37 = vld [vmem:[%s746_s1 + $0xe0] sm:$0xff] }
   0xa   :  { %384 = vmatprep.subr.bf16.mxu0 %v383_v14  ;;  %409 = vmatprep.subr.bf16.mxu1 %v383_v14  ;;  %v393_v33 = vpack.c.bf16 %v58_v30, %v57_v29  ;;  %v78_v38 = vld [vmem:[%s746_s1 + $0xe8] sm:$0xff]  ;;  %v397_v39 = vpack.c.bf16 %v60_v36, %v59_v35  ;;  %v61_v41 = vld [vmem:[%s746_s1 + $0x60] sm:$0xff]  ;;  %v79_v43 = vld [vmem:[%s746_s1 + $0xf0] sm:$0xff] }
   0xb   :  { %185 = vmatprep.mubr.f32.mxu1 %v34_v26  ;;  %v399_v40 = vpack.c.bf16 %v78_v38, %v77_v37  ;;  %v62_v42 = vld [vmem:[%s746_s1 + $0x68] sm:$0xff]  ;;  %v80_v44 = vld [vmem:[%s746_s1 + $0xf8] sm:$0xff]  ;;  %v63_v47 = vld [vmem:[%s746_s1 + $0x70] sm:$0xff] }
   0xc   :  { %v401_v45 = vpack.c.bf16 %v62_v42, %v61_v41  ;;  %v403_v46 = vpack.c.bf16 %v80_v44, %v79_v43  ;;  %v64_v48 = vld [vmem:[%s746_s1 + $0x78] sm:$0xff]  ;;  %v17_v50 = vld [vmem:[%s747_s0] sm:$0xff]  ;;  %v19_v54 = vld [vmem:[%s747_s0 + $0x10] sm:$0xff] }
   0xd   :  { %386 = vmatpush3.bf16.msra.mxu0 %v385_v19  ;;  %417 = vmatpush3.bf16.msra.mxu1 %v385_v19  ;;  %v405_v49 = vpack.c.bf16 %v64_v48, %v63_v47  ;;  %v33_v51 = vld [vmem:[%s747_s0 + $0x80] sm:$0xff]  ;;  %v20_v52 = vld [vmem:[%s747_s0 + $0x18] sm:$0xff]  ;;  %v35_v55 = vld [vmem:[%s747_s0 + $0x90] sm:$0xff] }
   0xe   :  { %388 = vmatprep.subr.bf16.mxu0 %v387_v20  ;;  %410 = vmatprep.subr.bf16.mxu1 %v387_v20  ;;  %v36_v53 = vld [vmem:[%s747_s0 + $0x98] sm:$0xff]  ;;  %v22_v56 = vld [vmem:[%s747_s0 + $0x28] sm:$0xff]  ;;  %v21_v58 = vld [vmem:[%s747_s0 + $0x20] sm:$0xff] }
   0xf   :  { %v38_v57 = vld [vmem:[%s747_s0 + $0xa8] sm:$0xff]  ;;  %v37_v59 = vld [vmem:[%s747_s0 + $0xa0] sm:$0xff]  ;;  %v24_v60 = vld [vmem:[%s747_s0 + $0x38] sm:$0xff] }
  0x10   :  { %v40_v61 = vld [vmem:[%s747_s0 + $0xb8] sm:$0xff]  ;;  %v23_v62 = vld [vmem:[%s747_s0 + $0x30] sm:$0xff]  ;;  %v26_v0 = vld [vmem:[%s747_s0 + $0x48] sm:$0xff] }
  0x11   :  { %390 = vmatpush3.bf16.msra.mxu0 %v389_v27  ;;  %418 = vmatpush3.bf16.msra.mxu1 %v389_v27  ;;  %v39_v63 = vld [vmem:[%s747_s0 + $0xb0] sm:$0xff]  ;;  %v42_v1 = vld [vmem:[%s747_s0 + $0xc8] sm:$0xff]  ;;  %v25_v2 = vld [vmem:[%s747_s0 + $0x40] sm:$0xff] }
  0x12   :  { %392 = vmatprep.subr.bf16.mxu0 %v391_v28  ;;  %411 = vmatprep.subr.bf16.mxu1 %v391_v28  ;;  %v41_v3 = vld [vmem:[%s747_s0 + $0xc0] sm:$0xff]  ;;  %v28_v4 = vld [vmem:[%s747_s0 + $0x58] sm:$0xff]  ;;  %v27_v6 = vld [vmem:[%s747_s0 + $0x50] sm:$0xff] }
  0x13   :  { %v44_v5 = vld [vmem:[%s747_s0 + $0xd8] sm:$0xff]  ;;  %v43_v7 = vld [vmem:[%s747_s0 + $0xd0] sm:$0xff]  ;;  %v30_v8 = vld [vmem:[%s747_s0 + $0x68] sm:$0xff] }
  0x14   :  { %v46_v9 = vld [vmem:[%s747_s0 + $0xe8] sm:$0xff]  ;;  %v29_v10 = vld [vmem:[%s747_s0 + $0x60] sm:$0xff]  ;;  %v32_v12 = vld [vmem:[%s747_s0 + $0x78] sm:$0xff] }
  0x15   :  { %394 = vmatpush3.bf16.msra.mxu0 %v393_v33  ;;  %419 = vmatpush3.bf16.msra.mxu1 %v393_v33  ;;  %v45_v11 = vld [vmem:[%s747_s0 + $0xe0] sm:$0xff]  ;;  %v48_v13 = vld [vmem:[%s747_s0 + $0xf8] sm:$0xff]  ;;  %v31_v14 = vld [vmem:[%s747_s0 + $0x70] sm:$0xff] }
  0x16   :  { %396 = vmatprep.subr.bf16.mxu0 %v395_v34  ;;  %412 = vmatprep.subr.bf16.mxu1 %v395_v34  ;;  %v47_v15 = vld [vmem:[%s747_s0 + $0xf0] sm:$0xff]  ;;  %v643_v19 = vld [vmem:[%s748_s2] ss:$0 sm:$0xff] }
  0x17   :  { %v648_v23 = vld [vmem:[%s749_s3] ss:$0 sm:$0xff] }
  0x19   :  { %398 = vmatpush3.bf16.msra.mxu0 %v397_v39  ;;  %420 = vmatpush3.bf16.msra.mxu1 %v397_v39 }
  0x1a   :  { %400 = vmatprep.subr.bf16.mxu0 %v399_v40  ;;  %413 = vmatprep.subr.bf16.mxu1 %v399_v40 }
  0x1d   :  { %402 = vmatpush3.bf16.msra.mxu0 %v401_v45  ;;  %421 = vmatpush3.bf16.msra.mxu1 %v401_v45 }
  0x1e   :  { %404 = vmatprep.subr.bf16.mxu0 %v403_v46  ;;  %414 = vmatprep.subr.bf16.mxu1 %v403_v46 }
  0x21   :  { %406 = vmatpush3.bf16.msra.mxu0 %v405_v49  ;;  %422 = vmatpush3.bf16.msra.mxu1 %v405_v49 }
  0x24   :  { %146 = vmatmul.mubr.f32.vlgmr.msra.gmra.mrb[0].mxu0 %v17_v50  ;;  %186 = vmatmul.mubr.f32.vlgmr.msra.gmra.mrb[0].mxu1 %v33_v51 }
  0x25   :  { %150 = vmatprep.mubr.f32.mxu0 %v20_v52  ;;  %190 = vmatprep.mubr.f32.mxu1 %v36_v53 }
  0x28   :  { %151 = vmatmul.mubr.f32.gmra.mrb[2].mxu0 %v19_v54  ;;  %191 = vmatmul.mubr.f32.gmra.mrb[2].mxu1 %v35_v55 }
  0x29   :  { %155 = vmatprep.mubr.f32.mxu0 %v22_v56  ;;  %195 = vmatprep.mubr.f32.mxu1 %v38_v57 }
  0x2c   :  { %156 = vmatmul.mubr.f32.gmra.mrb[4].mxu0 %v21_v58  ;;  %196 = vmatmul.mubr.f32.gmra.mrb[4].mxu1 %v37_v59 }
  0x2d   :  { %160 = vmatprep.mubr.f32.mxu0 %v24_v60  ;;  %200 = vmatprep.mubr.f32.mxu1 %v40_v61 }
  0x30   :  { %161 = vmatmul.mubr.f32.gmra.mrb[6].mxu0 %v23_v62  ;;  %201 = vmatmul.mubr.f32.gmra.mrb[6].mxu1 %v39_v63 }
  0x31   :  { %165 = vmatprep.mubr.f32.mxu0 %v26_v0  ;;  %205 = vmatprep.mubr.f32.mxu1 %v42_v1 }
  0x34   :  { %166 = vmatmul.mubr.f32.gmra.mrb[8].mxu0 %v25_v2  ;;  %206 = vmatmul.mubr.f32.gmra.mrb[8].mxu1 %v41_v3 }
  0x35   :  { %170 = vmatprep.mubr.f32.mxu0 %v28_v4  ;;  %210 = vmatprep.mubr.f32.mxu1 %v44_v5 }
  0x38   :  { %171 = vmatmul.mubr.f32.gmra.mrb[10].mxu0 %v27_v6  ;;  %211 = vmatmul.mubr.f32.gmra.mrb[10].mxu1 %v43_v7 }
  0x39   :  { %175 = vmatprep.mubr.f32.mxu0 %v30_v8  ;;  %215 = vmatprep.mubr.f32.mxu1 %v46_v9 }
  0x3c   :  { %176 = vmatmul.mubr.f32.gmra.mrb[12].mxu0 %v29_v10  ;;  %216 = vmatmul.mubr.f32.gmra.mrb[12].mxu1 %v45_v11 }
  0x3d   :  { %180 = vmatprep.mubr.f32.mxu0 %v32_v12  ;;  %220 = vmatprep.mubr.f32.mxu1 %v48_v13 }
  0x40   :  { %181 = vmatmul.mubr.f32.gmra.mrb[14].mxu0 %v31_v14  ;;  %221 = vmatmul.mubr.f32.gmra.mrb[14].mxu1 %v47_v15 }
  0xf7   :  { %v327_v16 = vpop.f32.mrb[0].mxu0  ;;  %v351_v17 = vpop.f32.mrb[0].mxu1 }
  0xf8   :  { %v328_v18 = vpop.f32.mrb[1].mxu0  ;;  %v352_v20 = vpop.f32.mrb[1].mxu1 }
  0xf9   :  { %v329_v21 = vadd.f32 %v328_v18, %v327_v16  ;;  %v353_v22 = vadd.f32 %v352_v20, %v351_v17 }
  0xfb   :  { %v233_v24 = vmul.f32 %v329_v21, %v643_v19  ;;  %v241_v25 = vmul.f32 %v353_v22, %v643_v19  ;;  %v330_v26 = vpop.f32.mrb[2].mxu0  ;;  %v354_v27 = vpop.f32.mrb[2].mxu1 }
  0xfc   :  { %v331_v28 = vpop.f32.mrb[3].mxu0  ;;  %v355_v29 = vpop.f32.mrb[3].mxu1 }
  0xfd   :  { %v256_v30 = vadd.f32 %v648_v23, %v233_v24  ;;  %v264_v31 = vadd.f32 %v648_v23, %v241_v25  ;;  %v332_v32 = vadd.f32 %v331_v28, %v330_v26  ;;  %v356_v33 = vadd.f32 %v355_v29, %v354_v27 }
  0xff   :  { %273 = vst.msk [vmem:[%s750_s4] sm:$0xff] %vm272_vm0, %v256_v30  ;;  %281 = vst.msk [vmem:[%s750_s4 + $0x40] sm:$0xff] %vm272_vm0, %v264_v31  ;;  %v234_v34 = vmul.f32 %v332_v32, %v643_v19  ;;  %v242_v35 = vmul.f32 %v356_v33, %v643_v19  ;;  %v333_v36 = vpop.f32.mrb[4].mxu0  ;;  %v357_v37 = vpop.f32.mrb[4].mxu1 }
 0x100   :  { %v334_v38 = vpop.f32.mrb[5].mxu0  ;;  %v358_v39 = vpop.f32.mrb[5].mxu1 }
 0x101   :  { %v257_v40 = vadd.f32 %v648_v23, %v234_v34  ;;  %v265_v41 = vadd.f32 %v648_v23, %v242_v35  ;;  %v335_v42 = vadd.f32 %v334_v38, %v333_v36  ;;  %v359_v43 = vadd.f32 %v358_v39, %v357_v37 }
 0x103   :  { %274 = vst.msk [vmem:[%s750_s4 + $0x8] sm:$0xff] %vm272_vm0, %v257_v40  ;;  %282 = vst.msk [vmem:[%s750_s4 + $0x48] sm:$0xff] %vm272_vm0, %v265_v41  ;;  %v235_v44 = vmul.f32 %v335_v42, %v643_v19  ;;  %v243_v45 = vmul.f32 %v359_v43, %v643_v19  ;;  %v336_v46 = vpop.f32.mrb[6].mxu0  ;;  %v360_v47 = vpop.f32.mrb[6].mxu1 }
 0x104   :  { %v337_v48 = vpop.f32.mrb[7].mxu0  ;;  %v361_v49 = vpop.f32.mrb[7].mxu1 }
 0x105   :  { %v258_v50 = vadd.f32 %v648_v23, %v235_v44  ;;  %v266_v51 = vadd.f32 %v648_v23, %v243_v45  ;;  %v338_v52 = vadd.f32 %v337_v48, %v336_v46  ;;  %v362_v53 = vadd.f32 %v361_v49, %v360_v47 }
 0x107   :  { %275 = vst.msk [vmem:[%s750_s4 + $0x10] sm:$0xff] %vm272_vm0, %v258_v50  ;;  %283 = vst.msk [vmem:[%s750_s4 + $0x50] sm:$0xff] %vm272_vm0, %v266_v51  ;;  %v236_v54 = vmul.f32 %v338_v52, %v643_v19  ;;  %v244_v55 = vmul.f32 %v362_v53, %v643_v19  ;;  %v339_v56 = vpop.f32.mrb[8].mxu0  ;;  %v363_v57 = vpop.f32.mrb[8].mxu1 }
 0x108   :  { %v340_v58 = vpop.f32.mrb[9].mxu0  ;;  %v364_v59 = vpop.f32.mrb[9].mxu1 }
 0x109   :  { %v259_v60 = vadd.f32 %v648_v23, %v236_v54  ;;  %v267_v61 = vadd.f32 %v648_v23, %v244_v55  ;;  %v341_v62 = vadd.f32 %v340_v58, %v339_v56  ;;  %v365_v63 = vadd.f32 %v364_v59, %v363_v57 }
 0x10b   :  { %276 = vst.msk [vmem:[%s750_s4 + $0x18] sm:$0xff] %vm272_vm0, %v259_v60  ;;  %284 = vst.msk [vmem:[%s750_s4 + $0x58] sm:$0xff] %vm272_vm0, %v267_v61  ;;  %v237_v0 = vmul.f32 %v341_v62, %v643_v19  ;;  %v245_v1 = vmul.f32 %v365_v63, %v643_v19  ;;  %v342_v2 = vpop.f32.mrb[10].mxu0  ;;  %v366_v3 = vpop.f32.mrb[10].mxu1 }
 0x10c   :  { %v343_v4 = vpop.f32.mrb[11].mxu0  ;;  %v367_v5 = vpop.f32.mrb[11].mxu1 }
 0x10d   :  { %v260_v6 = vadd.f32 %v648_v23, %v237_v0  ;;  %v268_v7 = vadd.f32 %v648_v23, %v245_v1  ;;  %v344_v8 = vadd.f32 %v343_v4, %v342_v2  ;;  %v368_v9 = vadd.f32 %v367_v5, %v366_v3 }
 0x10f   :  { %277 = vst.msk [vmem:[%s750_s4 + $0x20] sm:$0xff] %vm272_vm0, %v260_v6  ;;  %285 = vst.msk [vmem:[%s750_s4 + $0x60] sm:$0xff] %vm272_vm0, %v268_v7  ;;  %v238_v10 = vmul.f32 %v344_v8, %v643_v19  ;;  %v246_v11 = vmul.f32 %v368_v9, %v643_v19  ;;  %v345_v12 = vpop.f32.mrb[12].mxu0  ;;  %v369_v13 = vpop.f32.mrb[12].mxu1 }
 0x110   :  { %v346_v14 = vpop.f32.mrb[13].mxu0  ;;  %v370_v15 = vpop.f32.mrb[13].mxu1 }
 0x111   :  { %v261_v16 = vadd.f32 %v648_v23, %v238_v10  ;;  %v269_v17 = vadd.f32 %v648_v23, %v246_v11  ;;  %v347_v18 = vadd.f32 %v346_v14, %v345_v12  ;;  %v371_v20 = vadd.f32 %v370_v15, %v369_v13 }
 0x113   :  { %278 = vst.msk [vmem:[%s750_s4 + $0x28] sm:$0xff] %vm272_vm0, %v261_v16  ;;  %286 = vst.msk [vmem:[%s750_s4 + $0x68] sm:$0xff] %vm272_vm0, %v269_v17  ;;  %v239_v21 = vmul.f32 %v347_v18, %v643_v19  ;;  %v247_v22 = vmul.f32 %v371_v20, %v643_v19  ;;  %v348_v24 = vpop.f32.mrb[14].mxu0  ;;  %v372_v25 = vpop.f32.mrb[14].mxu1 }
 0x114   :  { %v349_v26 = vpop.f32.mrb[15].mxu0  ;;  %v373_v27 = vpop.f32.mrb[15].mxu1 }
 0x115   :  { %v262_v28 = vadd.f32 %v648_v23, %v239_v21  ;;  %v270_v29 = vadd.f32 %v648_v23, %v247_v22  ;;  %v350_v30 = vadd.f32 %v349_v26, %v348_v24  ;;  %v374_v31 = vadd.f32 %v373_v27, %v372_v25 }
 0x117   :  { %279 = vst.msk [vmem:[%s750_s4 + $0x30] sm:$0xff] %vm272_vm0, %v262_v28  ;;  %287 = vst.msk [vmem:[%s750_s4 + $0x70] sm:$0xff] %vm272_vm0, %v270_v29  ;;  %v240_v32 = vmul.f32 %v350_v30, %v643_v19  ;;  %v248_v33 = vmul.f32 %v374_v31, %v643_v19 }
 0x119   :  { %v263_v34 = vadd.f32 %v648_v23, %v240_v32  ;;  %v271_v35 = vadd.f32 %v648_v23, %v248_v33 }
 0x11b   :  { %280 = vst.msk [vmem:[%s750_s4 + $0x38] sm:$0xff] %vm272_vm0, %v263_v34  ;;  %288 = vst.msk [vmem:[%s750_s4 + $0x78] sm:$0xff] %vm272_vm0, %v271_v35 }

// kernel: multiscale_forward.114
= control target key start
LH: loop header
LB: loop body
LE: loop exit
PB: predicated region body
PF: predicated region fallthrough
CT: control target
= control target key end

     0   :  { %vm92_vm0 = vcmask 261120   ;;  %s271_s0 = inlined_call_operand.vmem [shape: f32[128,32], index: 0, kind: input, shape index: {}]   ;;  %s272_s1 = inlined_call_operand.vmem [shape: f32[1,32], index: 1, kind: input, shape index: {}]   ;;  %s273_s2 = inlined_call_operand.vmem [shape: f32[1,32], index: 2, kind: input, shape index: {}]   ;;  %s274_s3 = inlined_call_operand.vmem [shape: f32[128,32], index: 3, kind: output, shape index: {}]  }
   0x1   :  { %v14_v0 = vld [vmem:[%s271_s0] sm:$0xff]  ;;  %v15_v4 = vld [vmem:[%s271_s0 + $0x8] sm:$0xff]  ;;  %v16_v5 = vld [vmem:[%s271_s0 + $0x10] sm:$0xff] }
   0x2   :  { %v113_v1 = vld [vmem:[%s272_s1] ss:$0 sm:$0xff]  ;;  %v17_v6 = vld [vmem:[%s271_s0 + $0x18] sm:$0xff]  ;;  %v19_v11 = vld [vmem:[%s271_s0 + $0x28] sm:$0xff] }
   0x3   :  { %v144_v2 = vld [vmem:[%s273_s2] ss:$0 sm:$0xff]  ;;  %v37_v3 = vmul.f32 %v113_v1, %v14_v0  ;;  %v38_v7 = vmul.f32 %v113_v1, %v15_v4  ;;  %v39_v8 = vmul.f32 %v113_v1, %v16_v5  ;;  %v40_v9 = vmul.f32 %v113_v1, %v17_v6  ;;  %v20_v12 = vld [vmem:[%s271_s0 + $0x30] sm:$0xff]  ;;  %v21_v17 = vld [vmem:[%s271_s0 + $0x38] sm:$0xff] }
   0x4   :  { %v18_v10 = vld [vmem:[%s271_s0 + $0x20] sm:$0xff]  ;;  %v42_v15 = vmul.f32 %v113_v1, %v19_v11  ;;  %v43_v16 = vmul.f32 %v113_v1, %v20_v12  ;;  %v44_v21 = vmul.f32 %v113_v1, %v21_v17  ;;  %v23_v27 = vld [vmem:[%s271_s0 + $0x48] sm:$0xff]  ;;  %v24_v28 = vld [vmem:[%s271_s0 + $0x50] sm:$0xff] }
   0x5   :  { %v60_v13 = vadd.f32 %v144_v2, %v37_v3  ;;  %v41_v14 = vmul.f32 %v113_v1, %v18_v10  ;;  %v61_v18 = vadd.f32 %v144_v2, %v38_v7  ;;  %v62_v19 = vadd.f32 %v144_v2, %v39_v8  ;;  %v22_v22 = vld [vmem:[%s271_s0 + $0x40] sm:$0xff]  ;;  %v25_v29 = vld [vmem:[%s271_s0 + $0x58] sm:$0xff]  ;;  %v27_v35 = vld [vmem:[%s271_s0 + $0x68] sm:$0xff] }
   0x6   :  { %v63_v20 = vadd.f32 %v144_v2, %v40_v9  ;;  %v65_v25 = vadd.f32 %v144_v2, %v42_v15  ;;  %v66_v26 = vadd.f32 %v144_v2, %v43_v16  ;;  %v67_v33 = vadd.f32 %v144_v2, %v44_v21  ;;  %v26_v34 = vld [vmem:[%s271_s0 + $0x60] sm:$0xff]  ;;  %v28_v36 = vld [vmem:[%s271_s0 + $0x70] sm:$0xff]  ;;  %v29_v41 = vld [vmem:[%s271_s0 + $0x78] sm:$0xff] }
   0x7   :  { %v76_v23 = vmax.f32 %v60_v13, 0.0  ;;  %v64_v24 = vadd.f32 %v144_v2, %v41_v14  ;;  %v77_v30 = vmax.f32 %v61_v18, 0.0  ;;  %v78_v31 = vmax.f32 %v62_v19, 0.0 }
   0x8   :  { %v79_v32 = vmax.f32 %v63_v20, 0.0  ;;  %v81_v38 = vmax.f32 %v65_v25, 0.0  ;;  %v82_v39 = vmax.f32 %v66_v26, 0.0  ;;  %v45_v40 = vmul.f32 %v113_v1, %v22_v22 }
   0x9   :  { %93 = vst.msk [vmem:[%s274_s3] sm:$0xff] %vm92_vm0, %v76_v23  ;;  %v80_v37 = vmax.f32 %v64_v24, 0.0  ;;  %94 = vst.msk [vmem:[%s274_s3 + $0x8] sm:$0xff] %vm92_vm0, %v77_v30  ;;  %v83_v42 = vmax.f32 %v67_v33, 0.0  ;;  %v46_v43 = vmul.f32 %v113_v1, %v23_v27  ;;  %v47_v44 = vmul.f32 %v113_v1, %v24_v28 }
   0xa   :  { %95 = vst.msk [vmem:[%s274_s3 + $0x10] sm:$0xff] %vm92_vm0, %v78_v31  ;;  %96 = vst.msk [vmem:[%s274_s3 + $0x18] sm:$0xff] %vm92_vm0, %v79_v32  ;;  %v48_v45 = vmul.f32 %v113_v1, %v25_v29  ;;  %v68_v46 = vadd.f32 %v144_v2, %v45_v40  ;;  %v49_v47 = vmul.f32 %v113_v1, %v26_v34 }
   0xb   :  { %97 = vst.msk [vmem:[%s274_s3 + $0x20] sm:$0xff] %vm92_vm0, %v80_v37  ;;  %98 = vst.msk [vmem:[%s274_s3 + $0x28] sm:$0xff] %vm92_vm0, %v81_v38  ;;  %v50_v48 = vmul.f32 %v113_v1, %v27_v35  ;;  %v51_v49 = vmul.f32 %v113_v1, %v28_v36  ;;  %v69_v50 = vadd.f32 %v144_v2, %v46_v43 }
   0xc   :  { %99 = vst.msk [vmem:[%s274_s3 + $0x30] sm:$0xff] %vm92_vm0, %v82_v39  ;;  %100 = vst.msk [vmem:[%s274_s3 + $0x38] sm:$0xff] %vm92_vm0, %v83_v42  ;;  %v70_v51 = vadd.f32 %v144_v2, %v47_v44  ;;  %v71_v52 = vadd.f32 %v144_v2, %v48_v45  ;;  %v52_v53 = vmul.f32 %v113_v1, %v29_v41  ;;  %v84_v54 = vmax.f32 %v68_v46, 0.0 }
   0xd   :  { %v72_v55 = vadd.f32 %v144_v2, %v49_v47  ;;  %v73_v56 = vadd.f32 %v144_v2, %v50_v48  ;;  %v74_v57 = vadd.f32 %v144_v2, %v51_v49  ;;  %v85_v58 = vmax.f32 %v69_v50, 0.0 }
   0xe   :  { %v86_v59 = vmax.f32 %v70_v51, 0.0  ;;  %v87_v60 = vmax.f32 %v71_v52, 0.0  ;;  %v75_v61 = vadd.f32 %v144_v2, %v52_v53  ;;  %101 = vst.msk [vmem:[%s274_s3 + $0x40] sm:$0xff] %vm92_vm0, %v84_v54 }
   0xf   :  { %v88_v62 = vmax.f32 %v72_v55, 0.0  ;;  %v89_v63 = vmax.f32 %v73_v56, 0.0  ;;  %v90_v0 = vmax.f32 %v74_v57, 0.0  ;;  %102 = vst.msk [vmem:[%s274_s3 + $0x48] sm:$0xff] %vm92_vm0, %v85_v58 }
  0x10   :  { %103 = vst.msk [vmem:[%s274_s3 + $0x50] sm:$0xff] %vm92_vm0, %v86_v59  ;;  %104 = vst.msk [vmem:[%s274_s3 + $0x58] sm:$0xff] %vm92_vm0, %v87_v60  ;;  %v91_v1 = vmax.f32 %v75_v61, 0.0 }
  0x11   :  { %105 = vst.msk [vmem:[%s274_s3 + $0x60] sm:$0xff] %vm92_vm0, %v88_v62  ;;  %106 = vst.msk [vmem:[%s274_s3 + $0x68] sm:$0xff] %vm92_vm0, %v89_v63 }
  0x12   :  { %107 = vst.msk [vmem:[%s274_s3 + $0x70] sm:$0xff] %vm92_vm0, %v90_v0  ;;  %108 = vst.msk [vmem:[%s274_s3 + $0x78] sm:$0xff] %vm92_vm0, %v91_v1 }

// kernel: multiscale_forward.115
= control target key start
LH: loop header
LB: loop body
LE: loop exit
PB: predicated region body
PF: predicated region fallthrough
CT: control target
= control target key end

     0   :  { %vm256_vm0 = vcmask 130048   ;;  %s642_s1 = inlined_call_operand.vmem [shape: f32[128,16], index: 1, kind: input, shape index: {}]   ;;  %s643_s0 = inlined_call_operand.vmem [shape: f32[128,128], index: 0, kind: input, shape index: {}]   ;;  %s644_s2 = inlined_call_operand.vmem [shape: f32[1,16], index: 2, kind: input, shape index: {}]   ;;  %s645_s3 = inlined_call_operand.vmem [shape: f32[1,16], index: 3, kind: input, shape index: {}]   ;;  %s646_s4 = inlined_call_operand.vmem [shape: f32[128,16], index: 4, kind: output, shape index: {}]  }
   0x1   :  { %v33_v0 = vld [vmem:[%s642_s1] sm:$0xff]  ;;  %v34_v1 = vld [vmem:[%s642_s1 + $0x8] sm:$0xff]  ;;  %v35_v2 = vld [vmem:[%s642_s1 + $0x10] sm:$0xff] }
   0x2   :  { %v367_v3 = vpack.c.bf16 %v34_v1, %v33_v0  ;;  %v36_v4 = vld [vmem:[%s642_s1 + $0x18] sm:$0xff]  ;;  %v37_v6 = vld [vmem:[%s642_s1 + $0x20] sm:$0xff]  ;;  %v38_v7 = vld [vmem:[%s642_s1 + $0x28] sm:$0xff] }
   0x3   :  { %v371_v5 = vpack.c.bf16 %v36_v4, %v35_v2  ;;  %v375_v8 = vpack.c.bf16 %v38_v7, %v37_v6  ;;  %v17_v9 = vld [vmem:[%s643_s0] sm:$0xff]  ;;  %v39_v11 = vld [vmem:[%s642_s1 + $0x30] sm:$0xff]  ;;  %v40_v12 = vld [vmem:[%s642_s1 + $0x38] sm:$0xff] }
   0x4   :  { %368 = vmatprep.subr.bf16.mxu0 %v367_v3  ;;  %399 = vmatprep.subr.bf16.mxu1 %v367_v3  ;;  %v25_v10 = vld [vmem:[%s643_s0 + $0x40] sm:$0xff]  ;;  %v379_v13 = vpack.c.bf16 %v40_v12, %v39_v11  ;;  %v42_v15 = vld [vmem:[%s642_s1 + $0x48] sm:$0xff]  ;;  %v43_v17 = vld [vmem:[%s642_s1 + $0x50] sm:$0xff] }
   0x5   :  { %370 = vmatpush3.bf16.msra.mxu0 %v367_v3  ;;  %407 = vmatpush3.bf16.msra.mxu1 %v367_v3  ;;  %v41_v14 = vld [vmem:[%s642_s1 + $0x40] sm:$0xff]  ;;  %v44_v18 = vld [vmem:[%s642_s1 + $0x58] sm:$0xff]  ;;  %v46_v21 = vld [vmem:[%s642_s1 + $0x68] sm:$0xff] }
   0x6   :  { %372 = vmatprep.subr.bf16.mxu0 %v371_v5  ;;  %400 = vmatprep.subr.bf16.mxu1 %v371_v5  ;;  %v383_v16 = vpack.c.bf16 %v42_v15, %v41_v14  ;;  %v387_v19 = vpack.c.bf16 %v44_v18, %v43_v17  ;;  %v45_v20 = vld [vmem:[%s642_s1 + $0x60] sm:$0xff]  ;;  %v47_v23 = vld [vmem:[%s642_s1 + $0x70] sm:$0xff]  ;;  %v48_v24 = vld [vmem:[%s642_s1 + $0x78] sm:$0xff] }
   0x7   :  { %343 = vmatprep.mubr.f32.mxu0 %v17_v9  ;;  %355 = vmatprep.mubr.f32.mxu1 %v25_v10  ;;  %v391_v22 = vpack.c.bf16 %v46_v21, %v45_v20  ;;  %v395_v25 = vpack.c.bf16 %v48_v24, %v47_v23  ;;  %v18_v26 = vld [vmem:[%s643_s0 + $0x8] sm:$0xff]  ;;  %v19_v28 = vld [vmem:[%s643_s0 + $0x10] sm:$0xff]  ;;  %v20_v30 = vld [vmem:[%s643_s0 + $0x18] sm:$0xff] }
   0x8   :  { %v26_v27 = vld [vmem:[%s643_s0 + $0x48] sm:$0xff]  ;;  %v27_v29 = vld [vmem:[%s643_s0 + $0x50] sm:$0xff]  ;;  %v28_v31 = vld [vmem:[%s643_s0 + $0x58] sm:$0xff] }
   0x9   :  { %374 = vmatpush3.bf16.msra.mxu0 %v371_v5  ;;  %408 = vmatpush3.bf16.msra.mxu1 %v371_v5  ;;  %v21_v32 = vld [vmem:[%s643_s0 + $0x20] sm:$0xff]  ;;  %v22_v34 = vld [vmem:[%s643_s0 + $0x28] sm:$0xff]  ;;  %v23_v36 = vld [vmem:[%s643_s0 + $0x30] sm:$0xff] }
   0xa   :  { %376 = vmatprep.subr.bf16.mxu0 %v375_v8  ;;  %401 = vmatprep.subr.bf16.mxu1 %v375_v8  ;;  %v29_v33 = vld [vmem:[%s643_s0 + $0x60] sm:$0xff]  ;;  %v30_v35 = vld [vmem:[%s643_s0 + $0x68] sm:$0xff]  ;;  %v31_v37 = vld [vmem:[%s643_s0 + $0x70] sm:$0xff] }
   0xb   :  { %v24_v38 = vld [vmem:[%s643_s0 + $0x38] sm:$0xff]  ;;  %v539_v40 = vld [vmem:[%s644_s2] ss:$0 sm:$0xff] }
   0xc   :  { %v32_v39 = vld [vmem:[%s643_s0 + $0x78] sm:$0xff]  ;;  %v544_v42 = vld [vmem:[%s645_s3] ss:$0 sm:$0xff] }
   0xd   :  { %378 = vmatpush3.bf16.msra.mxu0 %v375_v8  ;;  %409 = vmatpush3.bf16.msra.mxu1 %v375_v8 }
   0xe   :  { %380 = vmatprep.subr.bf16.mxu0 %v379_v13  ;;  %402 = vmatprep.subr.bf16.mxu1 %v379_v13 }
  0x11   :  { %382 = vmatpush3.bf16.msra.mxu0 %v379_v13  ;;  %410 = vmatpush3.bf16.msra.mxu1 %v379_v13 }
  0x12   :  { %384 = vmatprep.subr.bf16.mxu0 %v383_v16  ;;  %403 = vmatprep.subr.bf16.mxu1 %v383_v16 }
  0x15   :  { %386 = vmatpush3.bf16.msra.mxu0 %v383_v16  ;;  %411 = vmatpush3.bf16.msra.mxu1 %v383_v16 }
  0x16   :  { %388 = vmatprep.subr.bf16.mxu0 %v387_v19  ;;  %404 = vmatprep.subr.bf16.mxu1 %v387_v19 }
  0x19   :  { %390 = vmatpush3.bf16.msra.mxu0 %v387_v19  ;;  %412 = vmatpush3.bf16.msra.mxu1 %v387_v19 }
  0x1a   :  { %392 = vmatprep.subr.bf16.mxu0 %v391_v22  ;;  %405 = vmatprep.subr.bf16.mxu1 %v391_v22 }
  0x1d   :  { %394 = vmatpush3.bf16.msra.mxu0 %v391_v22  ;;  %413 = vmatpush3.bf16.msra.mxu1 %v391_v22 }
  0x1e   :  { %396 = vmatprep.subr.bf16.mxu0 %v395_v25  ;;  %406 = vmatprep.subr.bf16.mxu1 %v395_v25 }
  0x21   :  { %398 = vmatpush3.bf16.msra.mxu0 %v395_v25  ;;  %414 = vmatpush3.bf16.msra.mxu1 %v395_v25 }
  0x24   :  { %344 = vmatmul.mubr.f32.vlgmr.msra.gmra.mrb[0].mxu0 %v18_v26  ;;  %356 = vmatmul.mubr.f32.vlgmr.msra.gmra.mrb[0].mxu1 %v26_v27 }
  0x25   :  { %346 = vmatprep.mubr.f32.mxu0 %v19_v28  ;;  %358 = vmatprep.mubr.f32.mxu1 %v27_v29 }
  0x28   :  { %347 = vmatmul.mubr.f32.gmra.mrb[2].mxu0 %v20_v30  ;;  %359 = vmatmul.mubr.f32.gmra.mrb[2].mxu1 %v28_v31 }
  0x29   :  { %349 = vmatprep.mubr.f32.mxu0 %v21_v32  ;;  %361 = vmatprep.mubr.f32.mxu1 %v29_v33 }
  0x2c   :  { %350 = vmatmul.mubr.f32.gmra.mrb[4].mxu0 %v22_v34  ;;  %362 = vmatmul.mubr.f32.gmra.mrb[4].mxu1 %v30_v35 }
  0x2d   :  { %352 = vmatprep.mubr.f32.mxu0 %v23_v36  ;;  %364 = vmatprep.mubr.f32.mxu1 %v31_v37 }
  0x30   :  { %353 = vmatmul.mubr.f32.gmra.mrb[6].mxu0 %v24_v38  ;;  %365 = vmatmul.mubr.f32.gmra.mrb[6].mxu1 %v32_v39 }
  0xf7   :  { %v345_v41 = vpop.f32.mrb[0].mxu0  ;;  %v357_v43 = vpop.f32.mrb[0].mxu1 }
  0xf8   :  { %v202_v44 = vmul.f32 %v345_v41, %v539_v40  ;;  %v210_v45 = vmul.f32 %v357_v43, %v539_v40  ;;  %v115_v46 = vpop.f32.mrb[1].mxu0  ;;  %v155_v47 = vpop.f32.mrb[1].mxu1 }
  0xf9   :  { %v201_v48 = vmul.f32 %v539_v40, %v115_v46  ;;  %v209_v49 = vmul.f32 %v539_v40, %v155_v47 }
  0xfa   :  { %v225_v50 = vadd.f32 %v544_v42, %v202_v44  ;;  %v233_v51 = vadd.f32 %v544_v42, %v210_v45 }
  0xfb   :  { %v224_v52 = vadd.f32 %v544_v42, %v201_v48  ;;  %v232_v53 = vadd.f32 %v544_v42, %v209_v49  ;;  %v348_v54 = vpop.f32.mrb[2].mxu0  ;;  %v360_v55 = vpop.f32.mrb[2].mxu1 }
  0xfc   :  { %v241_v56 = vmax.f32 %v225_v50, 0.0  ;;  %v249_v57 = vmax.f32 %v233_v51, 0.0  ;;  %v204_v58 = vmul.f32 %v348_v54, %v539_v40  ;;  %v212_v59 = vmul.f32 %v360_v55, %v539_v40  ;;  %v125_v60 = vpop.f32.mrb[3].mxu0  ;;  %v165_v61 = vpop.f32.mrb[3].mxu1 }
  0xfd   :  { %v240_v62 = vmax.f32 %v224_v52, 0.0  ;;  %v248_v63 = vmax.f32 %v232_v53, 0.0  ;;  %v203_v0 = vmul.f32 %v539_v40, %v125_v60  ;;  %v211_v1 = vmul.f32 %v539_v40, %v165_v61 }
  0xfe   :  { %258 = vst.msk [vmem:[%s646_s4 + $0x8] sm:$0xff] %vm256_vm0, %v241_v56  ;;  %266 = vst.msk [vmem:[%s646_s4 + $0x48] sm:$0xff] %vm256_vm0, %v249_v57  ;;  %v227_v2 = vadd.f32 %v544_v42, %v204_v58  ;;  %v235_v3 = vadd.f32 %v544_v42, %v212_v59 }
  0xff   :  { %257 = vst.msk [vmem:[%s646_s4] sm:$0xff] %vm256_vm0, %v240_v62  ;;  %265 = vst.msk [vmem:[%s646_s4 + $0x40] sm:$0xff] %vm256_vm0, %v248_v63  ;;  %v226_v4 = vadd.f32 %v544_v42, %v203_v0  ;;  %v234_v5 = vadd.f32 %v544_v42, %v211_v1  ;;  %v351_v6 = vpop.f32.mrb[4].mxu0  ;;  %v363_v7 = vpop.f32.mrb[4].mxu1 }
 0x100   :  { %v243_v8 = vmax.f32 %v227_v2, 0.0  ;;  %v251_v9 = vmax.f32 %v235_v3, 0.0  ;;  %v206_v10 = vmul.f32 %v351_v6, %v539_v40  ;;  %v214_v11 = vmul.f32 %v363_v7, %v539_v40  ;;  %v135_v12 = vpop.f32.mrb[5].mxu0  ;;  %v175_v13 = vpop.f32.mrb[5].mxu1 }
 0x101   :  { %v242_v14 = vmax.f32 %v226_v4, 0.0  ;;  %v250_v15 = vmax.f32 %v234_v5, 0.0  ;;  %v205_v16 = vmul.f32 %v539_v40, %v135_v12  ;;  %v213_v17 = vmul.f32 %v539_v40, %v175_v13 }
 0x102   :  { %260 = vst.msk [vmem:[%s646_s4 + $0x18] sm:$0xff] %vm256_vm0, %v243_v8  ;;  %268 = vst.msk [vmem:[%s646_s4 + $0x58] sm:$0xff] %vm256_vm0, %v251_v9  ;;  %v229_v18 = vadd.f32 %v544_v42, %v206_v10  ;;  %v237_v19 = vadd.f32 %v544_v42, %v214_v11 }
 0x103   :  { %259 = vst.msk [vmem:[%s646_s4 + $0x10] sm:$0xff] %vm256_vm0, %v242_v14  ;;  %267 = vst.msk [vmem:[%s646_s4 + $0x50] sm:$0xff] %vm256_vm0, %v250_v15  ;;  %v228_v20 = vadd.f32 %v544_v42, %v205_v16  ;;  %v236_v21 = vadd.f32 %v544_v42, %v213_v17  ;;  %v354_v22 = vpop.f32.mrb[6].mxu0  ;;  %v366_v23 = vpop.f32.mrb[6].mxu1 }
 0x104   :  { %v245_v24 = vmax.f32 %v229_v18, 0.0  ;;  %v253_v25 = vmax.f32 %v237_v19, 0.0  ;;  %v208_v26 = vmul.f32 %v354_v22, %v539_v40  ;;  %v216_v27 = vmul.f32 %v366_v23, %v539_v40  ;;  %v145_v28 = vpop.f32.mrb[7].mxu0  ;;  %v185_v29 = vpop.f32.mrb[7].mxu1 }
 0x105   :  { %v244_v30 = vmax.f32 %v228_v20, 0.0  ;;  %v252_v31 = vmax.f32 %v236_v21, 0.0  ;;  %v207_v32 = vmul.f32 %v539_v40, %v145_v28  ;;  %v215_v33 = vmul.f32 %v539_v40, %v185_v29 }
 0x106   :  { %262 = vst.msk [vmem:[%s646_s4 + $0x28] sm:$0xff] %vm256_vm0, %v245_v24  ;;  %270 = vst.msk [vmem:[%s646_s4 + $0x68] sm:$0xff] %vm256_vm0, %v253_v25  ;;  %v231_v34 = vadd.f32 %v544_v42, %v208_v26  ;;  %v239_v35 = vadd.f32 %v544_v42, %v216_v27 }
 0x107   :  { %261 = vst.msk [vmem:[%s646_s4 + $0x20] sm:$0xff] %vm256_vm0, %v244_v30  ;;  %269 = vst.msk [vmem:[%s646_s4 + $0x60] sm:$0xff] %vm256_vm0, %v252_v31  ;;  %v230_v36 = vadd.f32 %v544_v42, %v207_v32  ;;  %v238_v37 = vadd.f32 %v544_v42, %v215_v33 }
 0x108   :  { %v247_v38 = vmax.f32 %v231_v34, 0.0  ;;  %v255_v39 = vmax.f32 %v239_v35, 0.0 }
 0x109   :  { %v246_v40 = vmax.f32 %v230_v36, 0.0  ;;  %v254_v41 = vmax.f32 %v238_v37, 0.0 }
 0x10a   :  { %264 = vst.msk [vmem:[%s646_s4 + $0x38] sm:$0xff] %vm256_vm0, %v247_v38  ;;  %272 = vst.msk [vmem:[%s646_s4 + $0x78] sm:$0xff] %vm256_vm0, %v255_v39 }
 0x10b   :  { %263 = vst.msk [vmem:[%s646_s4 + $0x30] sm:$0xff] %vm256_vm0, %v246_v40  ;;  %271 = vst.msk [vmem:[%s646_s4 + $0x70] sm:$0xff] %vm256_vm0, %v254_v41 }

// kernel: multiscale_forward.111
= control target key start
LH: loop header
LB: loop body
LE: loop exit
PB: predicated region body
PF: predicated region fallthrough
CT: control target
= control target key end

     0   :  { %vm37_vm0 = vcmask 261120   ;;  %vm277_vm1 = vcmask 130048   ;;  %s551_s1 = inlined_call_operand.vmem [shape: f32[32,16], index: 1, kind: input, shape index: {}]   ;;  %s552_s0 = inlined_call_operand.vmem [shape: f32[128,32], index: 0, kind: input, shape index: {}]   ;;  %s553_s2 = inlined_call_operand.vmem [shape: f32[1,16], index: 2, kind: input, shape index: {}]   ;;  %s554_s3 = inlined_call_operand.vmem [shape: f32[1,16], index: 3, kind: input, shape index: {}]   ;;  %s555_s4 = inlined_call_operand.vmem [shape: f32[128,16], index: 4, kind: output, shape index: {}]  }
   0x1   :  { %v33_v0 = vld [vmem:[%s551_s1] sm:$0xff]  ;;  %v34_v1 = vld [vmem:[%s551_s1 + $0x8] sm:$0xff]  ;;  %v35_v2 = vld [vmem:[%s551_s1 + $0x10] sm:$0xff] }
   0x2   :  { %v368_v3 = vpack.c.bf16 %v34_v1, %v33_v0  ;;  %v36_v4 = vld [vmem:[%s551_s1 + $0x18] sm:$0xff]  ;;  %v17_v5 = vld [vmem:[%s552_s0] sm:$0xff]  ;;  %v18_v8 = vld [vmem:[%s552_s0 + $0x8] sm:$0xff] }
   0x3   :  { %v25_v6 = vld [vmem:[%s552_s0 + $0x40] sm:$0xff]  ;;  %v372_v7 = vpack.c.bf16 %v36_v4, %v35_v2  ;;  %344 = vmatprep.mubr.msk.f32.mxu0 %vm37_vm0, %v17_v5  ;;  %v26_v9 = vld [vmem:[%s552_s0 + $0x48] sm:$0xff]  ;;  %v19_v10 = vld [vmem:[%s552_s0 + $0x10] sm:$0xff] }
   0x4   :  { %356 = vmatprep.mubr.msk.f32.mxu1 %vm37_vm0, %v25_v6  ;;  %369 = vmatprep.subr.bf16.mxu0 %v368_v3  ;;  %v27_v11 = vld [vmem:[%s552_s0 + $0x50] sm:$0xff]  ;;  %v20_v12 = vld [vmem:[%s552_s0 + $0x18] sm:$0xff]  ;;  %v21_v14 = vld [vmem:[%s552_s0 + $0x20] sm:$0xff] }
   0x5   :  { %376 = vmatprep.subr.bf16.mxu1 %v368_v3  ;;  %371 = vmatpush3.bf16.msra.mxu0 %v368_v3  ;;  %v28_v13 = vld [vmem:[%s552_s0 + $0x58] sm:$0xff]  ;;  %v29_v15 = vld [vmem:[%s552_s0 + $0x60] sm:$0xff]  ;;  %v22_v16 = vld [vmem:[%s552_s0 + $0x28] sm:$0xff] }
   0x6   :  { %378 = vmatpush3.bf16.msra.mxu1 %v368_v3  ;;  %373 = vmatprep.subr.bf16.mxu0 %v372_v7  ;;  %v30_v17 = vld [vmem:[%s552_s0 + $0x68] sm:$0xff]  ;;  %v23_v18 = vld [vmem:[%s552_s0 + $0x30] sm:$0xff]  ;;  %v24_v20 = vld [vmem:[%s552_s0 + $0x38] sm:$0xff] }
   0x7   :  { %377 = vmatprep.subr.bf16.mxu1 %v372_v7  ;;  %v31_v19 = vld [vmem:[%s552_s0 + $0x70] sm:$0xff]  ;;  %v32_v21 = vld [vmem:[%s552_s0 + $0x78] sm:$0xff]  ;;  %v314_v22 = vld [vmem:[%s553_s2] ss:$0 sm:$0xff] }
   0x8   :  { %v315_v24 = vld [vmem:[%s554_s3] ss:$0 sm:$0xff] }
   0x9   :  { %375 = vmatpush3.bf16.msra.mxu0 %v372_v7 }
   0xa   :  { %379 = vmatpush3.bf16.msra.mxu1 %v372_v7 }
   0xc   :  { %345 = vmatmul.mubr.msk.f32.vlgmr.msra.gmra.mrb[0].mxu0 %vm37_vm0, %v18_v8 }
   0xd   :  { %357 = vmatmul.mubr.msk.f32.vlgmr.msra.gmra.mrb[0].mxu1 %vm37_vm0, %v26_v9  ;;  %347 = vmatprep.mubr.msk.f32.mxu0 %vm37_vm0, %v19_v10 }
   0xe   :  { %359 = vmatprep.mubr.msk.f32.mxu1 %vm37_vm0, %v27_v11 }
  0x10   :  { %348 = vmatmul.mubr.msk.f32.gmra.mrb[2].mxu0 %vm37_vm0, %v20_v12 }
  0x11   :  { %360 = vmatmul.mubr.msk.f32.gmra.mrb[2].mxu1 %vm37_vm0, %v28_v13  ;;  %350 = vmatprep.mubr.msk.f32.mxu0 %vm37_vm0, %v21_v14 }
  0x12   :  { %362 = vmatprep.mubr.msk.f32.mxu1 %vm37_vm0, %v29_v15 }
  0x14   :  { %351 = vmatmul.mubr.msk.f32.gmra.mrb[4].mxu0 %vm37_vm0, %v22_v16 }
  0x15   :  { %363 = vmatmul.mubr.msk.f32.gmra.mrb[4].mxu1 %vm37_vm0, %v30_v17  ;;  %353 = vmatprep.mubr.msk.f32.mxu0 %vm37_vm0, %v23_v18 }
  0x16   :  { %365 = vmatprep.mubr.msk.f32.mxu1 %vm37_vm0, %v31_v19 }
  0x18   :  { %354 = vmatmul.mubr.msk.f32.gmra.mrb[6].mxu0 %vm37_vm0, %v24_v20 }
  0x19   :  { %366 = vmatmul.mubr.msk.f32.gmra.mrb[6].mxu1 %vm37_vm0, %v32_v21 }
  0xdf   :  { %v346_v23 = vpop.f32.mrb[0].mxu0 }
  0xe0   :  { %v358_v25 = vpop.f32.mrb[0].mxu1  ;;  %v239_v26 = vmul.f32 %v346_v23, %v314_v22  ;;  %v152_v28 = vpop.f32.mrb[1].mxu0 }
  0xe1   :  { %v247_v27 = vmul.f32 %v358_v25, %v314_v22  ;;  %v192_v29 = vpop.f32.mrb[1].mxu1  ;;  %v238_v30 = vmul.f32 %v314_v22, %v152_v28 }
  0xe2   :  { %v246_v31 = vmul.f32 %v314_v22, %v192_v29  ;;  %v262_v32 = vadd.f32 %v315_v24, %v239_v26 }
  0xe3   :  { %v270_v33 = vadd.f32 %v315_v24, %v247_v27  ;;  %v261_v34 = vadd.f32 %v315_v24, %v238_v30  ;;  %v349_v36 = vpop.f32.mrb[2].mxu0 }
  0xe4   :  { %v269_v35 = vadd.f32 %v315_v24, %v246_v31  ;;  %v361_v37 = vpop.f32.mrb[2].mxu1  ;;  %279 = vst.msk [vmem:[%s555_s4 + $0x8] sm:$0xff] %vm277_vm1, %v262_v32  ;;  %v241_v38 = vmul.f32 %v349_v36, %v314_v22  ;;  %v162_v40 = vpop.f32.mrb[3].mxu0 }
  0xe5   :  { %287 = vst.msk [vmem:[%s555_s4 + $0x48] sm:$0xff] %vm277_vm1, %v270_v33  ;;  %v249_v39 = vmul.f32 %v361_v37, %v314_v22  ;;  %v202_v41 = vpop.f32.mrb[3].mxu1  ;;  %278 = vst.msk [vmem:[%s555_s4] sm:$0xff] %vm277_vm1, %v261_v34  ;;  %v240_v42 = vmul.f32 %v314_v22, %v162_v40 }
  0xe6   :  { %286 = vst.msk [vmem:[%s555_s4 + $0x40] sm:$0xff] %vm277_vm1, %v269_v35  ;;  %v248_v43 = vmul.f32 %v314_v22, %v202_v41  ;;  %v264_v44 = vadd.f32 %v315_v24, %v241_v38 }
  0xe7   :  { %v272_v45 = vadd.f32 %v315_v24, %v249_v39  ;;  %v263_v46 = vadd.f32 %v315_v24, %v240_v42  ;;  %v352_v48 = vpop.f32.mrb[4].mxu0 }
  0xe8   :  { %v271_v47 = vadd.f32 %v315_v24, %v248_v43  ;;  %v364_v49 = vpop.f32.mrb[4].mxu1  ;;  %281 = vst.msk [vmem:[%s555_s4 + $0x18] sm:$0xff] %vm277_vm1, %v264_v44  ;;  %v243_v50 = vmul.f32 %v352_v48, %v314_v22  ;;  %v172_v52 = vpop.f32.mrb[5].mxu0 }
  0xe9   :  { %289 = vst.msk [vmem:[%s555_s4 + $0x58] sm:$0xff] %vm277_vm1, %v272_v45  ;;  %v251_v51 = vmul.f32 %v364_v49, %v314_v22  ;;  %v212_v53 = vpop.f32.mrb[5].mxu1  ;;  %280 = vst.msk [vmem:[%s555_s4 + $0x10] sm:$0xff] %vm277_vm1, %v263_v46  ;;  %v242_v54 = vmul.f32 %v314_v22, %v172_v52 }
  0xea   :  { %288 = vst.msk [vmem:[%s555_s4 + $0x50] sm:$0xff] %vm277_vm1, %v271_v47  ;;  %v250_v55 = vmul.f32 %v314_v22, %v212_v53  ;;  %v266_v56 = vadd.f32 %v315_v24, %v243_v50 }
  0xeb   :  { %v274_v57 = vadd.f32 %v315_v24, %v251_v51  ;;  %v265_v58 = vadd.f32 %v315_v24, %v242_v54  ;;  %v355_v60 = vpop.f32.mrb[6].mxu0 }
  0xec   :  { %v273_v59 = vadd.f32 %v315_v24, %v250_v55  ;;  %v367_v61 = vpop.f32.mrb[6].mxu1  ;;  %283 = vst.msk [vmem:[%s555_s4 + $0x28] sm:$0xff] %vm277_vm1, %v266_v56  ;;  %v245_v62 = vmul.f32 %v355_v60, %v314_v22  ;;  %v182_v0 = vpop.f32.mrb[7].mxu0 }
  0xed   :  { %291 = vst.msk [vmem:[%s555_s4 + $0x68] sm:$0xff] %vm277_vm1, %v274_v57  ;;  %v253_v63 = vmul.f32 %v367_v61, %v314_v22  ;;  %v222_v1 = vpop.f32.mrb[7].mxu1  ;;  %282 = vst.msk [vmem:[%s555_s4 + $0x20] sm:$0xff] %vm277_vm1, %v265_v58  ;;  %v244_v2 = vmul.f32 %v314_v22, %v182_v0 }
  0xee   :  { %290 = vst.msk [vmem:[%s555_s4 + $0x60] sm:$0xff] %vm277_vm1, %v273_v59  ;;  %v252_v3 = vmul.f32 %v314_v22, %v222_v1  ;;  %v268_v4 = vadd.f32 %v315_v24, %v245_v62 }
  0xef   :  { %v276_v5 = vadd.f32 %v315_v24, %v253_v63  ;;  %v267_v6 = vadd.f32 %v315_v24, %v244_v2 }
  0xf0   :  { %v275_v7 = vadd.f32 %v315_v24, %v252_v3  ;;  %285 = vst.msk [vmem:[%s555_s4 + $0x38] sm:$0xff] %vm277_vm1, %v268_v4 }
  0xf1   :  { %293 = vst.msk [vmem:[%s555_s4 + $0x78] sm:$0xff] %vm277_vm1, %v276_v5  ;;  %284 = vst.msk [vmem:[%s555_s4 + $0x30] sm:$0xff] %vm277_vm1, %v267_v6 }
  0xf2   :  { %292 = vst.msk [vmem:[%s555_s4 + $0x70] sm:$0xff] %vm277_vm1, %v275_v7 }

// kernel: multiscale_forward.116
= control target key start
LH: loop header
LB: loop body
LE: loop exit
PB: predicated region body
PF: predicated region fallthrough
CT: control target
= control target key end

     0   :  { %v426_v0 = vmov 0.0|0.0   ;;  %vm70_vm0 = vcmask 130048   ;;  %s795_s1 = inlined_call_operand.vmem [shape: f32[144,16], index: 1, kind: input, shape index: {}]   ;;  %s796_s0 = inlined_call_operand.vmem [shape: f32[128,144], index: 0, kind: input, shape index: {}]   ;;  %s797_s2 = inlined_call_operand.vmem [shape: f32[1,16], index: 2, kind: input, shape index: {}]   ;;  %s798_s3 = inlined_call_operand.vmem [shape: f32[1,16], index: 3, kind: input, shape index: {}]   ;;  %s799_s4 = inlined_call_operand.vmem [shape: f32[128,16], index: 4, kind: input, shape index: {}]   ;;  %s800_s5 = inlined_call_operand.vmem [shape: f32[128,16], index: 5, kind: output, shape index: {}]  }
   0x1   :  { %380 = vmatprep.subr.bf16.mxu0 %v426_v0  ;;  %407 = vmatprep.subr.bf16.mxu1 %v426_v0  ;;  %v52_v1 = vld [vmem:[%s795_s1] sm:$0xff]  ;;  %v53_v2 = vld [vmem:[%s795_s1 + $0x8] sm:$0xff]  ;;  %v54_v3 = vld [vmem:[%s795_s1 + $0x10] sm:$0xff] }
   0x2   :  { %v381_v4 = vpack.c.bf16 %v53_v2, %v52_v1  ;;  %v55_v5 = vld [vmem:[%s795_s1 + $0x18] sm:$0xff]  ;;  %v56_v7 = vld [vmem:[%s795_s1 + $0x20] sm:$0xff]  ;;  %v57_v8 = vld [vmem:[%s795_s1 + $0x28] sm:$0xff] }
   0x3   :  { %v384_v6 = vpack.c.bf16 %v55_v5, %v54_v3  ;;  %v21_v9 = vld [vmem:[%s796_s0 + $0x8] sm:$0xff]  ;;  %v387_v11 = vpack.c.bf16 %v57_v8, %v56_v7  ;;  %v58_v12 = vld [vmem:[%s795_s1 + $0x30] sm:$0xff]  ;;  %v59_v13 = vld [vmem:[%s795_s1 + $0x38] sm:$0xff] }
   0x4   :  { %382 = vmatpush1.bf16.msra.mxu0 %v381_v4  ;;  %416 = vmatpush1.bf16.msra.mxu1 %v381_v4  ;;  %v37_v10 = vld [vmem:[%s796_s0 + $0x88] sm:$0xff]  ;;  %v390_v14 = vpack.c.bf16 %v59_v13, %v58_v12  ;;  %v60_v15 = vld [vmem:[%s795_s1 + $0x40] sm:$0xff]  ;;  %v62_v18 = vld [vmem:[%s795_s1 + $0x50] sm:$0xff] }
   0x5   :  { %383 = vmatprep.subr.bf16.mxu0 %v426_v0  ;;  %408 = vmatprep.subr.bf16.mxu1 %v426_v0  ;;  %v61_v16 = vld [vmem:[%s795_s1 + $0x48] sm:$0xff]  ;;  %v63_v19 = vld [vmem:[%s795_s1 + $0x58] sm:$0xff]  ;;  %v64_v21 = vld [vmem:[%s795_s1 + $0x60] sm:$0xff] }
   0x6   :  { %362 = vmatprep.mubr.msk.f32.mxu0 %vm70_vm0, %v21_v9  ;;  %370 = vmatprep.mubr.msk.f32.mxu1 %vm70_vm0, %v37_v10  ;;  %v393_v17 = vpack.c.bf16 %v61_v16, %v60_v15  ;;  %v396_v20 = vpack.c.bf16 %v63_v19, %v62_v18  ;;  %v65_v22 = vld [vmem:[%s795_s1 + $0x68] sm:$0xff]  ;;  %v66_v24 = vld [vmem:[%s795_s1 + $0x70] sm:$0xff]  ;;  %v67_v25 = vld [vmem:[%s795_s1 + $0x78] sm:$0xff] }
   0x7   :  { %v399_v23 = vpack.c.bf16 %v65_v22, %v64_v21  ;;  %v402_v26 = vpack.c.bf16 %v67_v25, %v66_v24  ;;  %v68_v27 = vld [vmem:[%s795_s1 + $0x80] sm:$0xff]  ;;  %v69_v28 = vld [vmem:[%s795_s1 + $0x88] sm:$0xff]  ;;  %v23_v32 = vld [vmem:[%s796_s0 + $0x18] sm:$0xff] }
   0x8   :  { %385 = vmatpush1.bf16.msra.mxu0 %v384_v6  ;;  %417 = vmatpush1.bf16.msra.mxu1 %v384_v6  ;;  %v405_v29 = vpack.c.bf16 %v69_v28, %v68_v27  ;;  %v20_v30 = vld [vmem:[%s796_s0] sm:$0xff]  ;;  %v39_v33 = vld [vmem:[%s796_s0 + $0x98] sm:$0xff]  ;;  %v22_v34 = vld [vmem:[%s796_s0 + $0x10] sm:$0xff] }
   0x9   :  { %386 = vmatprep.subr.bf16.mxu0 %v426_v0  ;;  %409 = vmatprep.subr.bf16.mxu1 %v426_v0  ;;  %v36_v31 = vld [vmem:[%s796_s0 + $0x80] sm:$0xff]  ;;  %v38_v35 = vld [vmem:[%s796_s0 + $0x90] sm:$0xff]  ;;  %v25_v36 = vld [vmem:[%s796_s0 + $0x28] sm:$0xff] }
   0xa   :  { %v41_v37 = vld [vmem:[%s796_s0 + $0xa8] sm:$0xff]  ;;  %v24_v38 = vld [vmem:[%s796_s0 + $0x20] sm:$0xff]  ;;  %v27_v40 = vld [vmem:[%s796_s0 + $0x38] sm:$0xff] }
   0xb   :  { %v40_v39 = vld [vmem:[%s796_s0 + $0xa0] sm:$0xff]  ;;  %v43_v41 = vld [vmem:[%s796_s0 + $0xb8] sm:$0xff]  ;;  %v26_v42 = vld [vmem:[%s796_s0 + $0x30] sm:$0xff] }
   0xc   :  { %388 = vmatpush1.bf16.msra.mxu0 %v387_v11  ;;  %418 = vmatpush1.bf16.msra.mxu1 %v387_v11  ;;  %v42_v43 = vld [vmem:[%s796_s0 + $0xb0] sm:$0xff]  ;;  %v29_v44 = vld [vmem:[%s796_s0 + $0x48] sm:$0xff]  ;;  %v28_v46 = vld [vmem:[%s796_s0 + $0x40] sm:$0xff] }
   0xd   :  { %389 = vmatprep.subr.bf16.mxu0 %v426_v0  ;;  %410 = vmatprep.subr.bf16.mxu1 %v426_v0  ;;  %v45_v45 = vld [vmem:[%s796_s0 + $0xc8] sm:$0xff]  ;;  %v44_v47 = vld [vmem:[%s796_s0 + $0xc0] sm:$0xff]  ;;  %v31_v48 = vld [vmem:[%s796_s0 + $0x58] sm:$0xff] }
   0xe   :  { %v47_v49 = vld [vmem:[%s796_s0 + $0xd8] sm:$0xff]  ;;  %v30_v50 = vld [vmem:[%s796_s0 + $0x50] sm:$0xff]  ;;  %v33_v52 = vld [vmem:[%s796_s0 + $0x68] sm:$0xff] }
   0xf   :  { %v46_v51 = vld [vmem:[%s796_s0 + $0xd0] sm:$0xff]  ;;  %v49_v53 = vld [vmem:[%s796_s0 + $0xe8] sm:$0xff]  ;;  %v32_v54 = vld [vmem:[%s796_s0 + $0x60] sm:$0xff] }
  0x10   :  { %391 = vmatpush1.bf16.msra.mxu0 %v390_v14  ;;  %419 = vmatpush1.bf16.msra.mxu1 %v390_v14  ;;  %v48_v55 = vld [vmem:[%s796_s0 + $0xe0] sm:$0xff]  ;;  %v35_v56 = vld [vmem:[%s796_s0 + $0x78] sm:$0xff]  ;;  %v34_v58 = vld [vmem:[%s796_s0 + $0x70] sm:$0xff] }
  0x11   :  { %392 = vmatprep.subr.bf16.mxu0 %v426_v0  ;;  %411 = vmatprep.subr.bf16.mxu1 %v426_v0  ;;  %v51_v57 = vld [vmem:[%s796_s0 + $0xf8] sm:$0xff]  ;;  %v50_v59 = vld [vmem:[%s796_s0 + $0xf0] sm:$0xff]  ;;  %v644_v60 = vld [vmem:[%s797_s2] ss:$0 sm:$0xff] }
  0x12   :  { %v649_v62 = vld [vmem:[%s798_s3] ss:$0 sm:$0xff]  ;;  %v311_v16 = vld [vmem:[%s799_s4 + $0x8] sm:$0xff]  ;;  %v312_v28 = vld [vmem:[%s799_s4 + $0x10] sm:$0xff] }
  0x13   :  { %v310_v4 = vld [vmem:[%s799_s4] sm:$0xff] }
  0x14   :  { %394 = vmatpush1.bf16.msra.mxu0 %v393_v17  ;;  %420 = vmatpush1.bf16.msra.mxu1 %v393_v17  ;;  %v318_v5 = vld [vmem:[%s799_s4 + $0x40] sm:$0xff]  ;;  %v319_v17 = vld [vmem:[%s799_s4 + $0x48] sm:$0xff] }
  0x15   :  { %395 = vmatprep.subr.bf16.mxu0 %v426_v0  ;;  %412 = vmatprep.subr.bf16.mxu1 %v426_v0 }
  0x18   :  { %397 = vmatpush1.bf16.msra.mxu0 %v396_v20  ;;  %421 = vmatpush1.bf16.msra.mxu1 %v396_v20 }
  0x19   :  { %398 = vmatprep.subr.bf16.mxu0 %v426_v0  ;;  %413 = vmatprep.subr.bf16.mxu1 %v426_v0 }
  0x1c   :  { %400 = vmatpush1.bf16.msra.mxu0 %v399_v23  ;;  %422 = vmatpush1.bf16.msra.mxu1 %v399_v23 }
  0x1d   :  { %401 = vmatprep.subr.bf16.mxu0 %v426_v0  ;;  %414 = vmatprep.subr.bf16.mxu1 %v426_v0 }
  0x20   :  { %403 = vmatpush1.bf16.msra.mxu0 %v402_v26  ;;  %423 = vmatpush1.bf16.msra.mxu1 %v402_v26 }
  0x21   :  { %404 = vmatprep.subr.bf16.mxu0 %v426_v0  ;;  %415 = vmatprep.subr.bf16.mxu1 %v426_v0 }
  0x24   :  { %406 = vmatpush1.bf16.msra.mxu0 %v405_v29  ;;  %424 = vmatpush1.bf16.msra.mxu1 %v405_v29  ;;  %v320_v29 = vld [vmem:[%s799_s4 + $0x50] sm:$0xff] }
  0x27   :  { %184 = vmatmul.mubr.f32.vlgmr.msra.gmra.mrb[0].mxu0 %v20_v30  ;;  %224 = vmatmul.mubr.f32.vlgmr.msra.gmra.mrb[0].mxu1 %v36_v31 }
  0x28   :  { %363 = vmatprep.mubr.msk.f32.mxu0 %vm70_vm0, %v23_v32  ;;  %371 = vmatprep.mubr.msk.f32.mxu1 %vm70_vm0, %v39_v33 }
  0x2b   :  { %189 = vmatmul.mubr.f32.gmra.mrb[2].mxu0 %v22_v34  ;;  %229 = vmatmul.mubr.f32.gmra.mrb[2].mxu1 %v38_v35 }
  0x2c   :  { %364 = vmatprep.mubr.msk.f32.mxu0 %vm70_vm0, %v25_v36  ;;  %372 = vmatprep.mubr.msk.f32.mxu1 %vm70_vm0, %v41_v37 }
  0x2f   :  { %194 = vmatmul.mubr.f32.gmra.mrb[4].mxu0 %v24_v38  ;;  %234 = vmatmul.mubr.f32.gmra.mrb[4].mxu1 %v40_v39 }
  0x30   :  { %365 = vmatprep.mubr.msk.f32.mxu0 %vm70_vm0, %v27_v40  ;;  %373 = vmatprep.mubr.msk.f32.mxu1 %vm70_vm0, %v43_v41  ;;  %v313_v40 = vld [vmem:[%s799_s4 + $0x18] sm:$0xff] }
  0x31   :  { %v321_v41 = vld [vmem:[%s799_s4 + $0x58] sm:$0xff] }
  0x33   :  { %199 = vmatmul.mubr.f32.gmra.mrb[6].mxu0 %v26_v42  ;;  %239 = vmatmul.mubr.f32.gmra.mrb[6].mxu1 %v42_v43 }
  0x34   :  { %366 = vmatprep.mubr.msk.f32.mxu0 %vm70_vm0, %v29_v44  ;;  %374 = vmatprep.mubr.msk.f32.mxu1 %vm70_vm0, %v45_v45 }
  0x37   :  { %204 = vmatmul.mubr.f32.gmra.mrb[8].mxu0 %v28_v46  ;;  %244 = vmatmul.mubr.f32.gmra.mrb[8].mxu1 %v44_v47 }
  0x38   :  { %367 = vmatprep.mubr.msk.f32.mxu0 %vm70_vm0, %v31_v48  ;;  %375 = vmatprep.mubr.msk.f32.mxu1 %vm70_vm0, %v47_v49 }
  0x3b   :  { %209 = vmatmul.mubr.f32.gmra.mrb[10].mxu0 %v30_v50  ;;  %249 = vmatmul.mubr.f32.gmra.mrb[10].mxu1 %v46_v51 }
  0x3c   :  { %368 = vmatprep.mubr.msk.f32.mxu0 %vm70_vm0, %v33_v52  ;;  %376 = vmatprep.mubr.msk.f32.mxu1 %vm70_vm0, %v49_v53  ;;  %v314_v52 = vld [vmem:[%s799_s4 + $0x20] sm:$0xff] }
  0x3d   :  { %v322_v53 = vld [vmem:[%s799_s4 + $0x60] sm:$0xff] }
  0x3f   :  { %214 = vmatmul.mubr.f32.gmra.mrb[12].mxu0 %v32_v54  ;;  %254 = vmatmul.mubr.f32.gmra.mrb[12].mxu1 %v48_v55 }
  0x40   :  { %369 = vmatprep.mubr.msk.f32.mxu0 %vm70_vm0, %v35_v56  ;;  %377 = vmatprep.mubr.msk.f32.mxu1 %vm70_vm0, %v51_v57 }
  0x43   :  { %219 = vmatmul.mubr.f32.gmra.mrb[14].mxu0 %v34_v58  ;;  %259 = vmatmul.mubr.f32.gmra.mrb[14].mxu1 %v50_v59 }
  0xfa   :  { %v185_v61 = vpop.f32.mrb[0].mxu0  ;;  %v225_v63 = vpop.f32.mrb[0].mxu1 }
  0xfb   :  { %v271_v0 = vmul.f32 %v644_v60, %v185_v61  ;;  %v279_v1 = vmul.f32 %v644_v60, %v225_v63  ;;  %v187_v2 = vpop.f32.mrb[1].mxu0  ;;  %v227_v3 = vpop.f32.mrb[1].mxu1 }
  0xfc   :  { %v315_v2 = vld [vmem:[%s799_s4 + $0x28] sm:$0xff] }
  0xfd   :  { %v294_v6 = vadd.f32 %v649_v62, %v271_v0  ;;  %v302_v7 = vadd.f32 %v649_v62, %v279_v1  ;;  %v323_v3 = vld [vmem:[%s799_s4 + $0x68] sm:$0xff] }
  0xfe   :  { %v190_v8 = vpop.f32.mrb[2].mxu0  ;;  %v230_v9 = vpop.f32.mrb[2].mxu1 }
  0xff   :  { %v326_v10 = vadd.f32 %v310_v4, %v294_v6  ;;  %v334_v11 = vadd.f32 %v318_v5, %v302_v7  ;;  %v272_v12 = vmul.f32 %v644_v60, %v190_v8  ;;  %v280_v13 = vmul.f32 %v644_v60, %v230_v9  ;;  %v192_v14 = vpop.f32.mrb[3].mxu0  ;;  %v232_v15 = vpop.f32.mrb[3].mxu1 }
 0x100   :  { %v316_v14 = vld [vmem:[%s799_s4 + $0x30] sm:$0xff] }
 0x101   :  { %342 = vst.msk [vmem:[%s800_s5] sm:$0xff] %vm70_vm0, %v326_v10  ;;  %350 = vst.msk [vmem:[%s800_s5 + $0x40] sm:$0xff] %vm70_vm0, %v334_v11  ;;  %v295_v18 = vadd.f32 %v649_v62, %v272_v12  ;;  %v303_v19 = vadd.f32 %v649_v62, %v280_v13  ;;  %v324_v15 = vld [vmem:[%s799_s4 + $0x70] sm:$0xff] }
 0x102   :  { %v195_v20 = vpop.f32.mrb[4].mxu0  ;;  %v235_v21 = vpop.f32.mrb[4].mxu1 }
 0x103   :  { %v327_v22 = vadd.f32 %v311_v16, %v295_v18  ;;  %v335_v23 = vadd.f32 %v319_v17, %v303_v19  ;;  %v273_v24 = vmul.f32 %v644_v60, %v195_v20  ;;  %v281_v25 = vmul.f32 %v644_v60, %v235_v21  ;;  %v197_v26 = vpop.f32.mrb[5].mxu0  ;;  %v237_v27 = vpop.f32.mrb[5].mxu1 }
 0x104   :  { %v317_v26 = vld [vmem:[%s799_s4 + $0x38] sm:$0xff] }
 0x105   :  { %343 = vst.msk [vmem:[%s800_s5 + $0x8] sm:$0xff] %vm70_vm0, %v327_v22  ;;  %351 = vst.msk [vmem:[%s800_s5 + $0x48] sm:$0xff] %vm70_vm0, %v335_v23  ;;  %v296_v30 = vadd.f32 %v649_v62, %v273_v24  ;;  %v304_v31 = vadd.f32 %v649_v62, %v281_v25  ;;  %v325_v27 = vld [vmem:[%s799_s4 + $0x78] sm:$0xff] }
 0x106   :  { %v200_v32 = vpop.f32.mrb[6].mxu0  ;;  %v240_v33 = vpop.f32.mrb[6].mxu1 }
 0x107   :  { %v328_v34 = vadd.f32 %v312_v28, %v296_v30  ;;  %v336_v35 = vadd.f32 %v320_v29, %v304_v31  ;;  %v274_v36 = vmul.f32 %v644_v60, %v200_v32  ;;  %v282_v37 = vmul.f32 %v644_v60, %v240_v33  ;;  %v202_v38 = vpop.f32.mrb[7].mxu0  ;;  %v242_v39 = vpop.f32.mrb[7].mxu1 }
 0x109   :  { %344 = vst.msk [vmem:[%s800_s5 + $0x10] sm:$0xff] %vm70_vm0, %v328_v34  ;;  %352 = vst.msk [vmem:[%s800_s5 + $0x50] sm:$0xff] %vm70_vm0, %v336_v35  ;;  %v297_v42 = vadd.f32 %v649_v62, %v274_v36  ;;  %v305_v43 = vadd.f32 %v649_v62, %v282_v37 }
 0x10a   :  { %v205_v44 = vpop.f32.mrb[8].mxu0  ;;  %v245_v45 = vpop.f32.mrb[8].mxu1 }
 0x10b   :  { %v329_v46 = vadd.f32 %v313_v40, %v297_v42  ;;  %v337_v47 = vadd.f32 %v321_v41, %v305_v43  ;;  %v275_v48 = vmul.f32 %v644_v60, %v205_v44  ;;  %v283_v49 = vmul.f32 %v644_v60, %v245_v45  ;;  %v207_v50 = vpop.f32.mrb[9].mxu0  ;;  %v247_v51 = vpop.f32.mrb[9].mxu1 }
 0x10d   :  { %345 = vst.msk [vmem:[%s800_s5 + $0x18] sm:$0xff] %vm70_vm0, %v329_v46  ;;  %353 = vst.msk [vmem:[%s800_s5 + $0x58] sm:$0xff] %vm70_vm0, %v337_v47  ;;  %v298_v54 = vadd.f32 %v649_v62, %v275_v48  ;;  %v306_v55 = vadd.f32 %v649_v62, %v283_v49 }
 0x10e   :  { %v210_v56 = vpop.f32.mrb[10].mxu0  ;;  %v250_v57 = vpop.f32.mrb[10].mxu1 }
 0x10f   :  { %v330_v58 = vadd.f32 %v314_v52, %v298_v54  ;;  %v338_v59 = vadd.f32 %v322_v53, %v306_v55  ;;  %v276_v61 = vmul.f32 %v644_v60, %v210_v56  ;;  %v284_v63 = vmul.f32 %v644_v60, %v250_v57  ;;  %v212_v0 = vpop.f32.mrb[11].mxu0  ;;  %v252_v1 = vpop.f32.mrb[11].mxu1 }
 0x111   :  { %346 = vst.msk [vmem:[%s800_s5 + $0x20] sm:$0xff] %vm70_vm0, %v330_v58  ;;  %354 = vst.msk [vmem:[%s800_s5 + $0x60] sm:$0xff] %vm70_vm0, %v338_v59  ;;  %v299_v4 = vadd.f32 %v649_v62, %v276_v61  ;;  %v307_v5 = vadd.f32 %v649_v62, %v284_v63 }
 0x112   :  { %v215_v6 = vpop.f32.mrb[12].mxu0  ;;  %v255_v7 = vpop.f32.mrb[12].mxu1 }
 0x113   :  { %v331_v8 = vadd.f32 %v315_v2, %v299_v4  ;;  %v339_v9 = vadd.f32 %v323_v3, %v307_v5  ;;  %v277_v10 = vmul.f32 %v644_v60, %v215_v6  ;;  %v285_v11 = vmul.f32 %v644_v60, %v255_v7  ;;  %v217_v12 = vpop.f32.mrb[13].mxu0  ;;  %v257_v13 = vpop.f32.mrb[13].mxu1 }
 0x115   :  { %347 = vst.msk [vmem:[%s800_s5 + $0x28] sm:$0xff] %vm70_vm0, %v331_v8  ;;  %355 = vst.msk [vmem:[%s800_s5 + $0x68] sm:$0xff] %vm70_vm0, %v339_v9  ;;  %v300_v16 = vadd.f32 %v649_v62, %v277_v10  ;;  %v308_v17 = vadd.f32 %v649_v62, %v285_v11 }
 0x116   :  { %v220_v18 = vpop.f32.mrb[14].mxu0  ;;  %v260_v19 = vpop.f32.mrb[14].mxu1 }
 0x117   :  { %v332_v20 = vadd.f32 %v316_v14, %v300_v16  ;;  %v340_v21 = vadd.f32 %v324_v15, %v308_v17  ;;  %v278_v22 = vmul.f32 %v644_v60, %v220_v18  ;;  %v286_v23 = vmul.f32 %v644_v60, %v260_v19  ;;  %v222_v24 = vpop.f32.mrb[15].mxu0  ;;  %v262_v25 = vpop.f32.mrb[15].mxu1 }
 0x119   :  { %348 = vst.msk [vmem:[%s800_s5 + $0x30] sm:$0xff] %vm70_vm0, %v332_v20  ;;  %356 = vst.msk [vmem:[%s800_s5 + $0x70] sm:$0xff] %vm70_vm0, %v340_v21  ;;  %v301_v60 = vadd.f32 %v649_v62, %v278_v22  ;;  %v309_v28 = vadd.f32 %v649_v62, %v286_v23 }
 0x11b   :  { %v333_v29 = vadd.f32 %v317_v26, %v301_v60  ;;  %v341_v30 = vadd.f32 %v325_v27, %v309_v28 }
 0x11d   :  { %349 = vst.msk [vmem:[%s800_s5 + $0x38] sm:$0xff] %vm70_vm0, %v333_v29  ;;  %357 = vst.msk [vmem:[%s800_s5 + $0x78] sm:$0xff] %vm70_vm0, %v341_v30 }

// kernel: multiscale_forward.119
= control target key start
LH: loop header
LB: loop body
LE: loop exit
PB: predicated region body
PF: predicated region fallthrough
CT: control target
= control target key end

     0   :  { %vm240_vm0 = vcmask 130048   ;;  %s590_s1 = inlined_call_operand.vmem [shape: f32[128,16], index: 1, kind: input, shape index: {}]   ;;  %s591_s0 = inlined_call_operand.vmem [shape: f32[128,128], index: 0, kind: input, shape index: {}]   ;;  %s592_s2 = inlined_call_operand.vmem [shape: f32[1,16], index: 2, kind: input, shape index: {}]   ;;  %s593_s3 = inlined_call_operand.vmem [shape: f32[1,16], index: 3, kind: input, shape index: {}]   ;;  %s594_s4 = inlined_call_operand.vmem [shape: f32[128,16], index: 4, kind: output, shape index: {}]  }
   0x1   :  { %v33_v0 = vld [vmem:[%s590_s1] sm:$0xff]  ;;  %v34_v1 = vld [vmem:[%s590_s1 + $0x8] sm:$0xff]  ;;  %v35_v2 = vld [vmem:[%s590_s1 + $0x10] sm:$0xff] }
   0x2   :  { %v351_v3 = vpack.c.bf16 %v34_v1, %v33_v0  ;;  %v36_v4 = vld [vmem:[%s590_s1 + $0x18] sm:$0xff]  ;;  %v37_v6 = vld [vmem:[%s590_s1 + $0x20] sm:$0xff]  ;;  %v38_v7 = vld [vmem:[%s590_s1 + $0x28] sm:$0xff] }
   0x3   :  { %v355_v5 = vpack.c.bf16 %v36_v4, %v35_v2  ;;  %v359_v8 = vpack.c.bf16 %v38_v7, %v37_v6  ;;  %v17_v9 = vld [vmem:[%s591_s0] sm:$0xff]  ;;  %v39_v11 = vld [vmem:[%s590_s1 + $0x30] sm:$0xff]  ;;  %v40_v12 = vld [vmem:[%s590_s1 + $0x38] sm:$0xff] }
   0x4   :  { %352 = vmatprep.subr.bf16.mxu0 %v351_v3  ;;  %383 = vmatprep.subr.bf16.mxu1 %v351_v3  ;;  %v25_v10 = vld [vmem:[%s591_s0 + $0x40] sm:$0xff]  ;;  %v363_v13 = vpack.c.bf16 %v40_v12, %v39_v11  ;;  %v42_v15 = vld [vmem:[%s590_s1 + $0x48] sm:$0xff]  ;;  %v43_v17 = vld [vmem:[%s590_s1 + $0x50] sm:$0xff] }
   0x5   :  { %354 = vmatpush3.bf16.msra.mxu0 %v351_v3  ;;  %391 = vmatpush3.bf16.msra.mxu1 %v351_v3  ;;  %v41_v14 = vld [vmem:[%s590_s1 + $0x40] sm:$0xff]  ;;  %v44_v18 = vld [vmem:[%s590_s1 + $0x58] sm:$0xff]  ;;  %v46_v21 = vld [vmem:[%s590_s1 + $0x68] sm:$0xff] }
   0x6   :  { %356 = vmatprep.subr.bf16.mxu0 %v355_v5  ;;  %384 = vmatprep.subr.bf16.mxu1 %v355_v5  ;;  %v367_v16 = vpack.c.bf16 %v42_v15, %v41_v14  ;;  %v371_v19 = vpack.c.bf16 %v44_v18, %v43_v17  ;;  %v45_v20 = vld [vmem:[%s590_s1 + $0x60] sm:$0xff]  ;;  %v47_v23 = vld [vmem:[%s590_s1 + $0x70] sm:$0xff]  ;;  %v48_v24 = vld [vmem:[%s590_s1 + $0x78] sm:$0xff] }
   0x7   :  { %327 = vmatprep.mubr.f32.mxu0 %v17_v9  ;;  %339 = vmatprep.mubr.f32.mxu1 %v25_v10  ;;  %v375_v22 = vpack.c.bf16 %v46_v21, %v45_v20  ;;  %v379_v25 = vpack.c.bf16 %v48_v24, %v47_v23  ;;  %v18_v26 = vld [vmem:[%s591_s0 + $0x8] sm:$0xff]  ;;  %v19_v28 = vld [vmem:[%s591_s0 + $0x10] sm:$0xff]  ;;  %v20_v30 = vld [vmem:[%s591_s0 + $0x18] sm:$0xff] }
   0x8   :  { %v26_v27 = vld [vmem:[%s591_s0 + $0x48] sm:$0xff]  ;;  %v27_v29 = vld [vmem:[%s591_s0 + $0x50] sm:$0xff]  ;;  %v28_v31 = vld [vmem:[%s591_s0 + $0x58] sm:$0xff] }
   0x9   :  { %358 = vmatpush3.bf16.msra.mxu0 %v355_v5  ;;  %392 = vmatpush3.bf16.msra.mxu1 %v355_v5  ;;  %v21_v32 = vld [vmem:[%s591_s0 + $0x20] sm:$0xff]  ;;  %v22_v34 = vld [vmem:[%s591_s0 + $0x28] sm:$0xff]  ;;  %v23_v36 = vld [vmem:[%s591_s0 + $0x30] sm:$0xff] }
   0xa   :  { %360 = vmatprep.subr.bf16.mxu0 %v359_v8  ;;  %385 = vmatprep.subr.bf16.mxu1 %v359_v8  ;;  %v29_v33 = vld [vmem:[%s591_s0 + $0x60] sm:$0xff]  ;;  %v30_v35 = vld [vmem:[%s591_s0 + $0x68] sm:$0xff]  ;;  %v31_v37 = vld [vmem:[%s591_s0 + $0x70] sm:$0xff] }
   0xb   :  { %v24_v38 = vld [vmem:[%s591_s0 + $0x38] sm:$0xff]  ;;  %v261_v40 = vld [vmem:[%s592_s2] ss:$0 sm:$0xff] }
   0xc   :  { %v32_v39 = vld [vmem:[%s591_s0 + $0x78] sm:$0xff]  ;;  %v262_v42 = vld [vmem:[%s593_s3] ss:$0 sm:$0xff] }
   0xd   :  { %362 = vmatpush3.bf16.msra.mxu0 %v359_v8  ;;  %393 = vmatpush3.bf16.msra.mxu1 %v359_v8 }
   0xe   :  { %364 = vmatprep.subr.bf16.mxu0 %v363_v13  ;;  %386 = vmatprep.subr.bf16.mxu1 %v363_v13 }
  0x11   :  { %366 = vmatpush3.bf16.msra.mxu0 %v363_v13  ;;  %394 = vmatpush3.bf16.msra.mxu1 %v363_v13 }
  0x12   :  { %368 = vmatprep.subr.bf16.mxu0 %v367_v16  ;;  %387 = vmatprep.subr.bf16.mxu1 %v367_v16 }
  0x15   :  { %370 = vmatpush3.bf16.msra.mxu0 %v367_v16  ;;  %395 = vmatpush3.bf16.msra.mxu1 %v367_v16 }
  0x16   :  { %372 = vmatprep.subr.bf16.mxu0 %v371_v19  ;;  %388 = vmatprep.subr.bf16.mxu1 %v371_v19 }
  0x19   :  { %374 = vmatpush3.bf16.msra.mxu0 %v371_v19  ;;  %396 = vmatpush3.bf16.msra.mxu1 %v371_v19 }
  0x1a   :  { %376 = vmatprep.subr.bf16.mxu0 %v375_v22  ;;  %389 = vmatprep.subr.bf16.mxu1 %v375_v22 }
  0x1d   :  { %378 = vmatpush3.bf16.msra.mxu0 %v375_v22  ;;  %397 = vmatpush3.bf16.msra.mxu1 %v375_v22 }
  0x1e   :  { %380 = vmatprep.subr.bf16.mxu0 %v379_v25  ;;  %390 = vmatprep.subr.bf16.mxu1 %v379_v25 }
  0x21   :  { %382 = vmatpush3.bf16.msra.mxu0 %v379_v25  ;;  %398 = vmatpush3.bf16.msra.mxu1 %v379_v25 }
  0x24   :  { %328 = vmatmul.mubr.f32.vlgmr.msra.gmra.mrb[0].mxu0 %v18_v26  ;;  %340 = vmatmul.mubr.f32.vlgmr.msra.gmra.mrb[0].mxu1 %v26_v27 }
  0x25   :  { %330 = vmatprep.mubr.f32.mxu0 %v19_v28  ;;  %342 = vmatprep.mubr.f32.mxu1 %v27_v29 }
  0x28   :  { %331 = vmatmul.mubr.f32.gmra.mrb[2].mxu0 %v20_v30  ;;  %343 = vmatmul.mubr.f32.gmra.mrb[2].mxu1 %v28_v31 }
  0x29   :  { %333 = vmatprep.mubr.f32.mxu0 %v21_v32  ;;  %345 = vmatprep.mubr.f32.mxu1 %v29_v33 }
  0x2c   :  { %334 = vmatmul.mubr.f32.gmra.mrb[4].mxu0 %v22_v34  ;;  %346 = vmatmul.mubr.f32.gmra.mrb[4].mxu1 %v30_v35 }
  0x2d   :  { %336 = vmatprep.mubr.f32.mxu0 %v23_v36  ;;  %348 = vmatprep.mubr.f32.mxu1 %v31_v37 }
  0x30   :  { %337 = vmatmul.mubr.f32.gmra.mrb[6].mxu0 %v24_v38  ;;  %349 = vmatmul.mubr.f32.gmra.mrb[6].mxu1 %v32_v39 }
  0xf7   :  { %v329_v41 = vpop.f32.mrb[0].mxu0  ;;  %v341_v43 = vpop.f32.mrb[0].mxu1 }
  0xf8   :  { %v202_v44 = vmul.f32 %v329_v41, %v261_v40  ;;  %v210_v45 = vmul.f32 %v341_v43, %v261_v40  ;;  %v115_v46 = vpop.f32.mrb[1].mxu0  ;;  %v155_v47 = vpop.f32.mrb[1].mxu1 }
  0xf9   :  { %v201_v48 = vmul.f32 %v261_v40, %v115_v46  ;;  %v209_v49 = vmul.f32 %v261_v40, %v155_v47 }
  0xfa   :  { %v225_v50 = vadd.f32 %v262_v42, %v202_v44  ;;  %v233_v51 = vadd.f32 %v262_v42, %v210_v45 }
  0xfb   :  { %v224_v52 = vadd.f32 %v262_v42, %v201_v48  ;;  %v232_v53 = vadd.f32 %v262_v42, %v209_v49  ;;  %v332_v54 = vpop.f32.mrb[2].mxu0  ;;  %v344_v55 = vpop.f32.mrb[2].mxu1 }
  0xfc   :  { %242 = vst.msk [vmem:[%s594_s4 + $0x8] sm:$0xff] %vm240_vm0, %v225_v50  ;;  %250 = vst.msk [vmem:[%s594_s4 + $0x48] sm:$0xff] %vm240_vm0, %v233_v51  ;;  %v204_v56 = vmul.f32 %v332_v54, %v261_v40  ;;  %v212_v57 = vmul.f32 %v344_v55, %v261_v40  ;;  %v125_v58 = vpop.f32.mrb[3].mxu0  ;;  %v165_v59 = vpop.f32.mrb[3].mxu1 }
  0xfd   :  { %241 = vst.msk [vmem:[%s594_s4] sm:$0xff] %vm240_vm0, %v224_v52  ;;  %249 = vst.msk [vmem:[%s594_s4 + $0x40] sm:$0xff] %vm240_vm0, %v232_v53  ;;  %v203_v60 = vmul.f32 %v261_v40, %v125_v58  ;;  %v211_v61 = vmul.f32 %v261_v40, %v165_v59 }
  0xfe   :  { %v227_v62 = vadd.f32 %v262_v42, %v204_v56  ;;  %v235_v63 = vadd.f32 %v262_v42, %v212_v57 }
  0xff   :  { %v226_v0 = vadd.f32 %v262_v42, %v203_v60  ;;  %v234_v1 = vadd.f32 %v262_v42, %v211_v61  ;;  %v335_v2 = vpop.f32.mrb[4].mxu0  ;;  %v347_v3 = vpop.f32.mrb[4].mxu1 }
 0x100   :  { %244 = vst.msk [vmem:[%s594_s4 + $0x18] sm:$0xff] %vm240_vm0, %v227_v62  ;;  %252 = vst.msk [vmem:[%s594_s4 + $0x58] sm:$0xff] %vm240_vm0, %v235_v63  ;;  %v206_v4 = vmul.f32 %v335_v2, %v261_v40  ;;  %v214_v5 = vmul.f32 %v347_v3, %v261_v40  ;;  %v135_v6 = vpop.f32.mrb[5].mxu0  ;;  %v175_v7 = vpop.f32.mrb[5].mxu1 }
 0x101   :  { %243 = vst.msk [vmem:[%s594_s4 + $0x10] sm:$0xff] %vm240_vm0, %v226_v0  ;;  %251 = vst.msk [vmem:[%s594_s4 + $0x50] sm:$0xff] %vm240_vm0, %v234_v1  ;;  %v205_v8 = vmul.f32 %v261_v40, %v135_v6  ;;  %v213_v9 = vmul.f32 %v261_v40, %v175_v7 }
 0x102   :  { %v229_v10 = vadd.f32 %v262_v42, %v206_v4  ;;  %v237_v11 = vadd.f32 %v262_v42, %v214_v5 }
 0x103   :  { %v228_v12 = vadd.f32 %v262_v42, %v205_v8  ;;  %v236_v13 = vadd.f32 %v262_v42, %v213_v9  ;;  %v338_v14 = vpop.f32.mrb[6].mxu0  ;;  %v350_v15 = vpop.f32.mrb[6].mxu1 }
 0x104   :  { %246 = vst.msk [vmem:[%s594_s4 + $0x28] sm:$0xff] %vm240_vm0, %v229_v10  ;;  %254 = vst.msk [vmem:[%s594_s4 + $0x68] sm:$0xff] %vm240_vm0, %v237_v11  ;;  %v208_v16 = vmul.f32 %v338_v14, %v261_v40  ;;  %v216_v17 = vmul.f32 %v350_v15, %v261_v40  ;;  %v145_v18 = vpop.f32.mrb[7].mxu0  ;;  %v185_v19 = vpop.f32.mrb[7].mxu1 }
 0x105   :  { %245 = vst.msk [vmem:[%s594_s4 + $0x20] sm:$0xff] %vm240_vm0, %v228_v12  ;;  %253 = vst.msk [vmem:[%s594_s4 + $0x60] sm:$0xff] %vm240_vm0, %v236_v13  ;;  %v207_v20 = vmul.f32 %v261_v40, %v145_v18  ;;  %v215_v21 = vmul.f32 %v261_v40, %v185_v19 }
 0x106   :  { %v231_v22 = vadd.f32 %v262_v42, %v208_v16  ;;  %v239_v23 = vadd.f32 %v262_v42, %v216_v17 }
 0x107   :  { %v230_v24 = vadd.f32 %v262_v42, %v207_v20  ;;  %v238_v25 = vadd.f32 %v262_v42, %v215_v21 }
 0x108   :  { %248 = vst.msk [vmem:[%s594_s4 + $0x38] sm:$0xff] %vm240_vm0, %v231_v22  ;;  %256 = vst.msk [vmem:[%s594_s4 + $0x78] sm:$0xff] %vm240_vm0, %v239_v23 }
 0x109   :  { %247 = vst.msk [vmem:[%s594_s4 + $0x30] sm:$0xff] %vm240_vm0, %v230_v24  ;;  %255 = vst.msk [vmem:[%s594_s4 + $0x70] sm:$0xff] %vm240_vm0, %v238_v25 }

// kernel: multiscale_forward.117
= control target key start
LH: loop header
LB: loop body
LE: loop exit
PB: predicated region body
PF: predicated region fallthrough
CT: control target
= control target key end

     0   :  { %vm35_vm0 = vcmask 130048   ;;  %s530_s1 = inlined_call_operand.vmem [shape: f32[16,16], index: 1, kind: input, shape index: {}]   ;;  %s531_s0 = inlined_call_operand.vmem [shape: f32[128,16], index: 0, kind: input, shape index: {}]   ;;  %s532_s2 = inlined_call_operand.vmem [shape: f32[1,16], index: 2, kind: input, shape index: {}]   ;;  %s533_s3 = inlined_call_operand.vmem [shape: f32[1,16], index: 3, kind: input, shape index: {}]   ;;  %s534_s4 = inlined_call_operand.vmem [shape: f32[128,16], index: 4, kind: output, shape index: {}]  }
   0x1   :  { %v33_v0 = vld [vmem:[%s530_s1] sm:$0xff]  ;;  %v34_v1 = vld [vmem:[%s530_s1 + $0x8] sm:$0xff]  ;;  %v19_v7 = vld [vmem:[%s531_s0 + $0x10] sm:$0xff] }
   0x2   :  { %v17_v2 = vld [vmem:[%s531_s0] sm:$0xff]  ;;  %v359_v3 = vpack.c.bf16 %v34_v1, %v33_v0  ;;  %v18_v5 = vld [vmem:[%s531_s0 + $0x8] sm:$0xff]  ;;  %v27_v8 = vld [vmem:[%s531_s0 + $0x50] sm:$0xff] }
   0x3   :  { %335 = vmatprep.mubr.msk.f32.mxu0 %vm35_vm0, %v17_v2  ;;  %v25_v4 = vld [vmem:[%s531_s0 + $0x40] sm:$0xff]  ;;  %v26_v6 = vld [vmem:[%s531_s0 + $0x48] sm:$0xff]  ;;  %v20_v9 = vld [vmem:[%s531_s0 + $0x18] sm:$0xff] }
   0x4   :  { %347 = vmatprep.mubr.msk.f32.mxu1 %vm35_vm0, %v25_v4  ;;  %360 = vmatprep.subr.bf16.mxu0 %v359_v3  ;;  %v28_v10 = vld [vmem:[%s531_s0 + $0x58] sm:$0xff]  ;;  %v21_v11 = vld [vmem:[%s531_s0 + $0x20] sm:$0xff]  ;;  %v22_v13 = vld [vmem:[%s531_s0 + $0x28] sm:$0xff] }
   0x5   :  { %363 = vmatprep.subr.bf16.mxu1 %v359_v3  ;;  %362 = vmatpush3.bf16.msra.mxu0 %v359_v3  ;;  %v29_v12 = vld [vmem:[%s531_s0 + $0x60] sm:$0xff]  ;;  %v30_v14 = vld [vmem:[%s531_s0 + $0x68] sm:$0xff]  ;;  %v23_v15 = vld [vmem:[%s531_s0 + $0x30] sm:$0xff] }
   0x6   :  { %364 = vmatpush3.bf16.msra.mxu1 %v359_v3  ;;  %v31_v16 = vld [vmem:[%s531_s0 + $0x70] sm:$0xff]  ;;  %v24_v17 = vld [vmem:[%s531_s0 + $0x38] sm:$0xff]  ;;  %v311_v19 = vld [vmem:[%s532_s2] ss:$0 sm:$0xff] }
   0x7   :  { %v32_v18 = vld [vmem:[%s531_s0 + $0x78] sm:$0xff]  ;;  %v312_v21 = vld [vmem:[%s533_s3] ss:$0 sm:$0xff] }
   0x8   :  { %336 = vmatmul.mubr.msk.f32.vlgmr.msra.gmra.mrb[0].mxu0 %vm35_vm0, %v18_v5 }
   0x9   :  { %348 = vmatmul.mubr.msk.f32.vlgmr.msra.gmra.mrb[0].mxu1 %vm35_vm0, %v26_v6  ;;  %338 = vmatprep.mubr.msk.f32.mxu0 %vm35_vm0, %v19_v7 }
   0xa   :  { %350 = vmatprep.mubr.msk.f32.mxu1 %vm35_vm0, %v27_v8 }
   0xc   :  { %339 = vmatmul.mubr.msk.f32.gmra.mrb[2].mxu0 %vm35_vm0, %v20_v9 }
   0xd   :  { %351 = vmatmul.mubr.msk.f32.gmra.mrb[2].mxu1 %vm35_vm0, %v28_v10  ;;  %341 = vmatprep.mubr.msk.f32.mxu0 %vm35_vm0, %v21_v11 }
   0xe   :  { %353 = vmatprep.mubr.msk.f32.mxu1 %vm35_vm0, %v29_v12 }
  0x10   :  { %342 = vmatmul.mubr.msk.f32.gmra.mrb[4].mxu0 %vm35_vm0, %v22_v13 }
  0x11   :  { %354 = vmatmul.mubr.msk.f32.gmra.mrb[4].mxu1 %vm35_vm0, %v30_v14  ;;  %344 = vmatprep.mubr.msk.f32.mxu0 %vm35_vm0, %v23_v15 }
  0x12   :  { %356 = vmatprep.mubr.msk.f32.mxu1 %vm35_vm0, %v31_v16 }
  0x14   :  { %345 = vmatmul.mubr.msk.f32.gmra.mrb[6].mxu0 %vm35_vm0, %v24_v17 }
  0x15   :  { %357 = vmatmul.mubr.msk.f32.gmra.mrb[6].mxu1 %vm35_vm0, %v32_v18 }
  0xdb   :  { %v337_v20 = vpop.f32.mrb[0].mxu0 }
  0xdc   :  { %v349_v22 = vpop.f32.mrb[0].mxu1  ;;  %v237_v23 = vmul.f32 %v337_v20, %v311_v19  ;;  %v150_v25 = vpop.f32.mrb[1].mxu0 }
  0xdd   :  { %v245_v24 = vmul.f32 %v349_v22, %v311_v19  ;;  %v190_v26 = vpop.f32.mrb[1].mxu1  ;;  %v236_v27 = vmul.f32 %v311_v19, %v150_v25 }
  0xde   :  { %v244_v28 = vmul.f32 %v311_v19, %v190_v26  ;;  %v260_v29 = vadd.f32 %v312_v21, %v237_v23 }
  0xdf   :  { %v268_v30 = vadd.f32 %v312_v21, %v245_v24  ;;  %v259_v31 = vadd.f32 %v312_v21, %v236_v27  ;;  %v340_v33 = vpop.f32.mrb[2].mxu0 }
  0xe0   :  { %v267_v32 = vadd.f32 %v312_v21, %v244_v28  ;;  %v352_v34 = vpop.f32.mrb[2].mxu1  ;;  %276 = vst.msk [vmem:[%s534_s4 + $0x8] sm:$0xff] %vm35_vm0, %v260_v29  ;;  %v239_v35 = vmul.f32 %v340_v33, %v311_v19  ;;  %v160_v37 = vpop.f32.mrb[3].mxu0 }
  0xe1   :  { %284 = vst.msk [vmem:[%s534_s4 + $0x48] sm:$0xff] %vm35_vm0, %v268_v30  ;;  %v247_v36 = vmul.f32 %v352_v34, %v311_v19  ;;  %v200_v38 = vpop.f32.mrb[3].mxu1  ;;  %275 = vst.msk [vmem:[%s534_s4] sm:$0xff] %vm35_vm0, %v259_v31  ;;  %v238_v39 = vmul.f32 %v311_v19, %v160_v37 }
  0xe2   :  { %283 = vst.msk [vmem:[%s534_s4 + $0x40] sm:$0xff] %vm35_vm0, %v267_v32  ;;  %v246_v40 = vmul.f32 %v311_v19, %v200_v38  ;;  %v262_v41 = vadd.f32 %v312_v21, %v239_v35 }
  0xe3   :  { %v270_v42 = vadd.f32 %v312_v21, %v247_v36  ;;  %v261_v43 = vadd.f32 %v312_v21, %v238_v39  ;;  %v343_v45 = vpop.f32.mrb[4].mxu0 }
  0xe4   :  { %v269_v44 = vadd.f32 %v312_v21, %v246_v40  ;;  %v355_v46 = vpop.f32.mrb[4].mxu1  ;;  %278 = vst.msk [vmem:[%s534_s4 + $0x18] sm:$0xff] %vm35_vm0, %v262_v41  ;;  %v241_v47 = vmul.f32 %v343_v45, %v311_v19  ;;  %v170_v49 = vpop.f32.mrb[5].mxu0 }
  0xe5   :  { %286 = vst.msk [vmem:[%s534_s4 + $0x58] sm:$0xff] %vm35_vm0, %v270_v42  ;;  %v249_v48 = vmul.f32 %v355_v46, %v311_v19  ;;  %v210_v50 = vpop.f32.mrb[5].mxu1  ;;  %277 = vst.msk [vmem:[%s534_s4 + $0x10] sm:$0xff] %vm35_vm0, %v261_v43  ;;  %v240_v51 = vmul.f32 %v311_v19, %v170_v49 }
  0xe6   :  { %285 = vst.msk [vmem:[%s534_s4 + $0x50] sm:$0xff] %vm35_vm0, %v269_v44  ;;  %v248_v52 = vmul.f32 %v311_v19, %v210_v50  ;;  %v264_v53 = vadd.f32 %v312_v21, %v241_v47 }
  0xe7   :  { %v272_v54 = vadd.f32 %v312_v21, %v249_v48  ;;  %v263_v55 = vadd.f32 %v312_v21, %v240_v51  ;;  %v346_v57 = vpop.f32.mrb[6].mxu0 }
  0xe8   :  { %v271_v56 = vadd.f32 %v312_v21, %v248_v52  ;;  %v358_v58 = vpop.f32.mrb[6].mxu1  ;;  %280 = vst.msk [vmem:[%s534_s4 + $0x28] sm:$0xff] %vm35_vm0, %v264_v53  ;;  %v243_v59 = vmul.f32 %v346_v57, %v311_v19  ;;  %v180_v61 = vpop.f32.mrb[7].mxu0 }
  0xe9   :  { %288 = vst.msk [vmem:[%s534_s4 + $0x68] sm:$0xff] %vm35_vm0, %v272_v54  ;;  %v251_v60 = vmul.f32 %v358_v58, %v311_v19  ;;  %v220_v62 = vpop.f32.mrb[7].mxu1  ;;  %279 = vst.msk [vmem:[%s534_s4 + $0x20] sm:$0xff] %vm35_vm0, %v263_v55  ;;  %v242_v63 = vmul.f32 %v311_v19, %v180_v61 }
  0xea   :  { %287 = vst.msk [vmem:[%s534_s4 + $0x60] sm:$0xff] %vm35_vm0, %v271_v56  ;;  %v250_v0 = vmul.f32 %v311_v19, %v220_v62  ;;  %v266_v1 = vadd.f32 %v312_v21, %v243_v59 }
  0xeb   :  { %v274_v2 = vadd.f32 %v312_v21, %v251_v60  ;;  %v265_v3 = vadd.f32 %v312_v21, %v242_v63 }
  0xec   :  { %v273_v4 = vadd.f32 %v312_v21, %v250_v0  ;;  %282 = vst.msk [vmem:[%s534_s4 + $0x38] sm:$0xff] %vm35_vm0, %v266_v1 }
  0xed   :  { %290 = vst.msk [vmem:[%s534_s4 + $0x78] sm:$0xff] %vm35_vm0, %v274_v2  ;;  %281 = vst.msk [vmem:[%s534_s4 + $0x30] sm:$0xff] %vm35_vm0, %v265_v3 }
  0xee   :  { %289 = vst.msk [vmem:[%s534_s4 + $0x70] sm:$0xff] %vm35_vm0, %v273_v4 }

// kernel: multiscale_forward.123
= control target key start
LH: loop header
LB: loop body
LE: loop exit
PB: predicated region body
PF: predicated region fallthrough
CT: control target
= control target key end

     0   :  { %vm112_vm0 = vcmask 523264   ;;  %vm384_vm1 = vcmask 130048   ;;  %s837_s3 = inlined_call_operand.vmem [shape: f32[64,16], index: 3, kind: input, shape index: {}]   ;;  %s838_s0 = inlined_call_operand.vmem [shape: f32[128,64], index: 0, kind: input, shape index: {}]   ;;  %s839_s1 = inlined_call_operand.vmem [shape: f32[1,64], index: 1, kind: input, shape index: {}]   ;;  %s840_s2 = inlined_call_operand.vmem [shape: f32[1,64], index: 2, kind: input, shape index: {}]   ;;  %s841_s4 = inlined_call_operand.vmem [shape: f32[1,16], index: 4, kind: input, shape index: {}]   ;;  %s842_s5 = inlined_call_operand.vmem [shape: f32[1,16], index: 5, kind: input, shape index: {}]   ;;  %s843_s6 = inlined_call_operand.vmem [shape: f32[128,16], index: 6, kind: input, shape index: {}]   ;;  %s844_s7 = inlined_call_operand.vmem [shape: f32[128,16], index: 7, kind: output, shape index: {}]  }
   0x1   :  { %v104_v0 = vld [vmem:[%s837_s3] sm:$0xff]  ;;  %v105_v1 = vld [vmem:[%s837_s3 + $0x8] sm:$0xff]  ;;  %v106_v2 = vld [vmem:[%s837_s3 + $0x10] sm:$0xff] }
   0x2   :  { %v489_v3 = vpack.c.bf16 %v105_v1, %v104_v0  ;;  %v107_v4 = vld [vmem:[%s837_s3 + $0x18] sm:$0xff]  ;;  %v108_v6 = vld [vmem:[%s837_s3 + $0x20] sm:$0xff]  ;;  %v109_v7 = vld [vmem:[%s837_s3 + $0x28] sm:$0xff] }
   0x3   :  { %v493_v5 = vpack.c.bf16 %v107_v4, %v106_v2  ;;  %v26_v8 = vld [vmem:[%s838_s0] sm:$0xff]  ;;  %v27_v14 = vld [vmem:[%s838_s0 + $0x8] sm:$0xff]  ;;  %v28_v16 = vld [vmem:[%s838_s0 + $0x10] sm:$0xff]  ;;  %v497_v17 = vpack.c.bf16 %v109_v7, %v108_v6 }
   0x4   :  { %490 = vmatprep.subr.bf16.mxu0 %v489_v3  ;;  %505 = vmatprep.subr.bf16.mxu1 %v489_v3  ;;  %v577_v9 = vld [vmem:[%s839_s1] ss:$0 sm:$0xff]  ;;  %v35_v15 = vld [vmem:[%s838_s0 + $0x48] sm:$0xff]  ;;  %v36_v18 = vld [vmem:[%s838_s0 + $0x50] sm:$0xff] }
   0x5   :  { %v582_v10 = vld [vmem:[%s840_s2] ss:$0 sm:$0xff]  ;;  %492 = vmatpush3.bf16.msra.mxu0 %v489_v3  ;;  %509 = vmatpush3.bf16.msra.mxu1 %v489_v3  ;;  %v49_v12 = vmul.f32 %v577_v9, %v26_v8  ;;  %v110_v19 = vld [vmem:[%s837_s3 + $0x30] sm:$0xff]  ;;  %v111_v20 = vld [vmem:[%s837_s3 + $0x38] sm:$0xff]  ;;  %v50_v23 = vmul.f32 %v577_v9, %v27_v14  ;;  %v58_v24 = vmul.f32 %v577_v9, %v35_v15 }
   0x6   :  { %v34_v11 = vld [vmem:[%s838_s0 + $0x40] sm:$0xff]  ;;  %494 = vmatprep.subr.bf16.mxu0 %v493_v5  ;;  %506 = vmatprep.subr.bf16.mxu1 %v493_v5  ;;  %v51_v25 = vmul.f32 %v577_v9, %v28_v16  ;;  %v29_v26 = vld [vmem:[%s838_s0 + $0x18] sm:$0xff]  ;;  %v59_v29 = vmul.f32 %v577_v9, %v36_v18  ;;  %v501_v31 = vpack.c.bf16 %v111_v20, %v110_v19  ;;  %v31_v39 = vld [vmem:[%s838_s0 + $0x28] sm:$0xff] }
   0x7   :  { %v57_v13 = vmul.f32 %v577_v9, %v34_v11  ;;  %v72_v21 = vadd.f32 %v582_v10, %v49_v12  ;;  %v37_v30 = vld [vmem:[%s838_s0 + $0x58] sm:$0xff]  ;;  %v30_v32 = vld [vmem:[%s838_s0 + $0x20] sm:$0xff]  ;;  %v73_v34 = vadd.f32 %v582_v10, %v50_v23  ;;  %v81_v35 = vadd.f32 %v582_v10, %v58_v24  ;;  %v39_v43 = vld [vmem:[%s838_s0 + $0x68] sm:$0xff] }
   0x8   :  { %v38_v33 = vld [vmem:[%s838_s0 + $0x60] sm:$0xff]  ;;  %v52_v36 = vmul.f32 %v577_v9, %v29_v26  ;;  %v74_v37 = vadd.f32 %v582_v10, %v51_v25  ;;  %v60_v38 = vmul.f32 %v577_v9, %v37_v30  ;;  %v82_v40 = vadd.f32 %v582_v10, %v59_v29  ;;  %v32_v44 = vld [vmem:[%s838_s0 + $0x30] sm:$0xff]  ;;  %v33_v58 = vld [vmem:[%s838_s0 + $0x38] sm:$0xff] }
   0x9   :  { %v80_v22 = vadd.f32 %v582_v10, %v57_v13  ;;  %496 = vmatpush3.bf16.msra.mxu0 %v493_v5  ;;  %510 = vmatpush3.bf16.msra.mxu1 %v493_v5  ;;  %v88_v27 = vmax.f32 %v72_v21, 0.0  ;;  %v53_v41 = vmul.f32 %v577_v9, %v30_v32  ;;  %v61_v42 = vmul.f32 %v577_v9, %v38_v33  ;;  %v40_v45 = vld [vmem:[%s838_s0 + $0x70] sm:$0xff]  ;;  %v41_v59 = vld [vmem:[%s838_s0 + $0x78] sm:$0xff]  ;;  %v691_v16 = vld [vmem:[%s842_s5] ss:$0 sm:$0xff] }
   0xa   :  { %498 = vmatprep.subr.bf16.mxu0 %v497_v17  ;;  %507 = vmatprep.subr.bf16.mxu1 %v497_v17  ;;  %v89_v46 = vmax.f32 %v73_v34, 0.0  ;;  %v97_v47 = vmax.f32 %v81_v35, 0.0  ;;  %v75_v48 = vadd.f32 %v582_v10, %v52_v36  ;;  %v54_v49 = vmul.f32 %v577_v9, %v31_v39  ;;  %v361_v23 = vld [vmem:[%s843_s6 + $0x48] sm:$0xff]  ;;  %v360_v29 = vld [vmem:[%s843_s6 + $0x40] sm:$0xff] }
   0xb   :  { %v96_v28 = vmax.f32 %v80_v22, 0.0  ;;  %465 = vmatprep.mubr.msk.f32.mxu0 %vm112_vm0, %v88_v27  ;;  %v90_v50 = vmax.f32 %v74_v37, 0.0  ;;  %v83_v51 = vadd.f32 %v582_v10, %v60_v38  ;;  %v62_v52 = vmul.f32 %v577_v9, %v39_v43  ;;  %v353_v22 = vld [vmem:[%s843_s6 + $0x8] sm:$0xff]  ;;  %v363_v43 = vld [vmem:[%s843_s6 + $0x58] sm:$0xff] }
   0xc   :  { %v55_v53 = vmul.f32 %v577_v9, %v32_v44  ;;  %v98_v54 = vmax.f32 %v82_v40, 0.0  ;;  %v76_v55 = vadd.f32 %v582_v10, %v53_v41  ;;  %v84_v56 = vadd.f32 %v582_v10, %v61_v42  ;;  %v355_v42 = vld [vmem:[%s843_s6 + $0x18] sm:$0xff] }
   0xd   :  { %477 = vmatprep.mubr.msk.f32.mxu1 %vm112_vm0, %v96_v28  ;;  %500 = vmatpush3.bf16.msra.mxu0 %v497_v17  ;;  %v63_v57 = vmul.f32 %v577_v9, %v40_v45  ;;  %v91_v60 = vmax.f32 %v75_v48, 0.0  ;;  %v77_v61 = vadd.f32 %v582_v10, %v54_v49  ;;  %v99_v62 = vmax.f32 %v83_v51, 0.0  ;;  %v352_v28 = vld [vmem:[%s843_s6] sm:$0xff]  ;;  %v354_v48 = vld [vmem:[%s843_s6 + $0x10] sm:$0xff] }
   0xe   :  { %511 = vmatpush3.bf16.msra.mxu1 %v497_v17  ;;  %502 = vmatprep.subr.bf16.mxu0 %v501_v31  ;;  %v85_v63 = vadd.f32 %v582_v10, %v62_v52  ;;  %v56_v0 = vmul.f32 %v577_v9, %v33_v58  ;;  %v64_v1 = vmul.f32 %v577_v9, %v41_v59  ;;  %v92_v2 = vmax.f32 %v76_v55, 0.0  ;;  %v362_v49 = vld [vmem:[%s843_s6 + $0x50] sm:$0xff] }
   0xf   :  { %508 = vmatprep.subr.bf16.mxu1 %v501_v31  ;;  %v100_v3 = vmax.f32 %v84_v56, 0.0  ;;  %v78_v4 = vadd.f32 %v582_v10, %v55_v53  ;;  %v86_v5 = vadd.f32 %v582_v10, %v63_v57  ;;  %v93_v6 = vmax.f32 %v77_v61, 0.0 }
  0x10   :  { %v101_v7 = vmax.f32 %v85_v63, 0.0  ;;  %v79_v8 = vadd.f32 %v582_v10, %v56_v0  ;;  %v87_v9 = vadd.f32 %v582_v10, %v64_v1  ;;  %v686_v10 = vld [vmem:[%s841_s4] ss:$0 sm:$0xff]  ;;  %v365_v63 = vld [vmem:[%s843_s6 + $0x68] sm:$0xff] }
  0x11   :  { %504 = vmatpush3.bf16.msra.mxu0 %v501_v31  ;;  %v94_v11 = vmax.f32 %v78_v4, 0.0  ;;  %v102_v12 = vmax.f32 %v86_v5, 0.0  ;;  %v356_v4 = vld [vmem:[%s843_s6 + $0x20] sm:$0xff] }
  0x12   :  { %512 = vmatpush3.bf16.msra.mxu1 %v501_v31  ;;  %v95_v13 = vmax.f32 %v79_v8, 0.0  ;;  %v103_v14 = vmax.f32 %v87_v9, 0.0  ;;  %v364_v5 = vld [vmem:[%s843_s6 + $0x60] sm:$0xff] }
  0x14   :  { %466 = vmatmul.mubr.msk.f32.vlgmr.msra.gmra.mrb[0].mxu0 %vm112_vm0, %v89_v46 }
  0x15   :  { %478 = vmatmul.mubr.msk.f32.vlgmr.msra.gmra.mrb[0].mxu1 %vm112_vm0, %v97_v47  ;;  %468 = vmatprep.mubr.msk.f32.mxu0 %vm112_vm0, %v90_v50 }
  0x16   :  { %480 = vmatprep.mubr.msk.f32.mxu1 %vm112_vm0, %v98_v54 }
  0x18   :  { %469 = vmatmul.mubr.msk.f32.gmra.mrb[2].mxu0 %vm112_vm0, %v91_v60 }
  0x19   :  { %481 = vmatmul.mubr.msk.f32.gmra.mrb[2].mxu1 %vm112_vm0, %v99_v62  ;;  %471 = vmatprep.mubr.msk.f32.mxu0 %vm112_vm0, %v92_v2  ;;  %v357_v62 = vld [vmem:[%s843_s6 + $0x28] sm:$0xff] }
  0x1a   :  { %483 = vmatprep.mubr.msk.f32.mxu1 %vm112_vm0, %v100_v3 }
  0x1c   :  { %472 = vmatmul.mubr.msk.f32.gmra.mrb[4].mxu0 %vm112_vm0, %v93_v6 }
  0x1d   :  { %484 = vmatmul.mubr.msk.f32.gmra.mrb[4].mxu1 %vm112_vm0, %v101_v7  ;;  %474 = vmatprep.mubr.msk.f32.mxu0 %vm112_vm0, %v94_v11 }
  0x1e   :  { %486 = vmatprep.mubr.msk.f32.mxu1 %vm112_vm0, %v102_v12 }
  0x20   :  { %475 = vmatmul.mubr.msk.f32.gmra.mrb[6].mxu0 %vm112_vm0, %v95_v13 }
  0x21   :  { %487 = vmatmul.mubr.msk.f32.gmra.mrb[6].mxu1 %vm112_vm0, %v103_v14 }
  0xe7   :  { %v467_v15 = vpop.f32.mrb[0].mxu0 }
  0xe8   :  { %v479_v17 = vpop.f32.mrb[0].mxu1  ;;  %v314_v18 = vmul.f32 %v467_v15, %v686_v10  ;;  %v227_v20 = vpop.f32.mrb[1].mxu0 }
  0xe9   :  { %v322_v19 = vmul.f32 %v479_v17, %v686_v10  ;;  %v267_v21 = vpop.f32.mrb[1].mxu1  ;;  %v313_v24 = vmul.f32 %v686_v10, %v227_v20  ;;  %v359_v20 = vld [vmem:[%s843_s6 + $0x38] sm:$0xff] }
  0xea   :  { %v321_v25 = vmul.f32 %v686_v10, %v267_v21  ;;  %v337_v26 = vadd.f32 %v691_v16, %v314_v18  ;;  %v367_v21 = vld [vmem:[%s843_s6 + $0x78] sm:$0xff] }
  0xeb   :  { %v345_v27 = vadd.f32 %v691_v16, %v322_v19  ;;  %v336_v30 = vadd.f32 %v691_v16, %v313_v24  ;;  %v470_v32 = vpop.f32.mrb[2].mxu0 }
  0xec   :  { %v344_v31 = vadd.f32 %v691_v16, %v321_v25  ;;  %v482_v33 = vpop.f32.mrb[2].mxu1  ;;  %v369_v34 = vadd.f32 %v353_v22, %v337_v26  ;;  %v316_v36 = vmul.f32 %v470_v32, %v686_v10  ;;  %v237_v38 = vpop.f32.mrb[3].mxu0  ;;  %v358_v26 = vld [vmem:[%s843_s6 + $0x30] sm:$0xff] }
  0xed   :  { %v377_v35 = vadd.f32 %v361_v23, %v345_v27  ;;  %v324_v37 = vmul.f32 %v482_v33, %v686_v10  ;;  %v277_v39 = vpop.f32.mrb[3].mxu1  ;;  %v368_v40 = vadd.f32 %v352_v28, %v336_v30  ;;  %v315_v44 = vmul.f32 %v686_v10, %v237_v38 }
  0xee   :  { %v376_v41 = vadd.f32 %v360_v29, %v344_v31  ;;  %v323_v45 = vmul.f32 %v686_v10, %v277_v39  ;;  %386 = vst.msk [vmem:[%s844_s7 + $0x8] sm:$0xff] %vm384_vm1, %v369_v34  ;;  %v339_v46 = vadd.f32 %v691_v16, %v316_v36 }
  0xef   :  { %394 = vst.msk [vmem:[%s844_s7 + $0x48] sm:$0xff] %vm384_vm1, %v377_v35  ;;  %v347_v47 = vadd.f32 %v691_v16, %v324_v37  ;;  %385 = vst.msk [vmem:[%s844_s7] sm:$0xff] %vm384_vm1, %v368_v40  ;;  %v338_v50 = vadd.f32 %v691_v16, %v315_v44  ;;  %v473_v52 = vpop.f32.mrb[4].mxu0 }
  0xf0   :  { %393 = vst.msk [vmem:[%s844_s7 + $0x40] sm:$0xff] %vm384_vm1, %v376_v41  ;;  %v346_v51 = vadd.f32 %v691_v16, %v323_v45  ;;  %v485_v53 = vpop.f32.mrb[4].mxu1  ;;  %v371_v54 = vadd.f32 %v355_v42, %v339_v46  ;;  %v318_v56 = vmul.f32 %v473_v52, %v686_v10  ;;  %v247_v58 = vpop.f32.mrb[5].mxu0 }
  0xf1   :  { %v379_v55 = vadd.f32 %v363_v43, %v347_v47  ;;  %v326_v57 = vmul.f32 %v485_v53, %v686_v10  ;;  %v287_v59 = vpop.f32.mrb[5].mxu1  ;;  %v370_v60 = vadd.f32 %v354_v48, %v338_v50  ;;  %v317_v0 = vmul.f32 %v686_v10, %v247_v58 }
  0xf2   :  { %v378_v61 = vadd.f32 %v362_v49, %v346_v51  ;;  %v325_v1 = vmul.f32 %v686_v10, %v287_v59  ;;  %388 = vst.msk [vmem:[%s844_s7 + $0x18] sm:$0xff] %vm384_vm1, %v371_v54  ;;  %v341_v2 = vadd.f32 %v691_v16, %v318_v56 }
  0xf3   :  { %396 = vst.msk [vmem:[%s844_s7 + $0x58] sm:$0xff] %vm384_vm1, %v379_v55  ;;  %v349_v3 = vadd.f32 %v691_v16, %v326_v57  ;;  %387 = vst.msk [vmem:[%s844_s7 + $0x10] sm:$0xff] %vm384_vm1, %v370_v60  ;;  %v340_v6 = vadd.f32 %v691_v16, %v317_v0  ;;  %v476_v8 = vpop.f32.mrb[6].mxu0 }
  0xf4   :  { %395 = vst.msk [vmem:[%s844_s7 + $0x50] sm:$0xff] %vm384_vm1, %v378_v61  ;;  %v348_v7 = vadd.f32 %v691_v16, %v325_v1  ;;  %v488_v9 = vpop.f32.mrb[6].mxu1  ;;  %v373_v11 = vadd.f32 %v357_v62, %v341_v2  ;;  %v320_v13 = vmul.f32 %v476_v8, %v686_v10  ;;  %v257_v15 = vpop.f32.mrb[7].mxu0 }
  0xf5   :  { %v381_v12 = vadd.f32 %v365_v63, %v349_v3  ;;  %v328_v14 = vmul.f32 %v488_v9, %v686_v10  ;;  %v297_v17 = vpop.f32.mrb[7].mxu1  ;;  %v372_v18 = vadd.f32 %v356_v4, %v340_v6  ;;  %v319_v22 = vmul.f32 %v686_v10, %v257_v15 }
  0xf6   :  { %v380_v19 = vadd.f32 %v364_v5, %v348_v7  ;;  %v327_v23 = vmul.f32 %v686_v10, %v297_v17  ;;  %390 = vst.msk [vmem:[%s844_s7 + $0x28] sm:$0xff] %vm384_vm1, %v373_v11  ;;  %v343_v24 = vadd.f32 %v691_v16, %v320_v13  ;;  %v366_v10 = vld [vmem:[%s843_s6 + $0x70] sm:$0xff] }
  0xf7   :  { %398 = vst.msk [vmem:[%s844_s7 + $0x68] sm:$0xff] %vm384_vm1, %v381_v12  ;;  %v351_v25 = vadd.f32 %v691_v16, %v328_v14  ;;  %389 = vst.msk [vmem:[%s844_s7 + $0x20] sm:$0xff] %vm384_vm1, %v372_v18  ;;  %v342_v27 = vadd.f32 %v691_v16, %v319_v22 }
  0xf8   :  { %397 = vst.msk [vmem:[%s844_s7 + $0x60] sm:$0xff] %vm384_vm1, %v380_v19  ;;  %v350_v28 = vadd.f32 %v691_v16, %v327_v23  ;;  %v375_v29 = vadd.f32 %v359_v20, %v343_v24 }
  0xf9   :  { %v383_v30 = vadd.f32 %v367_v21, %v351_v25  ;;  %v374_v31 = vadd.f32 %v358_v26, %v342_v27 }
  0xfa   :  { %v382_v32 = vadd.f32 %v366_v10, %v350_v28  ;;  %392 = vst.msk [vmem:[%s844_s7 + $0x38] sm:$0xff] %vm384_vm1, %v375_v29 }
  0xfb   :  { %400 = vst.msk [vmem:[%s844_s7 + $0x78] sm:$0xff] %vm384_vm1, %v383_v30  ;;  %391 = vst.msk [vmem:[%s844_s7 + $0x30] sm:$0xff] %vm384_vm1, %v374_v31 }
  0xfc   :  { %399 = vst.msk [vmem:[%s844_s7 + $0x70] sm:$0xff] %vm384_vm1, %v382_v32 }

// kernel: multiscale_forward.127
= control target key start
LH: loop header
LB: loop body
LE: loop exit
PB: predicated region body
PF: predicated region fallthrough
CT: control target
= control target key end

     0   :  { %vm60_vm0 = vcmask 261120   ;;  %s157_s0 = inlined_call_operand.vmem [shape: f32[64,32], index: 0, kind: input, shape index: {}]   ;;  %s158_s1 = inlined_call_operand.vmem [shape: f32[1,32], index: 1, kind: input, shape index: {}]   ;;  %s159_s2 = inlined_call_operand.vmem [shape: f32[1,32], index: 2, kind: input, shape index: {}]   ;;  %s160_s3 = inlined_call_operand.vmem [shape: f32[64,32], index: 3, kind: output, shape index: {}]  }
   0x1   :  { %v14_v0 = vld [vmem:[%s157_s0] sm:$0xff]  ;;  %v15_v4 = vld [vmem:[%s157_s0 + $0x8] sm:$0xff]  ;;  %v16_v5 = vld [vmem:[%s157_s0 + $0x10] sm:$0xff] }
   0x2   :  { %v73_v1 = vld [vmem:[%s158_s1] ss:$0 sm:$0xff]  ;;  %v17_v6 = vld [vmem:[%s157_s0 + $0x18] sm:$0xff]  ;;  %v19_v11 = vld [vmem:[%s157_s0 + $0x28] sm:$0xff] }
   0x3   :  { %v74_v2 = vld [vmem:[%s159_s2] ss:$0 sm:$0xff]  ;;  %v29_v3 = vmul.f32 %v73_v1, %v14_v0  ;;  %v30_v7 = vmul.f32 %v73_v1, %v15_v4  ;;  %v31_v8 = vmul.f32 %v73_v1, %v16_v5  ;;  %v32_v9 = vmul.f32 %v73_v1, %v17_v6  ;;  %v20_v12 = vld [vmem:[%s157_s0 + $0x30] sm:$0xff]  ;;  %v21_v17 = vld [vmem:[%s157_s0 + $0x38] sm:$0xff] }
   0x4   :  { %v18_v10 = vld [vmem:[%s157_s0 + $0x20] sm:$0xff]  ;;  %v34_v15 = vmul.f32 %v73_v1, %v19_v11  ;;  %v35_v16 = vmul.f32 %v73_v1, %v20_v12  ;;  %v36_v21 = vmul.f32 %v73_v1, %v21_v17 }
   0x5   :  { %v44_v13 = vadd.f32 %v74_v2, %v29_v3  ;;  %v33_v14 = vmul.f32 %v73_v1, %v18_v10  ;;  %v45_v18 = vadd.f32 %v74_v2, %v30_v7  ;;  %v46_v19 = vadd.f32 %v74_v2, %v31_v8 }
   0x6   :  { %v47_v20 = vadd.f32 %v74_v2, %v32_v9  ;;  %v49_v24 = vadd.f32 %v74_v2, %v34_v15  ;;  %v50_v25 = vadd.f32 %v74_v2, %v35_v16  ;;  %v51_v29 = vadd.f32 %v74_v2, %v36_v21 }
   0x7   :  { %v52_v22 = vmax.f32 %v44_v13, 0.0  ;;  %v48_v23 = vadd.f32 %v74_v2, %v33_v14  ;;  %v53_v26 = vmax.f32 %v45_v18, 0.0  ;;  %v54_v27 = vmax.f32 %v46_v19, 0.0 }
   0x8   :  { %v55_v28 = vmax.f32 %v47_v20, 0.0  ;;  %v57_v31 = vmax.f32 %v49_v24, 0.0  ;;  %v58_v32 = vmax.f32 %v50_v25, 0.0  ;;  %v59_v33 = vmax.f32 %v51_v29, 0.0 }
   0x9   :  { %61 = vst.msk [vmem:[%s160_s3] sm:$0xff] %vm60_vm0, %v52_v22  ;;  %v56_v30 = vmax.f32 %v48_v23, 0.0  ;;  %62 = vst.msk [vmem:[%s160_s3 + $0x8] sm:$0xff] %vm60_vm0, %v53_v26 }
   0xa   :  { %63 = vst.msk [vmem:[%s160_s3 + $0x10] sm:$0xff] %vm60_vm0, %v54_v27  ;;  %64 = vst.msk [vmem:[%s160_s3 + $0x18] sm:$0xff] %vm60_vm0, %v55_v28 }
   0xb   :  { %65 = vst.msk [vmem:[%s160_s3 + $0x20] sm:$0xff] %vm60_vm0, %v56_v30  ;;  %66 = vst.msk [vmem:[%s160_s3 + $0x28] sm:$0xff] %vm60_vm0, %v57_v31 }
   0xc   :  { %67 = vst.msk [vmem:[%s160_s3 + $0x30] sm:$0xff] %vm60_vm0, %v58_v32  ;;  %68 = vst.msk [vmem:[%s160_s3 + $0x38] sm:$0xff] %vm60_vm0, %v59_v33 }

// kernel: multiscale_forward.128
= control target key start
LH: loop header
LB: loop body
LE: loop exit
PB: predicated region body
PF: predicated region fallthrough
CT: control target
= control target key end

     0   :  { %vm176_vm0 = vcmask 130048   ;;  %s442_s1 = inlined_call_operand.vmem [shape: f32[128,16], index: 1, kind: input, shape index: {}]   ;;  %s443_s0 = inlined_call_operand.vmem [shape: f32[64,128], index: 0, kind: input, shape index: {}]   ;;  %s444_s2 = inlined_call_operand.vmem [shape: f32[1,16], index: 2, kind: input, shape index: {}]   ;;  %s445_s3 = inlined_call_operand.vmem [shape: f32[1,16], index: 3, kind: input, shape index: {}]   ;;  %s446_s4 = inlined_call_operand.vmem [shape: f32[64,16], index: 4, kind: output, shape index: {}]  }
   0x1   :  { %v25_v0 = vld [vmem:[%s442_s1] sm:$0xff]  ;;  %v26_v1 = vld [vmem:[%s442_s1 + $0x8] sm:$0xff]  ;;  %v27_v2 = vld [vmem:[%s442_s1 + $0x10] sm:$0xff] }
   0x2   :  { %v259_v3 = vpack.c.bf16 %v26_v1, %v25_v0  ;;  %v28_v4 = vld [vmem:[%s442_s1 + $0x18] sm:$0xff]  ;;  %v29_v6 = vld [vmem:[%s442_s1 + $0x20] sm:$0xff]  ;;  %v30_v7 = vld [vmem:[%s442_s1 + $0x28] sm:$0xff] }
   0x3   :  { %v263_v5 = vpack.c.bf16 %v28_v4, %v27_v2  ;;  %v267_v8 = vpack.c.bf16 %v30_v7, %v29_v6  ;;  %v17_v9 = vld [vmem:[%s443_s0] sm:$0xff]  ;;  %v31_v11 = vld [vmem:[%s442_s1 + $0x30] sm:$0xff]  ;;  %v32_v12 = vld [vmem:[%s442_s1 + $0x38] sm:$0xff] }
   0x4   :  { %260 = vmatprep.subr.bf16.mxu0 %v259_v3  ;;  %291 = vmatprep.subr.bf16.mxu1 %v259_v3  ;;  %v21_v10 = vld [vmem:[%s443_s0 + $0x20] sm:$0xff]  ;;  %v271_v13 = vpack.c.bf16 %v32_v12, %v31_v11  ;;  %v34_v15 = vld [vmem:[%s442_s1 + $0x48] sm:$0xff]  ;;  %v35_v17 = vld [vmem:[%s442_s1 + $0x50] sm:$0xff] }
   0x5   :  { %262 = vmatpush3.bf16.msra.mxu0 %v259_v3  ;;  %299 = vmatpush3.bf16.msra.mxu1 %v259_v3  ;;  %v33_v14 = vld [vmem:[%s442_s1 + $0x40] sm:$0xff]  ;;  %v36_v18 = vld [vmem:[%s442_s1 + $0x58] sm:$0xff]  ;;  %v38_v21 = vld [vmem:[%s442_s1 + $0x68] sm:$0xff] }
   0x6   :  { %264 = vmatprep.subr.bf16.mxu0 %v263_v5  ;;  %292 = vmatprep.subr.bf16.mxu1 %v263_v5  ;;  %v275_v16 = vpack.c.bf16 %v34_v15, %v33_v14  ;;  %v279_v19 = vpack.c.bf16 %v36_v18, %v35_v17  ;;  %v37_v20 = vld [vmem:[%s442_s1 + $0x60] sm:$0xff]  ;;  %v39_v23 = vld [vmem:[%s442_s1 + $0x70] sm:$0xff]  ;;  %v40_v24 = vld [vmem:[%s442_s1 + $0x78] sm:$0xff] }
   0x7   :  { %247 = vmatprep.mubr.f32.mxu0 %v17_v9  ;;  %253 = vmatprep.mubr.f32.mxu1 %v21_v10  ;;  %v283_v22 = vpack.c.bf16 %v38_v21, %v37_v20  ;;  %v287_v25 = vpack.c.bf16 %v40_v24, %v39_v23  ;;  %v18_v26 = vld [vmem:[%s443_s0 + $0x8] sm:$0xff]  ;;  %v19_v28 = vld [vmem:[%s443_s0 + $0x10] sm:$0xff]  ;;  %v20_v30 = vld [vmem:[%s443_s0 + $0x18] sm:$0xff] }
   0x8   :  { %v22_v27 = vld [vmem:[%s443_s0 + $0x28] sm:$0xff]  ;;  %v23_v29 = vld [vmem:[%s443_s0 + $0x30] sm:$0xff]  ;;  %v24_v31 = vld [vmem:[%s443_s0 + $0x38] sm:$0xff] }
   0x9   :  { %266 = vmatpush3.bf16.msra.mxu0 %v263_v5  ;;  %300 = vmatpush3.bf16.msra.mxu1 %v263_v5  ;;  %v189_v32 = vld [vmem:[%s444_s2] ss:$0 sm:$0xff] }
   0xa   :  { %268 = vmatprep.subr.bf16.mxu0 %v267_v8  ;;  %293 = vmatprep.subr.bf16.mxu1 %v267_v8  ;;  %v190_v34 = vld [vmem:[%s445_s3] ss:$0 sm:$0xff] }
   0xd   :  { %270 = vmatpush3.bf16.msra.mxu0 %v267_v8  ;;  %301 = vmatpush3.bf16.msra.mxu1 %v267_v8 }
   0xe   :  { %272 = vmatprep.subr.bf16.mxu0 %v271_v13  ;;  %294 = vmatprep.subr.bf16.mxu1 %v271_v13 }
  0x11   :  { %274 = vmatpush3.bf16.msra.mxu0 %v271_v13  ;;  %302 = vmatpush3.bf16.msra.mxu1 %v271_v13 }
  0x12   :  { %276 = vmatprep.subr.bf16.mxu0 %v275_v16  ;;  %295 = vmatprep.subr.bf16.mxu1 %v275_v16 }
  0x15   :  { %278 = vmatpush3.bf16.msra.mxu0 %v275_v16  ;;  %303 = vmatpush3.bf16.msra.mxu1 %v275_v16 }
  0x16   :  { %280 = vmatprep.subr.bf16.mxu0 %v279_v19  ;;  %296 = vmatprep.subr.bf16.mxu1 %v279_v19 }
  0x19   :  { %282 = vmatpush3.bf16.msra.mxu0 %v279_v19  ;;  %304 = vmatpush3.bf16.msra.mxu1 %v279_v19 }
  0x1a   :  { %284 = vmatprep.subr.bf16.mxu0 %v283_v22  ;;  %297 = vmatprep.subr.bf16.mxu1 %v283_v22 }
  0x1d   :  { %286 = vmatpush3.bf16.msra.mxu0 %v283_v22  ;;  %305 = vmatpush3.bf16.msra.mxu1 %v283_v22 }
  0x1e   :  { %288 = vmatprep.subr.bf16.mxu0 %v287_v25  ;;  %298 = vmatprep.subr.bf16.mxu1 %v287_v25 }
  0x21   :  { %290 = vmatpush3.bf16.msra.mxu0 %v287_v25  ;;  %306 = vmatpush3.bf16.msra.mxu1 %v287_v25 }
  0x24   :  { %248 = vmatmul.mubr.f32.vlgmr.msra.gmra.mrb[0].mxu0 %v18_v26  ;;  %254 = vmatmul.mubr.f32.vlgmr.msra.gmra.mrb[0].mxu1 %v22_v27 }
  0x25   :  { %250 = vmatprep.mubr.f32.mxu0 %v19_v28  ;;  %256 = vmatprep.mubr.f32.mxu1 %v23_v29 }
  0x28   :  { %251 = vmatmul.mubr.f32.gmra.mrb[2].mxu0 %v20_v30  ;;  %257 = vmatmul.mubr.f32.gmra.mrb[2].mxu1 %v24_v31 }
  0xf7   :  { %v249_v33 = vpop.f32.mrb[0].mxu0  ;;  %v255_v35 = vpop.f32.mrb[0].mxu1 }
  0xf8   :  { %v154_v36 = vmul.f32 %v249_v33, %v189_v32  ;;  %v158_v37 = vmul.f32 %v255_v35, %v189_v32  ;;  %v107_v38 = vpop.f32.mrb[1].mxu0  ;;  %v127_v39 = vpop.f32.mrb[1].mxu1 }
  0xf9   :  { %v153_v40 = vmul.f32 %v189_v32, %v107_v38  ;;  %v157_v41 = vmul.f32 %v189_v32, %v127_v39 }
  0xfa   :  { %v169_v42 = vadd.f32 %v190_v34, %v154_v36  ;;  %v173_v43 = vadd.f32 %v190_v34, %v158_v37 }
  0xfb   :  { %v168_v44 = vadd.f32 %v190_v34, %v153_v40  ;;  %v172_v45 = vadd.f32 %v190_v34, %v157_v41  ;;  %v252_v46 = vpop.f32.mrb[2].mxu0  ;;  %v258_v47 = vpop.f32.mrb[2].mxu1 }
  0xfc   :  { %178 = vst.msk [vmem:[%s446_s4 + $0x8] sm:$0xff] %vm176_vm0, %v169_v42  ;;  %182 = vst.msk [vmem:[%s446_s4 + $0x28] sm:$0xff] %vm176_vm0, %v173_v43  ;;  %v156_v48 = vmul.f32 %v252_v46, %v189_v32  ;;  %v160_v49 = vmul.f32 %v258_v47, %v189_v32  ;;  %v117_v50 = vpop.f32.mrb[3].mxu0  ;;  %v137_v51 = vpop.f32.mrb[3].mxu1 }
  0xfd   :  { %177 = vst.msk [vmem:[%s446_s4] sm:$0xff] %vm176_vm0, %v168_v44  ;;  %181 = vst.msk [vmem:[%s446_s4 + $0x20] sm:$0xff] %vm176_vm0, %v172_v45  ;;  %v155_v52 = vmul.f32 %v189_v32, %v117_v50  ;;  %v159_v53 = vmul.f32 %v189_v32, %v137_v51 }
  0xfe   :  { %v171_v54 = vadd.f32 %v190_v34, %v156_v48  ;;  %v175_v55 = vadd.f32 %v190_v34, %v160_v49 }
  0xff   :  { %v170_v56 = vadd.f32 %v190_v34, %v155_v52  ;;  %v174_v57 = vadd.f32 %v190_v34, %v159_v53 }
 0x100   :  { %180 = vst.msk [vmem:[%s446_s4 + $0x18] sm:$0xff] %vm176_vm0, %v171_v54  ;;  %184 = vst.msk [vmem:[%s446_s4 + $0x38] sm:$0xff] %vm176_vm0, %v175_v55 }
 0x101   :  { %179 = vst.msk [vmem:[%s446_s4 + $0x10] sm:$0xff] %vm176_vm0, %v170_v56  ;;  %183 = vst.msk [vmem:[%s446_s4 + $0x30] sm:$0xff] %vm176_vm0, %v174_v57 }

// kernel: multiscale_forward.130
= control target key start
LH: loop header
LB: loop body
LE: loop exit
PB: predicated region body
PF: predicated region fallthrough
CT: control target
= control target key end

     0   :  { %vm184_vm0 = vcmask 130048   ;;  %s450_s1 = inlined_call_operand.vmem [shape: f32[128,16], index: 1, kind: input, shape index: {}]   ;;  %s451_s0 = inlined_call_operand.vmem [shape: f32[64,128], index: 0, kind: input, shape index: {}]   ;;  %s452_s2 = inlined_call_operand.vmem [shape: f32[1,16], index: 2, kind: input, shape index: {}]   ;;  %s453_s3 = inlined_call_operand.vmem [shape: f32[1,16], index: 3, kind: input, shape index: {}]   ;;  %s454_s4 = inlined_call_operand.vmem [shape: f32[64,16], index: 4, kind: output, shape index: {}]  }
   0x1   :  { %v25_v0 = vld [vmem:[%s450_s1] sm:$0xff]  ;;  %v26_v1 = vld [vmem:[%s450_s1 + $0x8] sm:$0xff]  ;;  %v27_v2 = vld [vmem:[%s450_s1 + $0x10] sm:$0xff] }
   0x2   :  { %v267_v3 = vpack.c.bf16 %v26_v1, %v25_v0  ;;  %v28_v4 = vld [vmem:[%s450_s1 + $0x18] sm:$0xff]  ;;  %v29_v6 = vld [vmem:[%s450_s1 + $0x20] sm:$0xff]  ;;  %v30_v7 = vld [vmem:[%s450_s1 + $0x28] sm:$0xff] }
   0x3   :  { %v271_v5 = vpack.c.bf16 %v28_v4, %v27_v2  ;;  %v275_v8 = vpack.c.bf16 %v30_v7, %v29_v6  ;;  %v17_v9 = vld [vmem:[%s451_s0] sm:$0xff]  ;;  %v31_v11 = vld [vmem:[%s450_s1 + $0x30] sm:$0xff]  ;;  %v32_v12 = vld [vmem:[%s450_s1 + $0x38] sm:$0xff] }
   0x4   :  { %268 = vmatprep.subr.bf16.mxu0 %v267_v3  ;;  %299 = vmatprep.subr.bf16.mxu1 %v267_v3  ;;  %v21_v10 = vld [vmem:[%s451_s0 + $0x20] sm:$0xff]  ;;  %v279_v13 = vpack.c.bf16 %v32_v12, %v31_v11  ;;  %v34_v15 = vld [vmem:[%s450_s1 + $0x48] sm:$0xff]  ;;  %v35_v17 = vld [vmem:[%s450_s1 + $0x50] sm:$0xff] }
   0x5   :  { %270 = vmatpush3.bf16.msra.mxu0 %v267_v3  ;;  %307 = vmatpush3.bf16.msra.mxu1 %v267_v3  ;;  %v33_v14 = vld [vmem:[%s450_s1 + $0x40] sm:$0xff]  ;;  %v36_v18 = vld [vmem:[%s450_s1 + $0x58] sm:$0xff]  ;;  %v38_v21 = vld [vmem:[%s450_s1 + $0x68] sm:$0xff] }
   0x6   :  { %272 = vmatprep.subr.bf16.mxu0 %v271_v5  ;;  %300 = vmatprep.subr.bf16.mxu1 %v271_v5  ;;  %v283_v16 = vpack.c.bf16 %v34_v15, %v33_v14  ;;  %v287_v19 = vpack.c.bf16 %v36_v18, %v35_v17  ;;  %v37_v20 = vld [vmem:[%s450_s1 + $0x60] sm:$0xff]  ;;  %v39_v23 = vld [vmem:[%s450_s1 + $0x70] sm:$0xff]  ;;  %v40_v24 = vld [vmem:[%s450_s1 + $0x78] sm:$0xff] }
   0x7   :  { %255 = vmatprep.mubr.f32.mxu0 %v17_v9  ;;  %261 = vmatprep.mubr.f32.mxu1 %v21_v10  ;;  %v291_v22 = vpack.c.bf16 %v38_v21, %v37_v20  ;;  %v295_v25 = vpack.c.bf16 %v40_v24, %v39_v23  ;;  %v18_v26 = vld [vmem:[%s451_s0 + $0x8] sm:$0xff]  ;;  %v19_v28 = vld [vmem:[%s451_s0 + $0x10] sm:$0xff]  ;;  %v20_v30 = vld [vmem:[%s451_s0 + $0x18] sm:$0xff] }
   0x8   :  { %v22_v27 = vld [vmem:[%s451_s0 + $0x28] sm:$0xff]  ;;  %v23_v29 = vld [vmem:[%s451_s0 + $0x30] sm:$0xff]  ;;  %v24_v31 = vld [vmem:[%s451_s0 + $0x38] sm:$0xff] }
   0x9   :  { %274 = vmatpush3.bf16.msra.mxu0 %v271_v5  ;;  %308 = vmatpush3.bf16.msra.mxu1 %v271_v5  ;;  %v197_v32 = vld [vmem:[%s452_s2] ss:$0 sm:$0xff] }
   0xa   :  { %276 = vmatprep.subr.bf16.mxu0 %v275_v8  ;;  %301 = vmatprep.subr.bf16.mxu1 %v275_v8  ;;  %v198_v34 = vld [vmem:[%s453_s3] ss:$0 sm:$0xff] }
   0xd   :  { %278 = vmatpush3.bf16.msra.mxu0 %v275_v8  ;;  %309 = vmatpush3.bf16.msra.mxu1 %v275_v8 }
   0xe   :  { %280 = vmatprep.subr.bf16.mxu0 %v279_v13  ;;  %302 = vmatprep.subr.bf16.mxu1 %v279_v13 }
  0x11   :  { %282 = vmatpush3.bf16.msra.mxu0 %v279_v13  ;;  %310 = vmatpush3.bf16.msra.mxu1 %v279_v13 }
  0x12   :  { %284 = vmatprep.subr.bf16.mxu0 %v283_v16  ;;  %303 = vmatprep.subr.bf16.mxu1 %v283_v16 }
  0x15   :  { %286 = vmatpush3.bf16.msra.mxu0 %v283_v16  ;;  %311 = vmatpush3.bf16.msra.mxu1 %v283_v16 }
  0x16   :  { %288 = vmatprep.subr.bf16.mxu0 %v287_v19  ;;  %304 = vmatprep.subr.bf16.mxu1 %v287_v19 }
  0x19   :  { %290 = vmatpush3.bf16.msra.mxu0 %v287_v19  ;;  %312 = vmatpush3.bf16.msra.mxu1 %v287_v19 }
  0x1a   :  { %292 = vmatprep.subr.bf16.mxu0 %v291_v22  ;;  %305 = vmatprep.subr.bf16.mxu1 %v291_v22 }
  0x1d   :  { %294 = vmatpush3.bf16.msra.mxu0 %v291_v22  ;;  %313 = vmatpush3.bf16.msra.mxu1 %v291_v22 }
  0x1e   :  { %296 = vmatprep.subr.bf16.mxu0 %v295_v25  ;;  %306 = vmatprep.subr.bf16.mxu1 %v295_v25 }
  0x21   :  { %298 = vmatpush3.bf16.msra.mxu0 %v295_v25  ;;  %314 = vmatpush3.bf16.msra.mxu1 %v295_v25 }
  0x24   :  { %256 = vmatmul.mubr.f32.vlgmr.msra.gmra.mrb[0].mxu0 %v18_v26  ;;  %262 = vmatmul.mubr.f32.vlgmr.msra.gmra.mrb[0].mxu1 %v22_v27 }
  0x25   :  { %258 = vmatprep.mubr.f32.mxu0 %v19_v28  ;;  %264 = vmatprep.mubr.f32.mxu1 %v23_v29 }
  0x28   :  { %259 = vmatmul.mubr.f32.gmra.mrb[2].mxu0 %v20_v30  ;;  %265 = vmatmul.mubr.f32.gmra.mrb[2].mxu1 %v24_v31 }
  0xf7   :  { %v257_v33 = vpop.f32.mrb[0].mxu0  ;;  %v263_v35 = vpop.f32.mrb[0].mxu1 }
  0xf8   :  { %v154_v36 = vmul.f32 %v257_v33, %v197_v32  ;;  %v158_v37 = vmul.f32 %v263_v35, %v197_v32  ;;  %v107_v38 = vpop.f32.mrb[1].mxu0  ;;  %v127_v39 = vpop.f32.mrb[1].mxu1 }
  0xf9   :  { %v153_v40 = vmul.f32 %v197_v32, %v107_v38  ;;  %v157_v41 = vmul.f32 %v197_v32, %v127_v39 }
  0xfa   :  { %v169_v42 = vadd.f32 %v198_v34, %v154_v36  ;;  %v173_v43 = vadd.f32 %v198_v34, %v158_v37 }
  0xfb   :  { %v168_v44 = vadd.f32 %v198_v34, %v153_v40  ;;  %v172_v45 = vadd.f32 %v198_v34, %v157_v41  ;;  %v260_v46 = vpop.f32.mrb[2].mxu0  ;;  %v266_v47 = vpop.f32.mrb[2].mxu1 }
  0xfc   :  { %v177_v48 = vmax.f32 %v169_v42, 0.0  ;;  %v181_v49 = vmax.f32 %v173_v43, 0.0  ;;  %v156_v50 = vmul.f32 %v260_v46, %v197_v32  ;;  %v160_v51 = vmul.f32 %v266_v47, %v197_v32  ;;  %v117_v52 = vpop.f32.mrb[3].mxu0  ;;  %v137_v53 = vpop.f32.mrb[3].mxu1 }
  0xfd   :  { %v176_v54 = vmax.f32 %v168_v44, 0.0  ;;  %v180_v55 = vmax.f32 %v172_v45, 0.0  ;;  %v155_v56 = vmul.f32 %v197_v32, %v117_v52  ;;  %v159_v57 = vmul.f32 %v197_v32, %v137_v53 }
  0xfe   :  { %186 = vst.msk [vmem:[%s454_s4 + $0x8] sm:$0xff] %vm184_vm0, %v177_v48  ;;  %190 = vst.msk [vmem:[%s454_s4 + $0x28] sm:$0xff] %vm184_vm0, %v181_v49  ;;  %v171_v58 = vadd.f32 %v198_v34, %v156_v50  ;;  %v175_v59 = vadd.f32 %v198_v34, %v160_v51 }
  0xff   :  { %185 = vst.msk [vmem:[%s454_s4] sm:$0xff] %vm184_vm0, %v176_v54  ;;  %189 = vst.msk [vmem:[%s454_s4 + $0x20] sm:$0xff] %vm184_vm0, %v180_v55  ;;  %v170_v60 = vadd.f32 %v198_v34, %v155_v56  ;;  %v174_v61 = vadd.f32 %v198_v34, %v159_v57 }
 0x100   :  { %v179_v62 = vmax.f32 %v171_v58, 0.0  ;;  %v183_v63 = vmax.f32 %v175_v59, 0.0 }
 0x101   :  { %v178_v0 = vmax.f32 %v170_v60, 0.0  ;;  %v182_v1 = vmax.f32 %v174_v61, 0.0 }
 0x102   :  { %188 = vst.msk [vmem:[%s454_s4 + $0x18] sm:$0xff] %vm184_vm0, %v179_v62  ;;  %192 = vst.msk [vmem:[%s454_s4 + $0x38] sm:$0xff] %vm184_vm0, %v183_v63 }
 0x103   :  { %187 = vst.msk [vmem:[%s454_s4 + $0x10] sm:$0xff] %vm184_vm0, %v178_v0  ;;  %191 = vst.msk [vmem:[%s454_s4 + $0x30] sm:$0xff] %vm184_vm0, %v182_v1 }

// kernel: multiscale_forward.126
= control target key start
LH: loop header
LB: loop body
LE: loop exit
PB: predicated region body
PF: predicated region fallthrough
CT: control target
= control target key end

     0   :  { %vm27_vm0 = vcmask 130048   ;;  %s342_s1 = inlined_call_operand.vmem [shape: f32[16,16], index: 1, kind: input, shape index: {}]   ;;  %s343_s0 = inlined_call_operand.vmem [shape: f32[64,16], index: 0, kind: input, shape index: {}]   ;;  %s344_s2 = inlined_call_operand.vmem [shape: f32[1,16], index: 2, kind: input, shape index: {}]   ;;  %s345_s3 = inlined_call_operand.vmem [shape: f32[1,16], index: 3, kind: input, shape index: {}]   ;;  %s346_s4 = inlined_call_operand.vmem [shape: f32[64,16], index: 4, kind: output, shape index: {}]  }
   0x1   :  { %v25_v0 = vld [vmem:[%s342_s1] sm:$0xff]  ;;  %v26_v1 = vld [vmem:[%s342_s1 + $0x8] sm:$0xff]  ;;  %v19_v7 = vld [vmem:[%s343_s0 + $0x10] sm:$0xff] }
   0x2   :  { %v17_v2 = vld [vmem:[%s343_s0] sm:$0xff]  ;;  %v235_v3 = vpack.c.bf16 %v26_v1, %v25_v0  ;;  %v18_v5 = vld [vmem:[%s343_s0 + $0x8] sm:$0xff]  ;;  %v23_v8 = vld [vmem:[%s343_s0 + $0x30] sm:$0xff] }
   0x3   :  { %223 = vmatprep.mubr.msk.f32.mxu0 %vm27_vm0, %v17_v2  ;;  %v21_v4 = vld [vmem:[%s343_s0 + $0x20] sm:$0xff]  ;;  %v22_v6 = vld [vmem:[%s343_s0 + $0x28] sm:$0xff]  ;;  %v20_v9 = vld [vmem:[%s343_s0 + $0x18] sm:$0xff] }
   0x4   :  { %229 = vmatprep.mubr.msk.f32.mxu1 %vm27_vm0, %v21_v4  ;;  %236 = vmatprep.subr.bf16.mxu0 %v235_v3  ;;  %v24_v10 = vld [vmem:[%s343_s0 + $0x38] sm:$0xff]  ;;  %v207_v11 = vld [vmem:[%s344_s2] ss:$0 sm:$0xff] }
   0x5   :  { %239 = vmatprep.subr.bf16.mxu1 %v235_v3  ;;  %238 = vmatpush3.bf16.msra.mxu0 %v235_v3  ;;  %v208_v13 = vld [vmem:[%s345_s3] ss:$0 sm:$0xff] }
   0x6   :  { %240 = vmatpush3.bf16.msra.mxu1 %v235_v3 }
   0x8   :  { %224 = vmatmul.mubr.msk.f32.vlgmr.msra.gmra.mrb[0].mxu0 %vm27_vm0, %v18_v5 }
   0x9   :  { %230 = vmatmul.mubr.msk.f32.vlgmr.msra.gmra.mrb[0].mxu1 %vm27_vm0, %v22_v6  ;;  %226 = vmatprep.mubr.msk.f32.mxu0 %vm27_vm0, %v19_v7 }
   0xa   :  { %232 = vmatprep.mubr.msk.f32.mxu1 %vm27_vm0, %v23_v8 }
   0xc   :  { %227 = vmatmul.mubr.msk.f32.gmra.mrb[2].mxu0 %vm27_vm0, %v20_v9 }
   0xd   :  { %233 = vmatmul.mubr.msk.f32.gmra.mrb[2].mxu1 %vm27_vm0, %v24_v10 }
  0xdb   :  { %v225_v12 = vpop.f32.mrb[0].mxu0 }
  0xdc   :  { %v231_v14 = vpop.f32.mrb[0].mxu1  ;;  %v165_v15 = vmul.f32 %v225_v12, %v207_v11  ;;  %v118_v17 = vpop.f32.mrb[1].mxu0 }
  0xdd   :  { %v169_v16 = vmul.f32 %v231_v14, %v207_v11  ;;  %v138_v18 = vpop.f32.mrb[1].mxu1  ;;  %v164_v19 = vmul.f32 %v207_v11, %v118_v17 }
  0xde   :  { %v168_v20 = vmul.f32 %v207_v11, %v138_v18  ;;  %v180_v21 = vadd.f32 %v208_v13, %v165_v15 }
  0xdf   :  { %v184_v22 = vadd.f32 %v208_v13, %v169_v16  ;;  %v179_v23 = vadd.f32 %v208_v13, %v164_v19  ;;  %v228_v25 = vpop.f32.mrb[2].mxu0 }
  0xe0   :  { %v183_v24 = vadd.f32 %v208_v13, %v168_v20  ;;  %v234_v26 = vpop.f32.mrb[2].mxu1  ;;  %188 = vst.msk [vmem:[%s346_s4 + $0x8] sm:$0xff] %vm27_vm0, %v180_v21  ;;  %v167_v27 = vmul.f32 %v228_v25, %v207_v11  ;;  %v128_v29 = vpop.f32.mrb[3].mxu0 }
  0xe1   :  { %192 = vst.msk [vmem:[%s346_s4 + $0x28] sm:$0xff] %vm27_vm0, %v184_v22  ;;  %v171_v28 = vmul.f32 %v234_v26, %v207_v11  ;;  %v148_v30 = vpop.f32.mrb[3].mxu1  ;;  %187 = vst.msk [vmem:[%s346_s4] sm:$0xff] %vm27_vm0, %v179_v23  ;;  %v166_v31 = vmul.f32 %v207_v11, %v128_v29 }
  0xe2   :  { %191 = vst.msk [vmem:[%s346_s4 + $0x20] sm:$0xff] %vm27_vm0, %v183_v24  ;;  %v170_v32 = vmul.f32 %v207_v11, %v148_v30  ;;  %v182_v33 = vadd.f32 %v208_v13, %v167_v27 }
  0xe3   :  { %v186_v34 = vadd.f32 %v208_v13, %v171_v28  ;;  %v181_v35 = vadd.f32 %v208_v13, %v166_v31 }
  0xe4   :  { %v185_v36 = vadd.f32 %v208_v13, %v170_v32  ;;  %190 = vst.msk [vmem:[%s346_s4 + $0x18] sm:$0xff] %vm27_vm0, %v182_v33 }
  0xe5   :  { %194 = vst.msk [vmem:[%s346_s4 + $0x38] sm:$0xff] %vm27_vm0, %v186_v34  ;;  %189 = vst.msk [vmem:[%s346_s4 + $0x10] sm:$0xff] %vm27_vm0, %v181_v35 }
  0xe6   :  { %193 = vst.msk [vmem:[%s346_s4 + $0x30] sm:$0xff] %vm27_vm0, %v185_v36 }

// kernel: multiscale_forward.131
= control target key start
LH: loop header
LB: loop body
LE: loop exit
PB: predicated region body
PF: predicated region fallthrough
CT: control target
= control target key end

     0   :  { %v298_v0 = vmov 0.0|0.0   ;;  %vm54_vm0 = vcmask 130048   ;;  %s519_s1 = inlined_call_operand.vmem [shape: f32[144,16], index: 1, kind: input, shape index: {}]   ;;  %s520_s0 = inlined_call_operand.vmem [shape: f32[64,144], index: 0, kind: input, shape index: {}]   ;;  %s521_s2 = inlined_call_operand.vmem [shape: f32[1,16], index: 2, kind: input, shape index: {}]   ;;  %s522_s3 = inlined_call_operand.vmem [shape: f32[1,16], index: 3, kind: input, shape index: {}]   ;;  %s523_s4 = inlined_call_operand.vmem [shape: f32[64,16], index: 4, kind: input, shape index: {}]   ;;  %s524_s5 = inlined_call_operand.vmem [shape: f32[64,16], index: 5, kind: output, shape index: {}]  }
   0x1   :  { %252 = vmatprep.subr.bf16.mxu0 %v298_v0  ;;  %279 = vmatprep.subr.bf16.mxu1 %v298_v0  ;;  %v36_v1 = vld [vmem:[%s519_s1] sm:$0xff]  ;;  %v37_v2 = vld [vmem:[%s519_s1 + $0x8] sm:$0xff]  ;;  %v38_v3 = vld [vmem:[%s519_s1 + $0x10] sm:$0xff] }
   0x2   :  { %v253_v4 = vpack.c.bf16 %v37_v2, %v36_v1  ;;  %v39_v5 = vld [vmem:[%s519_s1 + $0x18] sm:$0xff]  ;;  %v40_v7 = vld [vmem:[%s519_s1 + $0x20] sm:$0xff]  ;;  %v41_v8 = vld [vmem:[%s519_s1 + $0x28] sm:$0xff] }
   0x3   :  { %v256_v6 = vpack.c.bf16 %v39_v5, %v38_v3  ;;  %v21_v9 = vld [vmem:[%s520_s0 + $0x8] sm:$0xff]  ;;  %v259_v11 = vpack.c.bf16 %v41_v8, %v40_v7  ;;  %v42_v12 = vld [vmem:[%s519_s1 + $0x30] sm:$0xff]  ;;  %v43_v13 = vld [vmem:[%s519_s1 + $0x38] sm:$0xff] }
   0x4   :  { %254 = vmatpush1.bf16.msra.mxu0 %v253_v4  ;;  %288 = vmatpush1.bf16.msra.mxu1 %v253_v4  ;;  %v29_v10 = vld [vmem:[%s520_s0 + $0x48] sm:$0xff]  ;;  %v262_v14 = vpack.c.bf16 %v43_v13, %v42_v12  ;;  %v44_v15 = vld [vmem:[%s519_s1 + $0x40] sm:$0xff]  ;;  %v46_v18 = vld [vmem:[%s519_s1 + $0x50] sm:$0xff] }
   0x5   :  { %255 = vmatprep.subr.bf16.mxu0 %v298_v0  ;;  %280 = vmatprep.subr.bf16.mxu1 %v298_v0  ;;  %v45_v16 = vld [vmem:[%s519_s1 + $0x48] sm:$0xff]  ;;  %v47_v19 = vld [vmem:[%s519_s1 + $0x58] sm:$0xff]  ;;  %v48_v21 = vld [vmem:[%s519_s1 + $0x60] sm:$0xff] }
   0x6   :  { %242 = vmatprep.mubr.msk.f32.mxu0 %vm54_vm0, %v21_v9  ;;  %246 = vmatprep.mubr.msk.f32.mxu1 %vm54_vm0, %v29_v10  ;;  %v265_v17 = vpack.c.bf16 %v45_v16, %v44_v15  ;;  %v268_v20 = vpack.c.bf16 %v47_v19, %v46_v18  ;;  %v49_v22 = vld [vmem:[%s519_s1 + $0x68] sm:$0xff]  ;;  %v50_v24 = vld [vmem:[%s519_s1 + $0x70] sm:$0xff]  ;;  %v51_v25 = vld [vmem:[%s519_s1 + $0x78] sm:$0xff] }
   0x7   :  { %v271_v23 = vpack.c.bf16 %v49_v22, %v48_v21  ;;  %v274_v26 = vpack.c.bf16 %v51_v25, %v50_v24  ;;  %v52_v27 = vld [vmem:[%s519_s1 + $0x80] sm:$0xff]  ;;  %v53_v28 = vld [vmem:[%s519_s1 + $0x88] sm:$0xff]  ;;  %v23_v32 = vld [vmem:[%s520_s0 + $0x18] sm:$0xff] }
   0x8   :  { %257 = vmatpush1.bf16.msra.mxu0 %v256_v6  ;;  %289 = vmatpush1.bf16.msra.mxu1 %v256_v6  ;;  %v277_v29 = vpack.c.bf16 %v53_v28, %v52_v27  ;;  %v20_v30 = vld [vmem:[%s520_s0] sm:$0xff]  ;;  %v31_v33 = vld [vmem:[%s520_s0 + $0x58] sm:$0xff]  ;;  %v22_v34 = vld [vmem:[%s520_s0 + $0x10] sm:$0xff] }
   0x9   :  { %258 = vmatprep.subr.bf16.mxu0 %v298_v0  ;;  %281 = vmatprep.subr.bf16.mxu1 %v298_v0  ;;  %v28_v31 = vld [vmem:[%s520_s0 + $0x40] sm:$0xff]  ;;  %v30_v35 = vld [vmem:[%s520_s0 + $0x50] sm:$0xff]  ;;  %v25_v36 = vld [vmem:[%s520_s0 + $0x28] sm:$0xff] }
   0xa   :  { %v33_v37 = vld [vmem:[%s520_s0 + $0x68] sm:$0xff]  ;;  %v24_v38 = vld [vmem:[%s520_s0 + $0x20] sm:$0xff]  ;;  %v27_v40 = vld [vmem:[%s520_s0 + $0x38] sm:$0xff] }
   0xb   :  { %v32_v39 = vld [vmem:[%s520_s0 + $0x60] sm:$0xff]  ;;  %v35_v41 = vld [vmem:[%s520_s0 + $0x78] sm:$0xff]  ;;  %v26_v42 = vld [vmem:[%s520_s0 + $0x30] sm:$0xff] }
   0xc   :  { %260 = vmatpush1.bf16.msra.mxu0 %v259_v11  ;;  %290 = vmatpush1.bf16.msra.mxu1 %v259_v11  ;;  %v34_v43 = vld [vmem:[%s520_s0 + $0x70] sm:$0xff]  ;;  %v250_v44 = vld [vmem:[%s521_s2] ss:$0 sm:$0xff]  ;;  %v219_v1 = vld [vmem:[%s523_s4 + $0x28] sm:$0xff] }
   0xd   :  { %261 = vmatprep.subr.bf16.mxu0 %v298_v0  ;;  %282 = vmatprep.subr.bf16.mxu1 %v298_v0  ;;  %v251_v46 = vld [vmem:[%s522_s3] ss:$0 sm:$0xff]  ;;  %v216_v12 = vld [vmem:[%s523_s4 + $0x10] sm:$0xff]  ;;  %v217_v24 = vld [vmem:[%s523_s4 + $0x18] sm:$0xff] }
   0xe   :  { %v214_v52 = vld [vmem:[%s523_s4] sm:$0xff]  ;;  %v220_v13 = vld [vmem:[%s523_s4 + $0x30] sm:$0xff]  ;;  %v221_v25 = vld [vmem:[%s523_s4 + $0x38] sm:$0xff] }
   0xf   :  { %v218_v53 = vld [vmem:[%s523_s4 + $0x20] sm:$0xff] }
  0x10   :  { %263 = vmatpush1.bf16.msra.mxu0 %v262_v14  ;;  %291 = vmatpush1.bf16.msra.mxu1 %v262_v14 }
  0x11   :  { %264 = vmatprep.subr.bf16.mxu0 %v298_v0  ;;  %283 = vmatprep.subr.bf16.mxu1 %v298_v0 }
  0x14   :  { %266 = vmatpush1.bf16.msra.mxu0 %v265_v17  ;;  %292 = vmatpush1.bf16.msra.mxu1 %v265_v17 }
  0x15   :  { %267 = vmatprep.subr.bf16.mxu0 %v298_v0  ;;  %284 = vmatprep.subr.bf16.mxu1 %v298_v0 }
  0x18   :  { %269 = vmatpush1.bf16.msra.mxu0 %v268_v20  ;;  %293 = vmatpush1.bf16.msra.mxu1 %v268_v20 }
  0x19   :  { %270 = vmatprep.subr.bf16.mxu0 %v298_v0  ;;  %285 = vmatprep.subr.bf16.mxu1 %v298_v0 }
  0x1c   :  { %272 = vmatpush1.bf16.msra.mxu0 %v271_v23  ;;  %294 = vmatpush1.bf16.msra.mxu1 %v271_v23 }
  0x1d   :  { %273 = vmatprep.subr.bf16.mxu0 %v298_v0  ;;  %286 = vmatprep.subr.bf16.mxu1 %v298_v0 }
  0x20   :  { %275 = vmatpush1.bf16.msra.mxu0 %v274_v26  ;;  %295 = vmatpush1.bf16.msra.mxu1 %v274_v26 }
  0x21   :  { %276 = vmatprep.subr.bf16.mxu0 %v298_v0  ;;  %287 = vmatprep.subr.bf16.mxu1 %v298_v0  ;;  %v215_v0 = vld [vmem:[%s523_s4 + $0x8] sm:$0xff] }
  0x24   :  { %278 = vmatpush1.bf16.msra.mxu0 %v277_v29  ;;  %296 = vmatpush1.bf16.msra.mxu1 %v277_v29 }
  0x27   :  { %144 = vmatmul.mubr.f32.vlgmr.msra.gmra.mrb[0].mxu0 %v20_v30  ;;  %164 = vmatmul.mubr.f32.vlgmr.msra.gmra.mrb[0].mxu1 %v28_v31 }
  0x28   :  { %243 = vmatprep.mubr.msk.f32.mxu0 %vm54_vm0, %v23_v32  ;;  %247 = vmatprep.mubr.msk.f32.mxu1 %vm54_vm0, %v31_v33 }
  0x2b   :  { %149 = vmatmul.mubr.f32.gmra.mrb[2].mxu0 %v22_v34  ;;  %169 = vmatmul.mubr.f32.gmra.mrb[2].mxu1 %v30_v35 }
  0x2c   :  { %244 = vmatprep.mubr.msk.f32.mxu0 %vm54_vm0, %v25_v36  ;;  %248 = vmatprep.mubr.msk.f32.mxu1 %vm54_vm0, %v33_v37 }
  0x2f   :  { %154 = vmatmul.mubr.f32.gmra.mrb[4].mxu0 %v24_v38  ;;  %174 = vmatmul.mubr.f32.gmra.mrb[4].mxu1 %v32_v39 }
  0x30   :  { %245 = vmatprep.mubr.msk.f32.mxu0 %vm54_vm0, %v27_v40  ;;  %249 = vmatprep.mubr.msk.f32.mxu1 %vm54_vm0, %v35_v41 }
  0x33   :  { %159 = vmatmul.mubr.f32.gmra.mrb[6].mxu0 %v26_v42  ;;  %179 = vmatmul.mubr.f32.gmra.mrb[6].mxu1 %v34_v43 }
  0xfa   :  { %v145_v45 = vpop.f32.mrb[0].mxu0  ;;  %v165_v47 = vpop.f32.mrb[0].mxu1 }
  0xfb   :  { %v191_v48 = vmul.f32 %v250_v44, %v145_v45  ;;  %v195_v49 = vmul.f32 %v250_v44, %v165_v47  ;;  %v147_v50 = vpop.f32.mrb[1].mxu0  ;;  %v167_v51 = vpop.f32.mrb[1].mxu1 }
  0xfd   :  { %v206_v54 = vadd.f32 %v251_v46, %v191_v48  ;;  %v210_v55 = vadd.f32 %v251_v46, %v195_v49 }
  0xfe   :  { %v150_v56 = vpop.f32.mrb[2].mxu0  ;;  %v170_v57 = vpop.f32.mrb[2].mxu1 }
  0xff   :  { %v222_v58 = vadd.f32 %v214_v52, %v206_v54  ;;  %v226_v59 = vadd.f32 %v218_v53, %v210_v55  ;;  %v192_v60 = vmul.f32 %v250_v44, %v150_v56  ;;  %v196_v61 = vmul.f32 %v250_v44, %v170_v57  ;;  %v152_v62 = vpop.f32.mrb[3].mxu0  ;;  %v172_v63 = vpop.f32.mrb[3].mxu1 }
 0x101   :  { %230 = vst.msk [vmem:[%s524_s5] sm:$0xff] %vm54_vm0, %v222_v58  ;;  %234 = vst.msk [vmem:[%s524_s5 + $0x20] sm:$0xff] %vm54_vm0, %v226_v59  ;;  %v207_v2 = vadd.f32 %v251_v46, %v192_v60  ;;  %v211_v3 = vadd.f32 %v251_v46, %v196_v61 }
 0x102   :  { %v155_v4 = vpop.f32.mrb[4].mxu0  ;;  %v175_v5 = vpop.f32.mrb[4].mxu1 }
 0x103   :  { %v223_v6 = vadd.f32 %v215_v0, %v207_v2  ;;  %v227_v7 = vadd.f32 %v219_v1, %v211_v3  ;;  %v193_v8 = vmul.f32 %v250_v44, %v155_v4  ;;  %v197_v9 = vmul.f32 %v250_v44, %v175_v5  ;;  %v157_v10 = vpop.f32.mrb[5].mxu0  ;;  %v177_v11 = vpop.f32.mrb[5].mxu1 }
 0x105   :  { %231 = vst.msk [vmem:[%s524_s5 + $0x8] sm:$0xff] %vm54_vm0, %v223_v6  ;;  %235 = vst.msk [vmem:[%s524_s5 + $0x28] sm:$0xff] %vm54_vm0, %v227_v7  ;;  %v208_v14 = vadd.f32 %v251_v46, %v193_v8  ;;  %v212_v15 = vadd.f32 %v251_v46, %v197_v9 }
 0x106   :  { %v160_v16 = vpop.f32.mrb[6].mxu0  ;;  %v180_v17 = vpop.f32.mrb[6].mxu1 }
 0x107   :  { %v224_v18 = vadd.f32 %v216_v12, %v208_v14  ;;  %v228_v19 = vadd.f32 %v220_v13, %v212_v15  ;;  %v194_v20 = vmul.f32 %v250_v44, %v160_v16  ;;  %v198_v21 = vmul.f32 %v250_v44, %v180_v17  ;;  %v162_v22 = vpop.f32.mrb[7].mxu0  ;;  %v182_v23 = vpop.f32.mrb[7].mxu1 }
 0x109   :  { %232 = vst.msk [vmem:[%s524_s5 + $0x10] sm:$0xff] %vm54_vm0, %v224_v18  ;;  %236 = vst.msk [vmem:[%s524_s5 + $0x30] sm:$0xff] %vm54_vm0, %v228_v19  ;;  %v209_v26 = vadd.f32 %v251_v46, %v194_v20  ;;  %v213_v27 = vadd.f32 %v251_v46, %v198_v21 }
 0x10b   :  { %v225_v28 = vadd.f32 %v217_v24, %v209_v26  ;;  %v229_v29 = vadd.f32 %v221_v25, %v213_v27 }
 0x10d   :  { %233 = vst.msk [vmem:[%s524_s5 + $0x18] sm:$0xff] %vm54_vm0, %v225_v28  ;;  %237 = vst.msk [vmem:[%s524_s5 + $0x38] sm:$0xff] %vm54_vm0, %v229_v29 }

// kernel: multiscale_forward.142
= control target key start
LH: loop header
LB: loop body
LE: loop exit
PB: predicated region body
PF: predicated region fallthrough
CT: control target
= control target key end

     0   :  { %vm44_vm0 = vcmask 261120   ;;  %s105_s0 = inlined_call_operand.vmem [shape: f32[32,32], index: 0, kind: input, shape index: {}]   ;;  %s106_s1 = inlined_call_operand.vmem [shape: f32[1,32], index: 1, kind: input, shape index: {}]   ;;  %s107_s2 = inlined_call_operand.vmem [shape: f32[1,32], index: 2, kind: input, shape index: {}]   ;;  %s108_s3 = inlined_call_operand.vmem [shape: f32[32,32], index: 3, kind: output, shape index: {}]  }
   0x1   :  { %v14_v0 = vld [vmem:[%s105_s0] sm:$0xff]  ;;  %v15_v4 = vld [vmem:[%s105_s0 + $0x8] sm:$0xff]  ;;  %v16_v5 = vld [vmem:[%s105_s0 + $0x10] sm:$0xff] }
   0x2   :  { %v53_v1 = vld [vmem:[%s106_s1] ss:$0 sm:$0xff]  ;;  %v17_v6 = vld [vmem:[%s105_s0 + $0x18] sm:$0xff] }
   0x3   :  { %v54_v2 = vld [vmem:[%s107_s2] ss:$0 sm:$0xff]  ;;  %v25_v3 = vmul.f32 %v53_v1, %v14_v0  ;;  %v26_v7 = vmul.f32 %v53_v1, %v15_v4  ;;  %v27_v8 = vmul.f32 %v53_v1, %v16_v5  ;;  %v28_v9 = vmul.f32 %v53_v1, %v17_v6 }
   0x5   :  { %v36_v10 = vadd.f32 %v54_v2, %v25_v3  ;;  %v37_v11 = vadd.f32 %v54_v2, %v26_v7  ;;  %v38_v12 = vadd.f32 %v54_v2, %v27_v8  ;;  %v39_v13 = vadd.f32 %v54_v2, %v28_v9 }
   0x7   :  { %v40_v14 = vmax.f32 %v36_v10, 0.0  ;;  %v41_v15 = vmax.f32 %v37_v11, 0.0  ;;  %v42_v16 = vmax.f32 %v38_v12, 0.0  ;;  %v43_v17 = vmax.f32 %v39_v13, 0.0 }
   0x9   :  { %45 = vst.msk [vmem:[%s108_s3] sm:$0xff] %vm44_vm0, %v40_v14  ;;  %46 = vst.msk [vmem:[%s108_s3 + $0x8] sm:$0xff] %vm44_vm0, %v41_v15 }
   0xa   :  { %47 = vst.msk [vmem:[%s108_s3 + $0x10] sm:$0xff] %vm44_vm0, %v42_v16  ;;  %48 = vst.msk [vmem:[%s108_s3 + $0x18] sm:$0xff] %vm44_vm0, %v43_v17 }

// kernel: multiscale_forward.143
= control target key start
LH: loop header
LB: loop body
LE: loop exit
PB: predicated region body
PF: predicated region fallthrough
CT: control target
= control target key end

     0   :  { %vm144_vm0 = vcmask 130048   ;;  %s364_s1 = inlined_call_operand.vmem [shape: f32[128,16], index: 1, kind: input, shape index: {}]   ;;  %s365_s0 = inlined_call_operand.vmem [shape: f32[32,128], index: 0, kind: input, shape index: {}]   ;;  %s366_s2 = inlined_call_operand.vmem [shape: f32[1,16], index: 2, kind: input, shape index: {}]   ;;  %s367_s3 = inlined_call_operand.vmem [shape: f32[1,16], index: 3, kind: input, shape index: {}]   ;;  %s368_s4 = inlined_call_operand.vmem [shape: f32[32,16], index: 4, kind: output, shape index: {}]  }
   0x1   :  { %v21_v0 = vld [vmem:[%s364_s1] sm:$0xff]  ;;  %v22_v1 = vld [vmem:[%s364_s1 + $0x8] sm:$0xff]  ;;  %v23_v2 = vld [vmem:[%s364_s1 + $0x10] sm:$0xff] }
   0x2   :  { %v213_v3 = vpack.c.bf16 %v22_v1, %v21_v0  ;;  %v24_v4 = vld [vmem:[%s364_s1 + $0x18] sm:$0xff]  ;;  %v25_v6 = vld [vmem:[%s364_s1 + $0x20] sm:$0xff]  ;;  %v26_v7 = vld [vmem:[%s364_s1 + $0x28] sm:$0xff] }
   0x3   :  { %v217_v5 = vpack.c.bf16 %v24_v4, %v23_v2  ;;  %v221_v8 = vpack.c.bf16 %v26_v7, %v25_v6  ;;  %v17_v9 = vld [vmem:[%s365_s0] sm:$0xff]  ;;  %v19_v10 = vld [vmem:[%s365_s0 + $0x10] sm:$0xff]  ;;  %v28_v12 = vld [vmem:[%s364_s1 + $0x38] sm:$0xff] }
   0x4   :  { %214 = vmatprep.subr.bf16.mxu0 %v213_v3  ;;  %245 = vmatprep.subr.bf16.mxu1 %v213_v3  ;;  %v27_v11 = vld [vmem:[%s364_s1 + $0x30] sm:$0xff]  ;;  %v29_v14 = vld [vmem:[%s364_s1 + $0x40] sm:$0xff]  ;;  %v30_v15 = vld [vmem:[%s364_s1 + $0x48] sm:$0xff] }
   0x5   :  { %216 = vmatpush3.bf16.msra.mxu0 %v213_v3  ;;  %253 = vmatpush3.bf16.msra.mxu1 %v213_v3  ;;  %v225_v13 = vpack.c.bf16 %v28_v12, %v27_v11  ;;  %v229_v16 = vpack.c.bf16 %v30_v15, %v29_v14  ;;  %v31_v17 = vld [vmem:[%s364_s1 + $0x50] sm:$0xff]  ;;  %v32_v18 = vld [vmem:[%s364_s1 + $0x58] sm:$0xff]  ;;  %v33_v20 = vld [vmem:[%s364_s1 + $0x60] sm:$0xff] }
   0x6   :  { %218 = vmatprep.subr.bf16.mxu0 %v217_v5  ;;  %246 = vmatprep.subr.bf16.mxu1 %v217_v5  ;;  %v233_v19 = vpack.c.bf16 %v32_v18, %v31_v17  ;;  %v34_v21 = vld [vmem:[%s364_s1 + $0x68] sm:$0xff]  ;;  %v35_v23 = vld [vmem:[%s364_s1 + $0x70] sm:$0xff]  ;;  %v36_v24 = vld [vmem:[%s364_s1 + $0x78] sm:$0xff] }
   0x7   :  { %207 = vmatprep.mubr.f32.mxu0 %v17_v9  ;;  %210 = vmatprep.mubr.f32.mxu1 %v19_v10  ;;  %v237_v22 = vpack.c.bf16 %v34_v21, %v33_v20  ;;  %v241_v25 = vpack.c.bf16 %v36_v24, %v35_v23  ;;  %v18_v26 = vld [vmem:[%s365_s0 + $0x8] sm:$0xff]  ;;  %v20_v27 = vld [vmem:[%s365_s0 + $0x18] sm:$0xff]  ;;  %v153_v28 = vld [vmem:[%s366_s2] ss:$0 sm:$0xff] }
   0x8   :  { %v154_v30 = vld [vmem:[%s367_s3] ss:$0 sm:$0xff] }
   0x9   :  { %220 = vmatpush3.bf16.msra.mxu0 %v217_v5  ;;  %254 = vmatpush3.bf16.msra.mxu1 %v217_v5 }
   0xa   :  { %222 = vmatprep.subr.bf16.mxu0 %v221_v8  ;;  %247 = vmatprep.subr.bf16.mxu1 %v221_v8 }
   0xd   :  { %224 = vmatpush3.bf16.msra.mxu0 %v221_v8  ;;  %255 = vmatpush3.bf16.msra.mxu1 %v221_v8 }
   0xe   :  { %226 = vmatprep.subr.bf16.mxu0 %v225_v13  ;;  %248 = vmatprep.subr.bf16.mxu1 %v225_v13 }
  0x11   :  { %228 = vmatpush3.bf16.msra.mxu0 %v225_v13  ;;  %256 = vmatpush3.bf16.msra.mxu1 %v225_v13 }
  0x12   :  { %230 = vmatprep.subr.bf16.mxu0 %v229_v16  ;;  %249 = vmatprep.subr.bf16.mxu1 %v229_v16 }
  0x15   :  { %232 = vmatpush3.bf16.msra.mxu0 %v229_v16  ;;  %257 = vmatpush3.bf16.msra.mxu1 %v229_v16 }
  0x16   :  { %234 = vmatprep.subr.bf16.mxu0 %v233_v19  ;;  %250 = vmatprep.subr.bf16.mxu1 %v233_v19 }
  0x19   :  { %236 = vmatpush3.bf16.msra.mxu0 %v233_v19  ;;  %258 = vmatpush3.bf16.msra.mxu1 %v233_v19 }
  0x1a   :  { %238 = vmatprep.subr.bf16.mxu0 %v237_v22  ;;  %251 = vmatprep.subr.bf16.mxu1 %v237_v22 }
  0x1d   :  { %240 = vmatpush3.bf16.msra.mxu0 %v237_v22  ;;  %259 = vmatpush3.bf16.msra.mxu1 %v237_v22 }
  0x1e   :  { %242 = vmatprep.subr.bf16.mxu0 %v241_v25  ;;  %252 = vmatprep.subr.bf16.mxu1 %v241_v25 }
  0x21   :  { %244 = vmatpush3.bf16.msra.mxu0 %v241_v25  ;;  %260 = vmatpush3.bf16.msra.mxu1 %v241_v25 }
  0x24   :  { %208 = vmatmul.mubr.f32.vlgmr.msra.gmra.mrb[0].mxu0 %v18_v26  ;;  %211 = vmatmul.mubr.f32.vlgmr.msra.gmra.mrb[0].mxu1 %v20_v27 }
  0xf7   :  { %v209_v29 = vpop.f32.mrb[0].mxu0  ;;  %v212_v31 = vpop.f32.mrb[0].mxu1 }
  0xf8   :  { %v130_v32 = vmul.f32 %v209_v29, %v153_v28  ;;  %v132_v33 = vmul.f32 %v212_v31, %v153_v28  ;;  %v103_v34 = vpop.f32.mrb[1].mxu0  ;;  %v113_v35 = vpop.f32.mrb[1].mxu1 }
  0xf9   :  { %v129_v36 = vmul.f32 %v153_v28, %v103_v34  ;;  %v131_v37 = vmul.f32 %v153_v28, %v113_v35 }
  0xfa   :  { %v141_v38 = vadd.f32 %v154_v30, %v130_v32  ;;  %v143_v39 = vadd.f32 %v154_v30, %v132_v33 }
  0xfb   :  { %v140_v40 = vadd.f32 %v154_v30, %v129_v36  ;;  %v142_v41 = vadd.f32 %v154_v30, %v131_v37 }
  0xfc   :  { %146 = vst.msk [vmem:[%s368_s4 + $0x8] sm:$0xff] %vm144_vm0, %v141_v38  ;;  %148 = vst.msk [vmem:[%s368_s4 + $0x18] sm:$0xff] %vm144_vm0, %v143_v39 }
  0xfd   :  { %145 = vst.msk [vmem:[%s368_s4] sm:$0xff] %vm144_vm0, %v140_v40  ;;  %147 = vst.msk [vmem:[%s368_s4 + $0x10] sm:$0xff] %vm144_vm0, %v142_v41 }

// kernel: multiscale_forward.138
= control target key start
LH: loop header
LB: loop body
LE: loop exit
PB: predicated region body
PF: predicated region fallthrough
CT: control target
= control target key end

     0   :  { %vm78_vm0 = vcmask 392192   ;;  %vm254_vm1 = vcmask 130048   ;;  %s493_s3 = inlined_call_operand.vmem [shape: f32[48,16], index: 3, kind: input, shape index: {}]   ;;  %s494_s0 = inlined_call_operand.vmem [shape: f32[64,48], index: 0, kind: input, shape index: {}]   ;;  %s495_s1 = inlined_call_operand.vmem [shape: f32[1,48], index: 1, kind: input, shape index: {}]   ;;  %s496_s2 = inlined_call_operand.vmem [shape: f32[1,48], index: 2, kind: input, shape index: {}]   ;;  %s497_s4 = inlined_call_operand.vmem [shape: f32[1,16], index: 4, kind: input, shape index: {}]   ;;  %s498_s5 = inlined_call_operand.vmem [shape: f32[1,16], index: 5, kind: input, shape index: {}]   ;;  %s499_s6 = inlined_call_operand.vmem [shape: f32[64,16], index: 6, kind: input, shape index: {}]   ;;  %s500_s7 = inlined_call_operand.vmem [shape: f32[64,16], index: 7, kind: output, shape index: {}]  }
   0x1   :  { %v72_v0 = vld [vmem:[%s493_s3] sm:$0xff]  ;;  %v73_v1 = vld [vmem:[%s493_s3 + $0x8] sm:$0xff]  ;;  %v74_v2 = vld [vmem:[%s493_s3 + $0x10] sm:$0xff] }
   0x2   :  { %v317_v3 = vpack.c.bf16 %v73_v1, %v72_v0  ;;  %v75_v4 = vld [vmem:[%s493_s3 + $0x18] sm:$0xff]  ;;  %v76_v5 = vld [vmem:[%s493_s3 + $0x20] sm:$0xff]  ;;  %v77_v6 = vld [vmem:[%s493_s3 + $0x28] sm:$0xff] }
   0x3   :  { %v321_v7 = vpack.c.bf16 %v75_v4, %v74_v2  ;;  %v26_v8 = vld [vmem:[%s494_s0] sm:$0xff]  ;;  %v325_v11 = vpack.c.bf16 %v77_v6, %v76_v5  ;;  %v27_v14 = vld [vmem:[%s494_s0 + $0x8] sm:$0xff]  ;;  %v28_v19 = vld [vmem:[%s494_s0 + $0x10] sm:$0xff] }
   0x4   :  { %v267_v9 = vld [vmem:[%s495_s1] ss:$0 sm:$0xff]  ;;  %318 = vmatprep.subr.bf16.mxu0 %v317_v3  ;;  %329 = vmatprep.subr.bf16.mxu1 %v317_v3  ;;  %v31_v15 = vld [vmem:[%s494_s0 + $0x28] sm:$0xff]  ;;  %v32_v20 = vld [vmem:[%s494_s0 + $0x30] sm:$0xff] }
   0x5   :  { %v268_v10 = vld [vmem:[%s496_s2] ss:$0 sm:$0xff]  ;;  %v41_v12 = vmul.f32 %v267_v9, %v26_v8  ;;  %320 = vmatpush3.bf16.msra.mxu0 %v317_v3  ;;  %332 = vmatpush3.bf16.msra.mxu1 %v317_v3  ;;  %v42_v17 = vmul.f32 %v267_v9, %v27_v14  ;;  %v46_v18 = vmul.f32 %v267_v9, %v31_v15  ;;  %v29_v21 = vld [vmem:[%s494_s0 + $0x18] sm:$0xff]  ;;  %v239_v51 = vld [vmem:[%s499_s6 + $0x8] sm:$0xff] }
   0x6   :  { %v30_v13 = vld [vmem:[%s494_s0 + $0x20] sm:$0xff]  ;;  %322 = vmatprep.subr.bf16.mxu0 %v321_v7  ;;  %330 = vmatprep.subr.bf16.mxu1 %v321_v7  ;;  %v43_v23 = vmul.f32 %v267_v9, %v28_v19  ;;  %v47_v24 = vmul.f32 %v267_v9, %v32_v20  ;;  %v33_v25 = vld [vmem:[%s494_s0 + $0x38] sm:$0xff]  ;;  %v44_v30 = vmul.f32 %v267_v9, %v29_v21  ;;  %v243_v52 = vld [vmem:[%s499_s6 + $0x28] sm:$0xff] }
   0x7   :  { %v45_v16 = vmul.f32 %v267_v9, %v30_v13  ;;  %v56_v22 = vadd.f32 %v268_v10, %v41_v12  ;;  %v57_v27 = vadd.f32 %v268_v10, %v42_v17  ;;  %v61_v29 = vadd.f32 %v268_v10, %v46_v18  ;;  %v277_v43 = vld [vmem:[%s497_s4] ss:$0 sm:$0xff]  ;;  %v245_v8 = vld [vmem:[%s499_s6 + $0x38] sm:$0xff]  ;;  %v240_v13 = vld [vmem:[%s499_s6 + $0x10] sm:$0xff] }
   0x8   :  { %v48_v31 = vmul.f32 %v267_v9, %v33_v25  ;;  %v58_v33 = vadd.f32 %v268_v10, %v43_v23  ;;  %v62_v34 = vadd.f32 %v268_v10, %v47_v24  ;;  %v59_v37 = vadd.f32 %v268_v10, %v44_v30  ;;  %v278_v45 = vld [vmem:[%s498_s5] ss:$0 sm:$0xff]  ;;  %v244_v14 = vld [vmem:[%s499_s6 + $0x30] sm:$0xff] }
   0x9   :  { %v60_v26 = vadd.f32 %v268_v10, %v45_v16  ;;  %v64_v28 = vmax.f32 %v56_v22, 0.0  ;;  %324 = vmatpush3.bf16.msra.mxu0 %v321_v7  ;;  %333 = vmatpush3.bf16.msra.mxu1 %v321_v7  ;;  %v65_v35 = vmax.f32 %v57_v27, 0.0  ;;  %v69_v36 = vmax.f32 %v61_v29, 0.0  ;;  %v238_v57 = vld [vmem:[%s499_s6] sm:$0xff]  ;;  %v241_v7 = vld [vmem:[%s499_s6 + $0x18] sm:$0xff] }
   0xa   :  { %326 = vmatprep.subr.bf16.mxu0 %v325_v11  ;;  %331 = vmatprep.subr.bf16.mxu1 %v325_v11  ;;  %v63_v38 = vadd.f32 %v268_v10, %v48_v31  ;;  %v66_v39 = vmax.f32 %v58_v33, 0.0  ;;  %v70_v40 = vmax.f32 %v62_v34, 0.0  ;;  %v67_v41 = vmax.f32 %v59_v37, 0.0  ;;  %v242_v58 = vld [vmem:[%s499_s6 + $0x20] sm:$0xff] }
   0xb   :  { %v68_v32 = vmax.f32 %v60_v26, 0.0  ;;  %305 = vmatprep.mubr.msk.f32.mxu0 %vm78_vm0, %v64_v28 }
   0xc   :  { %v71_v42 = vmax.f32 %v63_v38, 0.0 }
   0xd   :  { %311 = vmatprep.mubr.msk.f32.mxu1 %vm78_vm0, %v68_v32  ;;  %328 = vmatpush3.bf16.msra.mxu0 %v325_v11 }
   0xe   :  { %334 = vmatpush3.bf16.msra.mxu1 %v325_v11 }
  0x10   :  { %306 = vmatmul.mubr.msk.f32.vlgmr.msra.gmra.mrb[0].mxu0 %vm78_vm0, %v65_v35 }
  0x11   :  { %312 = vmatmul.mubr.msk.f32.vlgmr.msra.gmra.mrb[0].mxu1 %vm78_vm0, %v69_v36  ;;  %308 = vmatprep.mubr.msk.f32.mxu0 %vm78_vm0, %v66_v39 }
  0x12   :  { %314 = vmatprep.mubr.msk.f32.mxu1 %vm78_vm0, %v70_v40 }
  0x14   :  { %309 = vmatmul.mubr.msk.f32.gmra.mrb[2].mxu0 %vm78_vm0, %v67_v41 }
  0x15   :  { %315 = vmatmul.mubr.msk.f32.gmra.mrb[2].mxu1 %vm78_vm0, %v71_v42 }
  0xe3   :  { %v307_v44 = vpop.f32.mrb[0].mxu0 }
  0xe4   :  { %v313_v46 = vpop.f32.mrb[0].mxu1  ;;  %v216_v47 = vmul.f32 %v307_v44, %v277_v43  ;;  %v169_v49 = vpop.f32.mrb[1].mxu0 }
  0xe5   :  { %v220_v48 = vmul.f32 %v313_v46, %v277_v43  ;;  %v189_v50 = vpop.f32.mrb[1].mxu1  ;;  %v215_v53 = vmul.f32 %v277_v43, %v169_v49 }
  0xe6   :  { %v219_v54 = vmul.f32 %v277_v43, %v189_v50  ;;  %v231_v55 = vadd.f32 %v278_v45, %v216_v47 }
  0xe7   :  { %v235_v56 = vadd.f32 %v278_v45, %v220_v48  ;;  %v230_v59 = vadd.f32 %v278_v45, %v215_v53  ;;  %v310_v61 = vpop.f32.mrb[2].mxu0 }
  0xe8   :  { %v234_v60 = vadd.f32 %v278_v45, %v219_v54  ;;  %v316_v62 = vpop.f32.mrb[2].mxu1  ;;  %v247_v63 = vadd.f32 %v239_v51, %v231_v55  ;;  %v218_v1 = vmul.f32 %v310_v61, %v277_v43  ;;  %v179_v3 = vpop.f32.mrb[3].mxu0 }
  0xe9   :  { %v251_v0 = vadd.f32 %v243_v52, %v235_v56  ;;  %v222_v2 = vmul.f32 %v316_v62, %v277_v43  ;;  %v199_v4 = vpop.f32.mrb[3].mxu1  ;;  %v246_v5 = vadd.f32 %v238_v57, %v230_v59  ;;  %v217_v9 = vmul.f32 %v277_v43, %v179_v3 }
  0xea   :  { %v250_v6 = vadd.f32 %v242_v58, %v234_v60  ;;  %v221_v10 = vmul.f32 %v277_v43, %v199_v4  ;;  %256 = vst.msk [vmem:[%s500_s7 + $0x8] sm:$0xff] %vm254_vm1, %v247_v63  ;;  %v233_v11 = vadd.f32 %v278_v45, %v218_v1 }
  0xeb   :  { %260 = vst.msk [vmem:[%s500_s7 + $0x28] sm:$0xff] %vm254_vm1, %v251_v0  ;;  %v237_v12 = vadd.f32 %v278_v45, %v222_v2  ;;  %255 = vst.msk [vmem:[%s500_s7] sm:$0xff] %vm254_vm1, %v246_v5  ;;  %v232_v15 = vadd.f32 %v278_v45, %v217_v9 }
  0xec   :  { %259 = vst.msk [vmem:[%s500_s7 + $0x20] sm:$0xff] %vm254_vm1, %v250_v6  ;;  %v236_v16 = vadd.f32 %v278_v45, %v221_v10  ;;  %v249_v17 = vadd.f32 %v241_v7, %v233_v11 }
  0xed   :  { %v253_v18 = vadd.f32 %v245_v8, %v237_v12  ;;  %v248_v19 = vadd.f32 %v240_v13, %v232_v15 }
  0xee   :  { %v252_v20 = vadd.f32 %v244_v14, %v236_v16  ;;  %258 = vst.msk [vmem:[%s500_s7 + $0x18] sm:$0xff] %vm254_vm1, %v249_v17 }
  0xef   :  { %262 = vst.msk [vmem:[%s500_s7 + $0x38] sm:$0xff] %vm254_vm1, %v253_v18  ;;  %257 = vst.msk [vmem:[%s500_s7 + $0x10] sm:$0xff] %vm254_vm1, %v248_v19 }
  0xf0   :  { %261 = vst.msk [vmem:[%s500_s7 + $0x30] sm:$0xff] %vm254_vm1, %v252_v20 }

// kernel: multiscale_forward.145
= control target key start
LH: loop header
LB: loop body
LE: loop exit
PB: predicated region body
PF: predicated region fallthrough
CT: control target
= control target key end

     0   :  { %vm148_vm0 = vcmask 130048   ;;  %s368_s1 = inlined_call_operand.vmem [shape: f32[128,16], index: 1, kind: input, shape index: {}]   ;;  %s369_s0 = inlined_call_operand.vmem [shape: f32[32,128], index: 0, kind: input, shape index: {}]   ;;  %s370_s2 = inlined_call_operand.vmem [shape: f32[1,16], index: 2, kind: input, shape index: {}]   ;;  %s371_s3 = inlined_call_operand.vmem [shape: f32[1,16], index: 3, kind: input, shape index: {}]   ;;  %s372_s4 = inlined_call_operand.vmem [shape: f32[32,16], index: 4, kind: output, shape index: {}]  }
   0x1   :  { %v21_v0 = vld [vmem:[%s368_s1] sm:$0xff]  ;;  %v22_v1 = vld [vmem:[%s368_s1 + $0x8] sm:$0xff]  ;;  %v23_v2 = vld [vmem:[%s368_s1 + $0x10] sm:$0xff] }
   0x2   :  { %v217_v3 = vpack.c.bf16 %v22_v1, %v21_v0  ;;  %v24_v4 = vld [vmem:[%s368_s1 + $0x18] sm:$0xff]  ;;  %v25_v6 = vld [vmem:[%s368_s1 + $0x20] sm:$0xff]  ;;  %v26_v7 = vld [vmem:[%s368_s1 + $0x28] sm:$0xff] }
   0x3   :  { %v221_v5 = vpack.c.bf16 %v24_v4, %v23_v2  ;;  %v225_v8 = vpack.c.bf16 %v26_v7, %v25_v6  ;;  %v17_v9 = vld [vmem:[%s369_s0] sm:$0xff]  ;;  %v19_v10 = vld [vmem:[%s369_s0 + $0x10] sm:$0xff]  ;;  %v28_v12 = vld [vmem:[%s368_s1 + $0x38] sm:$0xff] }
   0x4   :  { %218 = vmatprep.subr.bf16.mxu0 %v217_v3  ;;  %249 = vmatprep.subr.bf16.mxu1 %v217_v3  ;;  %v27_v11 = vld [vmem:[%s368_s1 + $0x30] sm:$0xff]  ;;  %v29_v14 = vld [vmem:[%s368_s1 + $0x40] sm:$0xff]  ;;  %v30_v15 = vld [vmem:[%s368_s1 + $0x48] sm:$0xff] }
   0x5   :  { %220 = vmatpush3.bf16.msra.mxu0 %v217_v3  ;;  %257 = vmatpush3.bf16.msra.mxu1 %v217_v3  ;;  %v229_v13 = vpack.c.bf16 %v28_v12, %v27_v11  ;;  %v233_v16 = vpack.c.bf16 %v30_v15, %v29_v14  ;;  %v31_v17 = vld [vmem:[%s368_s1 + $0x50] sm:$0xff]  ;;  %v32_v18 = vld [vmem:[%s368_s1 + $0x58] sm:$0xff]  ;;  %v33_v20 = vld [vmem:[%s368_s1 + $0x60] sm:$0xff] }
   0x6   :  { %222 = vmatprep.subr.bf16.mxu0 %v221_v5  ;;  %250 = vmatprep.subr.bf16.mxu1 %v221_v5  ;;  %v237_v19 = vpack.c.bf16 %v32_v18, %v31_v17  ;;  %v34_v21 = vld [vmem:[%s368_s1 + $0x68] sm:$0xff]  ;;  %v35_v23 = vld [vmem:[%s368_s1 + $0x70] sm:$0xff]  ;;  %v36_v24 = vld [vmem:[%s368_s1 + $0x78] sm:$0xff] }
   0x7   :  { %211 = vmatprep.mubr.f32.mxu0 %v17_v9  ;;  %214 = vmatprep.mubr.f32.mxu1 %v19_v10  ;;  %v241_v22 = vpack.c.bf16 %v34_v21, %v33_v20  ;;  %v245_v25 = vpack.c.bf16 %v36_v24, %v35_v23  ;;  %v18_v26 = vld [vmem:[%s369_s0 + $0x8] sm:$0xff]  ;;  %v20_v27 = vld [vmem:[%s369_s0 + $0x18] sm:$0xff]  ;;  %v157_v28 = vld [vmem:[%s370_s2] ss:$0 sm:$0xff] }
   0x8   :  { %v158_v30 = vld [vmem:[%s371_s3] ss:$0 sm:$0xff] }
   0x9   :  { %224 = vmatpush3.bf16.msra.mxu0 %v221_v5  ;;  %258 = vmatpush3.bf16.msra.mxu1 %v221_v5 }
   0xa   :  { %226 = vmatprep.subr.bf16.mxu0 %v225_v8  ;;  %251 = vmatprep.subr.bf16.mxu1 %v225_v8 }
   0xd   :  { %228 = vmatpush3.bf16.msra.mxu0 %v225_v8  ;;  %259 = vmatpush3.bf16.msra.mxu1 %v225_v8 }
   0xe   :  { %230 = vmatprep.subr.bf16.mxu0 %v229_v13  ;;  %252 = vmatprep.subr.bf16.mxu1 %v229_v13 }
  0x11   :  { %232 = vmatpush3.bf16.msra.mxu0 %v229_v13  ;;  %260 = vmatpush3.bf16.msra.mxu1 %v229_v13 }
  0x12   :  { %234 = vmatprep.subr.bf16.mxu0 %v233_v16  ;;  %253 = vmatprep.subr.bf16.mxu1 %v233_v16 }
  0x15   :  { %236 = vmatpush3.bf16.msra.mxu0 %v233_v16  ;;  %261 = vmatpush3.bf16.msra.mxu1 %v233_v16 }
  0x16   :  { %238 = vmatprep.subr.bf16.mxu0 %v237_v19  ;;  %254 = vmatprep.subr.bf16.mxu1 %v237_v19 }
  0x19   :  { %240 = vmatpush3.bf16.msra.mxu0 %v237_v19  ;;  %262 = vmatpush3.bf16.msra.mxu1 %v237_v19 }
  0x1a   :  { %242 = vmatprep.subr.bf16.mxu0 %v241_v22  ;;  %255 = vmatprep.subr.bf16.mxu1 %v241_v22 }
  0x1d   :  { %244 = vmatpush3.bf16.msra.mxu0 %v241_v22  ;;  %263 = vmatpush3.bf16.msra.mxu1 %v241_v22 }
  0x1e   :  { %246 = vmatprep.subr.bf16.mxu0 %v245_v25  ;;  %256 = vmatprep.subr.bf16.mxu1 %v245_v25 }
  0x21   :  { %248 = vmatpush3.bf16.msra.mxu0 %v245_v25  ;;  %264 = vmatpush3.bf16.msra.mxu1 %v245_v25 }
  0x24   :  { %212 = vmatmul.mubr.f32.vlgmr.msra.gmra.mrb[0].mxu0 %v18_v26  ;;  %215 = vmatmul.mubr.f32.vlgmr.msra.gmra.mrb[0].mxu1 %v20_v27 }
  0xf7   :  { %v213_v29 = vpop.f32.mrb[0].mxu0  ;;  %v216_v31 = vpop.f32.mrb[0].mxu1 }
  0xf8   :  { %v130_v32 = vmul.f32 %v213_v29, %v157_v28  ;;  %v132_v33 = vmul.f32 %v216_v31, %v157_v28  ;;  %v103_v34 = vpop.f32.mrb[1].mxu0  ;;  %v113_v35 = vpop.f32.mrb[1].mxu1 }
  0xf9   :  { %v129_v36 = vmul.f32 %v157_v28, %v103_v34  ;;  %v131_v37 = vmul.f32 %v157_v28, %v113_v35 }
  0xfa   :  { %v141_v38 = vadd.f32 %v158_v30, %v130_v32  ;;  %v143_v39 = vadd.f32 %v158_v30, %v132_v33 }
  0xfb   :  { %v140_v40 = vadd.f32 %v158_v30, %v129_v36  ;;  %v142_v41 = vadd.f32 %v158_v30, %v131_v37 }
  0xfc   :  { %v145_v42 = vmax.f32 %v141_v38, 0.0  ;;  %v147_v43 = vmax.f32 %v143_v39, 0.0 }
  0xfd   :  { %v144_v44 = vmax.f32 %v140_v40, 0.0  ;;  %v146_v45 = vmax.f32 %v142_v41, 0.0 }
  0xfe   :  { %150 = vst.msk [vmem:[%s372_s4 + $0x8] sm:$0xff] %vm148_vm0, %v145_v42  ;;  %152 = vst.msk [vmem:[%s372_s4 + $0x18] sm:$0xff] %vm148_vm0, %v147_v43 }
  0xff   :  { %149 = vst.msk [vmem:[%s372_s4] sm:$0xff] %vm148_vm0, %v144_v44  ;;  %151 = vst.msk [vmem:[%s372_s4 + $0x10] sm:$0xff] %vm148_vm0, %v146_v45 }

// kernel: multiscale_forward.141
= control target key start
LH: loop header
LB: loop body
LE: loop exit
PB: predicated region body
PF: predicated region fallthrough
CT: control target
= control target key end

     0   :  { %vm23_vm0 = vcmask 130048   ;;  %s248_s1 = inlined_call_operand.vmem [shape: f32[16,16], index: 1, kind: input, shape index: {}]   ;;  %s249_s0 = inlined_call_operand.vmem [shape: f32[32,16], index: 0, kind: input, shape index: {}]   ;;  %s250_s2 = inlined_call_operand.vmem [shape: f32[1,16], index: 2, kind: input, shape index: {}]   ;;  %s251_s3 = inlined_call_operand.vmem [shape: f32[1,16], index: 3, kind: input, shape index: {}]   ;;  %s252_s4 = inlined_call_operand.vmem [shape: f32[32,16], index: 4, kind: output, shape index: {}]  }
   0x1   :  { %v21_v0 = vld [vmem:[%s248_s1] sm:$0xff]  ;;  %v22_v1 = vld [vmem:[%s248_s1 + $0x8] sm:$0xff]  ;;  %v19_v4 = vld [vmem:[%s249_s0 + $0x10] sm:$0xff] }
   0x2   :  { %v17_v2 = vld [vmem:[%s249_s0] sm:$0xff]  ;;  %v173_v3 = vpack.c.bf16 %v22_v1, %v21_v0  ;;  %170 = vmatprep.mubr.msk.f32.mxu1 %vm23_vm0, %v19_v4  ;;  %v18_v5 = vld [vmem:[%s249_s0 + $0x8] sm:$0xff]  ;;  %v20_v6 = vld [vmem:[%s249_s0 + $0x18] sm:$0xff] }
   0x3   :  { %167 = vmatprep.mubr.msk.f32.mxu0 %vm23_vm0, %v17_v2  ;;  %v155_v7 = vld [vmem:[%s250_s2] ss:$0 sm:$0xff] }
   0x4   :  { %174 = vmatprep.subr.bf16.mxu0 %v173_v3  ;;  %177 = vmatprep.subr.bf16.mxu1 %v173_v3  ;;  %v156_v9 = vld [vmem:[%s251_s3] ss:$0 sm:$0xff] }
   0x5   :  { %176 = vmatpush3.bf16.msra.mxu0 %v173_v3  ;;  %178 = vmatpush3.bf16.msra.mxu1 %v173_v3 }
   0x8   :  { %168 = vmatmul.mubr.msk.f32.vlgmr.msra.gmra.mrb[0].mxu0 %vm23_vm0, %v18_v5  ;;  %171 = vmatmul.mubr.msk.f32.vlgmr.msra.gmra.mrb[0].mxu1 %vm23_vm0, %v20_v6 }
  0xdb   :  { %v169_v8 = vpop.f32.mrb[0].mxu0  ;;  %v172_v10 = vpop.f32.mrb[0].mxu1 }
  0xdc   :  { %v129_v11 = vmul.f32 %v169_v8, %v155_v7  ;;  %v131_v12 = vmul.f32 %v172_v10, %v155_v7  ;;  %v102_v13 = vpop.f32.mrb[1].mxu0  ;;  %v112_v14 = vpop.f32.mrb[1].mxu1 }
  0xdd   :  { %v128_v15 = vmul.f32 %v155_v7, %v102_v13  ;;  %v130_v16 = vmul.f32 %v155_v7, %v112_v14 }
  0xde   :  { %v140_v17 = vadd.f32 %v156_v9, %v129_v11  ;;  %v142_v18 = vadd.f32 %v156_v9, %v131_v12 }
  0xdf   :  { %v139_v19 = vadd.f32 %v156_v9, %v128_v15  ;;  %v141_v20 = vadd.f32 %v156_v9, %v130_v16 }
  0xe0   :  { %144 = vst.msk [vmem:[%s252_s4 + $0x8] sm:$0xff] %vm23_vm0, %v140_v17  ;;  %146 = vst.msk [vmem:[%s252_s4 + $0x18] sm:$0xff] %vm23_vm0, %v142_v18 }
  0xe1   :  { %143 = vst.msk [vmem:[%s252_s4] sm:$0xff] %vm23_vm0, %v139_v19  ;;  %145 = vst.msk [vmem:[%s252_s4 + $0x10] sm:$0xff] %vm23_vm0, %v141_v20 }

// kernel: multiscale_forward.146
= control target key start
LH: loop header
LB: loop body
LE: loop exit
PB: predicated region body
PF: predicated region fallthrough
CT: control target
= control target key end

     0   :  { %v234_v0 = vmov 0.0|0.0   ;;  %vm46_vm0 = vcmask 130048   ;;  %s399_s1 = inlined_call_operand.vmem [shape: f32[144,16], index: 1, kind: input, shape index: {}]   ;;  %s400_s0 = inlined_call_operand.vmem [shape: f32[32,144], index: 0, kind: input, shape index: {}]   ;;  %s401_s2 = inlined_call_operand.vmem [shape: f32[1,16], index: 2, kind: input, shape index: {}]   ;;  %s402_s3 = inlined_call_operand.vmem [shape: f32[1,16], index: 3, kind: input, shape index: {}]   ;;  %s403_s4 = inlined_call_operand.vmem [shape: f32[32,16], index: 4, kind: input, shape index: {}]   ;;  %s404_s5 = inlined_call_operand.vmem [shape: f32[32,16], index: 5, kind: output, shape index: {}]  }
   0x1   :  { %188 = vmatprep.subr.bf16.mxu0 %v234_v0  ;;  %215 = vmatprep.subr.bf16.mxu1 %v234_v0  ;;  %v28_v1 = vld [vmem:[%s399_s1] sm:$0xff]  ;;  %v29_v2 = vld [vmem:[%s399_s1 + $0x8] sm:$0xff]  ;;  %v30_v3 = vld [vmem:[%s399_s1 + $0x10] sm:$0xff] }
   0x2   :  { %v189_v4 = vpack.c.bf16 %v29_v2, %v28_v1  ;;  %v31_v5 = vld [vmem:[%s399_s1 + $0x18] sm:$0xff]  ;;  %v32_v7 = vld [vmem:[%s399_s1 + $0x20] sm:$0xff]  ;;  %v33_v8 = vld [vmem:[%s399_s1 + $0x28] sm:$0xff] }
   0x3   :  { %v192_v6 = vpack.c.bf16 %v31_v5, %v30_v3  ;;  %v21_v9 = vld [vmem:[%s400_s0 + $0x8] sm:$0xff]  ;;  %v195_v11 = vpack.c.bf16 %v33_v8, %v32_v7  ;;  %v34_v12 = vld [vmem:[%s399_s1 + $0x30] sm:$0xff]  ;;  %v35_v13 = vld [vmem:[%s399_s1 + $0x38] sm:$0xff] }
   0x4   :  { %190 = vmatpush1.bf16.msra.mxu0 %v189_v4  ;;  %224 = vmatpush1.bf16.msra.mxu1 %v189_v4  ;;  %v25_v10 = vld [vmem:[%s400_s0 + $0x28] sm:$0xff]  ;;  %v198_v14 = vpack.c.bf16 %v35_v13, %v34_v12  ;;  %v36_v15 = vld [vmem:[%s399_s1 + $0x40] sm:$0xff]  ;;  %v38_v18 = vld [vmem:[%s399_s1 + $0x50] sm:$0xff] }
   0x5   :  { %191 = vmatprep.subr.bf16.mxu0 %v234_v0  ;;  %216 = vmatprep.subr.bf16.mxu1 %v234_v0  ;;  %v37_v16 = vld [vmem:[%s399_s1 + $0x48] sm:$0xff]  ;;  %v39_v19 = vld [vmem:[%s399_s1 + $0x58] sm:$0xff]  ;;  %v40_v21 = vld [vmem:[%s399_s1 + $0x60] sm:$0xff] }
   0x6   :  { %182 = vmatprep.mubr.msk.f32.mxu0 %vm46_vm0, %v21_v9  ;;  %184 = vmatprep.mubr.msk.f32.mxu1 %vm46_vm0, %v25_v10  ;;  %v201_v17 = vpack.c.bf16 %v37_v16, %v36_v15  ;;  %v204_v20 = vpack.c.bf16 %v39_v19, %v38_v18  ;;  %v41_v22 = vld [vmem:[%s399_s1 + $0x68] sm:$0xff]  ;;  %v42_v24 = vld [vmem:[%s399_s1 + $0x70] sm:$0xff]  ;;  %v43_v25 = vld [vmem:[%s399_s1 + $0x78] sm:$0xff] }
   0x7   :  { %v207_v23 = vpack.c.bf16 %v41_v22, %v40_v21  ;;  %v210_v26 = vpack.c.bf16 %v43_v25, %v42_v24  ;;  %v44_v27 = vld [vmem:[%s399_s1 + $0x80] sm:$0xff]  ;;  %v45_v28 = vld [vmem:[%s399_s1 + $0x88] sm:$0xff]  ;;  %v23_v32 = vld [vmem:[%s400_s0 + $0x18] sm:$0xff] }
   0x8   :  { %193 = vmatpush1.bf16.msra.mxu0 %v192_v6  ;;  %225 = vmatpush1.bf16.msra.mxu1 %v192_v6  ;;  %v213_v29 = vpack.c.bf16 %v45_v28, %v44_v27  ;;  %v20_v30 = vld [vmem:[%s400_s0] sm:$0xff]  ;;  %v27_v33 = vld [vmem:[%s400_s0 + $0x38] sm:$0xff]  ;;  %v22_v34 = vld [vmem:[%s400_s0 + $0x10] sm:$0xff] }
   0x9   :  { %194 = vmatprep.subr.bf16.mxu0 %v234_v0  ;;  %217 = vmatprep.subr.bf16.mxu1 %v234_v0  ;;  %v24_v31 = vld [vmem:[%s400_s0 + $0x20] sm:$0xff]  ;;  %v26_v35 = vld [vmem:[%s400_s0 + $0x30] sm:$0xff]  ;;  %v167_v56 = vld [vmem:[%s403_s4 + $0x8] sm:$0xff] }
   0xa   :  { %v186_v36 = vld [vmem:[%s401_s2] ss:$0 sm:$0xff]  ;;  %v168_v45 = vld [vmem:[%s403_s4 + $0x10] sm:$0xff]  ;;  %v169_v57 = vld [vmem:[%s403_s4 + $0x18] sm:$0xff] }
   0xb   :  { %v187_v38 = vld [vmem:[%s402_s3] ss:$0 sm:$0xff] }
   0xc   :  { %196 = vmatpush1.bf16.msra.mxu0 %v195_v11  ;;  %226 = vmatpush1.bf16.msra.mxu1 %v195_v11  ;;  %v166_v44 = vld [vmem:[%s403_s4] sm:$0xff] }
   0xd   :  { %197 = vmatprep.subr.bf16.mxu0 %v234_v0  ;;  %218 = vmatprep.subr.bf16.mxu1 %v234_v0 }
  0x10   :  { %199 = vmatpush1.bf16.msra.mxu0 %v198_v14  ;;  %227 = vmatpush1.bf16.msra.mxu1 %v198_v14 }
  0x11   :  { %200 = vmatprep.subr.bf16.mxu0 %v234_v0  ;;  %219 = vmatprep.subr.bf16.mxu1 %v234_v0 }
  0x14   :  { %202 = vmatpush1.bf16.msra.mxu0 %v201_v17  ;;  %228 = vmatpush1.bf16.msra.mxu1 %v201_v17 }
  0x15   :  { %203 = vmatprep.subr.bf16.mxu0 %v234_v0  ;;  %220 = vmatprep.subr.bf16.mxu1 %v234_v0 }
  0x18   :  { %205 = vmatpush1.bf16.msra.mxu0 %v204_v20  ;;  %229 = vmatpush1.bf16.msra.mxu1 %v204_v20 }
  0x19   :  { %206 = vmatprep.subr.bf16.mxu0 %v234_v0  ;;  %221 = vmatprep.subr.bf16.mxu1 %v234_v0 }
  0x1c   :  { %208 = vmatpush1.bf16.msra.mxu0 %v207_v23  ;;  %230 = vmatpush1.bf16.msra.mxu1 %v207_v23 }
  0x1d   :  { %209 = vmatprep.subr.bf16.mxu0 %v234_v0  ;;  %222 = vmatprep.subr.bf16.mxu1 %v234_v0 }
  0x20   :  { %211 = vmatpush1.bf16.msra.mxu0 %v210_v26  ;;  %231 = vmatpush1.bf16.msra.mxu1 %v210_v26 }
  0x21   :  { %212 = vmatprep.subr.bf16.mxu0 %v234_v0  ;;  %223 = vmatprep.subr.bf16.mxu1 %v234_v0 }
  0x24   :  { %214 = vmatpush1.bf16.msra.mxu0 %v213_v29  ;;  %232 = vmatpush1.bf16.msra.mxu1 %v213_v29 }
  0x27   :  { %124 = vmatmul.mubr.f32.vlgmr.msra.gmra.mrb[0].mxu0 %v20_v30  ;;  %134 = vmatmul.mubr.f32.vlgmr.msra.gmra.mrb[0].mxu1 %v24_v31 }
  0x28   :  { %183 = vmatprep.mubr.msk.f32.mxu0 %vm46_vm0, %v23_v32  ;;  %185 = vmatprep.mubr.msk.f32.mxu1 %vm46_vm0, %v27_v33 }
  0x2b   :  { %129 = vmatmul.mubr.f32.gmra.mrb[2].mxu0 %v22_v34  ;;  %139 = vmatmul.mubr.f32.gmra.mrb[2].mxu1 %v26_v35 }
  0xfa   :  { %v125_v37 = vpop.f32.mrb[0].mxu0  ;;  %v135_v39 = vpop.f32.mrb[0].mxu1 }
  0xfb   :  { %v151_v40 = vmul.f32 %v186_v36, %v125_v37  ;;  %v153_v41 = vmul.f32 %v186_v36, %v135_v39  ;;  %v127_v42 = vpop.f32.mrb[1].mxu0  ;;  %v137_v43 = vpop.f32.mrb[1].mxu1 }
  0xfd   :  { %v162_v46 = vadd.f32 %v187_v38, %v151_v40  ;;  %v164_v47 = vadd.f32 %v187_v38, %v153_v41 }
  0xfe   :  { %v130_v48 = vpop.f32.mrb[2].mxu0  ;;  %v140_v49 = vpop.f32.mrb[2].mxu1 }
  0xff   :  { %v170_v50 = vadd.f32 %v166_v44, %v162_v46  ;;  %v172_v51 = vadd.f32 %v168_v45, %v164_v47  ;;  %v152_v52 = vmul.f32 %v186_v36, %v130_v48  ;;  %v154_v53 = vmul.f32 %v186_v36, %v140_v49  ;;  %v132_v54 = vpop.f32.mrb[3].mxu0  ;;  %v142_v55 = vpop.f32.mrb[3].mxu1 }
 0x101   :  { %174 = vst.msk [vmem:[%s404_s5] sm:$0xff] %vm46_vm0, %v170_v50  ;;  %176 = vst.msk [vmem:[%s404_s5 + $0x10] sm:$0xff] %vm46_vm0, %v172_v51  ;;  %v163_v58 = vadd.f32 %v187_v38, %v152_v52  ;;  %v165_v59 = vadd.f32 %v187_v38, %v154_v53 }
 0x103   :  { %v171_v60 = vadd.f32 %v167_v56, %v163_v58  ;;  %v173_v61 = vadd.f32 %v169_v57, %v165_v59 }
 0x105   :  { %175 = vst.msk [vmem:[%s404_s5 + $0x8] sm:$0xff] %vm46_vm0, %v171_v60  ;;  %177 = vst.msk [vmem:[%s404_s5 + $0x18] sm:$0xff] %vm46_vm0, %v173_v61 }

// kernel: multiscale_forward.153
= control target key start
LH: loop header
LB: loop body
LE: loop exit
PB: predicated region body
PF: predicated region fallthrough
CT: control target
= control target key end

     0   :  { %vm62_vm0 = vcmask 392192   ;;  %vm190_vm1 = vcmask 130048   ;;  %s359_s3 = inlined_call_operand.vmem [shape: f32[48,16], index: 3, kind: input, shape index: {}]   ;;  %s360_s0 = inlined_call_operand.vmem [shape: f32[32,48], index: 0, kind: input, shape index: {}]   ;;  %s361_s1 = inlined_call_operand.vmem [shape: f32[1,48], index: 1, kind: input, shape index: {}]   ;;  %s362_s2 = inlined_call_operand.vmem [shape: f32[1,48], index: 2, kind: input, shape index: {}]   ;;  %s363_s4 = inlined_call_operand.vmem [shape: f32[1,16], index: 4, kind: input, shape index: {}]   ;;  %s364_s5 = inlined_call_operand.vmem [shape: f32[1,16], index: 5, kind: input, shape index: {}]   ;;  %s365_s6 = inlined_call_operand.vmem [shape: f32[32,16], index: 6, kind: input, shape index: {}]   ;;  %s366_s7 = inlined_call_operand.vmem [shape: f32[32,16], index: 7, kind: output, shape index: {}]  }
   0x1   :  { %v56_v0 = vld [vmem:[%s359_s3] sm:$0xff]  ;;  %v57_v1 = vld [vmem:[%s359_s3 + $0x8] sm:$0xff]  ;;  %v58_v2 = vld [vmem:[%s359_s3 + $0x10] sm:$0xff] }
   0x2   :  { %v235_v3 = vpack.c.bf16 %v57_v1, %v56_v0  ;;  %v59_v4 = vld [vmem:[%s359_s3 + $0x18] sm:$0xff]  ;;  %v60_v5 = vld [vmem:[%s359_s3 + $0x20] sm:$0xff]  ;;  %v61_v6 = vld [vmem:[%s359_s3 + $0x28] sm:$0xff] }
   0x3   :  { %v239_v7 = vpack.c.bf16 %v59_v4, %v58_v2  ;;  %v26_v8 = vld [vmem:[%s360_s0] sm:$0xff]  ;;  %v28_v12 = vld [vmem:[%s360_s0 + $0x10] sm:$0xff]  ;;  %v27_v13 = vld [vmem:[%s360_s0 + $0x8] sm:$0xff]  ;;  %v243_v18 = vpack.c.bf16 %v61_v6, %v60_v5 }
   0x4   :  { %v199_v9 = vld [vmem:[%s361_s1] ss:$0 sm:$0xff]  ;;  %236 = vmatprep.subr.bf16.mxu0 %v235_v3  ;;  %247 = vmatprep.subr.bf16.mxu1 %v235_v3  ;;  %v29_v14 = vld [vmem:[%s360_s0 + $0x18] sm:$0xff]  ;;  %v183_v35 = vld [vmem:[%s365_s6 + $0x8] sm:$0xff] }
   0x5   :  { %v200_v10 = vld [vmem:[%s362_s2] ss:$0 sm:$0xff]  ;;  %v37_v11 = vmul.f32 %v199_v9, %v26_v8  ;;  %238 = vmatpush3.bf16.msra.mxu0 %v235_v3  ;;  %250 = vmatpush3.bf16.msra.mxu1 %v235_v3  ;;  %v39_v15 = vmul.f32 %v199_v9, %v28_v12  ;;  %v38_v16 = vmul.f32 %v199_v9, %v27_v13  ;;  %v185_v36 = vld [vmem:[%s365_s6 + $0x18] sm:$0xff]  ;;  %v184_v42 = vld [vmem:[%s365_s6 + $0x10] sm:$0xff] }
   0x6   :  { %v40_v17 = vmul.f32 %v199_v9, %v29_v14  ;;  %240 = vmatprep.subr.bf16.mxu0 %v239_v7  ;;  %248 = vmatprep.subr.bf16.mxu1 %v239_v7  ;;  %v205_v27 = vld [vmem:[%s363_s4] ss:$0 sm:$0xff] }
   0x7   :  { %v48_v19 = vadd.f32 %v200_v10, %v37_v11  ;;  %v50_v20 = vadd.f32 %v200_v10, %v39_v15  ;;  %v49_v22 = vadd.f32 %v200_v10, %v38_v16  ;;  %v206_v29 = vld [vmem:[%s364_s5] ss:$0 sm:$0xff] }
   0x8   :  { %v51_v23 = vadd.f32 %v200_v10, %v40_v17  ;;  %v182_v41 = vld [vmem:[%s365_s6] sm:$0xff] }
   0x9   :  { %v52_v21 = vmax.f32 %v48_v19, 0.0  ;;  %242 = vmatpush3.bf16.msra.mxu0 %v239_v7  ;;  %251 = vmatpush3.bf16.msra.mxu1 %v239_v7  ;;  %v54_v24 = vmax.f32 %v50_v20, 0.0  ;;  %v53_v25 = vmax.f32 %v49_v22, 0.0 }
   0xa   :  { %244 = vmatprep.subr.bf16.mxu0 %v243_v18  ;;  %249 = vmatprep.subr.bf16.mxu1 %v243_v18  ;;  %v55_v26 = vmax.f32 %v51_v23, 0.0 }
   0xb   :  { %229 = vmatprep.mubr.msk.f32.mxu0 %vm62_vm0, %v52_v21  ;;  %232 = vmatprep.mubr.msk.f32.mxu1 %vm62_vm0, %v54_v24 }
   0xd   :  { %246 = vmatpush3.bf16.msra.mxu0 %v243_v18  ;;  %252 = vmatpush3.bf16.msra.mxu1 %v243_v18 }
  0x10   :  { %230 = vmatmul.mubr.msk.f32.vlgmr.msra.gmra.mrb[0].mxu0 %vm62_vm0, %v53_v25  ;;  %233 = vmatmul.mubr.msk.f32.vlgmr.msra.gmra.mrb[0].mxu1 %vm62_vm0, %v55_v26 }
  0xe3   :  { %v231_v28 = vpop.f32.mrb[0].mxu0  ;;  %v234_v30 = vpop.f32.mrb[0].mxu1 }
  0xe4   :  { %v168_v31 = vmul.f32 %v231_v28, %v205_v27  ;;  %v170_v32 = vmul.f32 %v234_v30, %v205_v27  ;;  %v141_v33 = vpop.f32.mrb[1].mxu0  ;;  %v151_v34 = vpop.f32.mrb[1].mxu1 }
  0xe5   :  { %v167_v37 = vmul.f32 %v205_v27, %v141_v33  ;;  %v169_v38 = vmul.f32 %v205_v27, %v151_v34 }
  0xe6   :  { %v179_v39 = vadd.f32 %v206_v29, %v168_v31  ;;  %v181_v40 = vadd.f32 %v206_v29, %v170_v32 }
  0xe7   :  { %v178_v43 = vadd.f32 %v206_v29, %v167_v37  ;;  %v180_v44 = vadd.f32 %v206_v29, %v169_v38 }
  0xe8   :  { %v187_v45 = vadd.f32 %v183_v35, %v179_v39  ;;  %v189_v46 = vadd.f32 %v185_v36, %v181_v40 }
  0xe9   :  { %v186_v47 = vadd.f32 %v182_v41, %v178_v43  ;;  %v188_v48 = vadd.f32 %v184_v42, %v180_v44 }
  0xea   :  { %192 = vst.msk [vmem:[%s366_s7 + $0x8] sm:$0xff] %vm190_vm1, %v187_v45  ;;  %194 = vst.msk [vmem:[%s366_s7 + $0x18] sm:$0xff] %vm190_vm1, %v189_v46 }
  0xeb   :  { %191 = vst.msk [vmem:[%s366_s7] sm:$0xff] %vm190_vm1, %v186_v47  ;;  %193 = vst.msk [vmem:[%s366_s7 + $0x10] sm:$0xff] %vm190_vm1, %v188_v48 }

// kernel: multiscale_forward.157
= control target key start
LH: loop header
LB: loop body
LE: loop exit
PB: predicated region body
PF: predicated region fallthrough
CT: control target
= control target key end

     0   :  { %vm36_vm0 = vcmask 261120   ;;  %s83_s0 = inlined_call_operand.vmem [shape: f32[16,32], index: 0, kind: input, shape index: {}]   ;;  %s84_s1 = inlined_call_operand.vmem [shape: f32[1,32], index: 1, kind: input, shape index: {}]   ;;  %s85_s2 = inlined_call_operand.vmem [shape: f32[1,32], index: 2, kind: input, shape index: {}]   ;;  %s86_s3 = inlined_call_operand.vmem [shape: f32[16,32], index: 3, kind: output, shape index: {}]  }
   0x1   :  { %v14_v0 = vld [vmem:[%s83_s0] sm:$0xff]  ;;  %v15_v4 = vld [vmem:[%s83_s0 + $0x8] sm:$0xff] }
   0x2   :  { %v43_v1 = vld [vmem:[%s84_s1] ss:$0 sm:$0xff] }
   0x3   :  { %v44_v2 = vld [vmem:[%s85_s2] ss:$0 sm:$0xff]  ;;  %v23_v3 = vmul.f32 %v43_v1, %v14_v0  ;;  %v24_v5 = vmul.f32 %v43_v1, %v15_v4 }
   0x5   :  { %v32_v6 = vadd.f32 %v44_v2, %v23_v3  ;;  %v33_v7 = vadd.f32 %v44_v2, %v24_v5 }
   0x7   :  { %v34_v8 = vmax.f32 %v32_v6, 0.0  ;;  %v35_v9 = vmax.f32 %v33_v7, 0.0 }
   0x9   :  { %37 = vst.msk [vmem:[%s86_s3] sm:$0xff] %vm36_vm0, %v34_v8  ;;  %38 = vst.msk [vmem:[%s86_s3 + $0x8] sm:$0xff] %vm36_vm0, %v35_v9 }

// kernel: multiscale_forward.158
= control target key start
LH: loop header
LB: loop body
LE: loop exit
PB: predicated region body
PF: predicated region fallthrough
CT: control target
= control target key end

     0   :  { %vm128_vm0 = vcmask 130048   ;;  %s313_s1 = inlined_call_operand.vmem [shape: f32[128,16], index: 1, kind: input, shape index: {}]   ;;  %s314_s0 = inlined_call_operand.vmem [shape: f32[16,128], index: 0, kind: input, shape index: {}]   ;;  %s315_s2 = inlined_call_operand.vmem [shape: f32[1,16], index: 2, kind: input, shape index: {}]   ;;  %s316_s3 = inlined_call_operand.vmem [shape: f32[1,16], index: 3, kind: input, shape index: {}]   ;;  %s317_s4 = inlined_call_operand.vmem [shape: f32[16,16], index: 4, kind: output, shape index: {}]  }
   0x1   :  { %v19_v0 = vld [vmem:[%s313_s1] sm:$0xff]  ;;  %v20_v1 = vld [vmem:[%s313_s1 + $0x8] sm:$0xff]  ;;  %v21_v2 = vld [vmem:[%s313_s1 + $0x10] sm:$0xff] }
   0x2   :  { %v190_v3 = vpack.c.bf16 %v20_v1, %v19_v0  ;;  %v22_v4 = vld [vmem:[%s313_s1 + $0x18] sm:$0xff]  ;;  %v23_v6 = vld [vmem:[%s313_s1 + $0x20] sm:$0xff]  ;;  %v24_v7 = vld [vmem:[%s313_s1 + $0x28] sm:$0xff] }
   0x3   :  { %v194_v5 = vpack.c.bf16 %v22_v4, %v21_v2  ;;  %v198_v8 = vpack.c.bf16 %v24_v7, %v23_v6  ;;  %v17_v9 = vld [vmem:[%s314_s0] sm:$0xff]  ;;  %v25_v10 = vld [vmem:[%s313_s1 + $0x30] sm:$0xff]  ;;  %v26_v11 = vld [vmem:[%s313_s1 + $0x38] sm:$0xff] }
   0x4   :  { %191 = vmatprep.subr.bf16.mxu0 %v190_v3  ;;  %187 = vmatprep.mubr.f32.mxu0 %v17_v9  ;;  %v202_v12 = vpack.c.bf16 %v26_v11, %v25_v10  ;;  %v27_v13 = vld [vmem:[%s313_s1 + $0x40] sm:$0xff]  ;;  %v28_v14 = vld [vmem:[%s313_s1 + $0x48] sm:$0xff]  ;;  %v29_v16 = vld [vmem:[%s313_s1 + $0x50] sm:$0xff] }
   0x5   :  { %193 = vmatpush3.bf16.msra.mxu0 %v190_v3  ;;  %v206_v15 = vpack.c.bf16 %v28_v14, %v27_v13  ;;  %v30_v17 = vld [vmem:[%s313_s1 + $0x58] sm:$0xff]  ;;  %v31_v19 = vld [vmem:[%s313_s1 + $0x60] sm:$0xff]  ;;  %v32_v20 = vld [vmem:[%s313_s1 + $0x68] sm:$0xff] }
   0x6   :  { %195 = vmatprep.subr.bf16.mxu0 %v194_v5  ;;  %v210_v18 = vpack.c.bf16 %v30_v17, %v29_v16  ;;  %v214_v21 = vpack.c.bf16 %v32_v20, %v31_v19  ;;  %v33_v22 = vld [vmem:[%s313_s1 + $0x70] sm:$0xff]  ;;  %v34_v23 = vld [vmem:[%s313_s1 + $0x78] sm:$0xff]  ;;  %v18_v25 = vld [vmem:[%s314_s0 + $0x8] sm:$0xff] }
   0x7   :  { %v218_v24 = vpack.c.bf16 %v34_v23, %v33_v22  ;;  %v135_v26 = vld [vmem:[%s315_s2] ss:$0 sm:$0xff] }
   0x8   :  { %v136_v28 = vld [vmem:[%s316_s3] ss:$0 sm:$0xff] }
   0x9   :  { %197 = vmatpush3.bf16.msra.mxu0 %v194_v5 }
   0xa   :  { %199 = vmatprep.subr.bf16.mxu0 %v198_v8 }
   0xd   :  { %201 = vmatpush3.bf16.msra.mxu0 %v198_v8 }
   0xe   :  { %203 = vmatprep.subr.bf16.mxu0 %v202_v12 }
  0x11   :  { %205 = vmatpush3.bf16.msra.mxu0 %v202_v12 }
  0x12   :  { %207 = vmatprep.subr.bf16.mxu0 %v206_v15 }
  0x15   :  { %209 = vmatpush3.bf16.msra.mxu0 %v206_v15 }
  0x16   :  { %211 = vmatprep.subr.bf16.mxu0 %v210_v18 }
  0x19   :  { %213 = vmatpush3.bf16.msra.mxu0 %v210_v18 }
  0x1a   :  { %215 = vmatprep.subr.bf16.mxu0 %v214_v21 }
  0x1d   :  { %217 = vmatpush3.bf16.msra.mxu0 %v214_v21 }
  0x1e   :  { %219 = vmatprep.subr.bf16.mxu0 %v218_v24 }
  0x21   :  { %221 = vmatpush3.bf16.msra.mxu0 %v218_v24 }
  0x24   :  { %188 = vmatmul.mubr.f32.vlgmr.msra.gmra.mrb[0].mxu0 %v18_v25 }
  0xf7   :  { %v189_v27 = vpop.f32.mrb[0].mxu0 }
  0xf8   :  { %v118_v29 = vmul.f32 %v189_v27, %v135_v26  ;;  %v101_v30 = vpop.f32.mrb[1].mxu0 }
  0xf9   :  { %v117_v31 = vmul.f32 %v135_v26, %v101_v30 }
  0xfa   :  { %v127_v32 = vadd.f32 %v136_v28, %v118_v29 }
  0xfb   :  { %v126_v33 = vadd.f32 %v136_v28, %v117_v31 }
  0xfc   :  { %130 = vst.msk [vmem:[%s317_s4 + $0x8] sm:$0xff] %vm128_vm0, %v127_v32 }
  0xfd   :  { %129 = vst.msk [vmem:[%s317_s4] sm:$0xff] %vm128_vm0, %v126_v33 }

// kernel: multiscale_forward.160
= control target key start
LH: loop header
LB: loop body
LE: loop exit
PB: predicated region body
PF: predicated region fallthrough
CT: control target
= control target key end

     0   :  { %vm130_vm0 = vcmask 130048   ;;  %s315_s1 = inlined_call_operand.vmem [shape: f32[128,16], index: 1, kind: input, shape index: {}]   ;;  %s316_s0 = inlined_call_operand.vmem [shape: f32[16,128], index: 0, kind: input, shape index: {}]   ;;  %s317_s2 = inlined_call_operand.vmem [shape: f32[1,16], index: 2, kind: input, shape index: {}]   ;;  %s318_s3 = inlined_call_operand.vmem [shape: f32[1,16], index: 3, kind: input, shape index: {}]   ;;  %s319_s4 = inlined_call_operand.vmem [shape: f32[16,16], index: 4, kind: output, shape index: {}]  }
   0x1   :  { %v19_v0 = vld [vmem:[%s315_s1] sm:$0xff]  ;;  %v20_v1 = vld [vmem:[%s315_s1 + $0x8] sm:$0xff]  ;;  %v21_v2 = vld [vmem:[%s315_s1 + $0x10] sm:$0xff] }
   0x2   :  { %v192_v3 = vpack.c.bf16 %v20_v1, %v19_v0  ;;  %v22_v4 = vld [vmem:[%s315_s1 + $0x18] sm:$0xff]  ;;  %v23_v6 = vld [vmem:[%s315_s1 + $0x20] sm:$0xff]  ;;  %v24_v7 = vld [vmem:[%s315_s1 + $0x28] sm:$0xff] }
   0x3   :  { %v196_v5 = vpack.c.bf16 %v22_v4, %v21_v2  ;;  %v200_v8 = vpack.c.bf16 %v24_v7, %v23_v6  ;;  %v17_v9 = vld [vmem:[%s316_s0] sm:$0xff]  ;;  %v25_v10 = vld [vmem:[%s315_s1 + $0x30] sm:$0xff]  ;;  %v26_v11 = vld [vmem:[%s315_s1 + $0x38] sm:$0xff] }
   0x4   :  { %193 = vmatprep.subr.bf16.mxu0 %v192_v3  ;;  %189 = vmatprep.mubr.f32.mxu0 %v17_v9  ;;  %v204_v12 = vpack.c.bf16 %v26_v11, %v25_v10  ;;  %v27_v13 = vld [vmem:[%s315_s1 + $0x40] sm:$0xff]  ;;  %v28_v14 = vld [vmem:[%s315_s1 + $0x48] sm:$0xff]  ;;  %v29_v16 = vld [vmem:[%s315_s1 + $0x50] sm:$0xff] }
   0x5   :  { %195 = vmatpush3.bf16.msra.mxu0 %v192_v3  ;;  %v208_v15 = vpack.c.bf16 %v28_v14, %v27_v13  ;;  %v30_v17 = vld [vmem:[%s315_s1 + $0x58] sm:$0xff]  ;;  %v31_v19 = vld [vmem:[%s315_s1 + $0x60] sm:$0xff]  ;;  %v32_v20 = vld [vmem:[%s315_s1 + $0x68] sm:$0xff] }
   0x6   :  { %197 = vmatprep.subr.bf16.mxu0 %v196_v5  ;;  %v212_v18 = vpack.c.bf16 %v30_v17, %v29_v16  ;;  %v216_v21 = vpack.c.bf16 %v32_v20, %v31_v19  ;;  %v33_v22 = vld [vmem:[%s315_s1 + $0x70] sm:$0xff]  ;;  %v34_v23 = vld [vmem:[%s315_s1 + $0x78] sm:$0xff]  ;;  %v18_v25 = vld [vmem:[%s316_s0 + $0x8] sm:$0xff] }
   0x7   :  { %v220_v24 = vpack.c.bf16 %v34_v23, %v33_v22  ;;  %v137_v26 = vld [vmem:[%s317_s2] ss:$0 sm:$0xff] }
   0x8   :  { %v138_v28 = vld [vmem:[%s318_s3] ss:$0 sm:$0xff] }
   0x9   :  { %199 = vmatpush3.bf16.msra.mxu0 %v196_v5 }
   0xa   :  { %201 = vmatprep.subr.bf16.mxu0 %v200_v8 }
   0xd   :  { %203 = vmatpush3.bf16.msra.mxu0 %v200_v8 }
   0xe   :  { %205 = vmatprep.subr.bf16.mxu0 %v204_v12 }
  0x11   :  { %207 = vmatpush3.bf16.msra.mxu0 %v204_v12 }
  0x12   :  { %209 = vmatprep.subr.bf16.mxu0 %v208_v15 }
  0x15   :  { %211 = vmatpush3.bf16.msra.mxu0 %v208_v15 }
  0x16   :  { %213 = vmatprep.subr.bf16.mxu0 %v212_v18 }
  0x19   :  { %215 = vmatpush3.bf16.msra.mxu0 %v212_v18 }
  0x1a   :  { %217 = vmatprep.subr.bf16.mxu0 %v216_v21 }
  0x1d   :  { %219 = vmatpush3.bf16.msra.mxu0 %v216_v21 }
  0x1e   :  { %221 = vmatprep.subr.bf16.mxu0 %v220_v24 }
  0x21   :  { %223 = vmatpush3.bf16.msra.mxu0 %v220_v24 }
  0x24   :  { %190 = vmatmul.mubr.f32.vlgmr.msra.gmra.mrb[0].mxu0 %v18_v25 }
  0xf7   :  { %v191_v27 = vpop.f32.mrb[0].mxu0 }
  0xf8   :  { %v118_v29 = vmul.f32 %v191_v27, %v137_v26  ;;  %v101_v30 = vpop.f32.mrb[1].mxu0 }
  0xf9   :  { %v117_v31 = vmul.f32 %v137_v26, %v101_v30 }
  0xfa   :  { %v127_v32 = vadd.f32 %v138_v28, %v118_v29 }
  0xfb   :  { %v126_v33 = vadd.f32 %v138_v28, %v117_v31 }
  0xfc   :  { %v129_v34 = vmax.f32 %v127_v32, 0.0 }
  0xfd   :  { %v128_v35 = vmax.f32 %v126_v33, 0.0 }
  0xfe   :  { %132 = vst.msk [vmem:[%s319_s4 + $0x8] sm:$0xff] %vm130_vm0, %v129_v34 }
  0xff   :  { %131 = vst.msk [vmem:[%s319_s4] sm:$0xff] %vm130_vm0, %v128_v35 }

// kernel: multiscale_forward.156
= control target key start
LH: loop header
LB: loop body
LE: loop exit
PB: predicated region body
PF: predicated region fallthrough
CT: control target
= control target key end

     0   :  { %vm21_vm0 = vcmask 130048   ;;  %s199_s1 = inlined_call_operand.vmem [shape: f32[16,16], index: 1, kind: input, shape index: {}]   ;;  %s200_s0 = inlined_call_operand.vmem [shape: f32[16,16], index: 0, kind: input, shape index: {}]   ;;  %s201_s2 = inlined_call_operand.vmem [shape: f32[1,16], index: 2, kind: input, shape index: {}]   ;;  %s202_s3 = inlined_call_operand.vmem [shape: f32[1,16], index: 3, kind: input, shape index: {}]   ;;  %s203_s4 = inlined_call_operand.vmem [shape: f32[16,16], index: 4, kind: output, shape index: {}]  }
   0x1   :  { %v19_v0 = vld [vmem:[%s199_s1] sm:$0xff]  ;;  %v20_v1 = vld [vmem:[%s199_s1 + $0x8] sm:$0xff] }
   0x2   :  { %v17_v2 = vld [vmem:[%s200_s0] sm:$0xff]  ;;  %v142_v3 = vpack.c.bf16 %v20_v1, %v19_v0  ;;  %v18_v4 = vld [vmem:[%s200_s0 + $0x8] sm:$0xff] }
   0x3   :  { %139 = vmatprep.mubr.msk.f32.mxu0 %vm21_vm0, %v17_v2  ;;  %v129_v5 = vld [vmem:[%s201_s2] ss:$0 sm:$0xff] }
   0x4   :  { %143 = vmatprep.subr.bf16.mxu0 %v142_v3  ;;  %v130_v7 = vld [vmem:[%s202_s3] ss:$0 sm:$0xff] }
   0x5   :  { %145 = vmatpush3.bf16.msra.mxu0 %v142_v3 }
   0x8   :  { %140 = vmatmul.mubr.msk.f32.vlgmr.msra.gmra.mrb[0].mxu0 %vm21_vm0, %v18_v4 }
  0xdb   :  { %v141_v6 = vpop.f32.mrb[0].mxu0 }
  0xdc   :  { %v111_v8 = vmul.f32 %v141_v6, %v129_v5  ;;  %v94_v9 = vpop.f32.mrb[1].mxu0 }
  0xdd   :  { %v110_v10 = vmul.f32 %v129_v5, %v94_v9 }
  0xde   :  { %v120_v11 = vadd.f32 %v130_v7, %v111_v8 }
  0xdf   :  { %v119_v12 = vadd.f32 %v130_v7, %v110_v10 }
  0xe0   :  { %122 = vst.msk [vmem:[%s203_s4 + $0x8] sm:$0xff] %vm21_vm0, %v120_v11 }
  0xe1   :  { %121 = vst.msk [vmem:[%s203_s4] sm:$0xff] %vm21_vm0, %v119_v12 }

// kernel: tile.28
= control target key start
LH: loop header
LB: loop body
LE: loop exit
PB: predicated region body
PF: predicated region fallthrough
CT: control target
= control target key end

     0   :  { %s22_s0 = inlined_call_operand.vmem [shape: f32[16], index: 0, kind: input, shape index: {}]   ;;  %s23_s1 = inlined_call_operand.vmem [shape: f32[2,16], index: 1, kind: output, shape index: {}]  }
   0x1   :  { %v4_v0 = vld [vmem:[%s22_s0] ss:$0 sm:$0xff] }
   0x2   :  { %5 = vst [vmem:[%s23_s1] sm:$0x3] %v4_v0 }

// kernel: multiscale_forward.161
= control target key start
LH: loop header
LB: loop body
LE: loop exit
PB: predicated region body
PF: predicated region fallthrough
CT: control target
= control target key end

     0   :  { %v202_v0 = vmov 0.0|0.0   ;;  %vm42_vm0 = vcmask 130048   ;;  %s339_s1 = inlined_call_operand.vmem [shape: f32[144,16], index: 1, kind: input, shape index: {}]   ;;  %s340_s0 = inlined_call_operand.vmem [shape: f32[16,144], index: 0, kind: input, shape index: {}]   ;;  %s341_s2 = inlined_call_operand.vmem [shape: f32[1,16], index: 2, kind: input, shape index: {}]   ;;  %s342_s3 = inlined_call_operand.vmem [shape: f32[1,16], index: 3, kind: input, shape index: {}]   ;;  %s343_s4 = inlined_call_operand.vmem [shape: f32[16,16], index: 4, kind: input, shape index: {}]   ;;  %s344_s5 = inlined_call_operand.vmem [shape: f32[16,16], index: 5, kind: output, shape index: {}]  }
   0x1   :  { %156 = vmatprep.subr.bf16.mxu0 %v202_v0  ;;  %183 = vmatprep.subr.bf16.mxu1 %v202_v0  ;;  %v24_v1 = vld [vmem:[%s339_s1] sm:$0xff]  ;;  %v25_v2 = vld [vmem:[%s339_s1 + $0x8] sm:$0xff]  ;;  %v26_v3 = vld [vmem:[%s339_s1 + $0x10] sm:$0xff] }
   0x2   :  { %v157_v4 = vpack.c.bf16 %v25_v2, %v24_v1  ;;  %v27_v5 = vld [vmem:[%s339_s1 + $0x18] sm:$0xff]  ;;  %v28_v7 = vld [vmem:[%s339_s1 + $0x20] sm:$0xff]  ;;  %v29_v8 = vld [vmem:[%s339_s1 + $0x28] sm:$0xff] }
   0x3   :  { %v160_v6 = vpack.c.bf16 %v27_v5, %v26_v3  ;;  %v21_v9 = vld [vmem:[%s340_s0 + $0x8] sm:$0xff]  ;;  %v23_v10 = vld [vmem:[%s340_s0 + $0x18] sm:$0xff]  ;;  %v163_v11 = vpack.c.bf16 %v29_v8, %v28_v7  ;;  %v30_v12 = vld [vmem:[%s339_s1 + $0x30] sm:$0xff] }
   0x4   :  { %158 = vmatpush1.bf16.msra.mxu0 %v157_v4  ;;  %192 = vmatpush1.bf16.msra.mxu1 %v157_v4  ;;  %v31_v13 = vld [vmem:[%s339_s1 + $0x38] sm:$0xff]  ;;  %v32_v15 = vld [vmem:[%s339_s1 + $0x40] sm:$0xff]  ;;  %v33_v16 = vld [vmem:[%s339_s1 + $0x48] sm:$0xff] }
   0x5   :  { %159 = vmatprep.subr.bf16.mxu0 %v202_v0  ;;  %184 = vmatprep.subr.bf16.mxu1 %v202_v0  ;;  %v166_v14 = vpack.c.bf16 %v31_v13, %v30_v12  ;;  %v169_v17 = vpack.c.bf16 %v33_v16, %v32_v15  ;;  %v34_v18 = vld [vmem:[%s339_s1 + $0x50] sm:$0xff]  ;;  %v35_v19 = vld [vmem:[%s339_s1 + $0x58] sm:$0xff]  ;;  %v36_v21 = vld [vmem:[%s339_s1 + $0x60] sm:$0xff] }
   0x6   :  { %152 = vmatprep.mubr.msk.f32.mxu0 %vm42_vm0, %v21_v9  ;;  %153 = vmatprep.mubr.msk.f32.mxu1 %vm42_vm0, %v23_v10  ;;  %v172_v20 = vpack.c.bf16 %v35_v19, %v34_v18  ;;  %v37_v22 = vld [vmem:[%s339_s1 + $0x68] sm:$0xff]  ;;  %v38_v24 = vld [vmem:[%s339_s1 + $0x70] sm:$0xff]  ;;  %v39_v25 = vld [vmem:[%s339_s1 + $0x78] sm:$0xff] }
   0x7   :  { %v175_v23 = vpack.c.bf16 %v37_v22, %v36_v21  ;;  %v178_v26 = vpack.c.bf16 %v39_v25, %v38_v24  ;;  %v40_v27 = vld [vmem:[%s339_s1 + $0x80] sm:$0xff]  ;;  %v41_v28 = vld [vmem:[%s339_s1 + $0x88] sm:$0xff]  ;;  %v22_v31 = vld [vmem:[%s340_s0 + $0x10] sm:$0xff] }
   0x8   :  { %161 = vmatpush1.bf16.msra.mxu0 %v160_v6  ;;  %193 = vmatpush1.bf16.msra.mxu1 %v160_v6  ;;  %v181_v29 = vpack.c.bf16 %v41_v28, %v40_v27  ;;  %v20_v30 = vld [vmem:[%s340_s0] sm:$0xff]  ;;  %v143_v41 = vld [vmem:[%s343_s4 + $0x8] sm:$0xff] }
   0x9   :  { %162 = vmatprep.subr.bf16.mxu0 %v202_v0  ;;  %185 = vmatprep.subr.bf16.mxu1 %v202_v0  ;;  %v154_v32 = vld [vmem:[%s341_s2] ss:$0 sm:$0xff] }
   0xa   :  { %v155_v34 = vld [vmem:[%s342_s3] ss:$0 sm:$0xff] }
   0xb   :  { %v142_v40 = vld [vmem:[%s343_s4] sm:$0xff] }
   0xc   :  { %164 = vmatpush1.bf16.msra.mxu0 %v163_v11  ;;  %194 = vmatpush1.bf16.msra.mxu1 %v163_v11 }
   0xd   :  { %165 = vmatprep.subr.bf16.mxu0 %v202_v0  ;;  %186 = vmatprep.subr.bf16.mxu1 %v202_v0 }
  0x10   :  { %167 = vmatpush1.bf16.msra.mxu0 %v166_v14  ;;  %195 = vmatpush1.bf16.msra.mxu1 %v166_v14 }
  0x11   :  { %168 = vmatprep.subr.bf16.mxu0 %v202_v0  ;;  %187 = vmatprep.subr.bf16.mxu1 %v202_v0 }
  0x14   :  { %170 = vmatpush1.bf16.msra.mxu0 %v169_v17  ;;  %196 = vmatpush1.bf16.msra.mxu1 %v169_v17 }
  0x15   :  { %171 = vmatprep.subr.bf16.mxu0 %v202_v0  ;;  %188 = vmatprep.subr.bf16.mxu1 %v202_v0 }
  0x18   :  { %173 = vmatpush1.bf16.msra.mxu0 %v172_v20  ;;  %197 = vmatpush1.bf16.msra.mxu1 %v172_v20 }
  0x19   :  { %174 = vmatprep.subr.bf16.mxu0 %v202_v0  ;;  %189 = vmatprep.subr.bf16.mxu1 %v202_v0 }
  0x1c   :  { %176 = vmatpush1.bf16.msra.mxu0 %v175_v23  ;;  %198 = vmatpush1.bf16.msra.mxu1 %v175_v23 }
  0x1d   :  { %177 = vmatprep.subr.bf16.mxu0 %v202_v0  ;;  %190 = vmatprep.subr.bf16.mxu1 %v202_v0 }
  0x20   :  { %179 = vmatpush1.bf16.msra.mxu0 %v178_v26  ;;  %199 = vmatpush1.bf16.msra.mxu1 %v178_v26 }
  0x21   :  { %180 = vmatprep.subr.bf16.mxu0 %v202_v0  ;;  %191 = vmatprep.subr.bf16.mxu1 %v202_v0 }
  0x24   :  { %182 = vmatpush1.bf16.msra.mxu0 %v181_v29  ;;  %200 = vmatpush1.bf16.msra.mxu1 %v181_v29 }
  0x27   :  { %114 = vmatmul.mubr.f32.vlgmr.msra.gmra.mrb[0].mxu0 %v20_v30  ;;  %119 = vmatmul.mubr.f32.vlgmr.msra.gmra.mrb[0].mxu1 %v22_v31 }
  0xfa   :  { %v115_v33 = vpop.f32.mrb[0].mxu0  ;;  %v120_v35 = vpop.f32.mrb[0].mxu1 }
  0xfb   :  { %v131_v36 = vmul.f32 %v154_v32, %v115_v33  ;;  %v132_v37 = vmul.f32 %v154_v32, %v120_v35  ;;  %v117_v38 = vpop.f32.mrb[1].mxu0  ;;  %v122_v39 = vpop.f32.mrb[1].mxu1 }
  0xfd   :  { %v140_v42 = vadd.f32 %v155_v34, %v131_v36  ;;  %v141_v43 = vadd.f32 %v155_v34, %v132_v37 }
  0xff   :  { %v144_v44 = vadd.f32 %v142_v40, %v140_v42  ;;  %v145_v45 = vadd.f32 %v143_v41, %v141_v43 }
 0x101   :  { %146 = vst.msk [vmem:[%s344_s5] sm:$0xff] %vm42_vm0, %v144_v44  ;;  %147 = vst.msk [vmem:[%s344_s5 + $0x8] sm:$0xff] %vm42_vm0, %v145_v45 }

// kernel: tile.29
= control target key start
LH: loop header
LB: loop body
LE: loop exit
PB: predicated region body
PF: predicated region fallthrough
CT: control target
= control target key end

     0   :  { %vm7_vm0 = vcmask 130048   ;;  %vm13_vm1 = vcmask 261248   ;;  %s39_s0 = inlined_call_operand.vmem [shape: f32[2,16], index: 0, kind: input, shape index: {}]   ;;  %s40_s1 = inlined_call_operand.vmem [shape: f32[1,32], index: 1, kind: output, shape index: {}]  }
   0x1   :  { %v4_v0 = vld [vmem:[%s39_s0] sm:$0x3]  ;;  %s22_s0 = smov 16  }
   0x2   :  { %5 = vst [vmem:[#allocation1] sm:$0x3] %v4_v0 }
   0x9   :  { %v10_v1 = vld [vmem:[#allocation1 + $0x1] sm:$0x1]   ;;  %v6_v2 = vld [vmem:[#allocation1] sm:$0x1]  }
   0xa   :  { %11 = vrot.lane.b32.xlu0 %v10_v1, %s22_s0  ;;  %8 = vst.msk [vmem:[#allocation0] sm:$0x1] %vm7_vm0, %v6_v2  }
  0x7c   :  { %v12_v3 = vpop.permute.xlu0 %11  }
  0x7d   :  { %14 = vst.msk [vmem:[#allocation0] sm:$0x1] %vm13_vm1, %v12_v3  }
  0x84   :  { %v18_v4 = vld [vmem:[#allocation0] sm:$0x1] }
  0x85   :  { %20 = vst [vmem:[%s40_s1] sm:$0x1] %v18_v4 }

// kernel: multiscale_forward.168
= control target key start
LH: loop header
LB: loop body
LE: loop exit
PB: predicated region body
PF: predicated region fallthrough
CT: control target
= control target key end

     0   :  { %vm54_vm0 = vcmask 392192   ;;  %vm158_vm1 = vcmask 130048   ;;  %s294_s3 = inlined_call_operand.vmem [shape: f32[48,16], index: 3, kind: input, shape index: {}]   ;;  %s295_s0 = inlined_call_operand.vmem [shape: f32[16,48], index: 0, kind: input, shape index: {}]   ;;  %s296_s1 = inlined_call_operand.vmem [shape: f32[1,48], index: 1, kind: input, shape index: {}]   ;;  %s297_s2 = inlined_call_operand.vmem [shape: f32[1,48], index: 2, kind: input, shape index: {}]   ;;  %s298_s4 = inlined_call_operand.vmem [shape: f32[1,16], index: 4, kind: input, shape index: {}]   ;;  %s299_s5 = inlined_call_operand.vmem [shape: f32[1,16], index: 5, kind: input, shape index: {}]   ;;  %s300_s6 = inlined_call_operand.vmem [shape: f32[16,16], index: 6, kind: input, shape index: {}]   ;;  %s301_s7 = inlined_call_operand.vmem [shape: f32[16,16], index: 7, kind: output, shape index: {}]  }
   0x1   :  { %v48_v0 = vld [vmem:[%s294_s3] sm:$0xff]  ;;  %v49_v1 = vld [vmem:[%s294_s3 + $0x8] sm:$0xff]  ;;  %v50_v2 = vld [vmem:[%s294_s3 + $0x10] sm:$0xff] }
   0x2   :  { %v194_v3 = vpack.c.bf16 %v49_v1, %v48_v0  ;;  %v51_v4 = vld [vmem:[%s294_s3 + $0x18] sm:$0xff]  ;;  %v52_v5 = vld [vmem:[%s294_s3 + $0x20] sm:$0xff]  ;;  %v53_v6 = vld [vmem:[%s294_s3 + $0x28] sm:$0xff] }
   0x3   :  { %v198_v7 = vpack.c.bf16 %v51_v4, %v50_v2  ;;  %v26_v8 = vld [vmem:[%s295_s0] sm:$0xff]  ;;  %v27_v9 = vld [vmem:[%s295_s0 + $0x8] sm:$0xff]  ;;  %v202_v14 = vpack.c.bf16 %v53_v6, %v52_v5 }
   0x4   :  { %v165_v10 = vld [vmem:[%s296_s1] ss:$0 sm:$0xff]  ;;  %195 = vmatprep.subr.bf16.mxu0 %v194_v3  ;;  %v155_v24 = vld [vmem:[%s300_s6 + $0x8] sm:$0xff] }
   0x5   :  { %v35_v11 = vmul.f32 %v165_v10, %v26_v8  ;;  %v36_v12 = vmul.f32 %v165_v10, %v27_v9  ;;  %v166_v13 = vld [vmem:[%s297_s2] ss:$0 sm:$0xff]  ;;  %197 = vmatpush3.bf16.msra.mxu0 %v194_v3 }
   0x6   :  { %199 = vmatprep.subr.bf16.mxu0 %v198_v7  ;;  %v169_v19 = vld [vmem:[%s298_s4] ss:$0 sm:$0xff] }
   0x7   :  { %v44_v15 = vadd.f32 %v166_v13, %v35_v11  ;;  %v45_v16 = vadd.f32 %v166_v13, %v36_v12  ;;  %v170_v21 = vld [vmem:[%s299_s5] ss:$0 sm:$0xff] }
   0x8   :  { %v154_v27 = vld [vmem:[%s300_s6] sm:$0xff] }
   0x9   :  { %v46_v17 = vmax.f32 %v44_v15, 0.0  ;;  %201 = vmatpush3.bf16.msra.mxu0 %v198_v7  ;;  %v47_v18 = vmax.f32 %v45_v16, 0.0 }
   0xa   :  { %203 = vmatprep.subr.bf16.mxu0 %v202_v14 }
   0xb   :  { %191 = vmatprep.mubr.msk.f32.mxu0 %vm54_vm0, %v46_v17 }
   0xd   :  { %205 = vmatpush3.bf16.msra.mxu0 %v202_v14 }
  0x10   :  { %192 = vmatmul.mubr.msk.f32.vlgmr.msra.gmra.mrb[0].mxu0 %vm54_vm0, %v47_v18 }
  0xe3   :  { %v193_v20 = vpop.f32.mrb[0].mxu0 }
  0xe4   :  { %v144_v22 = vmul.f32 %v193_v20, %v169_v19  ;;  %v127_v23 = vpop.f32.mrb[1].mxu0 }
  0xe5   :  { %v143_v25 = vmul.f32 %v169_v19, %v127_v23 }
  0xe6   :  { %v153_v26 = vadd.f32 %v170_v21, %v144_v22 }
  0xe7   :  { %v152_v28 = vadd.f32 %v170_v21, %v143_v25 }
  0xe8   :  { %v157_v29 = vadd.f32 %v155_v24, %v153_v26 }
  0xe9   :  { %v156_v30 = vadd.f32 %v154_v27, %v152_v28 }
  0xea   :  { %160 = vst.msk [vmem:[%s301_s7 + $0x8] sm:$0xff] %vm158_vm1, %v157_v29 }
  0xeb   :  { %159 = vst.msk [vmem:[%s301_s7] sm:$0xff] %vm158_vm1, %v156_v30 }

// kernel: multiscale_forward.169
= control target key start
LH: loop header
LB: loop body
LE: loop exit
PB: predicated region body
PF: predicated region fallthrough
CT: control target
= control target key end

     0   :  { %vm21_vm0 = vcmask 130048   ;;  %s219_s1 = inlined_call_operand.vmem [shape: f32[16,16], index: 1, kind: input, shape index: {}]   ;;  %s220_s0 = inlined_call_operand.vmem [shape: f32[16,16], index: 0, kind: input, shape index: {}]   ;;  %s221_s2 = inlined_call_operand.vmem [shape: f32[1,16], index: 2, kind: input, shape index: {}]   ;;  %s222_s3 = inlined_call_operand.vmem [shape: f32[1,16], index: 3, kind: input, shape index: {}]   ;;  %s223_s4 = inlined_call_operand.vmem [shape: f32[16,16], index: 4, kind: output, shape index: {}]  }
   0x1   :  { %v19_v0 = vld [vmem:[%s219_s1] sm:$0xff]  ;;  %v20_v1 = vld [vmem:[%s219_s1 + $0x8] sm:$0xff] }
   0x2   :  { %v17_v2 = vld [vmem:[%s220_s0] sm:$0xff]  ;;  %v158_v3 = vpack.c.bf16 %v20_v1, %v19_v0  ;;  %v18_v4 = vld [vmem:[%s220_s0 + $0x8] sm:$0xff] }
   0x3   :  { %155 = vmatprep.mubr.msk.f32.mxu0 %vm21_vm0, %v17_v2  ;;  %v143_v5 = vld [vmem:[%s221_s2] ss:$0 sm:$0xff] }
   0x4   :  { %159 = vmatprep.subr.bf16.mxu0 %v158_v3  ;;  %v144_v7 = vld [vmem:[%s222_s3] ss:$0 sm:$0xff] }
   0x5   :  { %161 = vmatpush3.bf16.msra.mxu0 %v158_v3 }
   0x8   :  { %156 = vmatmul.mubr.msk.f32.vlgmr.msra.gmra.mrb[0].mxu0 %vm21_vm0, %v18_v4 }
  0xdb   :  { %v157_v6 = vpop.f32.mrb[0].mxu0 }
  0xdc   :  { %v111_v8 = vmul.f32 %v157_v6, %v143_v5  ;;  %v94_v9 = vpop.f32.mrb[1].mxu0 }
  0xdd   :  { %v110_v10 = vmul.f32 %v143_v5, %v94_v9 }
  0xde   :  { %v120_v11 = vadd.f32 %v144_v7, %v111_v8 }
  0xdf   :  { %v119_v12 = vadd.f32 %v144_v7, %v110_v10 }
  0xe0   :  { %v125_v13 = vmul.f32 1.442695, %v120_v11  ;;  %vm122_vm1 = vcmp.gt.f32.partialorder %v120_v11, 0.0 }
  0xe1   :  { %v123_v14 = vmul.f32 1.442695, %v119_v12  ;;  %vm121_vm2 = vcmp.gt.f32.partialorder %v119_v12, 0.0 }
  0xe2   :  { %162 = vpow2.f32 %v125_v13 }
  0xe3   :  { %164 = vpow2.f32 %v123_v14 }
  0xec   :  { %v163_v15 = vpop.eup %162 }
  0xed   :  { %v165_v16 = vpop.eup %164  ;;  %v146_v17 = vadd.f32 -1.0, %v163_v15 }
  0xee   :  { %v145_v18 = vadd.f32 -1.0, %v165_v16 }
  0xef   :  { %v130_v19 = vmul.f32 1.6732632, %v146_v17 }
  0xf0   :  { %v129_v20 = vmul.f32 1.6732632, %v145_v18 }
  0xf1   :  { %v132_v21 = vsel %vm122_vm1, %v120_v11, %v130_v19 }
  0xf2   :  { %v134_v22 = vmul.f32 1.050701, %v132_v21  ;;  %v131_v23 = vsel %vm121_vm2, %v119_v12, %v129_v20 }
  0xf3   :  { %v133_v24 = vmul.f32 1.050701, %v131_v23 }
  0xf4   :  { %136 = vst.msk [vmem:[%s223_s4 + $0x8] sm:$0xff] %vm21_vm0, %v134_v22 }
  0xf5   :  { %135 = vst.msk [vmem:[%s223_s4] sm:$0xff] %vm21_vm0, %v133_v24 }

// kernel: multiscale_forward.170
= control target key start
LH: loop header
LB: loop body
LE: loop exit
PB: predicated region body
PF: predicated region fallthrough
CT: control target
= control target key end

     0   :  { %vm21_vm0 = vcmask 130048   ;;  %vm121_vm1 = vcmask 261120   ;;  %s196_s1 = inlined_call_operand.vmem [shape: f32[16,32], index: 1, kind: input, shape index: {}]   ;;  %s197_s0 = inlined_call_operand.vmem [shape: f32[16,16], index: 0, kind: input, shape index: {}]   ;;  %s198_s2 = inlined_call_operand.vmem [shape: f32[1,32], index: 2, kind: input, shape index: {}]   ;;  %s199_s3 = inlined_call_operand.vmem [shape: f32[1,32], index: 3, kind: input, shape index: {}]   ;;  %s200_s4 = inlined_call_operand.vmem [shape: f32[16,32], index: 4, kind: output, shape index: {}]  }
   0x1   :  { %v19_v0 = vld [vmem:[%s196_s1] sm:$0xff]  ;;  %v20_v1 = vld [vmem:[%s196_s1 + $0x8] sm:$0xff] }
   0x2   :  { %v17_v2 = vld [vmem:[%s197_s0] sm:$0xff]  ;;  %v143_v3 = vpack.c.bf16 %v20_v1, %v19_v0  ;;  %v18_v4 = vld [vmem:[%s197_s0 + $0x8] sm:$0xff] }
   0x3   :  { %140 = vmatprep.mubr.msk.f32.mxu0 %vm21_vm0, %v17_v2  ;;  %v130_v5 = vld [vmem:[%s198_s2] ss:$0 sm:$0xff] }
   0x4   :  { %144 = vmatprep.subr.bf16.mxu0 %v143_v3  ;;  %v131_v7 = vld [vmem:[%s199_s3] ss:$0 sm:$0xff] }
   0x5   :  { %146 = vmatpush3.bf16.msra.mxu0 %v143_v3 }
   0x8   :  { %141 = vmatmul.mubr.msk.f32.vlgmr.msra.gmra.mrb[0].mxu0 %vm21_vm0, %v18_v4 }
  0xdb   :  { %v142_v6 = vpop.f32.mrb[0].mxu0 }
  0xdc   :  { %v111_v8 = vmul.f32 %v142_v6, %v130_v5  ;;  %v94_v9 = vpop.f32.mrb[1].mxu0 }
  0xdd   :  { %v110_v10 = vmul.f32 %v130_v5, %v94_v9 }
  0xde   :  { %v120_v11 = vadd.f32 %v131_v7, %v111_v8 }
  0xdf   :  { %v119_v12 = vadd.f32 %v131_v7, %v110_v10 }
  0xe0   :  { %123 = vst.msk [vmem:[%s200_s4 + $0x8] sm:$0xff] %vm121_vm1, %v120_v11 }
  0xe1   :  { %122 = vst.msk [vmem:[%s200_s4] sm:$0xff] %vm121_vm1, %v119_v12 }

// kernel: multiscale_forward.171
= control target key start
LH: loop header
LB: loop body
LE: loop exit
PB: predicated region body
PF: predicated region fallthrough
CT: control target
= control target key end

     0   :  { %vm56_vm0 = vcmask 130048   ;;  %s472_s3 = inlined_call_operand.vmem [shape: f32[16,16], index: 3, kind: input, shape index: {}]   ;;  %s473_s2 = inlined_call_operand.vmem [shape: f32[16,16], index: 2, kind: input, shape index: {}]   ;;  %s474_s1 = inlined_call_operand.vmem [shape: f32[32,16], index: 1, kind: input, shape index: {}]   ;;  %s475_s0 = inlined_call_operand.vmem [shape: f32[32,16], index: 0, kind: input, shape index: {}]   ;;  %s476_s4 = inlined_call_operand.vmem [shape: f32[1,16], index: 4, kind: input, shape index: {}]   ;;  %s477_s5 = inlined_call_operand.vmem [shape: f32[32,16], index: 5, kind: output, shape index: {}]  }
   0x1   :  { %v54_v0 = vld [vmem:[%s472_s3] sm:$0xff]  ;;  %v55_v1 = vld [vmem:[%s472_s3 + $0x8] sm:$0xff]  ;;  %v22_v10 = vld [vmem:[%s474_s1 + $0x10] sm:$0xff] }
   0x2   :  { %v52_v2 = vld [vmem:[%s473_s2] sm:$0xff]  ;;  %v343_v3 = vpack.c.bf16 %v55_v1, %v54_v0  ;;  %v53_v4 = vld [vmem:[%s473_s2 + $0x8] sm:$0xff]  ;;  %v26_v11 = vsub.f32 0.0, %v22_v10  ;;  %v23_v12 = vld [vmem:[%s474_s1 + $0x18] sm:$0xff] }
   0x3   :  { %v20_v5 = vld [vmem:[%s474_s1] sm:$0xff]  ;;  %v21_v6 = vld [vmem:[%s474_s1 + $0x8] sm:$0xff]  ;;  %v347_v7 = vpack.c.bf16 %v53_v4, %v52_v2  ;;  %v27_v15 = vsub.f32 0.0, %v23_v12  ;;  %v46_v29 = vld [vmem:[%s475_s0 + $0x10] sm:$0xff] }
   0x4   :  { %v24_v8 = vsub.f32 0.0, %v20_v5  ;;  %327 = vmatprep.mubr.msk.f32.mxu1 %vm56_vm0, %v20_v5  ;;  %v25_v9 = vsub.f32 0.0, %v21_v6  ;;  %344 = vmatprep.subr.bf16.mxu1 %v343_v3  ;;  %v32_v16 = vmul.f32 1.442695, %v26_v11  ;;  %v44_v26 = vld [vmem:[%s475_s0] sm:$0xff]  ;;  %v45_v27 = vld [vmem:[%s475_s0 + $0x8] sm:$0xff] }
   0x5   :  { %346 = vmatpush3.bf16.msra.mxu1 %v343_v3  ;;  %348 = vmatprep.subr.bf16.mxu0 %v347_v7  ;;  %v34_v17 = vmul.f32 1.442695, %v27_v15  ;;  %v47_v32 = vld [vmem:[%s475_s0 + $0x18] sm:$0xff]  ;;  %v306_v43 = vld [vmem:[%s476_s4] ss:$0 sm:$0xff] }
   0x6   :  { %v28_v13 = vmul.f32 1.442695, %v24_v8  ;;  %v30_v14 = vmul.f32 1.442695, %v25_v9  ;;  %350 = vmatpush3.bf16.msra.mxu0 %v347_v7 }
   0x8   :  { %355 = vpow2.f32 %v28_v13  ;;  %328 = vmatmul.mubr.msk.f32.vlgmr.msra.gmra.mrb[0].mxu1 %vm56_vm0, %v21_v6 }
   0x9   :  { %357 = vpow2.f32 %v30_v14  ;;  %330 = vmatprep.mubr.msk.f32.mxu1 %vm56_vm0, %v22_v10 }
   0xa   :  { %359 = vpow2.f32 %v32_v16 }
   0xb   :  { %361 = vpow2.f32 %v34_v17 }
   0xc   :  { %331 = vmatmul.mubr.msk.f32.gmra.mrb[2].mxu1 %vm56_vm0, %v23_v12 }
  0x12   :  { %v356_v18 = vpop.eup %355 }
  0x13   :  { %v358_v19 = vpop.eup %357  ;;  %v36_v20 = vadd.f32 1.0, %v356_v18 }
  0x14   :  { %v360_v21 = vpop.eup %359  ;;  %v37_v22 = vadd.f32 1.0, %v358_v19 }
  0x15   :  { %v362_v23 = vpop.eup %361  ;;  %363 = vrcp.f32 %v36_v20  ;;  %v38_v24 = vadd.f32 1.0, %v360_v21 }
  0x16   :  { %365 = vrcp.f32 %v37_v22  ;;  %v39_v25 = vadd.f32 1.0, %v362_v23 }
  0x17   :  { %367 = vrcp.f32 %v38_v24 }
  0x18   :  { %369 = vrcp.f32 %v39_v25 }
  0x1f   :  { %v364_v28 = vpop.eup %363 }
  0x20   :  { %v366_v30 = vpop.eup %365  ;;  %v48_v31 = vmul.f32 %v364_v28, %v44_v26 }
  0x21   :  { %v368_v33 = vpop.eup %367  ;;  %v49_v34 = vmul.f32 %v366_v30, %v45_v27 }
  0x22   :  { %v370_v35 = vpop.eup %369  ;;  %337 = vmatprep.mubr.msk.f32.mxu0 %vm56_vm0, %v48_v31  ;;  %v50_v36 = vmul.f32 %v368_v33, %v46_v29 }
  0x23   :  { %338 = vmatmul.mubr.msk.f32.vlgmr.msra.gmra.mrb[0].mxu0 %vm56_vm0, %v49_v34  ;;  %v51_v37 = vmul.f32 %v370_v35, %v47_v32 }
  0x24   :  { %340 = vmatprep.mubr.msk.f32.mxu0 %vm56_vm0, %v50_v36 }
  0x27   :  { %341 = vmatmul.mubr.msk.f32.gmra.mrb[2].mxu0 %vm56_vm0, %v51_v37 }
  0xdb   :  { %v329_v38 = vpop.f32.mrb[0].mxu1 }
  0xdc   :  { %v135_v39 = vpop.f32.mrb[1].mxu1 }
  0xdf   :  { %v332_v40 = vpop.f32.mrb[2].mxu1 }
  0xe0   :  { %v145_v41 = vpop.f32.mrb[3].mxu1 }
  0xf6   :  { %v339_v42 = vpop.f32.mrb[0].mxu0 }
  0xf7   :  { %v238_v44 = vadd.f32 %v339_v42, %v329_v38  ;;  %v232_v45 = vpop.f32.mrb[1].mxu0 }
  0xf8   :  { %v233_v46 = vadd.f32 %v232_v45, %v135_v39 }
  0xf9   :  { %v259_v47 = vadd.f32 %v306_v43, %v238_v44 }
  0xfa   :  { %v258_v48 = vadd.f32 %v306_v43, %v233_v46  ;;  %v342_v49 = vpop.f32.mrb[2].mxu0 }
  0xfb   :  { %v268_v50 = vmul.f32 1.442695, %v259_v47  ;;  %v248_v51 = vadd.f32 %v342_v49, %v332_v40  ;;  %v242_v52 = vpop.f32.mrb[3].mxu0  ;;  %vm263_vm1 = vcmp.gt.f32.partialorder %v259_v47, 0.0 }
  0xfc   :  { %v266_v53 = vmul.f32 1.442695, %v258_v48  ;;  %v243_v54 = vadd.f32 %v242_v52, %v145_v41  ;;  %vm262_vm2 = vcmp.gt.f32.partialorder %v258_v48, 0.0 }
  0xfd   :  { %371 = vpow2.f32 %v268_v50  ;;  %v261_v55 = vadd.f32 %v306_v43, %v248_v51 }
  0xfe   :  { %373 = vpow2.f32 %v266_v53  ;;  %v260_v56 = vadd.f32 %v306_v43, %v243_v54 }
  0xff   :  { %v272_v57 = vmul.f32 1.442695, %v261_v55  ;;  %vm265_vm3 = vcmp.gt.f32.partialorder %v261_v55, 0.0 }
 0x100   :  { %v270_v58 = vmul.f32 1.442695, %v260_v56  ;;  %vm264_vm4 = vcmp.gt.f32.partialorder %v260_v56, 0.0 }
 0x101   :  { %375 = vpow2.f32 %v272_v57 }
 0x102   :  { %377 = vpow2.f32 %v270_v58 }
 0x107   :  { %v372_v59 = vpop.eup %371 }
 0x108   :  { %v374_v60 = vpop.eup %373  ;;  %v308_v61 = vadd.f32 -1.0, %v372_v59 }
 0x109   :  { %v307_v62 = vadd.f32 -1.0, %v374_v60 }
 0x10a   :  { %v279_v63 = vmul.f32 1.6732632, %v308_v61 }
 0x10b   :  { %v376_v0 = vpop.eup %375  ;;  %v278_v1 = vmul.f32 1.6732632, %v307_v62 }
 0x10c   :  { %v378_v2 = vpop.eup %377  ;;  %v283_v3 = vsel %vm263_vm1, %v259_v47, %v279_v63  ;;  %v310_v4 = vadd.f32 -1.0, %v376_v0 }
 0x10d   :  { %v287_v5 = vmul.f32 1.050701, %v283_v3  ;;  %v282_v6 = vsel %vm262_vm2, %v258_v48, %v278_v1  ;;  %v309_v7 = vadd.f32 -1.0, %v378_v2 }
 0x10e   :  { %v286_v8 = vmul.f32 1.050701, %v282_v6  ;;  %v281_v9 = vmul.f32 1.6732632, %v310_v4 }
 0x10f   :  { %291 = vst.msk [vmem:[%s477_s5 + $0x8] sm:$0xff] %vm56_vm0, %v287_v5  ;;  %v280_v10 = vmul.f32 1.6732632, %v309_v7 }
 0x110   :  { %290 = vst.msk [vmem:[%s477_s5] sm:$0xff] %vm56_vm0, %v286_v8  ;;  %v285_v11 = vsel %vm265_vm3, %v261_v55, %v281_v9 }
 0x111   :  { %v289_v12 = vmul.f32 1.050701, %v285_v11  ;;  %v284_v13 = vsel %vm264_vm4, %v260_v56, %v280_v10 }
 0x112   :  { %v288_v14 = vmul.f32 1.050701, %v284_v13 }
 0x113   :  { %293 = vst.msk [vmem:[%s477_s5 + $0x18] sm:$0xff] %vm56_vm0, %v289_v12 }
 0x114   :  { %292 = vst.msk [vmem:[%s477_s5 + $0x10] sm:$0xff] %vm56_vm0, %v288_v14 }

// kernel: multiscale_forward.173
= control target key start
LH: loop header
LB: loop body
LE: loop exit
PB: predicated region body
PF: predicated region fallthrough
CT: control target
= control target key end

     0   :  { %vm23_vm0 = vcmask 130048   ;;  %vm143_vm1 = vcmask 261120   ;;  %s241_s1 = inlined_call_operand.vmem [shape: f32[16,32], index: 1, kind: input, shape index: {}]   ;;  %s242_s0 = inlined_call_operand.vmem [shape: f32[32,16], index: 0, kind: input, shape index: {}]   ;;  %s243_s2 = inlined_call_operand.vmem [shape: f32[1,32], index: 2, kind: input, shape index: {}]   ;;  %s244_s3 = inlined_call_operand.vmem [shape: f32[1,32], index: 3, kind: input, shape index: {}]   ;;  %s245_s4 = inlined_call_operand.vmem [shape: f32[32,32], index: 4, kind: output, shape index: {}]  }
   0x1   :  { %v21_v0 = vld [vmem:[%s241_s1] sm:$0xff]  ;;  %v22_v1 = vld [vmem:[%s241_s1 + $0x8] sm:$0xff]  ;;  %v19_v4 = vld [vmem:[%s242_s0 + $0x10] sm:$0xff] }
   0x2   :  { %v17_v2 = vld [vmem:[%s242_s0] sm:$0xff]  ;;  %v174_v3 = vpack.c.bf16 %v22_v1, %v21_v0  ;;  %171 = vmatprep.mubr.msk.f32.mxu1 %vm23_vm0, %v19_v4  ;;  %v18_v5 = vld [vmem:[%s242_s0 + $0x8] sm:$0xff]  ;;  %v20_v6 = vld [vmem:[%s242_s0 + $0x18] sm:$0xff] }
   0x3   :  { %168 = vmatprep.mubr.msk.f32.mxu0 %vm23_vm0, %v17_v2  ;;  %v156_v7 = vld [vmem:[%s243_s2] ss:$0 sm:$0xff] }
   0x4   :  { %175 = vmatprep.subr.bf16.mxu0 %v174_v3  ;;  %178 = vmatprep.subr.bf16.mxu1 %v174_v3  ;;  %v157_v9 = vld [vmem:[%s244_s3] ss:$0 sm:$0xff] }
   0x5   :  { %177 = vmatpush3.bf16.msra.mxu0 %v174_v3  ;;  %179 = vmatpush3.bf16.msra.mxu1 %v174_v3 }
   0x8   :  { %169 = vmatmul.mubr.msk.f32.vlgmr.msra.gmra.mrb[0].mxu0 %vm23_vm0, %v18_v5  ;;  %172 = vmatmul.mubr.msk.f32.vlgmr.msra.gmra.mrb[0].mxu1 %vm23_vm0, %v20_v6 }
  0xdb   :  { %v170_v8 = vpop.f32.mrb[0].mxu0  ;;  %v173_v10 = vpop.f32.mrb[0].mxu1 }
  0xdc   :  { %v129_v11 = vmul.f32 %v170_v8, %v156_v7  ;;  %v131_v12 = vmul.f32 %v173_v10, %v156_v7  ;;  %v102_v13 = vpop.f32.mrb[1].mxu0  ;;  %v112_v14 = vpop.f32.mrb[1].mxu1 }
  0xdd   :  { %v128_v15 = vmul.f32 %v156_v7, %v102_v13  ;;  %v130_v16 = vmul.f32 %v156_v7, %v112_v14 }
  0xde   :  { %v140_v17 = vadd.f32 %v157_v9, %v129_v11  ;;  %v142_v18 = vadd.f32 %v157_v9, %v131_v12 }
  0xdf   :  { %v139_v19 = vadd.f32 %v157_v9, %v128_v15  ;;  %v141_v20 = vadd.f32 %v157_v9, %v130_v16 }
  0xe0   :  { %145 = vst.msk [vmem:[%s245_s4 + $0x8] sm:$0xff] %vm143_vm1, %v140_v17  ;;  %147 = vst.msk [vmem:[%s245_s4 + $0x18] sm:$0xff] %vm143_vm1, %v142_v18 }
  0xe1   :  { %144 = vst.msk [vmem:[%s245_s4] sm:$0xff] %vm143_vm1, %v139_v19  ;;  %146 = vst.msk [vmem:[%s245_s4 + $0x10] sm:$0xff] %vm143_vm1, %v141_v20 }

// kernel: multiscale_forward.172
= control target key start
LH: loop header
LB: loop body
LE: loop exit
PB: predicated region body
PF: predicated region fallthrough
CT: control target
= control target key end

     0   :  { %vm23_vm0 = vcmask 130048   ;;  %s288_s1 = inlined_call_operand.vmem [shape: f32[16,16], index: 1, kind: input, shape index: {}]   ;;  %s289_s0 = inlined_call_operand.vmem [shape: f32[32,16], index: 0, kind: input, shape index: {}]   ;;  %s290_s2 = inlined_call_operand.vmem [shape: f32[1,16], index: 2, kind: input, shape index: {}]   ;;  %s291_s3 = inlined_call_operand.vmem [shape: f32[1,16], index: 3, kind: input, shape index: {}]   ;;  %s292_s4 = inlined_call_operand.vmem [shape: f32[32,16], index: 4, kind: output, shape index: {}]  }
   0x1   :  { %v21_v0 = vld [vmem:[%s288_s1] sm:$0xff]  ;;  %v22_v1 = vld [vmem:[%s288_s1 + $0x8] sm:$0xff]  ;;  %v19_v4 = vld [vmem:[%s289_s0 + $0x10] sm:$0xff] }
   0x2   :  { %v17_v2 = vld [vmem:[%s289_s0] sm:$0xff]  ;;  %v205_v3 = vpack.c.bf16 %v22_v1, %v21_v0  ;;  %202 = vmatprep.mubr.msk.f32.mxu1 %vm23_vm0, %v19_v4  ;;  %v18_v5 = vld [vmem:[%s289_s0 + $0x8] sm:$0xff]  ;;  %v20_v6 = vld [vmem:[%s289_s0 + $0x18] sm:$0xff] }
   0x3   :  { %199 = vmatprep.mubr.msk.f32.mxu0 %vm23_vm0, %v17_v2  ;;  %v183_v7 = vld [vmem:[%s290_s2] ss:$0 sm:$0xff] }
   0x4   :  { %206 = vmatprep.subr.bf16.mxu0 %v205_v3  ;;  %209 = vmatprep.subr.bf16.mxu1 %v205_v3  ;;  %v184_v9 = vld [vmem:[%s291_s3] ss:$0 sm:$0xff] }
   0x5   :  { %208 = vmatpush3.bf16.msra.mxu0 %v205_v3  ;;  %210 = vmatpush3.bf16.msra.mxu1 %v205_v3 }
   0x8   :  { %200 = vmatmul.mubr.msk.f32.vlgmr.msra.gmra.mrb[0].mxu0 %vm23_vm0, %v18_v5  ;;  %203 = vmatmul.mubr.msk.f32.vlgmr.msra.gmra.mrb[0].mxu1 %vm23_vm0, %v20_v6 }
  0xdb   :  { %v201_v8 = vpop.f32.mrb[0].mxu0  ;;  %v204_v10 = vpop.f32.mrb[0].mxu1 }
  0xdc   :  { %v129_v11 = vmul.f32 %v201_v8, %v183_v7  ;;  %v131_v12 = vmul.f32 %v204_v10, %v183_v7  ;;  %v102_v13 = vpop.f32.mrb[1].mxu0  ;;  %v112_v14 = vpop.f32.mrb[1].mxu1 }
  0xdd   :  { %v128_v15 = vmul.f32 %v183_v7, %v102_v13  ;;  %v130_v16 = vmul.f32 %v183_v7, %v112_v14 }
  0xde   :  { %v140_v17 = vadd.f32 %v184_v9, %v129_v11  ;;  %v142_v18 = vadd.f32 %v184_v9, %v131_v12 }
  0xdf   :  { %v139_v19 = vadd.f32 %v184_v9, %v128_v15  ;;  %v141_v20 = vadd.f32 %v184_v9, %v130_v16 }
  0xe0   :  { %v149_v21 = vmul.f32 1.442695, %v140_v17  ;;  %v153_v22 = vmul.f32 1.442695, %v142_v18  ;;  %vm144_vm1 = vcmp.gt.f32.partialorder %v140_v17, 0.0  ;;  %vm146_vm2 = vcmp.gt.f32.partialorder %v142_v18, 0.0 }
  0xe1   :  { %v147_v23 = vmul.f32 1.442695, %v139_v19  ;;  %v151_v24 = vmul.f32 1.442695, %v141_v20  ;;  %vm143_vm3 = vcmp.gt.f32.partialorder %v139_v19, 0.0  ;;  %vm145_vm4 = vcmp.gt.f32.partialorder %v141_v20, 0.0 }
  0xe2   :  { %211 = vpow2.f32 %v149_v21 }
  0xe3   :  { %213 = vpow2.f32 %v153_v22 }
  0xe4   :  { %215 = vpow2.f32 %v147_v23 }
  0xe5   :  { %217 = vpow2.f32 %v151_v24 }
  0xec   :  { %v212_v25 = vpop.eup %211 }
  0xed   :  { %v214_v26 = vpop.eup %213  ;;  %v186_v27 = vadd.f32 -1.0, %v212_v25 }
  0xee   :  { %v216_v28 = vpop.eup %215  ;;  %v188_v29 = vadd.f32 -1.0, %v214_v26 }
  0xef   :  { %v218_v30 = vpop.eup %217  ;;  %v160_v31 = vmul.f32 1.6732632, %v186_v27  ;;  %v185_v32 = vadd.f32 -1.0, %v216_v28 }
  0xf0   :  { %v162_v33 = vmul.f32 1.6732632, %v188_v29  ;;  %v187_v34 = vadd.f32 -1.0, %v218_v30 }
  0xf1   :  { %v164_v35 = vsel %vm144_vm1, %v140_v17, %v160_v31  ;;  %v159_v36 = vmul.f32 1.6732632, %v185_v32 }
  0xf2   :  { %v168_v37 = vmul.f32 1.050701, %v164_v35  ;;  %v166_v38 = vsel %vm146_vm2, %v142_v18, %v162_v33  ;;  %v161_v39 = vmul.f32 1.6732632, %v187_v34 }
  0xf3   :  { %v170_v40 = vmul.f32 1.050701, %v166_v38  ;;  %v163_v41 = vsel %vm143_vm3, %v139_v19, %v159_v36 }
  0xf4   :  { %172 = vst.msk [vmem:[%s292_s4 + $0x8] sm:$0xff] %vm23_vm0, %v168_v37  ;;  %v167_v42 = vmul.f32 1.050701, %v163_v41  ;;  %v165_v43 = vsel %vm145_vm4, %v141_v20, %v161_v39 }
  0xf5   :  { %174 = vst.msk [vmem:[%s292_s4 + $0x18] sm:$0xff] %vm23_vm0, %v170_v40  ;;  %v169_v44 = vmul.f32 1.050701, %v165_v43 }
  0xf6   :  { %171 = vst.msk [vmem:[%s292_s4] sm:$0xff] %vm23_vm0, %v167_v42 }
  0xf7   :  { %173 = vst.msk [vmem:[%s292_s4 + $0x10] sm:$0xff] %vm23_vm0, %v169_v44 }

// kernel: multiscale_forward.174
= control target key start
LH: loop header
LB: loop body
LE: loop exit
PB: predicated region body
PF: predicated region fallthrough
CT: control target
= control target key end

     0   :  { %vm88_vm0 = vcmask 130048   ;;  %s712_s3 = inlined_call_operand.vmem [shape: f32[16,16], index: 3, kind: input, shape index: {}]   ;;  %s713_s2 = inlined_call_operand.vmem [shape: f32[16,16], index: 2, kind: input, shape index: {}]   ;;  %s714_s1 = inlined_call_operand.vmem [shape: f32[64,16], index: 1, kind: input, shape index: {}]   ;;  %s715_s0 = inlined_call_operand.vmem [shape: f32[64,16], index: 0, kind: input, shape index: {}]   ;;  %s716_s4 = inlined_call_operand.vmem [shape: f32[1,16], index: 4, kind: input, shape index: {}]   ;;  %s717_s5 = inlined_call_operand.vmem [shape: f32[64,16], index: 5, kind: output, shape index: {}]  }
   0x1   :  { %v86_v0 = vld [vmem:[%s712_s3] sm:$0xff]  ;;  %v87_v1 = vld [vmem:[%s712_s3 + $0x8] sm:$0xff]  ;;  %v22_v10 = vld [vmem:[%s714_s1 + $0x10] sm:$0xff] }
   0x2   :  { %v84_v2 = vld [vmem:[%s713_s2] sm:$0xff]  ;;  %v507_v3 = vpack.c.bf16 %v87_v1, %v86_v0  ;;  %v85_v4 = vld [vmem:[%s713_s2 + $0x8] sm:$0xff]  ;;  %v30_v11 = vsub.f32 0.0, %v22_v10  ;;  %v23_v12 = vld [vmem:[%s714_s1 + $0x18] sm:$0xff] }
   0x3   :  { %v20_v5 = vld [vmem:[%s714_s1] sm:$0xff]  ;;  %v21_v6 = vld [vmem:[%s714_s1 + $0x8] sm:$0xff]  ;;  %v511_v7 = vpack.c.bf16 %v85_v4, %v84_v2  ;;  %v31_v15 = vsub.f32 0.0, %v23_v12  ;;  %v26_v22 = vld [vmem:[%s714_s1 + $0x30] sm:$0xff] }
   0x4   :  { %v28_v8 = vsub.f32 0.0, %v20_v5  ;;  %479 = vmatprep.mubr.msk.f32.mxu1 %vm88_vm0, %v20_v5  ;;  %v29_v9 = vsub.f32 0.0, %v21_v6  ;;  %508 = vmatprep.subr.bf16.mxu1 %v507_v3  ;;  %v24_v16 = vld [vmem:[%s714_s1 + $0x20] sm:$0xff]  ;;  %v40_v17 = vmul.f32 1.442695, %v30_v11  ;;  %v25_v19 = vld [vmem:[%s714_s1 + $0x28] sm:$0xff] }
   0x5   :  { %510 = vmatpush3.bf16.msra.mxu1 %v507_v3  ;;  %512 = vmatprep.subr.bf16.mxu0 %v511_v7  ;;  %v32_v18 = vsub.f32 0.0, %v24_v16  ;;  %v42_v20 = vmul.f32 1.442695, %v31_v15  ;;  %v33_v21 = vsub.f32 0.0, %v25_v19  ;;  %v27_v23 = vld [vmem:[%s714_s1 + $0x38] sm:$0xff]  ;;  %v34_v25 = vsub.f32 0.0, %v26_v22 }
   0x6   :  { %v36_v13 = vmul.f32 1.442695, %v28_v8  ;;  %v38_v14 = vmul.f32 1.442695, %v29_v9  ;;  %514 = vmatpush3.bf16.msra.mxu0 %v511_v7  ;;  %v35_v26 = vsub.f32 0.0, %v27_v23  ;;  %v68_v46 = vld [vmem:[%s715_s0] sm:$0xff] }
   0x7   :  { %v44_v24 = vmul.f32 1.442695, %v32_v18  ;;  %v46_v27 = vmul.f32 1.442695, %v33_v21  ;;  %v48_v28 = vmul.f32 1.442695, %v34_v25 }
   0x8   :  { %523 = vpow2.f32 %v36_v13  ;;  %480 = vmatmul.mubr.msk.f32.vlgmr.msra.gmra.mrb[0].mxu1 %vm88_vm0, %v21_v6  ;;  %v50_v29 = vmul.f32 1.442695, %v35_v26  ;;  %v69_v47 = vld [vmem:[%s715_s0 + $0x8] sm:$0xff]  ;;  %v70_v49 = vld [vmem:[%s715_s0 + $0x10] sm:$0xff]  ;;  %v71_v52 = vld [vmem:[%s715_s0 + $0x18] sm:$0xff] }
   0x9   :  { %525 = vpow2.f32 %v38_v14  ;;  %482 = vmatprep.mubr.msk.f32.mxu1 %vm88_vm0, %v22_v10  ;;  %v72_v55 = vld [vmem:[%s715_s0 + $0x20] sm:$0xff]  ;;  %v73_v62 = vld [vmem:[%s715_s0 + $0x28] sm:$0xff]  ;;  %v74_v0 = vld [vmem:[%s715_s0 + $0x30] sm:$0xff] }
   0xa   :  { %527 = vpow2.f32 %v40_v17  ;;  %v75_v4 = vld [vmem:[%s715_s0 + $0x38] sm:$0xff]  ;;  %v446_v15 = vld [vmem:[%s716_s4] ss:$0 sm:$0xff] }
   0xb   :  { %529 = vpow2.f32 %v42_v20 }
   0xc   :  { %531 = vpow2.f32 %v44_v24  ;;  %483 = vmatmul.mubr.msk.f32.gmra.mrb[2].mxu1 %vm88_vm0, %v23_v12 }
   0xd   :  { %533 = vpow2.f32 %v46_v27  ;;  %485 = vmatprep.mubr.msk.f32.mxu1 %vm88_vm0, %v24_v16 }
   0xe   :  { %535 = vpow2.f32 %v48_v28 }
   0xf   :  { %537 = vpow2.f32 %v50_v29 }
  0x10   :  { %486 = vmatmul.mubr.msk.f32.gmra.mrb[4].mxu1 %vm88_vm0, %v25_v19 }
  0x11   :  { %488 = vmatprep.mubr.msk.f32.mxu1 %vm88_vm0, %v26_v22 }
  0x12   :  { %v524_v30 = vpop.eup %523 }
  0x13   :  { %v526_v31 = vpop.eup %525  ;;  %v52_v32 = vadd.f32 1.0, %v524_v30 }
  0x14   :  { %v528_v33 = vpop.eup %527  ;;  %v53_v34 = vadd.f32 1.0, %v526_v31  ;;  %489 = vmatmul.mubr.msk.f32.gmra.mrb[6].mxu1 %vm88_vm0, %v27_v23 }
  0x15   :  { %v530_v35 = vpop.eup %529  ;;  %539 = vrcp.f32 %v52_v32  ;;  %v54_v36 = vadd.f32 1.0, %v528_v33 }
  0x16   :  { %v532_v37 = vpop.eup %531  ;;  %541 = vrcp.f32 %v53_v34  ;;  %v55_v38 = vadd.f32 1.0, %v530_v35 }
  0x17   :  { %v534_v39 = vpop.eup %533  ;;  %543 = vrcp.f32 %v54_v36  ;;  %v56_v40 = vadd.f32 1.0, %v532_v37 }
  0x18   :  { %v536_v41 = vpop.eup %535  ;;  %545 = vrcp.f32 %v55_v38  ;;  %v57_v42 = vadd.f32 1.0, %v534_v39 }
  0x19   :  { %v538_v43 = vpop.eup %537  ;;  %547 = vrcp.f32 %v56_v40  ;;  %v58_v44 = vadd.f32 1.0, %v536_v41 }
  0x1a   :  { %549 = vrcp.f32 %v57_v42  ;;  %v59_v45 = vadd.f32 1.0, %v538_v43 }
  0x1b   :  { %551 = vrcp.f32 %v58_v44 }
  0x1c   :  { %553 = vrcp.f32 %v59_v45 }
  0x1f   :  { %v540_v48 = vpop.eup %539 }
  0x20   :  { %v542_v50 = vpop.eup %541  ;;  %v76_v51 = vmul.f32 %v540_v48, %v68_v46 }
  0x21   :  { %v544_v53 = vpop.eup %543  ;;  %v77_v54 = vmul.f32 %v542_v50, %v69_v47 }
  0x22   :  { %v546_v56 = vpop.eup %545  ;;  %495 = vmatprep.mubr.msk.f32.mxu0 %vm88_vm0, %v76_v51  ;;  %v78_v57 = vmul.f32 %v544_v53, %v70_v49 }
  0x23   :  { %v548_v58 = vpop.eup %547  ;;  %496 = vmatmul.mubr.msk.f32.vlgmr.msra.gmra.mrb[0].mxu0 %vm88_vm0, %v77_v54  ;;  %v79_v59 = vmul.f32 %v546_v56, %v71_v52 }
  0x24   :  { %v550_v60 = vpop.eup %549  ;;  %498 = vmatprep.mubr.msk.f32.mxu0 %vm88_vm0, %v78_v57  ;;  %v80_v61 = vmul.f32 %v548_v58, %v72_v55 }
  0x25   :  { %v552_v63 = vpop.eup %551  ;;  %v81_v1 = vmul.f32 %v550_v60, %v73_v62 }
  0x26   :  { %v554_v2 = vpop.eup %553  ;;  %v82_v3 = vmul.f32 %v552_v63, %v74_v0 }
  0x27   :  { %499 = vmatmul.mubr.msk.f32.gmra.mrb[2].mxu0 %vm88_vm0, %v79_v59  ;;  %v83_v5 = vmul.f32 %v554_v2, %v75_v4 }
  0x28   :  { %501 = vmatprep.mubr.msk.f32.mxu0 %vm88_vm0, %v80_v61 }
  0x2b   :  { %502 = vmatmul.mubr.msk.f32.gmra.mrb[4].mxu0 %vm88_vm0, %v81_v1 }
  0x2c   :  { %504 = vmatprep.mubr.msk.f32.mxu0 %vm88_vm0, %v82_v3 }
  0x2f   :  { %505 = vmatmul.mubr.msk.f32.gmra.mrb[6].mxu0 %vm88_vm0, %v83_v5 }
  0xdb   :  { %v481_v6 = vpop.f32.mrb[0].mxu1 }
  0xdc   :  { %v179_v7 = vpop.f32.mrb[1].mxu1 }
  0xdf   :  { %v484_v8 = vpop.f32.mrb[2].mxu1 }
  0xe0   :  { %v189_v9 = vpop.f32.mrb[3].mxu1 }
  0xe3   :  { %v487_v10 = vpop.f32.mrb[4].mxu1 }
  0xe4   :  { %v199_v11 = vpop.f32.mrb[5].mxu1 }
  0xe7   :  { %v490_v12 = vpop.f32.mrb[6].mxu1 }
  0xe8   :  { %v209_v13 = vpop.f32.mrb[7].mxu1 }
  0xf6   :  { %v497_v14 = vpop.f32.mrb[0].mxu0 }
  0xf7   :  { %v314_v16 = vadd.f32 %v497_v14, %v481_v6  ;;  %v308_v17 = vpop.f32.mrb[1].mxu0 }
  0xf8   :  { %v309_v18 = vadd.f32 %v308_v17, %v179_v7 }
  0xf9   :  { %v355_v19 = vadd.f32 %v446_v15, %v314_v16 }
  0xfa   :  { %v354_v20 = vadd.f32 %v446_v15, %v309_v18  ;;  %v500_v21 = vpop.f32.mrb[2].mxu0 }
  0xfb   :  { %v372_v22 = vmul.f32 1.442695, %v355_v19  ;;  %v324_v23 = vadd.f32 %v500_v21, %v484_v8  ;;  %v318_v24 = vpop.f32.mrb[3].mxu0  ;;  %vm363_vm1 = vcmp.gt.f32.partialorder %v355_v19, 0.0 }
  0xfc   :  { %v370_v25 = vmul.f32 1.442695, %v354_v20  ;;  %v319_v26 = vadd.f32 %v318_v24, %v189_v9  ;;  %vm362_vm2 = vcmp.gt.f32.partialorder %v354_v20, 0.0 }
  0xfd   :  { %555 = vpow2.f32 %v372_v22  ;;  %v357_v27 = vadd.f32 %v446_v15, %v324_v23 }
  0xfe   :  { %557 = vpow2.f32 %v370_v25  ;;  %v356_v28 = vadd.f32 %v446_v15, %v319_v26  ;;  %v503_v29 = vpop.f32.mrb[4].mxu0 }
  0xff   :  { %v376_v30 = vmul.f32 1.442695, %v357_v27  ;;  %v334_v31 = vadd.f32 %v503_v29, %v487_v10  ;;  %v328_v32 = vpop.f32.mrb[5].mxu0  ;;  %vm365_vm3 = vcmp.gt.f32.partialorder %v357_v27, 0.0 }
 0x100   :  { %v374_v33 = vmul.f32 1.442695, %v356_v28  ;;  %v329_v34 = vadd.f32 %v328_v32, %v199_v11  ;;  %vm364_vm4 = vcmp.gt.f32.partialorder %v356_v28, 0.0 }
 0x101   :  { %559 = vpow2.f32 %v376_v30  ;;  %v359_v35 = vadd.f32 %v446_v15, %v334_v31 }
 0x102   :  { %561 = vpow2.f32 %v374_v33  ;;  %v358_v36 = vadd.f32 %v446_v15, %v329_v34  ;;  %v506_v37 = vpop.f32.mrb[6].mxu0 }
 0x103   :  { %v380_v38 = vmul.f32 1.442695, %v359_v35  ;;  %v344_v39 = vadd.f32 %v506_v37, %v490_v12  ;;  %v338_v40 = vpop.f32.mrb[7].mxu0  ;;  %vm367_vm5 = vcmp.gt.f32.partialorder %v359_v35, 0.0 }
 0x104   :  { %v378_v41 = vmul.f32 1.442695, %v358_v36  ;;  %v339_v42 = vadd.f32 %v338_v40, %v209_v13  ;;  %vm366_vm6 = vcmp.gt.f32.partialorder %v358_v36, 0.0 }
 0x105   :  { %563 = vpow2.f32 %v380_v38  ;;  %v361_v43 = vadd.f32 %v446_v15, %v344_v39 }
 0x106   :  { %565 = vpow2.f32 %v378_v41  ;;  %v360_v44 = vadd.f32 %v446_v15, %v339_v42 }
 0x107   :  { %v556_v45 = vpop.eup %555  ;;  %v384_v46 = vmul.f32 1.442695, %v361_v43  ;;  %vm369_vm7 = vcmp.gt.f32.partialorder %v361_v43, 0.0 }
 0x108   :  { %v558_v47 = vpop.eup %557  ;;  %v448_v48 = vadd.f32 -1.0, %v556_v45  ;;  %v382_v49 = vmul.f32 1.442695, %v360_v44  ;;  %vm368_vm8 = vcmp.gt.f32.partialorder %v360_v44, 0.0 }
 0x109   :  { %v447_v50 = vadd.f32 -1.0, %v558_v47  ;;  %567 = vpow2.f32 %v384_v46 }
 0x10a   :  { %v395_v51 = vmul.f32 1.6732632, %v448_v48  ;;  %569 = vpow2.f32 %v382_v49 }
 0x10b   :  { %v560_v52 = vpop.eup %559  ;;  %v394_v53 = vmul.f32 1.6732632, %v447_v50 }
 0x10c   :  { %v562_v54 = vpop.eup %561  ;;  %v403_v55 = vsel %vm363_vm1, %v355_v19, %v395_v51  ;;  %v450_v56 = vadd.f32 -1.0, %v560_v52 }
 0x10d   :  { %v411_v57 = vmul.f32 1.050701, %v403_v55  ;;  %v402_v58 = vsel %vm362_vm2, %v354_v20, %v394_v53  ;;  %v449_v59 = vadd.f32 -1.0, %v562_v54 }
 0x10e   :  { %v410_v60 = vmul.f32 1.050701, %v402_v58  ;;  %v397_v61 = vmul.f32 1.6732632, %v450_v56 }
 0x10f   :  { %v564_v62 = vpop.eup %563  ;;  %419 = vst.msk [vmem:[%s717_s5 + $0x8] sm:$0xff] %vm88_vm0, %v411_v57  ;;  %v396_v63 = vmul.f32 1.6732632, %v449_v59 }
 0x110   :  { %v566_v0 = vpop.eup %565  ;;  %418 = vst.msk [vmem:[%s717_s5] sm:$0xff] %vm88_vm0, %v410_v60  ;;  %v405_v1 = vsel %vm365_vm3, %v357_v27, %v397_v61  ;;  %v452_v2 = vadd.f32 -1.0, %v564_v62 }
 0x111   :  { %v413_v3 = vmul.f32 1.050701, %v405_v1  ;;  %v404_v4 = vsel %vm364_vm4, %v356_v28, %v396_v63  ;;  %v451_v5 = vadd.f32 -1.0, %v566_v0 }
 0x112   :  { %v412_v6 = vmul.f32 1.050701, %v404_v4  ;;  %v399_v7 = vmul.f32 1.6732632, %v452_v2 }
 0x113   :  { %v568_v8 = vpop.eup %567  ;;  %421 = vst.msk [vmem:[%s717_s5 + $0x18] sm:$0xff] %vm88_vm0, %v413_v3  ;;  %v398_v9 = vmul.f32 1.6732632, %v451_v5 }
 0x114   :  { %v570_v10 = vpop.eup %569  ;;  %420 = vst.msk [vmem:[%s717_s5 + $0x10] sm:$0xff] %vm88_vm0, %v412_v6  ;;  %v407_v11 = vsel %vm367_vm5, %v359_v35, %v399_v7  ;;  %v454_v12 = vadd.f32 -1.0, %v568_v8 }
 0x115   :  { %v415_v13 = vmul.f32 1.050701, %v407_v11  ;;  %v406_v14 = vsel %vm366_vm6, %v358_v36, %v398_v9  ;;  %v453_v15 = vadd.f32 -1.0, %v570_v10 }
 0x116   :  { %v414_v16 = vmul.f32 1.050701, %v406_v14  ;;  %v401_v17 = vmul.f32 1.6732632, %v454_v12 }
 0x117   :  { %423 = vst.msk [vmem:[%s717_s5 + $0x28] sm:$0xff] %vm88_vm0, %v415_v13  ;;  %v400_v18 = vmul.f32 1.6732632, %v453_v15 }
 0x118   :  { %422 = vst.msk [vmem:[%s717_s5 + $0x20] sm:$0xff] %vm88_vm0, %v414_v16  ;;  %v409_v19 = vsel %vm369_vm7, %v361_v43, %v401_v17 }
 0x119   :  { %v417_v20 = vmul.f32 1.050701, %v409_v19  ;;  %v408_v21 = vsel %vm368_vm8, %v360_v44, %v400_v18 }
 0x11a   :  { %v416_v22 = vmul.f32 1.050701, %v408_v21 }
 0x11b   :  { %425 = vst.msk [vmem:[%s717_s5 + $0x38] sm:$0xff] %vm88_vm0, %v417_v20 }
 0x11c   :  { %424 = vst.msk [vmem:[%s717_s5 + $0x30] sm:$0xff] %vm88_vm0, %v416_v22 }

// kernel: multiscale_forward.205
= control target key start
LH: loop header
LB: loop body
LE: loop exit
PB: predicated region body
PF: predicated region fallthrough
CT: control target
= control target key end

     0   :  { %vm27_vm0 = vcmask 130048   ;;  %vm187_vm1 = vcmask 261120   ;;  %s343_s1 = inlined_call_operand.vmem [shape: f32[16,32], index: 1, kind: input, shape index: {}]   ;;  %s344_s0 = inlined_call_operand.vmem [shape: f32[64,16], index: 0, kind: input, shape index: {}]   ;;  %s345_s2 = inlined_call_operand.vmem [shape: f32[1,32], index: 2, kind: input, shape index: {}]   ;;  %s346_s3 = inlined_call_operand.vmem [shape: f32[1,32], index: 3, kind: input, shape index: {}]   ;;  %s347_s4 = inlined_call_operand.vmem [shape: f32[64,32], index: 4, kind: output, shape index: {}]  }
   0x1   :  { %v25_v0 = vld [vmem:[%s343_s1] sm:$0xff]  ;;  %v26_v1 = vld [vmem:[%s343_s1 + $0x8] sm:$0xff]  ;;  %v19_v7 = vld [vmem:[%s344_s0 + $0x10] sm:$0xff] }
   0x2   :  { %v17_v2 = vld [vmem:[%s344_s0] sm:$0xff]  ;;  %v236_v3 = vpack.c.bf16 %v26_v1, %v25_v0  ;;  %v18_v5 = vld [vmem:[%s344_s0 + $0x8] sm:$0xff]  ;;  %v23_v8 = vld [vmem:[%s344_s0 + $0x30] sm:$0xff] }
   0x3   :  { %224 = vmatprep.mubr.msk.f32.mxu0 %vm27_vm0, %v17_v2  ;;  %v21_v4 = vld [vmem:[%s344_s0 + $0x20] sm:$0xff]  ;;  %v22_v6 = vld [vmem:[%s344_s0 + $0x28] sm:$0xff]  ;;  %v20_v9 = vld [vmem:[%s344_s0 + $0x18] sm:$0xff] }
   0x4   :  { %230 = vmatprep.mubr.msk.f32.mxu1 %vm27_vm0, %v21_v4  ;;  %237 = vmatprep.subr.bf16.mxu0 %v236_v3  ;;  %v24_v10 = vld [vmem:[%s344_s0 + $0x38] sm:$0xff]  ;;  %v208_v11 = vld [vmem:[%s345_s2] ss:$0 sm:$0xff] }
   0x5   :  { %240 = vmatprep.subr.bf16.mxu1 %v236_v3  ;;  %239 = vmatpush3.bf16.msra.mxu0 %v236_v3  ;;  %v209_v13 = vld [vmem:[%s346_s3] ss:$0 sm:$0xff] }
   0x6   :  { %241 = vmatpush3.bf16.msra.mxu1 %v236_v3 }
   0x8   :  { %225 = vmatmul.mubr.msk.f32.vlgmr.msra.gmra.mrb[0].mxu0 %vm27_vm0, %v18_v5 }
   0x9   :  { %231 = vmatmul.mubr.msk.f32.vlgmr.msra.gmra.mrb[0].mxu1 %vm27_vm0, %v22_v6  ;;  %227 = vmatprep.mubr.msk.f32.mxu0 %vm27_vm0, %v19_v7 }
   0xa   :  { %233 = vmatprep.mubr.msk.f32.mxu1 %vm27_vm0, %v23_v8 }
   0xc   :  { %228 = vmatmul.mubr.msk.f32.gmra.mrb[2].mxu0 %vm27_vm0, %v20_v9 }
   0xd   :  { %234 = vmatmul.mubr.msk.f32.gmra.mrb[2].mxu1 %vm27_vm0, %v24_v10 }
  0xdb   :  { %v226_v12 = vpop.f32.mrb[0].mxu0 }
  0xdc   :  { %v232_v14 = vpop.f32.mrb[0].mxu1  ;;  %v165_v15 = vmul.f32 %v226_v12, %v208_v11  ;;  %v118_v17 = vpop.f32.mrb[1].mxu0 }
  0xdd   :  { %v169_v16 = vmul.f32 %v232_v14, %v208_v11  ;;  %v138_v18 = vpop.f32.mrb[1].mxu1  ;;  %v164_v19 = vmul.f32 %v208_v11, %v118_v17 }
  0xde   :  { %v168_v20 = vmul.f32 %v208_v11, %v138_v18  ;;  %v180_v21 = vadd.f32 %v209_v13, %v165_v15 }
  0xdf   :  { %v184_v22 = vadd.f32 %v209_v13, %v169_v16  ;;  %v179_v23 = vadd.f32 %v209_v13, %v164_v19  ;;  %v229_v25 = vpop.f32.mrb[2].mxu0 }
  0xe0   :  { %v183_v24 = vadd.f32 %v209_v13, %v168_v20  ;;  %v235_v26 = vpop.f32.mrb[2].mxu1  ;;  %189 = vst.msk [vmem:[%s347_s4 + $0x8] sm:$0xff] %vm187_vm1, %v180_v21  ;;  %v167_v27 = vmul.f32 %v229_v25, %v208_v11  ;;  %v128_v29 = vpop.f32.mrb[3].mxu0 }
  0xe1   :  { %193 = vst.msk [vmem:[%s347_s4 + $0x28] sm:$0xff] %vm187_vm1, %v184_v22  ;;  %v171_v28 = vmul.f32 %v235_v26, %v208_v11  ;;  %v148_v30 = vpop.f32.mrb[3].mxu1  ;;  %188 = vst.msk [vmem:[%s347_s4] sm:$0xff] %vm187_vm1, %v179_v23  ;;  %v166_v31 = vmul.f32 %v208_v11, %v128_v29 }
  0xe2   :  { %192 = vst.msk [vmem:[%s347_s4 + $0x20] sm:$0xff] %vm187_vm1, %v183_v24  ;;  %v170_v32 = vmul.f32 %v208_v11, %v148_v30  ;;  %v182_v33 = vadd.f32 %v209_v13, %v167_v27 }
  0xe3   :  { %v186_v34 = vadd.f32 %v209_v13, %v171_v28  ;;  %v181_v35 = vadd.f32 %v209_v13, %v166_v31 }
  0xe4   :  { %v185_v36 = vadd.f32 %v209_v13, %v170_v32  ;;  %191 = vst.msk [vmem:[%s347_s4 + $0x18] sm:$0xff] %vm187_vm1, %v182_v33 }
  0xe5   :  { %195 = vst.msk [vmem:[%s347_s4 + $0x38] sm:$0xff] %vm187_vm1, %v186_v34  ;;  %190 = vst.msk [vmem:[%s347_s4 + $0x10] sm:$0xff] %vm187_vm1, %v181_v35 }
  0xe6   :  { %194 = vst.msk [vmem:[%s347_s4 + $0x30] sm:$0xff] %vm187_vm1, %v185_v36 }

// kernel: multiscale_forward.219
= control target key start
LH: loop header
LB: loop body
LE: loop exit
PB: predicated region body
PF: predicated region fallthrough
CT: control target
= control target key end

     0   :  { %vm111_vm0 = vcmask 392192   ;;  %s824_s0 = inlined_call_operand.vmem [shape: f32[128,48], index: 0, kind: input, shape index: {}]   ;;  %s825_s1 = inlined_call_operand.vmem [shape: f32[1,48], index: 1, kind: input, shape index: {}]   ;;  %s826_s2 = inlined_call_operand.vmem [shape: f32[1,48], index: 2, kind: input, shape index: {}]   ;;  %s827_s3 = inlined_call_operand.vmem [shape: f32[48,16], index: 3, kind: input, shape index: {}]   ;;  %s828_s4 = inlined_call_operand.vmem [shape: f32[1,16], index: 4, kind: input, shape index: {}]   ;;  %s829_s5 = inlined_call_operand.vmem [shape: f32[1,16], index: 5, kind: input, shape index: {}]   ;;  %s830_s6 = inlined_call_operand.vmem [shape: f32[128,16], index: 6, kind: input, shape index: {}]   ;;  %s831_s7 = inlined_call_operand.hbm [shape: f32[128,16], index: 7, kind: output, shape index: {}]  }
   0x1   :  { %v105_v0 = vld [vmem:[%s827_s3] sm:$0xff]  ;;  %v106_v1 = vld [vmem:[%s827_s3 + $0x8] sm:$0xff]  ;;  %v107_v2 = vld [vmem:[%s827_s3 + $0x10] sm:$0xff] }
   0x2   :  { %v494_v3 = vpack.c.bf16 %v106_v1, %v105_v0  ;;  %v108_v4 = vld [vmem:[%s827_s3 + $0x18] sm:$0xff]  ;;  %v109_v5 = vld [vmem:[%s827_s3 + $0x20] sm:$0xff]  ;;  %v110_v6 = vld [vmem:[%s827_s3 + $0x28] sm:$0xff] }
   0x3   :  { %v498_v7 = vpack.c.bf16 %v108_v4, %v107_v2  ;;  %v27_v8 = vld [vmem:[%s824_s0] sm:$0xff]  ;;  %v502_v11 = vpack.c.bf16 %v110_v6, %v109_v5  ;;  %v28_v14 = vld [vmem:[%s824_s0 + $0x8] sm:$0xff]  ;;  %v29_v19 = vld [vmem:[%s824_s0 + $0x10] sm:$0xff] }
   0x4   :  { %v606_v9 = vld [vmem:[%s825_s1] ss:$0 sm:$0xff]  ;;  %495 = vmatprep.subr.bf16.mxu0 %v494_v3  ;;  %506 = vmatprep.subr.bf16.mxu1 %v494_v3  ;;  %v36_v15 = vld [vmem:[%s824_s0 + $0x48] sm:$0xff]  ;;  %v37_v20 = vld [vmem:[%s824_s0 + $0x50] sm:$0xff] }
   0x5   :  { %v611_v10 = vld [vmem:[%s826_s2] ss:$0 sm:$0xff]  ;;  %v50_v12 = vmul.f32 %v606_v9, %v27_v8  ;;  %497 = vmatpush3.bf16.msra.mxu0 %v494_v3  ;;  %509 = vmatpush3.bf16.msra.mxu1 %v494_v3  ;;  %v51_v17 = vmul.f32 %v606_v9, %v28_v14  ;;  %v59_v18 = vmul.f32 %v606_v9, %v36_v15  ;;  %v30_v21 = vld [vmem:[%s824_s0 + $0x18] sm:$0xff]  ;;  %v32_v35 = vld [vmem:[%s824_s0 + $0x28] sm:$0xff] }
   0x6   :  { %v35_v13 = vld [vmem:[%s824_s0 + $0x40] sm:$0xff]  ;;  %499 = vmatprep.subr.bf16.mxu0 %v498_v7  ;;  %507 = vmatprep.subr.bf16.mxu1 %v498_v7  ;;  %v52_v23 = vmul.f32 %v606_v9, %v29_v19  ;;  %v60_v24 = vmul.f32 %v606_v9, %v37_v20  ;;  %v38_v25 = vld [vmem:[%s824_s0 + $0x58] sm:$0xff]  ;;  %v53_v29 = vmul.f32 %v606_v9, %v30_v21  ;;  %v40_v38 = vld [vmem:[%s824_s0 + $0x68] sm:$0xff] }
   0x7   :  { %v58_v16 = vmul.f32 %v606_v9, %v35_v13  ;;  %v73_v22 = vadd.f32 %v611_v10, %v50_v12  ;;  %v74_v27 = vadd.f32 %v611_v10, %v51_v17  ;;  %v82_v28 = vadd.f32 %v611_v10, %v59_v18  ;;  %v31_v30 = vld [vmem:[%s824_s0 + $0x20] sm:$0xff] }
   0x8   :  { %v75_v32 = vadd.f32 %v611_v10, %v52_v23  ;;  %v61_v33 = vmul.f32 %v606_v9, %v38_v25  ;;  %v39_v34 = vld [vmem:[%s824_s0 + $0x60] sm:$0xff]  ;;  %v83_v37 = vadd.f32 %v611_v10, %v60_v24 }
   0x9   :  { %v81_v26 = vadd.f32 %v611_v10, %v58_v16  ;;  %v89_v31 = vmax.f32 %v73_v22, 0.0  ;;  %501 = vmatpush3.bf16.msra.mxu0 %v498_v7  ;;  %510 = vmatpush3.bf16.msra.mxu1 %v498_v7 }
   0xb   :  { %v97_v36 = vmax.f32 %v81_v26, 0.0 }
   0xc   :  { %12 = vsyncpa [#allocation3], 0  ;;  %503 = vmatprep.subr.bf16.mxu0 %v502_v11  ;;  %508 = vmatprep.subr.bf16.mxu1 %v502_v11  ;;  %v90_v39 = vmax.f32 %v74_v27, 0.0  ;;  %v54_v40 = vmul.f32 %v606_v9, %v31_v30  ;;  %v33_v41 = vld [vmem:[%s824_s0 + $0x30] sm:$0xff]  ;;  %v98_v43 = vmax.f32 %v82_v28, 0.0  ;;  %v76_v44 = vadd.f32 %v611_v10, %v53_v29  ;;  %v34_v55 = vld [vmem:[%s824_s0 + $0x38] sm:$0xff] }
   0xd   :  { %v41_v42 = vld [vmem:[%s824_s0 + $0x70] sm:$0xff]  ;;  %470 = vmatprep.mubr.msk.f32.mxu0 %vm111_vm0, %v89_v31  ;;  %482 = vmatprep.mubr.msk.f32.mxu1 %vm111_vm0, %v97_v36  ;;  %v62_v45 = vmul.f32 %v606_v9, %v39_v34  ;;  %v55_v46 = vmul.f32 %v606_v9, %v32_v35  ;;  %v91_v47 = vmax.f32 %v75_v32, 0.0  ;;  %v84_v48 = vadd.f32 %v611_v10, %v61_v33  ;;  %v42_v56 = vld [vmem:[%s824_s0 + $0x78] sm:$0xff]  ;;  %v714_v13 = vld [vmem:[%s829_s5] ss:$0 sm:$0xff]  ;;  %s539_s2 = smov [#allocation2]  }
   0xe   :  { %v77_v49 = vadd.f32 %v611_v10, %v54_v40  ;;  %v63_v50 = vmul.f32 %v606_v9, %v40_v38  ;;  %505 = vmatpush3.bf16.msra.mxu0 %v502_v11  ;;  %511 = vmatpush3.bf16.msra.mxu1 %v502_v11  ;;  %v99_v51 = vmax.f32 %v83_v37, 0.0  ;;  %v56_v53 = vmul.f32 %v606_v9, %v33_v41  ;;  %v352_v19 = vld [vmem:[%s830_s6 + $0x8] sm:$0xff]  ;;  %v351_v25 = vld [vmem:[%s830_s6] sm:$0xff]  ;;  %v362_v40 = vld [vmem:[%s830_s6 + $0x58] sm:$0xff]  ;;  %s405_s23 = sshll.u32 %s539_s2, 4  ;;  %s406_s23 = int_to_ptr.vmem [resolvable:$true] %s405_s23 }
   0xf   :  { %v85_v52 = vadd.f32 %v611_v10, %v62_v45  ;;  %v64_v54 = vmul.f32 %v606_v9, %v41_v42  ;;  %v92_v57 = vmax.f32 %v76_v44, 0.0  ;;  %v78_v58 = vadd.f32 %v611_v10, %v55_v46  ;;  %v360_v20 = vld [vmem:[%s830_s6 + $0x48] sm:$0xff]  ;;  %v359_v26 = vld [vmem:[%s830_s6 + $0x40] sm:$0xff]  ;;  %v353_v45 = vld [vmem:[%s830_s6 + $0x10] sm:$0xff]  ;;  %p520_p1 = scmp.lt.s32.totalorder %s406_s23, %s406_s23 }
  0x10   :  { %v100_v59 = vmax.f32 %v84_v48, 0.0  ;;  %v86_v60 = vadd.f32 %v611_v10, %v63_v50  ;;  %v57_v61 = vmul.f32 %v606_v9, %v34_v55  ;;  %v65_v62 = vmul.f32 %v606_v9, %v42_v56  ;;  %v361_v46 = vld [vmem:[%s830_s6 + $0x50] sm:$0xff] }
  0x11   :  { %471 = vmatmul.mubr.msk.f32.vlgmr.msra.gmra.mrb[0].mxu0 %vm111_vm0, %v90_v39  ;;  %483 = vmatmul.mubr.msk.f32.vlgmr.msra.gmra.mrb[0].mxu1 %vm111_vm0, %v98_v43  ;;  %v93_v63 = vmax.f32 %v77_v49, 0.0  ;;  %v101_v0 = vmax.f32 %v85_v52, 0.0  ;;  %v79_v1 = vadd.f32 %v611_v10, %v56_v53  ;;  %v87_v2 = vadd.f32 %v611_v10, %v64_v54  ;;  %v354_v39 = vld [vmem:[%s830_s6 + $0x18] sm:$0xff] }
  0x12   :  { %473 = vmatprep.mubr.msk.f32.mxu0 %vm111_vm0, %v91_v47  ;;  %485 = vmatprep.mubr.msk.f32.mxu1 %vm111_vm0, %v99_v51  ;;  %v94_v3 = vmax.f32 %v78_v58, 0.0  ;;  %v102_v4 = vmax.f32 %v86_v60, 0.0  ;;  %v80_v5 = vadd.f32 %v611_v10, %v57_v61  ;;  %v88_v6 = vadd.f32 %v611_v10, %v65_v62  ;;  %v709_v10 = vld [vmem:[%s828_s4] ss:$0 sm:$0xff]  ;;  %v364_v60 = vld [vmem:[%s830_s6 + $0x68] sm:$0xff] }
  0x13   :  { %v95_v7 = vmax.f32 %v79_v1, 0.0  ;;  %v103_v8 = vmax.f32 %v87_v2, 0.0  ;;  %vm383_vm1 = vcmask 130048   ;;  %v355_v1 = vld [vmem:[%s830_s6 + $0x20] sm:$0xff] }
  0x14   :  { %v96_v9 = vmax.f32 %v80_v5, 0.0  ;;  %v104_v11 = vmax.f32 %v88_v6, 0.0  ;;  %v363_v2 = vld [vmem:[%s830_s6 + $0x60] sm:$0xff] }
  0x15   :  { %474 = vmatmul.mubr.msk.f32.gmra.mrb[2].mxu0 %vm111_vm0, %v92_v57  ;;  %486 = vmatmul.mubr.msk.f32.gmra.mrb[2].mxu1 %vm111_vm0, %v100_v59  ;;  %v356_v59 = vld [vmem:[%s830_s6 + $0x28] sm:$0xff] }
  0x16   :  { %476 = vmatprep.mubr.msk.f32.mxu0 %vm111_vm0, %v93_v63  ;;  %488 = vmatprep.mubr.msk.f32.mxu1 %vm111_vm0, %v101_v0 }
  0x19   :  { %477 = vmatmul.mubr.msk.f32.gmra.mrb[4].mxu0 %vm111_vm0, %v94_v3  ;;  %489 = vmatmul.mubr.msk.f32.gmra.mrb[4].mxu1 %vm111_vm0, %v102_v4 }
  0x1a   :  { %479 = vmatprep.mubr.msk.f32.mxu0 %vm111_vm0, %v95_v7  ;;  %491 = vmatprep.mubr.msk.f32.mxu1 %vm111_vm0, %v103_v8 }
  0x1d   :  { %480 = vmatmul.mubr.msk.f32.gmra.mrb[6].mxu0 %vm111_vm0, %v96_v9  ;;  %492 = vmatmul.mubr.msk.f32.gmra.mrb[6].mxu1 %vm111_vm0, %v104_v11 }
  0xe4   :  { %v472_v12 = vpop.f32.mrb[0].mxu0  ;;  %v484_v14 = vpop.f32.mrb[0].mxu1 }
  0xe5   :  { %v313_v15 = vmul.f32 %v472_v12, %v709_v10  ;;  %v321_v16 = vmul.f32 %v484_v14, %v709_v10  ;;  %v226_v17 = vpop.f32.mrb[1].mxu0  ;;  %v266_v18 = vpop.f32.mrb[1].mxu1 }
  0xe6   :  { %v312_v21 = vmul.f32 %v709_v10, %v226_v17  ;;  %v320_v22 = vmul.f32 %v709_v10, %v266_v18  ;;  %v358_v17 = vld [vmem:[%s830_s6 + $0x38] sm:$0xff] }
  0xe7   :  { %v336_v23 = vadd.f32 %v714_v13, %v313_v15  ;;  %v344_v24 = vadd.f32 %v714_v13, %v321_v16  ;;  %v366_v18 = vld [vmem:[%s830_s6 + $0x78] sm:$0xff] }
  0xe8   :  { %v335_v27 = vadd.f32 %v714_v13, %v312_v21  ;;  %v343_v28 = vadd.f32 %v714_v13, %v320_v22  ;;  %v475_v29 = vpop.f32.mrb[2].mxu0  ;;  %v487_v30 = vpop.f32.mrb[2].mxu1 }
  0xe9   :  { %v368_v31 = vadd.f32 %v352_v19, %v336_v23  ;;  %v376_v32 = vadd.f32 %v360_v20, %v344_v24  ;;  %v315_v33 = vmul.f32 %v475_v29, %v709_v10  ;;  %v323_v34 = vmul.f32 %v487_v30, %v709_v10  ;;  %v236_v35 = vpop.f32.mrb[3].mxu0  ;;  %v276_v36 = vpop.f32.mrb[3].mxu1  ;;  %v357_v23 = vld [vmem:[%s830_s6 + $0x30] sm:$0xff] }
  0xea   :  { %v367_v37 = vadd.f32 %v351_v25, %v335_v27  ;;  %v375_v38 = vadd.f32 %v359_v26, %v343_v28  ;;  %v314_v41 = vmul.f32 %v709_v10, %v236_v35  ;;  %v322_v42 = vmul.f32 %v709_v10, %v276_v36  ;;  %v365_v24 = vld [vmem:[%s830_s6 + $0x70] sm:$0xff]  ;;  %s515_s6 = scalar_lea.vmem %s406_s23, 2048 }
  0xeb   :  { %385 = vst.msk [vmem:[#allocation2 + $0x8] sm:$0xff] %vm383_vm1, %v368_v31  ;;  %393 = vst.msk [vmem:[#allocation2 + $0x48] sm:$0xff] %vm383_vm1, %v376_v32  ;;  %v338_v43 = vadd.f32 %v714_v13, %v315_v33  ;;  %v346_v44 = vadd.f32 %v714_v13, %v323_v34  ;;  %p516_p0 = scmp.ne.s32.totalorder %s406_s23, %s515_s6  ;;  %p521_p2 = scmp.lt.s32.totalorder %s515_s6, %s515_s6 }
  0xec   :  { %384 = vst.msk [vmem:[#allocation2] sm:$0xff] %vm383_vm1, %v367_v37  ;;  %392 = vst.msk [vmem:[#allocation2 + $0x40] sm:$0xff] %vm383_vm1, %v375_v38  ;;  %v337_v47 = vadd.f32 %v714_v13, %v314_v41  ;;  %v345_v48 = vadd.f32 %v714_v13, %v322_v42  ;;  %v478_v49 = vpop.f32.mrb[4].mxu0  ;;  %v490_v50 = vpop.f32.mrb[4].mxu1 }
  0xed   :  { %v370_v51 = vadd.f32 %v354_v39, %v338_v43  ;;  %v378_v52 = vadd.f32 %v362_v40, %v346_v44  ;;  %v317_v53 = vmul.f32 %v478_v49, %v709_v10  ;;  %v325_v54 = vmul.f32 %v490_v50, %v709_v10  ;;  %v246_v55 = vpop.f32.mrb[5].mxu0  ;;  %v286_v56 = vpop.f32.mrb[5].mxu1  ;;  %p522_p3 = por %p521_p2, %p520_p1 }
  0xee   :  { %v369_v57 = vadd.f32 %v353_v45, %v337_v47  ;;  %v377_v58 = vadd.f32 %v361_v46, %v345_v48  ;;  %v316_v61 = vmul.f32 %v709_v10, %v246_v55  ;;  %v324_v62 = vmul.f32 %v709_v10, %v286_v56 }
  0xef   :  { %387 = vst.msk [vmem:[#allocation2 + $0x18] sm:$0xff] %vm383_vm1, %v370_v51  ;;  %395 = vst.msk [vmem:[#allocation2 + $0x58] sm:$0xff] %vm383_vm1, %v378_v52  ;;  %v340_v63 = vadd.f32 %v714_v13, %v317_v53  ;;  %v348_v0 = vadd.f32 %v714_v13, %v325_v54  ;;  %p523_p4 = pnand %p522_p3, %p516_p0 }
  0xf0   :  { %386 = vst.msk [vmem:[#allocation2 + $0x10] sm:$0xff] %vm383_vm1, %v369_v57  ;;  %394 = vst.msk [vmem:[#allocation2 + $0x50] sm:$0xff] %vm383_vm1, %v377_v58  ;;  %v339_v3 = vadd.f32 %v714_v13, %v316_v61  ;;  %v347_v4 = vadd.f32 %v714_v13, %v324_v62  ;;  %v481_v5 = vpop.f32.mrb[6].mxu0  ;;  %v493_v6 = vpop.f32.mrb[6].mxu1 }
  0xf1   :  { %v372_v7 = vadd.f32 %v356_v59, %v340_v63  ;;  %v380_v8 = vadd.f32 %v364_v60, %v348_v0  ;;  %v319_v9 = vmul.f32 %v481_v5, %v709_v10  ;;  %v327_v11 = vmul.f32 %v493_v6, %v709_v10  ;;  %v256_v12 = vpop.f32.mrb[7].mxu0  ;;  %v296_v14 = vpop.f32.mrb[7].mxu1 }
  0xf2   :  { %v371_v15 = vadd.f32 %v355_v1, %v339_v3  ;;  %v379_v16 = vadd.f32 %v363_v2, %v347_v4  ;;  %v318_v19 = vmul.f32 %v709_v10, %v256_v12  ;;  %v326_v20 = vmul.f32 %v709_v10, %v296_v14 }
  0xf3   :  { %389 = vst.msk [vmem:[#allocation2 + $0x28] sm:$0xff] %vm383_vm1, %v372_v7  ;;  %397 = vst.msk [vmem:[#allocation2 + $0x68] sm:$0xff] %vm383_vm1, %v380_v8  ;;  %v342_v21 = vadd.f32 %v714_v13, %v319_v9  ;;  %v350_v22 = vadd.f32 %v714_v13, %v327_v11 }
  0xf4   :  { %388 = vst.msk [vmem:[#allocation2 + $0x20] sm:$0xff] %vm383_vm1, %v371_v15  ;;  %396 = vst.msk [vmem:[#allocation2 + $0x60] sm:$0xff] %vm383_vm1, %v379_v16  ;;  %v341_v10 = vadd.f32 %v714_v13, %v318_v19  ;;  %v349_v25 = vadd.f32 %v714_v13, %v326_v20 }
  0xf5   :  { %v374_v26 = vadd.f32 %v358_v17, %v342_v21  ;;  %v382_v27 = vadd.f32 %v366_v18, %v350_v22 }
  0xf6   :  { %v373_v28 = vadd.f32 %v357_v23, %v341_v10  ;;  %v381_v29 = vadd.f32 %v365_v24, %v349_v25 }
  0xf7   :  { %391 = vst.msk [vmem:[#allocation2 + $0x38] sm:$0xff] %vm383_vm1, %v374_v26  ;;  %399 = vst.msk [vmem:[#allocation2 + $0x78] sm:$0xff] %vm383_vm1, %v382_v27 }
  0xf8   :  { %390 = vst.msk [vmem:[#allocation2 + $0x30] sm:$0xff] %vm383_vm1, %v373_v28  ;;  %398 = vst.msk [vmem:[#allocation2 + $0x70] sm:$0xff] %vm383_vm1, %v381_v29 }
  0xf9   :  { %526 = shalt.err (!%p523_p4)
}
  0xfa   :  { %s527_s28 = scalar_lea.hbm %s831_s7, 2048 }
  0xfb   :  { %p528_p5 = scmp.ne.s32.totalorder %s831_s7, %s527_s28  ;;  %p531_p6 = scmp.lt.u32.totalorder %s527_s28, %s831_s7 }
  0xfd   :  { %p533_p7 = pnand %p531_p6, %p528_p5 }
  0xff   :  { %536 = shalt.err (!%p533_p7)
}
 0x100   :  { %s540_s10 = smov 128   ;;  %s541_s11 = smov 8  }
 0x101   :  { %411 = dma.vmem_to_hbm [thread:$0]  %s406_s23, 2048, %s831_s7, [#allocation3], %s540_s10, %s540_s10, %s541_s11  }
 0x102   :  { %537 = dma.done.wait [#allocation3], 2048  }
 0x103   :  { %538 = vsyncadd [#allocation3], 4294965248 }
 0x104   :  { %415 = vsyncpa [#allocation3], 1 }

</bundles_post_ra>
